<compile_context>
chip_gen: v7x
topology: tpu7x:2x2x1
jax: 0.10.0
libtpu: 0.0.40
codegen_flags: <defaults>
</compile_context>

<pallas_src>
import jax
import jax.numpy as jnp
from jax import lax
from jax.experimental import pallas as pl
from jax.experimental.pallas import tpu as pltpu


def _scatter_taps(y, bias, acc_ref, N, H, W, cout):
    """Combine the 9 tap results of a 3x3 "same" conv into acc_ref (N, H, W, cout).

    y    : (N*H*W, 9*cout) — columns grouped tap-major, tap index t = ky*3 + kx.
    bias : (1, cout)
    The center tap (ky = kx = 1) covers the full output and initializes the buffer (with the
    bias folded in); the remaining 8 taps accumulate into statically clipped shifted windows,
    so no padded halo buffers and no zero fills are needed.
    """
    y4 = y.reshape(N, H, W, 9 * cout)
    # Center tap (t = 4) initializes the whole buffer, bias added exactly once.
    acc_ref[...] = y4[..., 4 * cout:5 * cout] + bias
    for ky in range(3):
        for kx in range(3):
            if ky == 1 and kx == 1:
                continue
            t = ky * 3 + kx
            dy, dx = 1 - ky, 1 - kx
            oy0, oy1 = max(dy, 0), H + min(dy, 0)   # output window (rows)
            ox0, ox1 = max(dx, 0), W + min(dx, 0)   # output window (cols)
            iy0, iy1 = max(-dy, 0), H + min(-dy, 0)  # input window (rows)
            ix0, ix1 = max(-dx, 0), W + min(-dx, 0)  # input window (cols)
            acc_ref[:, oy0:oy1, ox0:ox1, :] = (
                acc_ref[:, oy0:oy1, ox0:ox1, :]
                + y4[:, iy0:iy1, ix0:ix1, t * cout:(t + 1) * cout])


def _make_fcn_kernel(N, H, W, chans):
    """Fused 4-layer 3x3 same-padded conv stack + sigmoid, with layer-1 K streamed on the grid."""
    M = N * H * W
    _, C1, C2, C3, C4 = chans

    def kernel(x_ref, w1_ref, b1_ref, w2_ref, b2_ref, w3_ref, b3_ref, w4_ref, b4_ref,
               o_ref, y1_ref, a1_ref, a2_ref, a3_ref, a4_ref):
        k = pl.program_id(0)
        kc = x_ref.shape[-1]

        # Layer-1 partial matmul for this Cin chunk: (M, kc) x (kc, 9*C1) — lane-dense MXU work.
        partial = jnp.dot(x_ref[...].reshape(M, kc), w1_ref[...],
                          preferred_element_type=jnp.float32)

        @pl.when(k == 0)
        def _():
            y1_ref[...] = partial            # no zero-fill: first chunk initializes

        @pl.when(k != 0)
        def _():
            y1_ref[...] = y1_ref[...] + partial

        # Everything after the layer-1 reduction runs only on the final K chunk.
        @pl.when(k == pl.num_programs(0) - 1)
        def _():
            _scatter_taps(y1_ref[...], b1_ref[...], a1_ref, N, H, W, C1)

            y2 = jnp.dot(a1_ref[...].reshape(M, C1), w2_ref[...],
                         preferred_element_type=jnp.float32)
            _scatter_taps(y2, b2_ref[...], a2_ref, N, H, W, C2)

            y3 = jnp.dot(a2_ref[...].reshape(M, C2), w3_ref[...],
                         preferred_element_type=jnp.float32)
            _scatter_taps(y3, b3_ref[...], a3_ref, N, H, W, C3)

            y4 = jnp.dot(a3_ref[...].reshape(M, C3), w4_ref[...],
                         preferred_element_type=jnp.float32)
            _scatter_taps(y4, b4_ref[...], a4_ref, N, H, W, C4)

            o_ref[...] = jax.nn.sigmoid(a4_ref[...]).astype(o_ref.dtype)

    return kernel


def _fold_taps(w):
    """HWIO (3,3,Cin,Cout) -> lane-dense (Cin, 9*Cout); columns ordered t*Cout + co, t=ky*3+kx."""
    kh, kw, cin, cout = w.shape
    return jnp.transpose(w, (2, 0, 1, 3)).reshape(cin, kh * kw * cout)


def fcn_fused(x_nhwc, params, *, k_chunk=256):
    """Runs the whole FCN (4 convs + sigmoid) as a single Pallas call. NHWC in/out."""
    N, H, W, Cin = x_nhwc.shape
    chans = [Cin] + [w.shape[-1] for (w, _) in params]
    M = N * H * W

    if Cin % k_chunk != 0:
        k_chunk = Cin                      # fall back to a single chunk
    num_k = Cin // k_chunk

    w_mats = [_fold_taps(w) for (w, _) in params]
    b_rows = [b.reshape(1, -1) for (_, b) in params]

    kernel = _make_fcn_kernel(N, H, W, chans)

    in_specs = [
        # x: streamed over Cin chunks (last two block dims (W=8, k_chunk) satisfy (8,128)).
        pl.BlockSpec((N, H, W, k_chunk), lambda k: (0, 0, 0, k)),
        # w1: streamed over Cin chunks, lane-dense (k_chunk, 9*C1).
        pl.BlockSpec((k_chunk, 9 * chans[1]), lambda k: (k, 0)),
        pl.BlockSpec(b_rows[0].shape, lambda k: (0, 0)),
        # Remaining (small) weights/biases: constant block index -> loaded once, stay resident.
        pl.BlockSpec(w_mats[1].shape, lambda k: (0, 0)),
        pl.BlockSpec(b_rows[1].shape, lambda k: (0, 0)),
        pl.BlockSpec(w_mats[2].shape, lambda k: (0, 0)),
        pl.BlockSpec(b_rows[2].shape, lambda k: (0, 0)),
        pl.BlockSpec(w_mats[3].shape, lambda k: (0, 0)),
        pl.BlockSpec(b_rows[3].shape, lambda k: (0, 0)),
    ]

    scratch_shapes = [
        pltpu.VMEM((M, 9 * chans[1]), jnp.float32),       # layer-1 accumulator across Cin chunks
        pltpu.VMEM((N, H, W, chans[1]), jnp.float32),     # activation after layer 1
        pltpu.VMEM((N, H, W, chans[2]), jnp.float32),     # activation after layer 2
        pltpu.VMEM((N, H, W, chans[3]), jnp.float32),     # activation after layer 3
        pltpu.VMEM((N, H, W, chans[4]), jnp.float32),     # pre-sigmoid layer-4 output
    ]

    return pl.pallas_call(
        kernel,
        out_shape=jax.ShapeDtypeStruct((N, H, W, chans[-1]), jnp.float32),
        grid_spec=pltpu.PrefetchScalarGridSpec(
            num_scalar_prefetch=0,
            grid=(num_k,),
            in_specs=in_specs,
            out_specs=pl.BlockSpec((N, H, W, chans[-1]), lambda k: (0, 0, 0, 0)),
            scratch_shapes=scratch_shapes,
        ),
        compiler_params=pltpu.CompilerParams(
            dimension_semantics=("arbitrary",),   # K-reduction axis
        ),
    )(x_nhwc, w_mats[0], b_rows[0], w_mats[1], b_rows[1],
      w_mats[2], b_rows[2], w_mats[3], b_rows[3])


def init_fcn_params(key):
    """Deterministic synthetic params; channels follow the PyTorch module: 768->32->16->8->1."""
    chans = [768, 32, 16, 8, 1]
    params = []
    for i in range(4):
        cin, cout = chans[i], chans[i + 1]
        key, kw, kb = jax.random.split(key, 3)
        scale = 1.0 / jnp.sqrt(jnp.float32(cin * 9))
        w = scale * jax.random.normal(kw, (3, 3, cin, cout), dtype=jnp.float32)  # HWIO
        b = scale * jax.random.normal(kb, (cout,), dtype=jnp.float32)
        params.append((w, b))
    return params


@jax.jit
def fcn_forward(x_nchw, params):
    """Full FCN forward. Input is NCHW (PyTorch convention); output is NCHW."""
    x = jnp.transpose(x_nchw, (0, 2, 3, 1))   # NCHW -> NHWC
    y = fcn_fused(x, params)                  # (N, H, W, 1)
    return jnp.transpose(y, (0, 3, 1, 2))     # NHWC -> NCHW


def fcn_reference(x_nchw, params):
    """Pure-JAX reference (lax.conv) for correctness checking."""
    x = jnp.transpose(x_nchw, (0, 2, 3, 1))
    for (w, b) in params:
        x = lax.conv_general_dilated(
            x, w, window_strides=(1, 1), padding="SAME",
            dimension_numbers=("NHWC", "HWIO", "NHWC"),
        ) + b
    x = jax.nn.sigmoid(x)
    return jnp.transpose(x, (0, 3, 1, 2))


if __name__ == "__main__":
    key = jax.random.PRNGKey(0)
    key, kx = jax.random.split(key)
    # Small but faithful shape: batch=2, C=768 (required by the module), spatial=8x8.
    x = jax.random.normal(kx, (2, 768, 8, 8), dtype=jnp.float32)

    params = tuple(init_fcn_params(key))

    out = fcn_forward(x, params)
    out = jax.block_until_ready(out)

    ref = fcn_reference(x, params)
    assert out.shape == (2, 1, 8, 8), out.shape
    assert jnp.allclose(out, ref, rtol=2e-3, atol=1e-3), "mismatch vs JAX reference"

    # TODO(synk): at larger batch/spatial sizes, add a 'parallel' row-tile grid axis (halo'd)
    # for v7x's 2 TensorCores / 64 MiB VMEM, and consider bf16 layer-1 matmuls on v6e/v7x.
    print("KERNEL_OK")
</pallas_src>

<mosaic_0001>
module attributes {stable_mosaic.version = 11 : i64} {
  func.func @kernel(%arg0: i32, %arg1: memref<2x8x8x256xf32, #tpu.memory_space<vmem>>, %arg2: memref<256x288xf32, #tpu.memory_space<vmem>>, %arg3: memref<1x32xf32, #tpu.memory_space<vmem>>, %arg4: memref<32x144xf32, #tpu.memory_space<vmem>>, %arg5: memref<1x16xf32, #tpu.memory_space<vmem>>, %arg6: memref<16x72xf32, #tpu.memory_space<vmem>>, %arg7: memref<1x8xf32, #tpu.memory_space<vmem>>, %arg8: memref<8x9xf32, #tpu.memory_space<vmem>>, %arg9: memref<1x1xf32, #tpu.memory_space<vmem>>, %arg10: memref<2x8x8x1xf32, #tpu.memory_space<vmem>>, %arg11: memref<128x288xf32, #tpu.memory_space<vmem>>, %arg12: memref<2x8x8x32xf32, #tpu.memory_space<vmem>>, %arg13: memref<2x8x8x16xf32, #tpu.memory_space<vmem>>, %arg14: memref<2x8x8x8xf32, #tpu.memory_space<vmem>>, %arg15: memref<2x8x8x1xf32, #tpu.memory_space<vmem>>) attributes {dimension_semantics = [#tpu.dimension_semantics<arbitrary>], iteration_bounds = array<i64: 3>, scalar_prefetch = 0 : i64, scratch_operands = 5 : i64, tpu.core_type = #tpu.core_type<tc>, window_params = [{transform_indices = @transform_0, window_bounds = array<i64: 2, 8, 8, 256>}, {transform_indices = @transform_1, window_bounds = array<i64: 256, 288>}, {pipeline_mode = #tpu.pipeline_mode<synchronous>, transform_indices = @transform_2, window_bounds = array<i64: 1, 32>}, {pipeline_mode = #tpu.pipeline_mode<synchronous>, transform_indices = @transform_3, window_bounds = array<i64: 32, 144>}, {pipeline_mode = #tpu.pipeline_mode<synchronous>, transform_indices = @transform_4, window_bounds = array<i64: 1, 16>}, {pipeline_mode = #tpu.pipeline_mode<synchronous>, transform_indices = @transform_5, window_bounds = array<i64: 16, 72>}, {pipeline_mode = #tpu.pipeline_mode<synchronous>, transform_indices = @transform_6, window_bounds = array<i64: 1, 8>}, {pipeline_mode = #tpu.pipeline_mode<synchronous>, transform_indices = @transform_7, window_bounds = array<i64: 8, 9>}, {pipeline_mode = #tpu.pipeline_mode<synchronous>, transform_indices = @transform_8, window_bounds = array<i64: 1, 1>}, {pipeline_mode = #tpu.pipeline_mode<synchronous>, transform_indices = @transform_9, window_bounds = array<i64: 2, 8, 8, 1>}]} {
    %c0 = arith.constant 0 : index
    %c0_0 = arith.constant 0 : index
    %c0_1 = arith.constant 0 : index
    %c0_2 = arith.constant 0 : index
    %0 = vector.load %arg1[%c0, %c0_0, %c0_1, %c0_2] : memref<2x8x8x256xf32, #tpu.memory_space<vmem>>, vector<2x8x8x256xf32>
    %1 = vector.shape_cast %0 : vector<2x8x8x256xf32> to vector<128x256xf32>
    %c0_3 = arith.constant 0 : index
    %c0_4 = arith.constant 0 : index
    %2 = vector.load %arg2[%c0_3, %c0_4] : memref<256x288xf32, #tpu.memory_space<vmem>>, vector<256x288xf32>
    %cst = arith.constant dense<0.000000e+00> : vector<128x288xf32>
    %3 = tpu.matmul %1, %2, %cst {dimension_numbers = #tpu.dot_dimension_numbers<[1], [0], [0], [1], [0, 0, 1, 1], [], []>} : vector<128x256xf32>, vector<256x288xf32>, vector<128x288xf32> -> vector<128x288xf32>
    %c0_i32 = arith.constant 0 : i32
    %4 = arith.cmpi eq, %arg0, %c0_i32 : i32
    %5 = arith.extui %4 : i1 to i32
    %c0_i32_5 = arith.constant 0 : i32
    %6 = arith.cmpi ne, %5, %c0_i32_5 : i32
    scf.if %6 {
      %c0_9 = arith.constant 0 : index
      %c0_10 = arith.constant 0 : index
      %13 = vector.load %arg11[%c0_9, %c0_10] : memref<128x288xf32, #tpu.memory_space<vmem>>, vector<128x288xf32>
      tpu.vector_store %arg11[%c0_9, %c0_10], %3 {strides = array<i32>} : memref<128x288xf32, #tpu.memory_space<vmem>>, vector<128x288xf32>,
    } else {
    }
    %c0_i32_6 = arith.constant 0 : i32
    %7 = arith.cmpi ne, %arg0, %c0_i32_6 : i32
    %8 = arith.extui %7 : i1 to i32
    %c0_i32_7 = arith.constant 0 : i32
    %9 = arith.cmpi ne, %8, %c0_i32_7 : i32
    scf.if %9 {
      %c0_9 = arith.constant 0 : index
      %c0_10 = arith.constant 0 : index
      %13 = vector.load %arg11[%c0_9, %c0_10] : memref<128x288xf32, #tpu.memory_space<vmem>>, vector<128x288xf32>
      %14 = arith.addf %13, %3 : vector<128x288xf32>
      %c0_11 = arith.constant 0 : index
      %c0_12 = arith.constant 0 : index
      %15 = vector.load %arg11[%c0_11, %c0_12] : memref<128x288xf32, #tpu.memory_space<vmem>>, vector<128x288xf32>
      tpu.vector_store %arg11[%c0_11, %c0_12], %14 {strides = array<i32>} : memref<128x288xf32, #tpu.memory_space<vmem>>, vector<128x288xf32>,
    } else {
    }
    %c2_i32 = arith.constant 2 : i32
    %10 = arith.cmpi eq, %arg0, %c2_i32 : i32
    %11 = arith.extui %10 : i1 to i32
    %c0_i32_8 = arith.constant 0 : i32
    %12 = arith.cmpi ne, %11, %c0_i32_8 : i32
    scf.if %12 {
      %c0_9 = arith.constant 0 : index
      %c0_10 = arith.constant 0 : index
      %13 = vector.load %arg11[%c0_9, %c0_10] : memref<128x288xf32, #tpu.memory_space<vmem>>, vector<128x288xf32>
      %c0_11 = arith.constant 0 : index
      %c0_12 = arith.constant 0 : index
      %14 = vector.load %arg3[%c0_11, %c0_12] : memref<1x32xf32, #tpu.memory_space<vmem>>, vector<1x32xf32>
      %15 = vector.shape_cast %13 : vector<128x288xf32> to vector<2x8x8x288xf32>
      %16 = vector.extract_strided_slice %15 {offsets = [0, 0, 0, 128], sizes = [2, 8, 8, 32], strides = [1, 1, 1, 1]} : vector<2x8x8x288xf32> to vector<2x8x8x32xf32>
      %17 = vector.shape_cast %14 : vector<1x32xf32> to vector<1x1x1x32xf32>
      %18 = vector.broadcast %17 : vector<1x1x1x32xf32> to vector<2x8x8x32xf32>
      %19 = arith.addf %16, %18 : vector<2x8x8x32xf32>
      %c0_13 = arith.constant 0 : index
      %c0_14 = arith.constant 0 : index
      %c0_15 = arith.constant 0 : index
      %c0_16 = arith.constant 0 : index
      %20 = vector.load %arg12[%c0_13, %c0_14, %c0_15, %c0_16] : memref<2x8x8x32xf32, #tpu.memory_space<vmem>>, vector<2x8x8x32xf32>
      tpu.vector_store %arg12[%c0_13, %c0_14, %c0_15, %c0_16], %19 {strides = array<i32>} : memref<2x8x8x32xf32, #tpu.memory_space<vmem>>, vector<2x8x8x32xf32>,
      %c0_17 = arith.constant 0 : index
      %c1 = arith.constant 1 : index
      %c1_18 = arith.constant 1 : index
      %c0_19 = arith.constant 0 : index
      %21 = vector.load %arg12[%c0_17, %c1, %c1_18, %c0_19] : memref<2x8x8x32xf32, #tpu.memory_space<vmem>>, vector<2x7x7x32xf32>
      %22 = vector.extract_strided_slice %15 {offsets = [0, 0, 0, 0], sizes = [2, 7, 7, 32], strides = [1, 1, 1, 1]} : vector<2x8x8x288xf32> to vector<2x7x7x32xf32>
      %23 = arith.addf %21, %22 : vector<2x7x7x32xf32>
      %c0_20 = arith.constant 0 : index
      %c1_21 = arith.constant 1 : index
      %c1_22 = arith.constant 1 : index
      %c0_23 = arith.constant 0 : index
      %24 = vector.load %arg12[%c0_20, %c1_21, %c1_22, %c0_23] : memref<2x8x8x32xf32, #tpu.memory_space<vmem>>, vector<2x7x7x32xf32>
      tpu.vector_store %arg12[%c0_20, %c1_21, %c1_22, %c0_23], %23 {strides = array<i32>} : memref<2x8x8x32xf32, #tpu.memory_space<vmem>>, vector<2x7x7x32xf32>,
      %c0_24 = arith.constant 0 : index
      %c1_25 = arith.constant 1 : index
      %c0_26 = arith.constant 0 : index
      %c0_27 = arith.constant 0 : index
      %25 = vector.load %arg12[%c0_24, %c1_25, %c0_26, %c0_27] : memref<2x8x8x32xf32, #tpu.memory_space<vmem>>, vector<2x7x8x32xf32>
      %26 = vector.extract_strided_slice %15 {offsets = [0, 0, 0, 32], sizes = [2, 7, 8, 32], strides = [1, 1, 1, 1]} : vector<2x8x8x288xf32> to vector<2x7x8x32xf32>
      %27 = arith.addf %25, %26 : vector<2x7x8x32xf32>
      %c0_28 = arith.constant 0 : index
      %c1_29 = arith.constant 1 : index
      %c0_30 = arith.constant 0 : index
      %c0_31 = arith.constant 0 : index
      %28 = vector.load %arg12[%c0_28, %c1_29, %c0_30, %c0_31] : memref<2x8x8x32xf32, #tpu.memory_space<vmem>>, vector<2x7x8x32xf32>
      tpu.vector_store %arg12[%c0_28, %c1_29, %c0_30, %c0_31], %27 {strides = array<i32>} : memref<2x8x8x32xf32, #tpu.memory_space<vmem>>, vector<2x7x8x32xf32>,
      %c0_32 = arith.constant 0 : index
      %c1_33 = arith.constant 1 : index
      %c0_34 = arith.constant 0 : index
      %c0_35 = arith.constant 0 : index
      %29 = vector.load %arg12[%c0_32, %c1_33, %c0_34, %c0_35] : memref<2x8x8x32xf32, #tpu.memory_space<vmem>>, vector<2x7x7x32xf32>
      %30 = vector.extract_strided_slice %15 {offsets = [0, 0, 1, 64], sizes = [2, 7, 7, 32], strides = [1, 1, 1, 1]} : vector<2x8x8x288xf32> to vector<2x7x7x32xf32>
      %31 = arith.addf %29, %30 : vector<2x7x7x32xf32>
      %c0_36 = arith.constant 0 : index
      %c1_37 = arith.constant 1 : index
      %c0_38 = arith.constant 0 : index
      %c0_39 = arith.constant 0 : index
      %32 = vector.load %arg12[%c0_36, %c1_37, %c0_38, %c0_39] : memref<2x8x8x32xf32, #tpu.memory_space<vmem>>, vector<2x7x7x32xf32>
      tpu.vector_store %arg12[%c0_36, %c1_37, %c0_38, %c0_39], %31 {strides = array<i32>} : memref<2x8x8x32xf32, #tpu.memory_space<vmem>>, vector<2x7x7x32xf32>,
      %c0_40 = arith.constant 0 : index
      %c0_41 = arith.constant 0 : index
      %c1_42 = arith.constant 1 : index
      %c0_43 = arith.constant 0 : index
      %33 = vector.load %arg12[%c0_40, %c0_41, %c1_42, %c0_43] : memref<2x8x8x32xf32, #tpu.memory_space<vmem>>, vector<2x8x7x32xf32>
      %34 = vector.extract_strided_slice %15 {offsets = [0, 0, 0, 96], sizes = [2, 8, 7, 32], strides = [1, 1, 1, 1]} : vector<2x8x8x288xf32> to vector<2x8x7x32xf32>
      %35 = arith.addf %33, %34 : vector<2x8x7x32xf32>
      %c0_44 = arith.constant 0 : index
      %c0_45 = arith.constant 0 : index
      %c1_46 = arith.constant 1 : index
      %c0_47 = arith.constant 0 : index
      %36 = vector.load %arg12[%c0_44, %c0_45, %c1_46, %c0_47] : memref<2x8x8x32xf32, #tpu.memory_space<vmem>>, vector<2x8x7x32xf32>
      tpu.vector_store %arg12[%c0_44, %c0_45, %c1_46, %c0_47], %35 {strides = array<i32>} : memref<2x8x8x32xf32, #tpu.memory_space<vmem>>, vector<2x8x7x32xf32>,
      %c0_48 = arith.constant 0 : index
      %c0_49 = arith.constant 0 : index
      %c0_50 = arith.constant 0 : index
      %c0_51 = arith.constant 0 : index
      %37 = vector.load %arg12[%c0_48, %c0_49, %c0_50, %c0_51] : memref<2x8x8x32xf32, #tpu.memory_space<vmem>>, vector<2x8x7x32xf32>
      %38 = vector.extract_strided_slice %15 {offsets = [0, 0, 1, 160], sizes = [2, 8, 7, 32], strides = [1, 1, 1, 1]} : vector<2x8x8x288xf32> to vector<2x8x7x32xf32>
      %39 = arith.addf %37, %38 : vector<2x8x7x32xf32>
      %c0_52 = arith.constant 0 : index
      %c0_53 = arith.constant 0 : index
      %c0_54 = arith.constant 0 : index
      %c0_55 = arith.constant 0 : index
      %40 = vector.load %arg12[%c0_52, %c0_53, %c0_54, %c0_55] : memref<2x8x8x32xf32, #tpu.memory_space<vmem>>, vector<2x8x7x32xf32>
      tpu.vector_store %arg12[%c0_52, %c0_53, %c0_54, %c0_55], %39 {strides = array<i32>} : memref<2x8x8x32xf32, #tpu.memory_space<vmem>>, vector<2x8x7x32xf32>,
      %c0_56 = arith.constant 0 : index
      %c0_57 = arith.constant 0 : index
      %c1_58 = arith.constant 1 : index
      %c0_59 = arith.constant 0 : index
      %41 = vector.load %arg12[%c0_56, %c0_57, %c1_58, %c0_59] : memref<2x8x8x32xf32, #tpu.memory_space<vmem>>, vector<2x7x7x32xf32>
      %42 = vector.extract_strided_slice %15 {offsets = [0, 1, 0, 192], sizes = [2, 7, 7, 32], strides = [1, 1, 1, 1]} : vector<2x8x8x288xf32> to vector<2x7x7x32xf32>
      %43 = arith.addf %41, %42 : vector<2x7x7x32xf32>
      %c0_60 = arith.constant 0 : index
      %c0_61 = arith.constant 0 : index
      %c1_62 = arith.constant 1 : index
      %c0_63 = arith.constant 0 : index
      %44 = vector.load %arg12[%c0_60, %c0_61, %c1_62, %c0_63] : memref<2x8x8x32xf32, #tpu.memory_space<vmem>>, vector<2x7x7x32xf32>
      tpu.vector_store %arg12[%c0_60, %c0_61, %c1_62, %c0_63], %43 {strides = array<i32>} : memref<2x8x8x32xf32, #tpu.memory_space<vmem>>, vector<2x7x7x32xf32>,
      %c0_64 = arith.constant 0 : index
      %c0_65 = arith.constant 0 : index
      %c0_66 = arith.constant 0 : index
      %c0_67 = arith.constant 0 : index
      %45 = vector.load %arg12[%c0_64, %c0_65, %c0_66, %c0_67] : memref<2x8x8x32xf32, #tpu.memory_space<vmem>>, vector<2x7x8x32xf32>
      %46 = vector.extract_strided_slice %15 {offsets = [0, 1, 0, 224], sizes = [2, 7, 8, 32], strides = [1, 1, 1, 1]} : vector<2x8x8x288xf32> to vector<2x7x8x32xf32>
      %47 = arith.addf %45, %46 : vector<2x7x8x32xf32>
      %c0_68 = arith.constant 0 : index
      %c0_69 = arith.constant 0 : index
      %c0_70 = arith.constant 0 : index
      %c0_71 = arith.constant 0 : index
      %48 = vector.load %arg12[%c0_68, %c0_69, %c0_70, %c0_71] : memref<2x8x8x32xf32, #tpu.memory_space<vmem>>, vector<2x7x8x32xf32>
      tpu.vector_store %arg12[%c0_68, %c0_69, %c0_70, %c0_71], %47 {strides = array<i32>} : memref<2x8x8x32xf32, #tpu.memory_space<vmem>>, vector<2x7x8x32xf32>,
      %c0_72 = arith.constant 0 : index
      %c0_73 = arith.constant 0 : index
      %c0_74 = arith.constant 0 : index
      %c0_75 = arith.constant 0 : index
      %49 = vector.load %arg12[%c0_72, %c0_73, %c0_74, %c0_75] : memref<2x8x8x32xf32, #tpu.memory_space<vmem>>, vector<2x7x7x32xf32>
      %50 = vector.extract_strided_slice %15 {offsets = [0, 1, 1, 256], sizes = [2, 7, 7, 32], strides = [1, 1, 1, 1]} : vector<2x8x8x288xf32> to vector<2x7x7x32xf32>
      %51 = arith.addf %49, %50 : vector<2x7x7x32xf32>
      %c0_76 = arith.constant 0 : index
      %c0_77 = arith.constant 0 : index
      %c0_78 = arith.constant 0 : index
      %c0_79 = arith.constant 0 : index
      %52 = vector.load %arg12[%c0_76, %c0_77, %c0_78, %c0_79] : memref<2x8x8x32xf32, #tpu.memory_space<vmem>>, vector<2x7x7x32xf32>
      tpu.vector_store %arg12[%c0_76, %c0_77, %c0_78, %c0_79], %51 {strides = array<i32>} : memref<2x8x8x32xf32, #tpu.memory_space<vmem>>, vector<2x7x7x32xf32>,
      %c0_80 = arith.constant 0 : index
      %c0_81 = arith.constant 0 : index
      %c0_82 = arith.constant 0 : index
      %c0_83 = arith.constant 0 : index
      %53 = vector.load %arg12[%c0_80, %c0_81, %c0_82, %c0_83] : memref<2x8x8x32xf32, #tpu.memory_space<vmem>>, vector<2x8x8x32xf32>
      %54 = vector.shape_cast %53 : vector<2x8x8x32xf32> to vector<128x32xf32>
      %c0_84 = arith.constant 0 : index
      %c0_85 = arith.constant 0 : index
      %55 = vector.load %arg4[%c0_84, %c0_85] : memref<32x144xf32, #tpu.memory_space<vmem>>, vector<32x144xf32>
      %cst_86 = arith.constant dense<0.000000e+00> : vector<128x144xf32>
      %56 = tpu.matmul %54, %55, %cst_86 {dimension_numbers = #tpu.dot_dimension_numbers<[1], [0], [0], [1], [0, 0, 1, 1], [], []>} : vector<128x32xf32>, vector<32x144xf32>, vector<128x144xf32> -> vector<128x144xf32>
      %c0_87 = arith.constant 0 : index
      %c0_88 = arith.constant 0 : index
      %57 = vector.load %arg5[%c0_87, %c0_88] : memref<1x16xf32, #tpu.memory_space<vmem>>, vector<1x16xf32>
      %58 = vector.shape_cast %56 : vector<128x144xf32> to vector<2x8x8x144xf32>
      %59 = vector.extract_strided_slice %58 {offsets = [0, 0, 0, 64], sizes = [2, 8, 8, 16], strides = [1, 1, 1, 1]} : vector<2x8x8x144xf32> to vector<2x8x8x16xf32>
      %60 = vector.shape_cast %57 : vector<1x16xf32> to vector<1x1x1x16xf32>
      %61 = vector.broadcast %60 : vector<1x1x1x16xf32> to vector<2x8x8x16xf32>
      %62 = arith.addf %59, %61 : vector<2x8x8x16xf32>
      %c0_89 = arith.constant 0 : index
      %c0_90 = arith.constant 0 : index
      %c0_91 = arith.constant 0 : index
      %c0_92 = arith.constant 0 : index
      %63 = vector.load %arg13[%c0_89, %c0_90, %c0_91, %c0_92] : memref<2x8x8x16xf32, #tpu.memory_space<vmem>>, vector<2x8x8x16xf32>
      tpu.vector_store %arg13[%c0_89, %c0_90, %c0_91, %c0_92], %62 {strides = array<i32>} : memref<2x8x8x16xf32, #tpu.memory_space<vmem>>, vector<2x8x8x16xf32>,
      %c0_93 = arith.constant 0 : index
      %c1_94 = arith.constant 1 : index
      %c1_95 = arith.constant 1 : index
      %c0_96 = arith.constant 0 : index
      %64 = vector.load %arg13[%c0_93, %c1_94, %c1_95, %c0_96] : memref<2x8x8x16xf32, #tpu.memory_space<vmem>>, vector<2x7x7x16xf32>
      %65 = vector.extract_strided_slice %58 {offsets = [0, 0, 0, 0], sizes = [2, 7, 7, 16], strides = [1, 1, 1, 1]} : vector<2x8x8x144xf32> to vector<2x7x7x16xf32>
      %66 = arith.addf %64, %65 : vector<2x7x7x16xf32>
      %c0_97 = arith.constant 0 : index
      %c1_98 = arith.constant 1 : index
      %c1_99 = arith.constant 1 : index
      %c0_100 = arith.constant 0 : index
      %67 = vector.load %arg13[%c0_97, %c1_98, %c1_99, %c0_100] : memref<2x8x8x16xf32, #tpu.memory_space<vmem>>, vector<2x7x7x16xf32>
      tpu.vector_store %arg13[%c0_97, %c1_98, %c1_99, %c0_100], %66 {strides = array<i32>} : memref<2x8x8x16xf32, #tpu.memory_space<vmem>>, vector<2x7x7x16xf32>,
      %c0_101 = arith.constant 0 : index
      %c1_102 = arith.constant 1 : index
      %c0_103 = arith.constant 0 : index
      %c0_104 = arith.constant 0 : index
      %68 = vector.load %arg13[%c0_101, %c1_102, %c0_103, %c0_104] : memref<2x8x8x16xf32, #tpu.memory_space<vmem>>, vector<2x7x8x16xf32>
      %69 = vector.extract_strided_slice %58 {offsets = [0, 0, 0, 16], sizes = [2, 7, 8, 16], strides = [1, 1, 1, 1]} : vector<2x8x8x144xf32> to vector<2x7x8x16xf32>
      %70 = arith.addf %68, %69 : vector<2x7x8x16xf32>
      %c0_105 = arith.constant 0 : index
      %c1_106 = arith.constant 1 : index
      %c0_107 = arith.constant 0 : index
      %c0_108 = arith.constant 0 : index
      %71 = vector.load %arg13[%c0_105, %c1_106, %c0_107, %c0_108] : memref<2x8x8x16xf32, #tpu.memory_space<vmem>>, vector<2x7x8x16xf32>
      tpu.vector_store %arg13[%c0_105, %c1_106, %c0_107, %c0_108], %70 {strides = array<i32>} : memref<2x8x8x16xf32, #tpu.memory_space<vmem>>, vector<2x7x8x16xf32>,
      %c0_109 = arith.constant 0 : index
      %c1_110 = arith.constant 1 : index
      %c0_111 = arith.constant 0 : index
      %c0_112 = arith.constant 0 : index
      %72 = vector.load %arg13[%c0_109, %c1_110, %c0_111, %c0_112] : memref<2x8x8x16xf32, #tpu.memory_space<vmem>>, vector<2x7x7x16xf32>
      %73 = vector.extract_strided_slice %58 {offsets = [0, 0, 1, 32], sizes = [2, 7, 7, 16], strides = [1, 1, 1, 1]} : vector<2x8x8x144xf32> to vector<2x7x7x16xf32>
      %74 = arith.addf %72, %73 : vector<2x7x7x16xf32>
      %c0_113 = arith.constant 0 : index
      %c1_114 = arith.constant 1 : index
      %c0_115 = arith.constant 0 : index
      %c0_116 = arith.constant 0 : index
      %75 = vector.load %arg13[%c0_113, %c1_114, %c0_115, %c0_116] : memref<2x8x8x16xf32, #tpu.memory_space<vmem>>, vector<2x7x7x16xf32>
      tpu.vector_store %arg13[%c0_113, %c1_114, %c0_115, %c0_116], %74 {strides = array<i32>} : memref<2x8x8x16xf32, #tpu.memory_space<vmem>>, vector<2x7x7x16xf32>,
      %c0_117 = arith.constant 0 : index
      %c0_118 = arith.constant 0 : index
      %c1_119 = arith.constant 1 : index
      %c0_120 = arith.constant 0 : index
      %76 = vector.load %arg13[%c0_117, %c0_118, %c1_119, %c0_120] : memref<2x8x8x16xf32, #tpu.memory_space<vmem>>, vector<2x8x7x16xf32>
      %77 = vector.extract_strided_slice %58 {offsets = [0, 0, 0, 48], sizes = [2, 8, 7, 16], strides = [1, 1, 1, 1]} : vector<2x8x8x144xf32> to vector<2x8x7x16xf32>
      %78 = arith.addf %76, %77 : vector<2x8x7x16xf32>
      %c0_121 = arith.constant 0 : index
      %c0_122 = arith.constant 0 : index
      %c1_123 = arith.constant 1 : index
      %c0_124 = arith.constant 0 : index
      %79 = vector.load %arg13[%c0_121, %c0_122, %c1_123, %c0_124] : memref<2x8x8x16xf32, #tpu.memory_space<vmem>>, vector<2x8x7x16xf32>
      tpu.vector_store %arg13[%c0_121, %c0_122, %c1_123, %c0_124], %78 {strides = array<i32>} : memref<2x8x8x16xf32, #tpu.memory_space<vmem>>, vector<2x8x7x16xf32>,
      %c0_125 = arith.constant 0 : index
      %c0_126 = arith.constant 0 : index
      %c0_127 = arith.constant 0 : index
      %c0_128 = arith.constant 0 : index
      %80 = vector.load %arg13[%c0_125, %c0_126, %c0_127, %c0_128] : memref<2x8x8x16xf32, #tpu.memory_space<vmem>>, vector<2x8x7x16xf32>
      %81 = vector.extract_strided_slice %58 {offsets = [0, 0, 1, 80], sizes = [2, 8, 7, 16], strides = [1, 1, 1, 1]} : vector<2x8x8x144xf32> to vector<2x8x7x16xf32>
      %82 = arith.addf %80, %81 : vector<2x8x7x16xf32>
      %c0_129 = arith.constant 0 : index
      %c0_130 = arith.constant 0 : index
      %c0_131 = arith.constant 0 : index
      %c0_132 = arith.constant 0 : index
      %83 = vector.load %arg13[%c0_129, %c0_130, %c0_131, %c0_132] : memref<2x8x8x16xf32, #tpu.memory_space<vmem>>, vector<2x8x7x16xf32>
      tpu.vector_store %arg13[%c0_129, %c0_130, %c0_131, %c0_132], %82 {strides = array<i32>} : memref<2x8x8x16xf32, #tpu.memory_space<vmem>>, vector<2x8x7x16xf32>,
      %c0_133 = arith.constant 0 : index
      %c0_134 = arith.constant 0 : index
      %c1_135 = arith.constant 1 : index
      %c0_136 = arith.constant 0 : index
      %84 = vector.load %arg13[%c0_133, %c0_134, %c1_135, %c0_136] : memref<2x8x8x16xf32, #tpu.memory_space<vmem>>, vector<2x7x7x16xf32>
      %85 = vector.extract_strided_slice %58 {offsets = [0, 1, 0, 96], sizes = [2, 7, 7, 16], strides = [1, 1, 1, 1]} : vector<2x8x8x144xf32> to vector<2x7x7x16xf32>
      %86 = arith.addf %84, %85 : vector<2x7x7x16xf32>
      %c0_137 = arith.constant 0 : index
      %c0_138 = arith.constant 0 : index
      %c1_139 = arith.constant 1 : index
      %c0_140 = arith.constant 0 : index
      %87 = vector.load %arg13[%c0_137, %c0_138, %c1_139, %c0_140] : memref<2x8x8x16xf32, #tpu.memory_space<vmem>>, vector<2x7x7x16xf32>
      tpu.vector_store %arg13[%c0_137, %c0_138, %c1_139, %c0_140], %86 {strides = array<i32>} : memref<2x8x8x16xf32, #tpu.memory_space<vmem>>, vector<2x7x7x16xf32>,
      %c0_141 = arith.constant 0 : index
      %c0_142 = arith.constant 0 : index
      %c0_143 = arith.constant 0 : index
      %c0_144 = arith.constant 0 : index
      %88 = vector.load %arg13[%c0_141, %c0_142, %c0_143, %c0_144] : memref<2x8x8x16xf32, #tpu.memory_space<vmem>>, vector<2x7x8x16xf32>
      %89 = vector.extract_strided_slice %58 {offsets = [0, 1, 0, 112], sizes = [2, 7, 8, 16], strides = [1, 1, 1, 1]} : vector<2x8x8x144xf32> to vector<2x7x8x16xf32>
      %90 = arith.addf %88, %89 : vector<2x7x8x16xf32>
      %c0_145 = arith.constant 0 : index
      %c0_146 = arith.constant 0 : index
      %c0_147 = arith.constant 0 : index
      %c0_148 = arith.constant 0 : index
      %91 = vector.load %arg13[%c0_145, %c0_146, %c0_147, %c0_148] : memref<2x8x8x16xf32, #tpu.memory_space<vmem>>, vector<2x7x8x16xf32>
      tpu.vector_store %arg13[%c0_145, %c0_146, %c0_147, %c0_148], %90 {strides = array<i32>} : memref<2x8x8x16xf32, #tpu.memory_space<vmem>>, vector<2x7x8x16xf32>,
      %c0_149 = arith.constant 0 : index
      %c0_150 = arith.constant 0 : index
      %c0_151 = arith.constant 0 : index
      %c0_152 = arith.constant 0 : index
      %92 = vector.load %arg13[%c0_149, %c0_150, %c0_151, %c0_152] : memref<2x8x8x16xf32, #tpu.memory_space<vmem>>, vector<2x7x7x16xf32>
      %93 = vector.extract_strided_slice %58 {offsets = [0, 1, 1, 128], sizes = [2, 7, 7, 16], strides = [1, 1, 1, 1]} : vector<2x8x8x144xf32> to vector<2x7x7x16xf32>
      %94 = arith.addf %92, %93 : vector<2x7x7x16xf32>
      %c0_153 = arith.constant 0 : index
      %c0_154 = arith.constant 0 : index
      %c0_155 = arith.constant 0 : index
      %c0_156 = arith.constant 0 : index
      %95 = vector.load %arg13[%c0_153, %c0_154, %c0_155, %c0_156] : memref<2x8x8x16xf32, #tpu.memory_space<vmem>>, vector<2x7x7x16xf32>
      tpu.vector_store %arg13[%c0_153, %c0_154, %c0_155, %c0_156], %94 {strides = array<i32>} : memref<2x8x8x16xf32, #tpu.memory_space<vmem>>, vector<2x7x7x16xf32>,
      %c0_157 = arith.constant 0 : index
      %c0_158 = arith.constant 0 : index
      %c0_159 = arith.constant 0 : index
      %c0_160 = arith.constant 0 : index
      %96 = vector.load %arg13[%c0_157, %c0_158, %c0_159, %c0_160] : memref<2x8x8x16xf32, #tpu.memory_space<vmem>>, vector<2x8x8x16xf32>
      %97 = vector.shape_cast %96 : vector<2x8x8x16xf32> to vector<128x16xf32>
      %c0_161 = arith.constant 0 : index
      %c0_162 = arith.constant 0 : index
      %98 = vector.load %arg6[%c0_161, %c0_162] : memref<16x72xf32, #tpu.memory_space<vmem>>, vector<16x72xf32>
      %cst_163 = arith.constant dense<0.000000e+00> : vector<128x72xf32>
      %99 = tpu.matmul %97, %98, %cst_163 {dimension_numbers = #tpu.dot_dimension_numbers<[1], [0], [0], [1], [0, 0, 1, 1], [], []>} : vector<128x16xf32>, vector<16x72xf32>, vector<128x72xf32> -> vector<128x72xf32>
      %c0_164 = arith.constant 0 : index
      %c0_165 = arith.constant 0 : index
      %100 = vector.load %arg7[%c0_164, %c0_165] : memref<1x8xf32, #tpu.memory_space<vmem>>, vector<1x8xf32>
      %101 = vector.shape_cast %99 : vector<128x72xf32> to vector<2x8x8x72xf32>
      %102 = vector.extract_strided_slice %101 {offsets = [0, 0, 0, 32], sizes = [2, 8, 8, 8], strides = [1, 1, 1, 1]} : vector<2x8x8x72xf32> to vector<2x8x8x8xf32>
      %103 = vector.shape_cast %100 : vector<1x8xf32> to vector<1x1x1x8xf32>
      %104 = vector.broadcast %103 : vector<1x1x1x8xf32> to vector<2x8x8x8xf32>
      %105 = arith.addf %102, %104 : vector<2x8x8x8xf32>
      %c0_166 = arith.constant 0 : index
      %c0_167 = arith.constant 0 : index
      %c0_168 = arith.constant 0 : index
      %c0_169 = arith.constant 0 : index
      %106 = vector.load %arg14[%c0_166, %c0_167, %c0_168, %c0_169] : memref<2x8x8x8xf32, #tpu.memory_space<vmem>>, vector<2x8x8x8xf32>
      tpu.vector_store %arg14[%c0_166, %c0_167, %c0_168, %c0_169], %105 {strides = array<i32>} : memref<2x8x8x8xf32, #tpu.memory_space<vmem>>, vector<2x8x8x8xf32>,
      %c0_170 = arith.constant 0 : index
      %c1_171 = arith.constant 1 : index
      %c1_172 = arith.constant 1 : index
      %c0_173 = arith.constant 0 : index
      %107 = vector.load %arg14[%c0_170, %c1_171, %c1_172, %c0_173] : memref<2x8x8x8xf32, #tpu.memory_space<vmem>>, vector<2x7x7x8xf32>
      %108 = vector.extract_strided_slice %101 {offsets = [0, 0, 0, 0], sizes = [2, 7, 7, 8], strides = [1, 1, 1, 1]} : vector<2x8x8x72xf32> to vector<2x7x7x8xf32>
      %109 = arith.addf %107, %108 : vector<2x7x7x8xf32>
      %c0_174 = arith.constant 0 : index
      %c1_175 = arith.constant 1 : index
      %c1_176 = arith.constant 1 : index
      %c0_177 = arith.constant 0 : index
      %110 = vector.load %arg14[%c0_174, %c1_175, %c1_176, %c0_177] : memref<2x8x8x8xf32, #tpu.memory_space<vmem>>, vector<2x7x7x8xf32>
      tpu.vector_store %arg14[%c0_174, %c1_175, %c1_176, %c0_177], %109 {strides = array<i32>} : memref<2x8x8x8xf32, #tpu.memory_space<vmem>>, vector<2x7x7x8xf32>,
      %c0_178 = arith.constant 0 : index
      %c1_179 = arith.constant 1 : index
      %c0_180 = arith.constant 0 : index
      %c0_181 = arith.constant 0 : index
      %111 = vector.load %arg14[%c0_178, %c1_179, %c0_180, %c0_181] : memref<2x8x8x8xf32, #tpu.memory_space<vmem>>, vector<2x7x8x8xf32>
      %112 = vector.extract_strided_slice %101 {offsets = [0, 0, 0, 8], sizes = [2, 7, 8, 8], strides = [1, 1, 1, 1]} : vector<2x8x8x72xf32> to vector<2x7x8x8xf32>
      %113 = arith.addf %111, %112 : vector<2x7x8x8xf32>
      %c0_182 = arith.constant 0 : index
      %c1_183 = arith.constant 1 : index
      %c0_184 = arith.constant 0 : index
      %c0_185 = arith.constant 0 : index
      %114 = vector.load %arg14[%c0_182, %c1_183, %c0_184, %c0_185] : memref<2x8x8x8xf32, #tpu.memory_space<vmem>>, vector<2x7x8x8xf32>
      tpu.vector_store %arg14[%c0_182, %c1_183, %c0_184, %c0_185], %113 {strides = array<i32>} : memref<2x8x8x8xf32, #tpu.memory_space<vmem>>, vector<2x7x8x8xf32>,
      %c0_186 = arith.constant 0 : index
      %c1_187 = arith.constant 1 : index
      %c0_188 = arith.constant 0 : index
      %c0_189 = arith.constant 0 : index
      %115 = vector.load %arg14[%c0_186, %c1_187, %c0_188, %c0_189] : memref<2x8x8x8xf32, #tpu.memory_space<vmem>>, vector<2x7x7x8xf32>
      %116 = vector.extract_strided_slice %101 {offsets = [0, 0, 1, 16], sizes = [2, 7, 7, 8], strides = [1, 1, 1, 1]} : vector<2x8x8x72xf32> to vector<2x7x7x8xf32>
      %117 = arith.addf %115, %116 : vector<2x7x7x8xf32>
      %c0_190 = arith.constant 0 : index
      %c1_191 = arith.constant 1 : index
      %c0_192 = arith.constant 0 : index
      %c0_193 = arith.constant 0 : index
      %118 = vector.load %arg14[%c0_190, %c1_191, %c0_192, %c0_193] : memref<2x8x8x8xf32, #tpu.memory_space<vmem>>, vector<2x7x7x8xf32>
      tpu.vector_store %arg14[%c0_190, %c1_191, %c0_192, %c0_193], %117 {strides = array<i32>} : memref<2x8x8x8xf32, #tpu.memory_space<vmem>>, vector<2x7x7x8xf32>,
      %c0_194 = arith.constant 0 : index
      %c0_195 = arith.constant 0 : index
      %c1_196 = arith.constant 1 : index
      %c0_197 = arith.constant 0 : index
      %119 = vector.load %arg14[%c0_194, %c0_195, %c1_196, %c0_197] : memref<2x8x8x8xf32, #tpu.memory_space<vmem>>, vector<2x8x7x8xf32>
      %120 = vector.extract_strided_slice %101 {offsets = [0, 0, 0, 24], sizes = [2, 8, 7, 8], strides = [1, 1, 1, 1]} : vector<2x8x8x72xf32> to vector<2x8x7x8xf32>
      %121 = arith.addf %119, %120 : vector<2x8x7x8xf32>
      %c0_198 = arith.constant 0 : index
      %c0_199 = arith.constant 0 : index
      %c1_200 = arith.constant 1 : index
      %c0_201 = arith.constant 0 : index
      %122 = vector.load %arg14[%c0_198, %c0_199, %c1_200, %c0_201] : memref<2x8x8x8xf32, #tpu.memory_space<vmem>>, vector<2x8x7x8xf32>
      tpu.vector_store %arg14[%c0_198, %c0_199, %c1_200, %c0_201], %121 {strides = array<i32>} : memref<2x8x8x8xf32, #tpu.memory_space<vmem>>, vector<2x8x7x8xf32>,
      %c0_202 = arith.constant 0 : index
      %c0_203 = arith.constant 0 : index
      %c0_204 = arith.constant 0 : index
      %c0_205 = arith.constant 0 : index
      %123 = vector.load %arg14[%c0_202, %c0_203, %c0_204, %c0_205] : memref<2x8x8x8xf32, #tpu.memory_space<vmem>>, vector<2x8x7x8xf32>
      %124 = vector.extract_strided_slice %101 {offsets = [0, 0, 1, 40], sizes = [2, 8, 7, 8], strides = [1, 1, 1, 1]} : vector<2x8x8x72xf32> to vector<2x8x7x8xf32>
      %125 = arith.addf %123, %124 : vector<2x8x7x8xf32>
      %c0_206 = arith.constant 0 : index
      %c0_207 = arith.constant 0 : index
      %c0_208 = arith.constant 0 : index
      %c0_209 = arith.constant 0 : index
      %126 = vector.load %arg14[%c0_206, %c0_207, %c0_208, %c0_209] : memref<2x8x8x8xf32, #tpu.memory_space<vmem>>, vector<2x8x7x8xf32>
      tpu.vector_store %arg14[%c0_206, %c0_207, %c0_208, %c0_209], %125 {strides = array<i32>} : memref<2x8x8x8xf32, #tpu.memory_space<vmem>>, vector<2x8x7x8xf32>,
      %c0_210 = arith.constant 0 : index
      %c0_211 = arith.constant 0 : index
      %c1_212 = arith.constant 1 : index
      %c0_213 = arith.constant 0 : index
      %127 = vector.load %arg14[%c0_210, %c0_211, %c1_212, %c0_213] : memref<2x8x8x8xf32, #tpu.memory_space<vmem>>, vector<2x7x7x8xf32>
      %128 = vector.extract_strided_slice %101 {offsets = [0, 1, 0, 48], sizes = [2, 7, 7, 8], strides = [1, 1, 1, 1]} : vector<2x8x8x72xf32> to vector<2x7x7x8xf32>
      %129 = arith.addf %127, %128 : vector<2x7x7x8xf32>
      %c0_214 = arith.constant 0 : index
      %c0_215 = arith.constant 0 : index
      %c1_216 = arith.constant 1 : index
      %c0_217 = arith.constant 0 : index
      %130 = vector.load %arg14[%c0_214, %c0_215, %c1_216, %c0_217] : memref<2x8x8x8xf32, #tpu.memory_space<vmem>>, vector<2x7x7x8xf32>
      tpu.vector_store %arg14[%c0_214, %c0_215, %c1_216, %c0_217], %129 {strides = array<i32>} : memref<2x8x8x8xf32, #tpu.memory_space<vmem>>, vector<2x7x7x8xf32>,
      %c0_218 = arith.constant 0 : index
      %c0_219 = arith.constant 0 : index
      %c0_220 = arith.constant 0 : index
      %c0_221 = arith.constant 0 : index
      %131 = vector.load %arg14[%c0_218, %c0_219, %c0_220, %c0_221] : memref<2x8x8x8xf32, #tpu.memory_space<vmem>>, vector<2x7x8x8xf32>
      %132 = vector.extract_strided_slice %101 {offsets = [0, 1, 0, 56], sizes = [2, 7, 8, 8], strides = [1, 1, 1, 1]} : vector<2x8x8x72xf32> to vector<2x7x8x8xf32>
      %133 = arith.addf %131, %132 : vector<2x7x8x8xf32>
      %c0_222 = arith.constant 0 : index
      %c0_223 = arith.constant 0 : index
      %c0_224 = arith.constant 0 : index
      %c0_225 = arith.constant 0 : index
      %134 = vector.load %arg14[%c0_222, %c0_223, %c0_224, %c0_225] : memref<2x8x8x8xf32, #tpu.memory_space<vmem>>, vector<2x7x8x8xf32>
      tpu.vector_store %arg14[%c0_222, %c0_223, %c0_224, %c0_225], %133 {strides = array<i32>} : memref<2x8x8x8xf32, #tpu.memory_space<vmem>>, vector<2x7x8x8xf32>,
      %c0_226 = arith.constant 0 : index
      %c0_227 = arith.constant 0 : index
      %c0_228 = arith.constant 0 : index
      %c0_229 = arith.constant 0 : index
      %135 = vector.load %arg14[%c0_226, %c0_227, %c0_228, %c0_229] : memref<2x8x8x8xf32, #tpu.memory_space<vmem>>, vector<2x7x7x8xf32>
      %136 = vector.extract_strided_slice %101 {offsets = [0, 1, 1, 64], sizes = [2, 7, 7, 8], strides = [1, 1, 1, 1]} : vector<2x8x8x72xf32> to vector<2x7x7x8xf32>
      %137 = arith.addf %135, %136 : vector<2x7x7x8xf32>
      %c0_230 = arith.constant 0 : index
      %c0_231 = arith.constant 0 : index
      %c0_232 = arith.constant 0 : index
      %c0_233 = arith.constant 0 : index
      %138 = vector.load %arg14[%c0_230, %c0_231, %c0_232, %c0_233] : memref<2x8x8x8xf32, #tpu.memory_space<vmem>>, vector<2x7x7x8xf32>
      tpu.vector_store %arg14[%c0_230, %c0_231, %c0_232, %c0_233], %137 {strides = array<i32>} : memref<2x8x8x8xf32, #tpu.memory_space<vmem>>, vector<2x7x7x8xf32>,
      %c0_234 = arith.constant 0 : index
      %c0_235 = arith.constant 0 : index
      %c0_236 = arith.constant 0 : index
      %c0_237 = arith.constant 0 : index
      %139 = vector.load %arg14[%c0_234, %c0_235, %c0_236, %c0_237] : memref<2x8x8x8xf32, #tpu.memory_space<vmem>>, vector<2x8x8x8xf32>
      %140 = vector.shape_cast %139 : vector<2x8x8x8xf32> to vector<128x8xf32>
      %c0_238 = arith.constant 0 : index
      %c0_239 = arith.constant 0 : index
      %141 = vector.load %arg8[%c0_238, %c0_239] : memref<8x9xf32, #tpu.memory_space<vmem>>, vector<8x9xf32>
      %cst_240 = arith.constant dense<0.000000e+00> : vector<128x9xf32>
      %142 = tpu.matmul %140, %141, %cst_240 {dimension_numbers = #tpu.dot_dimension_numbers<[1], [0], [0], [1], [0, 0, 1, 1], [], []>} : vector<128x8xf32>, vector<8x9xf32>, vector<128x9xf32> -> vector<128x9xf32>
      %c0_241 = arith.constant 0 : index
      %c0_242 = arith.constant 0 : index
      %143 = vector.load %arg9[%c0_241, %c0_242] : memref<1x1xf32, #tpu.memory_space<vmem>>, vector<1x1xf32>
      %144 = vector.shape_cast %142 : vector<128x9xf32> to vector<2x8x8x9xf32>
      %145 = vector.extract_strided_slice %144 {offsets = [0, 0, 0, 4], sizes = [2, 8, 8, 1], strides = [1, 1, 1, 1]} : vector<2x8x8x9xf32> to vector<2x8x8x1xf32>
      %146 = vector.shape_cast %143 : vector<1x1xf32> to vector<1x1x1x1xf32>
      %147 = vector.broadcast %146 : vector<1x1x1x1xf32> to vector<2x8x8x1xf32>
      %148 = arith.addf %145, %147 : vector<2x8x8x1xf32>
      %c0_243 = arith.constant 0 : index
      %c0_244 = arith.constant 0 : index
      %c0_245 = arith.constant 0 : index
      %c0_246 = arith.constant 0 : index
      %149 = vector.load %arg15[%c0_243, %c0_244, %c0_245, %c0_246] : memref<2x8x8x1xf32, #tpu.memory_space<vmem>>, vector<2x8x8x1xf32>
      tpu.vector_store %arg15[%c0_243, %c0_244, %c0_245, %c0_246], %148 {strides = array<i32>} : memref<2x8x8x1xf32, #tpu.memory_space<vmem>>, vector<2x8x8x1xf32>,
      %c0_247 = arith.constant 0 : index
      %c1_248 = arith.constant 1 : index
      %c1_249 = arith.constant 1 : index
      %c0_250 = arith.constant 0 : index
      %150 = vector.load %arg15[%c0_247, %c1_248, %c1_249, %c0_250] : memref<2x8x8x1xf32, #tpu.memory_space<vmem>>, vector<2x7x7x1xf32>
      %151 = vector.extract_strided_slice %144 {offsets = [0, 0, 0, 0], sizes = [2, 7, 7, 1], strides = [1, 1, 1, 1]} : vector<2x8x8x9xf32> to vector<2x7x7x1xf32>
      %152 = arith.addf %150, %151 : vector<2x7x7x1xf32>
      %c0_251 = arith.constant 0 : index
      %c1_252 = arith.constant 1 : index
      %c1_253 = arith.constant 1 : index
      %c0_254 = arith.constant 0 : index
      %153 = vector.load %arg15[%c0_251, %c1_252, %c1_253, %c0_254] : memref<2x8x8x1xf32, #tpu.memory_space<vmem>>, vector<2x7x7x1xf32>
      tpu.vector_store %arg15[%c0_251, %c1_252, %c1_253, %c0_254], %152 {strides = array<i32>} : memref<2x8x8x1xf32, #tpu.memory_space<vmem>>, vector<2x7x7x1xf32>,
      %c0_255 = arith.constant 0 : index
      %c1_256 = arith.constant 1 : index
      %c0_257 = arith.constant 0 : index
      %c0_258 = arith.constant 0 : index
      %154 = vector.load %arg15[%c0_255, %c1_256, %c0_257, %c0_258] : memref<2x8x8x1xf32, #tpu.memory_space<vmem>>, vector<2x7x8x1xf32>
      %155 = vector.extract_strided_slice %144 {offsets = [0, 0, 0, 1], sizes = [2, 7, 8, 1], strides = [1, 1, 1, 1]} : vector<2x8x8x9xf32> to vector<2x7x8x1xf32>
      %156 = arith.addf %154, %155 : vector<2x7x8x1xf32>
      %c0_259 = arith.constant 0 : index
      %c1_260 = arith.constant 1 : index
      %c0_261 = arith.constant 0 : index
      %c0_262 = arith.constant 0 : index
      %157 = vector.load %arg15[%c0_259, %c1_260, %c0_261, %c0_262] : memref<2x8x8x1xf32, #tpu.memory_space<vmem>>, vector<2x7x8x1xf32>
      tpu.vector_store %arg15[%c0_259, %c1_260, %c0_261, %c0_262], %156 {strides = array<i32>} : memref<2x8x8x1xf32, #tpu.memory_space<vmem>>, vector<2x7x8x1xf32>,
      %c0_263 = arith.constant 0 : index
      %c1_264 = arith.constant 1 : index
      %c0_265 = arith.constant 0 : index
      %c0_266 = arith.constant 0 : index
      %158 = vector.load %arg15[%c0_263, %c1_264, %c0_265, %c0_266] : memref<2x8x8x1xf32, #tpu.memory_space<vmem>>, vector<2x7x7x1xf32>
      %159 = vector.extract_strided_slice %144 {offsets = [0, 0, 1, 2], sizes = [2, 7, 7, 1], strides = [1, 1, 1, 1]} : vector<2x8x8x9xf32> to vector<2x7x7x1xf32>
      %160 = arith.addf %158, %159 : vector<2x7x7x1xf32>
      %c0_267 = arith.constant 0 : index
      %c1_268 = arith.constant 1 : index
      %c0_269 = arith.constant 0 : index
      %c0_270 = arith.constant 0 : index
      %161 = vector.load %arg15[%c0_267, %c1_268, %c0_269, %c0_270] : memref<2x8x8x1xf32, #tpu.memory_space<vmem>>, vector<2x7x7x1xf32>
      tpu.vector_store %arg15[%c0_267, %c1_268, %c0_269, %c0_270], %160 {strides = array<i32>} : memref<2x8x8x1xf32, #tpu.memory_space<vmem>>, vector<2x7x7x1xf32>,
      %c0_271 = arith.constant 0 : index
      %c0_272 = arith.constant 0 : index
      %c1_273 = arith.constant 1 : index
      %c0_274 = arith.constant 0 : index
      %162 = vector.load %arg15[%c0_271, %c0_272, %c1_273, %c0_274] : memref<2x8x8x1xf32, #tpu.memory_space<vmem>>, vector<2x8x7x1xf32>
      %163 = vector.extract_strided_slice %144 {offsets = [0, 0, 0, 3], sizes = [2, 8, 7, 1], strides = [1, 1, 1, 1]} : vector<2x8x8x9xf32> to vector<2x8x7x1xf32>
      %164 = arith.addf %162, %163 : vector<2x8x7x1xf32>
      %c0_275 = arith.constant 0 : index
      %c0_276 = arith.constant 0 : index
      %c1_277 = arith.constant 1 : index
      %c0_278 = arith.constant 0 : index
      %165 = vector.load %arg15[%c0_275, %c0_276, %c1_277, %c0_278] : memref<2x8x8x1xf32, #tpu.memory_space<vmem>>, vector<2x8x7x1xf32>
      tpu.vector_store %arg15[%c0_275, %c0_276, %c1_277, %c0_278], %164 {strides = array<i32>} : memref<2x8x8x1xf32, #tpu.memory_space<vmem>>, vector<2x8x7x1xf32>,
      %c0_279 = arith.constant 0 : index
      %c0_280 = arith.constant 0 : index
      %c0_281 = arith.constant 0 : index
      %c0_282 = arith.constant 0 : index
      %166 = vector.load %arg15[%c0_279, %c0_280, %c0_281, %c0_282] : memref<2x8x8x1xf32, #tpu.memory_space<vmem>>, vector<2x8x7x1xf32>
      %167 = vector.extract_strided_slice %144 {offsets = [0, 0, 1, 5], sizes = [2, 8, 7, 1], strides = [1, 1, 1, 1]} : vector<2x8x8x9xf32> to vector<2x8x7x1xf32>
      %168 = arith.addf %166, %167 : vector<2x8x7x1xf32>
      %c0_283 = arith.constant 0 : index
      %c0_284 = arith.constant 0 : index
      %c0_285 = arith.constant 0 : index
      %c0_286 = arith.constant 0 : index
      %169 = vector.load %arg15[%c0_283, %c0_284, %c0_285, %c0_286] : memref<2x8x8x1xf32, #tpu.memory_space<vmem>>, vector<2x8x7x1xf32>
      tpu.vector_store %arg15[%c0_283, %c0_284, %c0_285, %c0_286], %168 {strides = array<i32>} : memref<2x8x8x1xf32, #tpu.memory_space<vmem>>, vector<2x8x7x1xf32>,
      %c0_287 = arith.constant 0 : index
      %c0_288 = arith.constant 0 : index
      %c1_289 = arith.constant 1 : index
      %c0_290 = arith.constant 0 : index
      %170 = vector.load %arg15[%c0_287, %c0_288, %c1_289, %c0_290] : memref<2x8x8x1xf32, #tpu.memory_space<vmem>>, vector<2x7x7x1xf32>
      %171 = vector.extract_strided_slice %144 {offsets = [0, 1, 0, 6], sizes = [2, 7, 7, 1], strides = [1, 1, 1, 1]} : vector<2x8x8x9xf32> to vector<2x7x7x1xf32>
      %172 = arith.addf %170, %171 : vector<2x7x7x1xf32>
      %c0_291 = arith.constant 0 : index
      %c0_292 = arith.constant 0 : index
      %c1_293 = arith.constant 1 : index
      %c0_294 = arith.constant 0 : index
      %173 = vector.load %arg15[%c0_291, %c0_292, %c1_293, %c0_294] : memref<2x8x8x1xf32, #tpu.memory_space<vmem>>, vector<2x7x7x1xf32>
      tpu.vector_store %arg15[%c0_291, %c0_292, %c1_293, %c0_294], %172 {strides = array<i32>} : memref<2x8x8x1xf32, #tpu.memory_space<vmem>>, vector<2x7x7x1xf32>,
      %c0_295 = arith.constant 0 : index
      %c0_296 = arith.constant 0 : index
      %c0_297 = arith.constant 0 : index
      %c0_298 = arith.constant 0 : index
      %174 = vector.load %arg15[%c0_295, %c0_296, %c0_297, %c0_298] : memref<2x8x8x1xf32, #tpu.memory_space<vmem>>, vector<2x7x8x1xf32>
      %175 = vector.extract_strided_slice %144 {offsets = [0, 1, 0, 7], sizes = [2, 7, 8, 1], strides = [1, 1, 1, 1]} : vector<2x8x8x9xf32> to vector<2x7x8x1xf32>
      %176 = arith.addf %174, %175 : vector<2x7x8x1xf32>
      %c0_299 = arith.constant 0 : index
      %c0_300 = arith.constant 0 : index
      %c0_301 = arith.constant 0 : index
      %c0_302 = arith.constant 0 : index
      %177 = vector.load %arg15[%c0_299, %c0_300, %c0_301, %c0_302] : memref<2x8x8x1xf32, #tpu.memory_space<vmem>>, vector<2x7x8x1xf32>
      tpu.vector_store %arg15[%c0_299, %c0_300, %c0_301, %c0_302], %176 {strides = array<i32>} : memref<2x8x8x1xf32, #tpu.memory_space<vmem>>, vector<2x7x8x1xf32>,
      %c0_303 = arith.constant 0 : index
      %c0_304 = arith.constant 0 : index
      %c0_305 = arith.constant 0 : index
      %c0_306 = arith.constant 0 : index
      %178 = vector.load %arg15[%c0_303, %c0_304, %c0_305, %c0_306] : memref<2x8x8x1xf32, #tpu.memory_space<vmem>>, vector<2x7x7x1xf32>
      %179 = vector.extract_strided_slice %144 {offsets = [0, 1, 1, 8], sizes = [2, 7, 7, 1], strides = [1, 1, 1, 1]} : vector<2x8x8x9xf32> to vector<2x7x7x1xf32>
      %180 = arith.addf %178, %179 : vector<2x7x7x1xf32>
      %c0_307 = arith.constant 0 : index
      %c0_308 = arith.constant 0 : index
      %c0_309 = arith.constant 0 : index
      %c0_310 = arith.constant 0 : index
      %181 = vector.load %arg15[%c0_307, %c0_308, %c0_309, %c0_310] : memref<2x8x8x1xf32, #tpu.memory_space<vmem>>, vector<2x7x7x1xf32>
      tpu.vector_store %arg15[%c0_307, %c0_308, %c0_309, %c0_310], %180 {strides = array<i32>} : memref<2x8x8x1xf32, #tpu.memory_space<vmem>>, vector<2x7x7x1xf32>,
      %c0_311 = arith.constant 0 : index
      %c0_312 = arith.constant 0 : index
      %c0_313 = arith.constant 0 : index
      %c0_314 = arith.constant 0 : index
      %182 = vector.load %arg15[%c0_311, %c0_312, %c0_313, %c0_314] : memref<2x8x8x1xf32, #tpu.memory_space<vmem>>, vector<2x8x8x1xf32>
      %183 = arith.negf %182 : vector<2x8x8x1xf32>
      %184 = math.exp %183 : vector<2x8x8x1xf32>
      %cst_315 = arith.constant 1.000000e+00 : f32
      %185 = vector.broadcast %cst_315 : f32 to vector<2x8x8x1xf32>
      %186 = arith.addf %185, %184 : vector<2x8x8x1xf32>
      %187 = arith.divf %185, %186 : vector<2x8x8x1xf32>
      %c0_316 = arith.constant 0 : index
      %c0_317 = arith.constant 0 : index
      %c0_318 = arith.constant 0 : index
      %c0_319 = arith.constant 0 : index
      %188 = vector.load %arg10[%c0_316, %c0_317, %c0_318, %c0_319] : memref<2x8x8x1xf32, #tpu.memory_space<vmem>>, vector<2x8x8x1xf32>
      tpu.vector_store %arg10[%c0_316, %c0_317, %c0_318, %c0_319], %187 {strides = array<i32>} : memref<2x8x8x1xf32, #tpu.memory_space<vmem>>, vector<2x8x8x1xf32>,
    } else {
    }
    return
  }
  func.func @transform_0(%arg0: i32) -> (i32, i32, i32, i32) {
    %c0_i32 = arith.constant 0 : i32
    %c0_i32_0 = arith.constant 0 : i32
    %c0_i32_1 = arith.constant 0 : i32
    %c0_i32_2 = arith.constant 0 : i32
    return %c0_i32, %c0_i32_0, %c0_i32_1, %arg0 : i32, i32, i32, i32
  }
  func.func @transform_1(%arg0: i32) -> (i32, i32) {
    %c0_i32 = arith.constant 0 : i32
    %c0_i32_0 = arith.constant 0 : i32
    return %arg0, %c0_i32 : i32, i32
  }
  func.func @transform_2(%arg0: i32) -> (i32, i32) {
    %c0_i32 = arith.constant 0 : i32
    %c0_i32_0 = arith.constant 0 : i32
    %c0_i32_1 = arith.constant 0 : i32
    return %c0_i32, %c0_i32_0 : i32, i32
  }
  func.func @transform_3(%arg0: i32) -> (i32, i32) {
    %c0_i32 = arith.constant 0 : i32
    %c0_i32_0 = arith.constant 0 : i32
    %c0_i32_1 = arith.constant 0 : i32
    return %c0_i32, %c0_i32_0 : i32, i32
  }
  func.func @transform_4(%arg0: i32) -> (i32, i32) {
    %c0_i32 = arith.constant 0 : i32
    %c0_i32_0 = arith.constant 0 : i32
    %c0_i32_1 = arith.constant 0 : i32
    return %c0_i32, %c0_i32_0 : i32, i32
  }
  func.func @transform_5(%arg0: i32) -> (i32, i32) {
    %c0_i32 = arith.constant 0 : i32
    %c0_i32_0 = arith.constant 0 : i32
    %c0_i32_1 = arith.constant 0 : i32
    return %c0_i32, %c0_i32_0 : i32, i32
  }
  func.func @transform_6(%arg0: i32) -> (i32, i32) {
    %c0_i32 = arith.constant 0 : i32
    %c0_i32_0 = arith.constant 0 : i32
    %c0_i32_1 = arith.constant 0 : i32
    return %c0_i32, %c0_i32_0 : i32, i32
  }
  func.func @transform_7(%arg0: i32) -> (i32, i32) {
    %c0_i32 = arith.constant 0 : i32
    %c0_i32_0 = arith.constant 0 : i32
    %c0_i32_1 = arith.constant 0 : i32
    return %c0_i32, %c0_i32_0 : i32, i32
  }
  func.func @transform_8(%arg0: i32) -> (i32, i32) {
    %c0_i32 = arith.constant 0 : i32
    %c0_i32_0 = arith.constant 0 : i32
    %c0_i32_1 = arith.constant 0 : i32
    return %c0_i32, %c0_i32_0 : i32, i32
  }
  func.func @transform_9(%arg0: i32) -> (i32, i32, i32, i32) {
    %c0_i32 = arith.constant 0 : i32
    %c0_i32_0 = arith.constant 0 : i32
    %c0_i32_1 = arith.constant 0 : i32
    %c0_i32_2 = arith.constant 0 : i32
    %c0_i32_3 = arith.constant 0 : i32
    return %c0_i32, %c0_i32_0, %c0_i32_1, %c0_i32_2 : i32, i32, i32, i32
  }
}

</mosaic_0001>

<bundles_post_ra>
// kernel: fcn_forward.1
= control target key start
LH: loop header
LB: loop body
LE: loop exit
PB: predicated region body
PF: predicated region fallthrough
CT: control target
= control target key end

     0   :  { %s8553_s0 = inlined_call_operand.vmem [shape: f32[2,8,8,768], index: 0, kind: input, shape index: {}]   ;;  %s8554_s1 = inlined_call_operand.vmem [shape: f32[768,288], index: 1, kind: input, shape index: {}]   ;;  %s8555_s2 = inlined_call_operand.vmem [shape: f32[1,32], index: 2, kind: input, shape index: {}]   ;;  %s8556_s3 = inlined_call_operand.vmem [shape: f32[32,144], index: 3, kind: input, shape index: {}]   ;;  %s8557_s4 = inlined_call_operand.vmem [shape: f32[1,16], index: 4, kind: input, shape index: {}]   ;;  %s8558_s5 = inlined_call_operand.vmem [shape: f32[16,72], index: 5, kind: input, shape index: {}]   ;;  %s8559_s6 = inlined_call_operand.vmem [shape: f32[1,8], index: 6, kind: input, shape index: {}]   ;;  %s8560_s7 = inlined_call_operand.vmem [shape: f32[8,9], index: 7, kind: input, shape index: {}]   ;;  %s8561_s8 = inlined_call_operand.<no memory space> [shape: f32[1,1], index: 8, kind: input, shape index: {}]   ;;  %s8562_s9 = inlined_call_operand.vmem [shape: f32[2,8,8,1], index: 9, kind: output, shape index: {}]  }
   0x1   :  { %v14_v0 = vstv %s8561_s8 }
   0x2   :  { %15 = vst [vmem:[#allocation7] sm:$0x1] %v14_v0 }
   0x3   :  { %s5647_s11 = smov 0   ;;  %s5649_s12 = smov 0  }
   0x4   :  { %s5651_s13 = smov 0  }
   0x5 LB: > { %s5663_s8 = sadd.s32 4294967295, %s5572_s13   ;;  %s5666_s14 = sadd.s32 1, %s5572_s13   ;;  %s5572_s13 = sphi %s5651_s13, %s8565_s13   ;;  %s5568_s12 = sphi %s5649_s12, %s8564_s12   ;;  %s5564_s11 = sphi %s5647_s11, %s8563_s11  }
   0x6   : > { %s25_s15 = ssub.s32 %s5572_s13, %s5666_s14  ;;  %s28_s16 = sadd.s32 1, %s5568_s12 }
   0x7   : > { %p26_p0 = scmp.eq.s32.totalorder %s25_s15, 0  ;;  %p35_p1 = scmp.ne.s32.totalorder %s5568_s12, %s5564_s11 }
   0x8   : > { %p36_p2 = scmp.eq.s32.totalorder %s5572_s13, 0  ;;  %p5082_p4 = scmp.ge.s32.totalorder %s5572_s13, 3 }
   0x9   : > { %s5675_s17 = scalar_select %p26_p0, %s5568_s12, %s28_s16  }
   0xa   : > { %p37_p3 = por %p36_p2, %p35_p1  ;;  %276 = sbr.rel (%p5082_p4) target bundleno = 37 (0x25), region = 44 }
  0x11   : > { %279 = sbr.rel (!%p37_p3) target bundleno = 37 (0x25), region = 48  ;;  %s281_s18 = sand.u32 (%p37_p3), 1, %s5568_s12  }
  0x12   : > { %s5163_s19 = sshll.u32 (%p37_p3), %s5572_s13, 4  ;;  %s5083_s20 = sshll.u32 (%p37_p3), %s281_s18, 8 }
  0x13   : > { %s5683_s23 = scalar_lea.vmem (%p37_p3), %s8553_s0, %s5163_s19  ;;  %s5688_s24 = scalar_lea.vmem (%p37_p3), [#allocation8], %s5083_s20 }
  0x14   : > { %v299_v1 = vld [vmem:[%s5683_s23] sm:$0xff] (%p37_p3)  ;;  %v301_v2 = vld [vmem:[%s5683_s23 + $0x8] sm:$0xff] (%p37_p3)  ;;  %v303_v3 = vld [vmem:[%s5683_s23 + $0x30] sm:$0xff] (%p37_p3) }
  0x15   : > { %300 = vst [vmem:[%s5688_s24] sm:$0xff] (%p37_p3), %v299_v1  ;;  %302 = vst [vmem:[%s5688_s24 + $0x8] sm:$0xff] (%p37_p3), %v301_v2  ;;  %v305_v4 = vld [vmem:[%s5683_s23 + $0x38] sm:$0xff] (%p37_p3)  ;;  %v307_v5 = vld [vmem:[%s5683_s23 + $0x60] sm:$0xff] (%p37_p3) }
  0x16   : > { %304 = vst [vmem:[%s5688_s24 + $0x10] sm:$0xff] (%p37_p3), %v303_v3  ;;  %v309_v6 = vld [vmem:[%s5683_s23 + $0x68] sm:$0xff] (%p37_p3)  ;;  %306 = vst [vmem:[%s5688_s24 + $0x18] sm:$0xff] (%p37_p3), %v305_v4  ;;  %v311_v7 = vld [vmem:[%s5683_s23 + $0x90] sm:$0xff] (%p37_p3) }
  0x17   : > { %308 = vst [vmem:[%s5688_s24 + $0x20] sm:$0xff] (%p37_p3), %v307_v5  ;;  %310 = vst [vmem:[%s5688_s24 + $0x28] sm:$0xff] (%p37_p3), %v309_v6  ;;  %v313_v8 = vld [vmem:[%s5683_s23 + $0x98] sm:$0xff] (%p37_p3)  ;;  %v315_v9 = vld [vmem:[%s5683_s23 + $0xc0] sm:$0xff] (%p37_p3) }
  0x18   : > { %312 = vst [vmem:[%s5688_s24 + $0x30] sm:$0xff] %v311_v7  ;;  %314 = vst [vmem:[%s5688_s24 + $0x38] sm:$0xff] %v313_v8  ;;  %v317_v10 = vld [vmem:[%s5683_s23 + $0xc8] sm:$0xff]  ;;  %v319_v11 = vld [vmem:[%s5683_s23 + $0xf0] sm:$0xff] }
  0x19   : > { %316 = vst [vmem:[%s5688_s24 + $0x40] sm:$0xff] %v315_v9  ;;  %v321_v12 = vld [vmem:[%s5683_s23 + $0xf8] sm:$0xff]  ;;  %318 = vst [vmem:[%s5688_s24 + $0x48] sm:$0xff] %v317_v10  ;;  %v323_v13 = vld [vmem:[%s5683_s23 + $0x120] sm:$0xff] }
  0x1a   : > { %320 = vst [vmem:[%s5688_s24 + $0x50] sm:$0xff] %v319_v11  ;;  %322 = vst [vmem:[%s5688_s24 + $0x58] sm:$0xff] %v321_v12  ;;  %v325_v14 = vld [vmem:[%s5683_s23 + $0x128] sm:$0xff]  ;;  %v327_v15 = vld [vmem:[%s5683_s23 + $0x150] sm:$0xff] }
  0x1b   : > { %324 = vst [vmem:[%s5688_s24 + $0x60] sm:$0xff] %v323_v13  ;;  %326 = vst [vmem:[%s5688_s24 + $0x68] sm:$0xff] %v325_v14  ;;  %v329_v16 = vld [vmem:[%s5683_s23 + $0x158] sm:$0xff]  ;;  %v331_v17 = vld [vmem:[%s5683_s23 + $0x180] sm:$0xff] }
  0x1c   : > { %328 = vst [vmem:[%s5688_s24 + $0x70] sm:$0xff] %v327_v15  ;;  %v333_v18 = vld [vmem:[%s5683_s23 + $0x188] sm:$0xff]  ;;  %330 = vst [vmem:[%s5688_s24 + $0x78] sm:$0xff] %v329_v16  ;;  %v335_v19 = vld [vmem:[%s5683_s23 + $0x1b0] sm:$0xff] }
  0x1d   : > { %332 = vst [vmem:[%s5688_s24 + $0x80] sm:$0xff] %v331_v17  ;;  %334 = vst [vmem:[%s5688_s24 + $0x88] sm:$0xff] %v333_v18  ;;  %v337_v20 = vld [vmem:[%s5683_s23 + $0x1b8] sm:$0xff]  ;;  %v339_v21 = vld [vmem:[%s5683_s23 + $0x1e0] sm:$0xff] }
  0x1e   : > { %336 = vst [vmem:[%s5688_s24 + $0x90] sm:$0xff] %v335_v19  ;;  %338 = vst [vmem:[%s5688_s24 + $0x98] sm:$0xff] %v337_v20  ;;  %v341_v22 = vld [vmem:[%s5683_s23 + $0x1e8] sm:$0xff]  ;;  %v343_v23 = vld [vmem:[%s5683_s23 + $0x210] sm:$0xff] }
  0x1f   : > { %340 = vst [vmem:[%s5688_s24 + $0xa0] sm:$0xff] %v339_v21  ;;  %v345_v24 = vld [vmem:[%s5683_s23 + $0x218] sm:$0xff]  ;;  %342 = vst [vmem:[%s5688_s24 + $0xa8] sm:$0xff] %v341_v22  ;;  %v347_v25 = vld [vmem:[%s5683_s23 + $0x240] sm:$0xff] }
  0x20   : > { %344 = vst [vmem:[%s5688_s24 + $0xb0] sm:$0xff] %v343_v23  ;;  %346 = vst [vmem:[%s5688_s24 + $0xb8] sm:$0xff] %v345_v24  ;;  %v349_v26 = vld [vmem:[%s5683_s23 + $0x248] sm:$0xff]  ;;  %v351_v27 = vld [vmem:[%s5683_s23 + $0x270] sm:$0xff] }
  0x21   : > { %348 = vst [vmem:[%s5688_s24 + $0xc0] sm:$0xff] %v347_v25  ;;  %350 = vst [vmem:[%s5688_s24 + $0xc8] sm:$0xff] %v349_v26  ;;  %v353_v28 = vld [vmem:[%s5683_s23 + $0x278] sm:$0xff]  ;;  %v355_v29 = vld [vmem:[%s5683_s23 + $0x2a0] sm:$0xff] }
  0x22   : > { %352 = vst [vmem:[%s5688_s24 + $0xd0] sm:$0xff] %v351_v27  ;;  %v357_v30 = vld [vmem:[%s5683_s23 + $0x2a8] sm:$0xff]  ;;  %354 = vst [vmem:[%s5688_s24 + $0xd8] sm:$0xff] %v353_v28  ;;  %v359_v31 = vld [vmem:[%s5683_s23 + $0x2d0] sm:$0xff] }
  0x23   : > { %356 = vst [vmem:[%s5688_s24 + $0xe0] sm:$0xff] %v355_v29  ;;  %358 = vst [vmem:[%s5688_s24 + $0xe8] sm:$0xff] %v357_v30  ;;  %v361_v32 = vld [vmem:[%s5683_s23 + $0x2d8] sm:$0xff] }
  0x24   : > { %360 = vst [vmem:[%s5688_s24 + $0xf0] sm:$0xff] %v359_v31  ;;  %362 = vst [vmem:[%s5688_s24 + $0xf8] sm:$0xff] %v361_v32 }
  0x25 PF: > { %p5086_p5 = scmp.ge.s32.totalorder %s5572_s13, 1  ;;  %p377_p6 = scmp.lt.s32.totalorder %s5572_s13, 4 }
  0x27   : > { %p378_p7 = pnand %p5086_p5, %p377_p6 }
  0x28   : > { %s5088_s25 = sshll.u32 (!%p378_p7), %s5663_s8, 5  ;;  %s384_s26 = sand.u32 (!%p378_p7), 1, %s5564_s11  }
  0x29   : > { %381 = sbr.rel (%p378_p7) target bundleno = 2236 (0x8bc), region = 75  ;;  %p422_p8 = scmp.lt.s32.totalorder (!%p378_p7), %s5088_s25, 95 }
  0x2a   : > { %s5087_s27 = sshll.u32 (!%p378_p7), %s384_s26, 8  ;;  %p5090_p9 = scmp.ne.s32.totalorder (!%p378_p7), %s5663_s8, 0 }
  0x2b   : > { %s5755_s28 = scalar_lea.vmem (!%p378_p7), [#allocation8], %s5087_s27 }
  0x2c   : > { %v429_v33 = vld [vmem:[%s5755_s28 + $0x8] sm:$0xff] (!%p378_p7) }
  0x2d   : > { %781 = vmatprep.mubr.f32.mxu1 (!%p378_p7), %v429_v33  ;;  %620 = vmatprep.mubr.f32.mxu0 (!%p378_p7), %v429_v33 }
  0x30   : > { %s8567_s25 = smov (!%p422_p8, %s5088_s25), 95  ;;  %vm868_vm0 = vcmask (!%p5090_p9), 261120  }
  0x31   : > { %s5441_s29 = smul.u32 24, %s8567_s25 }
  0x33   : > { %s5761_s13 = scalar_lea.vmem %s8554_s1, %s5441_s29 }
  0x34   : > { %v461_v34 = vld [vmem:[%s5761_s13 + $0x8] sm:$0xff]  ;;  %v464_v35 = vld [vmem:[%s5761_s13 + $0x20] sm:$0xff]  ;;  %v463_v38 = vld [vmem:[%s5761_s13 + $0x18] sm:$0xff] }
  0x35   : > { %v460_v36 = vld [vmem:[%s5761_s13] sm:$0xff]  ;;  %v5333_v37 = vpack.c.bf16 %v464_v35, %v461_v34  ;;  %v467_v39 = vld [vmem:[%s5761_s13 + $0x38] sm:$0xff]  ;;  %v470_v40 = vld [vmem:[%s5761_s13 + $0x50] sm:$0xff] }
  0x36   : > { %v5335_v41 = vpack.c.bf16 %v463_v38, %v460_v36  ;;  %v5337_v42 = vpack.c.bf16 %v470_v40, %v467_v39  ;;  %v466_v43 = vld [vmem:[%s5761_s13 + $0x30] sm:$0xff]  ;;  %v469_v44 = vld [vmem:[%s5761_s13 + $0x48] sm:$0xff]  ;;  %v476_v46 = vld [vmem:[%s5761_s13 + $0x80] sm:$0xff] }
  0x37   : > { %v473_v45 = vld [vmem:[%s5761_s13 + $0x68] sm:$0xff]  ;;  %5334 = vmatprep.subr.bf16.mxu0 %v5333_v37  ;;  %v5339_v47 = vpack.c.bf16 %v469_v44, %v466_v43  ;;  %v472_v49 = vld [vmem:[%s5761_s13 + $0x60] sm:$0xff]  ;;  %v475_v50 = vld [vmem:[%s5761_s13 + $0x78] sm:$0xff] }
  0x38   : > { %5336 = vmatpush1.bf16.msra.mxu0 %v5335_v41  ;;  %v5341_v48 = vpack.c.bf16 %v476_v46, %v473_v45  ;;  %v479_v51 = vld [vmem:[%s5761_s13 + $0x98] sm:$0xff]  ;;  %v482_v52 = vld [vmem:[%s5761_s13 + $0xb0] sm:$0xff]  ;;  %v5343_v53 = vpack.c.bf16 %v475_v50, %v472_v49  ;;  %v481_v56 = vld [vmem:[%s5761_s13 + $0xa8] sm:$0xff] }
  0x39   : > { %5338 = vmatprep.subr.bf16.mxu0 %v5337_v42  ;;  %v5345_v54 = vpack.c.bf16 %v482_v52, %v479_v51  ;;  %v478_v55 = vld [vmem:[%s5761_s13 + $0x90] sm:$0xff]  ;;  %v485_v57 = vld [vmem:[%s5761_s13 + $0xc8] sm:$0xff]  ;;  %v488_v58 = vld [vmem:[%s5761_s13 + $0xe0] sm:$0xff] }
  0x3a   : > { %v510_v59 = vld [vmem:[%s5761_s13 + $0x190] sm:$0xff]  ;;  %v513_v60 = vld [vmem:[%s5761_s13 + $0x1a8] sm:$0xff]  ;;  %v5347_v63 = vpack.c.bf16 %v481_v56, %v478_v55  ;;  %v484_v0 = vld [vmem:[%s5761_s13 + $0xc0] sm:$0xff]  ;;  %v5349_v4 = vpack.c.bf16 %v488_v58, %v485_v57 }
  0x3b   : > { %v462_v61 = vld [vmem:[%s5761_s13 + $0x10] sm:$0xff]  ;;  %v465_v62 = vld [vmem:[%s5761_s13 + $0x28] sm:$0xff]  ;;  %v487_v1 = vld [vmem:[%s5761_s13 + $0xd8] sm:$0xff]  ;;  %v5397_v2 = vpack.c.bf16 %v513_v60, %v510_v59 }
  0x3c   : > { %5340 = vmatpush1.bf16.msra.mxu0 %v5339_v47  ;;  %v5399_v3 = vpack.c.bf16 %v465_v62, %v462_v61  ;;  %v491_v5 = vld [vmem:[%s5761_s13 + $0xf8] sm:$0xff]  ;;  %v516_v6 = vld [vmem:[%s5761_s13 + $0x1c0] sm:$0xff]  ;;  %v494_v8 = vld [vmem:[%s5761_s13 + $0x110] sm:$0xff]  ;;  %v5351_v13 = vpack.c.bf16 %v487_v1, %v484_v0 }
  0x3d   : > { %5342 = vmatprep.subr.bf16.mxu0 %v5341_v48  ;;  %v519_v7 = vld [vmem:[%s5761_s13 + $0x1d8] sm:$0xff]  ;;  %5398 = vmatprep.subr.bf16.mxu1 %v5397_v2  ;;  %v468_v10 = vld [vmem:[%s5761_s13 + $0x40] sm:$0xff]  ;;  %v522_v14 = vld [vmem:[%s5761_s13 + $0x1f0] sm:$0xff]  ;;  %v5353_v17 = vpack.c.bf16 %v494_v8, %v491_v5 }
  0x3e   : > { %v5401_v9 = vpack.c.bf16 %v519_v7, %v516_v6  ;;  %v471_v11 = vld [vmem:[%s5761_s13 + $0x58] sm:$0xff]  ;;  %5400 = vmatpush3.bf16.msra.mxu1 %v5399_v3  ;;  %v525_v15 = vld [vmem:[%s5761_s13 + $0x208] sm:$0xff]  ;;  %v474_v16 = vld [vmem:[%s5761_s13 + $0x70] sm:$0xff] }
  0x3f   : > { %v5403_v12 = vpack.c.bf16 %v471_v11, %v468_v10  ;;  %v490_v18 = vld [vmem:[%s5761_s13 + $0xf0] sm:$0xff]  ;;  %v493_v19 = vld [vmem:[%s5761_s13 + $0x108] sm:$0xff]  ;;  %v5405_v20 = vpack.c.bf16 %v525_v15, %v522_v14  ;;  %v500_v23 = vld [vmem:[%s5761_s13 + $0x140] sm:$0xff] }
  0x40   : > { %5344 = vmatpush1.bf16.msra.mxu0 %v5343_v53  ;;  %5402 = vmatprep.subr.bf16.mxu1 %v5401_v9  ;;  %v477_v21 = vld [vmem:[%s5761_s13 + $0x88] sm:$0xff]  ;;  %v528_v24 = vld [vmem:[%s5761_s13 + $0x220] sm:$0xff]  ;;  %v531_v26 = vld [vmem:[%s5761_s13 + $0x238] sm:$0xff]  ;;  %v5355_v27 = vpack.c.bf16 %v493_v19, %v490_v18 }
  0x41   : > { %5346 = vmatprep.subr.bf16.mxu0 %v5345_v54  ;;  %v497_v22 = vld [vmem:[%s5761_s13 + $0x128] sm:$0xff]  ;;  %v5407_v25 = vpack.c.bf16 %v477_v21, %v474_v16  ;;  %v496_v28 = vld [vmem:[%s5761_s13 + $0x120] sm:$0xff]  ;;  %v5409_v29 = vpack.c.bf16 %v531_v26, %v528_v24  ;;  %v483_v31 = vld [vmem:[%s5761_s13 + $0xb8] sm:$0xff] }
  0x42   : > { %5404 = vmatpush3.bf16.msra.mxu1 %v5403_v12  ;;  %v480_v30 = vld [vmem:[%s5761_s13 + $0xa0] sm:$0xff]  ;;  %v5357_v32 = vpack.c.bf16 %v500_v23, %v497_v22  ;;  %v499_v33 = vld [vmem:[%s5761_s13 + $0x138] sm:$0xff]  ;;  %v534_v34 = vld [vmem:[%s5761_s13 + $0x250] sm:$0xff] }
  0x43   : > { %5406 = vmatprep.subr.bf16.mxu1 %v5405_v20  ;;  %v537_v35 = vld [vmem:[%s5761_s13 + $0x268] sm:$0xff]  ;;  %v503_v36 = vld [vmem:[%s5761_s13 + $0x158] sm:$0xff]  ;;  %v506_v37 = vld [vmem:[%s5761_s13 + $0x170] sm:$0xff]  ;;  %v5411_v38 = vpack.c.bf16 %v483_v31, %v480_v30  ;;  %v5359_v39 = vpack.c.bf16 %v499_v33, %v496_v28 }
  0x44   : > { %5348 = vmatpush1.bf16.msra.mxu0 %v5347_v63  ;;  %v502_v40 = vld [vmem:[%s5761_s13 + $0x150] sm:$0xff]  ;;  %v5413_v41 = vpack.c.bf16 %v537_v35, %v534_v34  ;;  %v489_v43 = vld [vmem:[%s5761_s13 + $0xe8] sm:$0xff]  ;;  %v5361_v44 = vpack.c.bf16 %v506_v37, %v503_v36  ;;  %v540_v46 = vld [vmem:[%s5761_s13 + $0x280] sm:$0xff] }
  0x45   : > { %5350 = vmatprep.subr.bf16.mxu0 %v5349_v4  ;;  %v486_v42 = vld [vmem:[%s5761_s13 + $0xd0] sm:$0xff]  ;;  %v505_v45 = vld [vmem:[%s5761_s13 + $0x168] sm:$0xff]  ;;  %v543_v47 = vld [vmem:[%s5761_s13 + $0x298] sm:$0xff] }
  0x46   : > { %5408 = vmatpush3.bf16.msra.mxu1 %v5407_v25  ;;  %v509_v48 = vld [vmem:[%s5761_s13 + $0x188] sm:$0xff]  ;;  %v512_v49 = vld [vmem:[%s5761_s13 + $0x1a0] sm:$0xff]  ;;  %v5415_v50 = vpack.c.bf16 %v489_v43, %v486_v42  ;;  %v5363_v51 = vpack.c.bf16 %v505_v45, %v502_v40  ;;  %v5417_v53 = vpack.c.bf16 %v543_v47, %v540_v46  ;;  %v495_v55 = vld [vmem:[%s5761_s13 + $0x118] sm:$0xff] }
  0x47   : > { %5410 = vmatprep.subr.bf16.mxu1 %v5409_v29  ;;  %v508_v52 = vld [vmem:[%s5761_s13 + $0x180] sm:$0xff]  ;;  %v5365_v56 = vpack.c.bf16 %v512_v49, %v509_v48  ;;  %v511_v57 = vld [vmem:[%s5761_s13 + $0x198] sm:$0xff]  ;;  %v546_v58 = vld [vmem:[%s5761_s13 + $0x2b0] sm:$0xff] }
  0x48   : > { %5352 = vmatpush1.bf16.msra.mxu0 %v5351_v13  ;;  %v492_v54 = vld [vmem:[%s5761_s13 + $0x100] sm:$0xff]  ;;  %v549_v59 = vld [vmem:[%s5761_s13 + $0x2c8] sm:$0xff]  ;;  %v515_v60 = vld [vmem:[%s5761_s13 + $0x1b8] sm:$0xff]  ;;  %v5367_v63 = vpack.c.bf16 %v511_v57, %v508_v52 }
  0x49   : > { %5354 = vmatprep.subr.bf16.mxu0 %v5353_v17  ;;  %v518_v61 = vld [vmem:[%s5761_s13 + $0x1d0] sm:$0xff]  ;;  %v5419_v62 = vpack.c.bf16 %v495_v55, %v492_v54  ;;  %v5421_v1 = vpack.c.bf16 %v549_v59, %v546_v58  ;;  %v501_v3 = vld [vmem:[%s5761_s13 + $0x148] sm:$0xff]  ;;  %v552_v6 = vld [vmem:[%s5761_s13 + $0x2e0] sm:$0xff] }
  0x4a   : > { %5412 = vmatpush3.bf16.msra.mxu1 %v5411_v38  ;;  %v514_v0 = vld [vmem:[%s5761_s13 + $0x1b0] sm:$0xff]  ;;  %v5369_v4 = vpack.c.bf16 %v518_v61, %v515_v60  ;;  %v517_v5 = vld [vmem:[%s5761_s13 + $0x1c8] sm:$0xff]  ;;  %v555_v7 = vld [vmem:[%s5761_s13 + $0x2f8] sm:$0xff] }
  0x4b   : > { %5414 = vmatprep.subr.bf16.mxu1 %v5413_v41  ;;  %v498_v2 = vld [vmem:[%s5761_s13 + $0x130] sm:$0xff]  ;;  %v521_v8 = vld [vmem:[%s5761_s13 + $0x1e8] sm:$0xff]  ;;  %v524_v9 = vld [vmem:[%s5761_s13 + $0x200] sm:$0xff]  ;;  %v5371_v11 = vpack.c.bf16 %v517_v5, %v514_v0  ;;  %v5425_v12 = vpack.c.bf16 %v555_v7, %v552_v6 }
  0x4c   : > { %5356 = vmatpush1.bf16.msra.mxu0 %v5355_v27  ;;  %v5423_v10 = vpack.c.bf16 %v501_v3, %v498_v2  ;;  %v504_v13 = vld [vmem:[%s5761_s13 + $0x160] sm:$0xff]  ;;  %v507_v14 = vld [vmem:[%s5761_s13 + $0x178] sm:$0xff]  ;;  %v5373_v15 = vpack.c.bf16 %v524_v9, %v521_v8  ;;  %v530_v19 = vld [vmem:[%s5761_s13 + $0x230] sm:$0xff] }
  0x4d   : > { %5358 = vmatprep.subr.bf16.mxu0 %v5357_v32  ;;  %v520_v16 = vld [vmem:[%s5761_s13 + $0x1e0] sm:$0xff]  ;;  %v523_v17 = vld [vmem:[%s5761_s13 + $0x1f8] sm:$0xff]  ;;  %v5427_v20 = vpack.c.bf16 %v507_v14, %v504_v13  ;;  %v526_v23 = vld [vmem:[%s5761_s13 + $0x210] sm:$0xff] }
  0x4e   : > { %5416 = vmatpush3.bf16.msra.mxu1 %v5415_v50  ;;  %v527_v18 = vld [vmem:[%s5761_s13 + $0x218] sm:$0xff]  ;;  %v5375_v21 = vpack.c.bf16 %v523_v17, %v520_v16  ;;  %v529_v24 = vld [vmem:[%s5761_s13 + $0x228] sm:$0xff]  ;;  %v536_v26 = vld [vmem:[%s5761_s13 + $0x260] sm:$0xff] }
  0x4f   : > { %5418 = vmatprep.subr.bf16.mxu1 %v5417_v53  ;;  %v5377_v22 = vpack.c.bf16 %v530_v19, %v527_v18  ;;  %v533_v25 = vld [vmem:[%s5761_s13 + $0x248] sm:$0xff]  ;;  %v5379_v28 = vpack.c.bf16 %v529_v24, %v526_v23  ;;  %v431_v29 = vld [vmem:[%s5755_s28 + $0x18] sm:$0xff]  ;;  %v542_v34 = vld [vmem:[%s5761_s13 + $0x290] sm:$0xff] }
  0x50   : > { %5360 = vmatpush1.bf16.msra.mxu0 %v5359_v39  ;;  %v428_v27 = vld [vmem:[%s5755_s28] sm:$0xff]  ;;  %v5381_v30 = vpack.c.bf16 %v536_v26, %v533_v25  ;;  %v535_v32 = vld [vmem:[%s5761_s13 + $0x258] sm:$0xff]  ;;  %v433_v37 = vld [vmem:[%s5755_s28 + $0x28] sm:$0xff] }
  0x51   : > { %5362 = vmatprep.subr.bf16.mxu0 %v5361_v44  ;;  %v532_v31 = vld [vmem:[%s5761_s13 + $0x240] sm:$0xff]  ;;  %v539_v33 = vld [vmem:[%s5761_s13 + $0x278] sm:$0xff]  ;;  %v538_v39 = vld [vmem:[%s5761_s13 + $0x270] sm:$0xff] }
  0x52   : > { %5420 = vmatpush3.bf16.msra.mxu1 %v5419_v62  ;;  %v430_v35 = vld [vmem:[%s5755_s28 + $0x10] sm:$0xff]  ;;  %v5383_v36 = vpack.c.bf16 %v535_v32, %v532_v31  ;;  %v5385_v38 = vpack.c.bf16 %v542_v34, %v539_v33  ;;  %v541_v40 = vld [vmem:[%s5761_s13 + $0x288] sm:$0xff]  ;;  %v548_v42 = vld [vmem:[%s5761_s13 + $0x2c0] sm:$0xff] }
  0x53   : > { %5422 = vmatprep.subr.bf16.mxu1 %v5421_v1  ;;  %v545_v41 = vld [vmem:[%s5761_s13 + $0x2a8] sm:$0xff]  ;;  %v5387_v44 = vpack.c.bf16 %v541_v40, %v538_v39  ;;  %v435_v45 = vld [vmem:[%s5755_s28 + $0x38] sm:$0xff]  ;;  %v554_v50 = vld [vmem:[%s5761_s13 + $0x2f0] sm:$0xff] }
  0x54   : > { %5364 = vmatpush1.bf16.msra.mxu0 %v5363_v51  ;;  %v432_v43 = vld [vmem:[%s5755_s28 + $0x20] sm:$0xff]  ;;  %v5389_v46 = vpack.c.bf16 %v548_v42, %v545_v41  ;;  %v547_v48 = vld [vmem:[%s5761_s13 + $0x2b8] sm:$0xff]  ;;  %v437_v53 = vld [vmem:[%s5755_s28 + $0x48] sm:$0xff] }
  0x55   : > { %5366 = vmatprep.subr.bf16.mxu0 %v5365_v56  ;;  %v544_v47 = vld [vmem:[%s5761_s13 + $0x2a0] sm:$0xff]  ;;  %v551_v49 = vld [vmem:[%s5761_s13 + $0x2d8] sm:$0xff]  ;;  %v550_v55 = vld [vmem:[%s5761_s13 + $0x2d0] sm:$0xff] }
  0x56   : > { %5424 = vmatpush3.bf16.msra.mxu1 %v5423_v10  ;;  %v434_v51 = vld [vmem:[%s5755_s28 + $0x30] sm:$0xff]  ;;  %v5391_v52 = vpack.c.bf16 %v547_v48, %v544_v47  ;;  %v5393_v54 = vpack.c.bf16 %v554_v50, %v551_v49  ;;  %v553_v56 = vld [vmem:[%s5761_s13 + $0x2e8] sm:$0xff]  ;;  %v439_v59 = vld [vmem:[%s5755_s28 + $0x58] sm:$0xff] }
  0x57   : > { %5426 = vmatprep.subr.bf16.mxu1 %v5425_v12  ;;  %v436_v57 = vld [vmem:[%s5755_s28 + $0x40] sm:$0xff]  ;;  %v5395_v58 = vpack.c.bf16 %v553_v56, %v550_v55  ;;  %v438_v60 = vld [vmem:[%s5755_s28 + $0x50] sm:$0xff]  ;;  %v441_v61 = vld [vmem:[%s5755_s28 + $0x68] sm:$0xff] }
  0x58   : > { %5368 = vmatpush1.bf16.msra.mxu0 %v5367_v63  ;;  %v440_v62 = vld [vmem:[%s5755_s28 + $0x60] sm:$0xff]  ;;  %v443_v63 = vld [vmem:[%s5755_s28 + $0x78] sm:$0xff]  ;;  %v442_v0 = vld [vmem:[%s5755_s28 + $0x70] sm:$0xff] }
  0x59   : > { %5370 = vmatprep.subr.bf16.mxu0 %v5369_v4  ;;  %v445_v1 = vld [vmem:[%s5755_s28 + $0x88] sm:$0xff]  ;;  %v444_v2 = vld [vmem:[%s5755_s28 + $0x80] sm:$0xff]  ;;  %v447_v3 = vld [vmem:[%s5755_s28 + $0x98] sm:$0xff] }
  0x5a   : > { %5428 = vmatpush3.bf16.msra.mxu1 %v5427_v20  ;;  %v446_v4 = vld [vmem:[%s5755_s28 + $0x90] sm:$0xff]  ;;  %v449_v5 = vld [vmem:[%s5755_s28 + $0xa8] sm:$0xff]  ;;  %v448_v6 = vld [vmem:[%s5755_s28 + $0xa0] sm:$0xff] }
  0x5b   : > { %v451_v7 = vld [vmem:[%s5755_s28 + $0xb8] sm:$0xff]  ;;  %v450_v8 = vld [vmem:[%s5755_s28 + $0xb0] sm:$0xff]  ;;  %v453_v9 = vld [vmem:[%s5755_s28 + $0xc8] sm:$0xff] }
  0x5c   : > { %5372 = vmatpush1.bf16.msra.mxu0 %v5371_v11  ;;  %v452_v10 = vld [vmem:[%s5755_s28 + $0xc0] sm:$0xff]  ;;  %v455_v11 = vld [vmem:[%s5755_s28 + $0xd8] sm:$0xff]  ;;  %v454_v12 = vld [vmem:[%s5755_s28 + $0xd0] sm:$0xff] }
  0x5d   : > { %5374 = vmatprep.subr.bf16.mxu0 %v5373_v15  ;;  %782 = vmatmul.mubr.f32.vlgmr.msra.gmra.mrb[0].mxu1 %v428_v27  ;;  %v457_v13 = vld [vmem:[%s5755_s28 + $0xe8] sm:$0xff]  ;;  %v456_v14 = vld [vmem:[%s5755_s28 + $0xe0] sm:$0xff]  ;;  %v459_v15 = vld [vmem:[%s5755_s28 + $0xf8] sm:$0xff] }
  0x5e   : > { %786 = vmatprep.mubr.f32.mxu1 %v431_v29  ;;  %v458_v16 = vld [vmem:[%s5755_s28 + $0xf0] sm:$0xff] }
  0x60   : > { %5376 = vmatpush1.bf16.msra.mxu0 %v5375_v21 }
  0x61   : > { %5378 = vmatprep.subr.bf16.mxu0 %v5377_v22  ;;  %787 = vmatmul.mubr.f32.gmra.mrb[2].mxu1 %v430_v35 }
  0x62   : > { %791 = vmatprep.mubr.f32.mxu1 %v433_v37 }
  0x64   : > { %5380 = vmatpush1.bf16.msra.mxu0 %v5379_v28 }
  0x65   : > { %5382 = vmatprep.subr.bf16.mxu0 %v5381_v30  ;;  %792 = vmatmul.mubr.f32.gmra.mrb[4].mxu1 %v432_v43 }
  0x66   : > { %796 = vmatprep.mubr.f32.mxu1 %v435_v45 }
  0x68   : > { %5384 = vmatpush1.bf16.msra.mxu0 %v5383_v36 }
  0x69   : > { %5386 = vmatprep.subr.bf16.mxu0 %v5385_v38  ;;  %797 = vmatmul.mubr.f32.gmra.mrb[6].mxu1 %v434_v51 }
  0x6a   : > { %801 = vmatprep.mubr.f32.mxu1 %v437_v53 }
  0x6c   : > { %5388 = vmatpush1.bf16.msra.mxu0 %v5387_v44 }
  0x6d   : > { %5390 = vmatprep.subr.bf16.mxu0 %v5389_v46  ;;  %802 = vmatmul.mubr.f32.gmra.mrb[8].mxu1 %v436_v57 }
  0x6e   : > { %806 = vmatprep.mubr.f32.mxu1 %v439_v59 }
  0x70   : > { %5392 = vmatpush1.bf16.msra.mxu0 %v5391_v52 }
  0x71   : > { %5394 = vmatprep.subr.bf16.mxu0 %v5393_v54  ;;  %807 = vmatmul.mubr.f32.gmra.mrb[10].mxu1 %v438_v60 }
  0x72   : > { %811 = vmatprep.mubr.f32.mxu1 %v441_v61 }
  0x74   : > { %5396 = vmatpush1.bf16.msra.mxu0 %v5395_v58 }
  0x75   : > { %812 = vmatmul.mubr.f32.gmra.mrb[12].mxu1 %v440_v62 }
  0x76   : > { %816 = vmatprep.mubr.f32.mxu1 %v443_v63 }
  0x77   : > { %621 = vmatmul.mubr.f32.vlgmr.msra.gmra.mrb[0].mxu0 %v428_v27 }
  0x78   : > { %626 = vmatprep.mubr.f32.mxu0 %v431_v29 }
  0x79   : > { %817 = vmatmul.mubr.f32.gmra.mrb[14].mxu1 %v442_v0 }
  0x7a   : > { %821 = vmatprep.mubr.f32.mxu1 %v445_v1 }
  0x7b   : > { %627 = vmatmul.mubr.f32.gmra.mrb[2].mxu0 %v430_v35 }
  0x7c   : > { %632 = vmatprep.mubr.f32.mxu0 %v433_v37 }
  0x7d   : > { %822 = vmatmul.mubr.f32.gmra.mrb[16].mxu1 %v444_v2 }
  0x7e   : > { %826 = vmatprep.mubr.f32.mxu1 %v447_v3 }
  0x7f   : > { %633 = vmatmul.mubr.f32.gmra.mrb[4].mxu0 %v432_v43 }
  0x80   : > { %638 = vmatprep.mubr.f32.mxu0 %v435_v45 }
  0x81   : > { %827 = vmatmul.mubr.f32.gmra.mrb[18].mxu1 %v446_v4 }
  0x82   : > { %831 = vmatprep.mubr.f32.mxu1 %v449_v5 }
  0x83   : > { %639 = vmatmul.mubr.f32.gmra.mrb[6].mxu0 %v434_v51 }
  0x84   : > { %644 = vmatprep.mubr.f32.mxu0 %v437_v53 }
  0x85   : > { %832 = vmatmul.mubr.f32.gmra.mrb[20].mxu1 %v448_v6 }
  0x86   : > { %836 = vmatprep.mubr.f32.mxu1 %v451_v7 }
  0x87   : > { %645 = vmatmul.mubr.f32.gmra.mrb[8].mxu0 %v436_v57 }
  0x88   : > { %650 = vmatprep.mubr.f32.mxu0 %v439_v59 }
  0x89   : > { %837 = vmatmul.mubr.f32.gmra.mrb[22].mxu1 %v450_v8 }
  0x8a   : > { %841 = vmatprep.mubr.f32.mxu1 %v453_v9 }
  0x8b   : > { %651 = vmatmul.mubr.f32.gmra.mrb[10].mxu0 %v438_v60 }
  0x8c   : > { %656 = vmatprep.mubr.f32.mxu0 %v441_v61 }
  0x8d   : > { %842 = vmatmul.mubr.f32.gmra.mrb[24].mxu1 %v452_v10 }
  0x8e   : > { %846 = vmatprep.mubr.f32.mxu1 %v455_v11 }
  0x8f   : > { %657 = vmatmul.mubr.f32.gmra.mrb[12].mxu0 %v440_v62 }
  0x90   : > { %662 = vmatprep.mubr.f32.mxu0 %v443_v63 }
  0x91   : > { %847 = vmatmul.mubr.f32.gmra.mrb[26].mxu1 %v454_v12 }
  0x92   : > { %851 = vmatprep.mubr.f32.mxu1 %v457_v13 }
  0x93   : > { %663 = vmatmul.mubr.f32.gmra.mrb[14].mxu0 %v442_v0 }
  0x94   : > { %668 = vmatprep.mubr.f32.mxu0 %v445_v1 }
  0x95   : > { %852 = vmatmul.mubr.f32.gmra.mrb[28].mxu1 %v456_v14 }
  0x96   : > { %856 = vmatprep.mubr.f32.mxu1 %v459_v15 }
  0x97   : > { %669 = vmatmul.mubr.f32.gmra.mrb[16].mxu0 %v444_v2 }
  0x98   : > { %674 = vmatprep.mubr.f32.mxu0 %v447_v3 }
  0x99   : > { %857 = vmatmul.mubr.f32.gmra.mrb[30].mxu1 %v458_v16 }
  0x9b   : > { %675 = vmatmul.mubr.f32.gmra.mrb[18].mxu0 %v446_v4 }
  0x9c   : > { %680 = vmatprep.mubr.f32.mxu0 %v449_v5 }
  0x9f   : > { %681 = vmatmul.mubr.f32.gmra.mrb[20].mxu0 %v448_v6 }
  0xa0   : > { %686 = vmatprep.mubr.f32.mxu0 %v451_v7 }
  0xa3   : > { %687 = vmatmul.mubr.f32.gmra.mrb[22].mxu0 %v450_v8 }
  0xa4   : > { %692 = vmatprep.mubr.f32.mxu0 %v453_v9 }
  0xa7   : > { %693 = vmatmul.mubr.f32.gmra.mrb[24].mxu0 %v452_v10 }
  0xa8   : > { %698 = vmatprep.mubr.f32.mxu0 %v455_v11 }
  0xab   : > { %699 = vmatmul.mubr.f32.gmra.mrb[26].mxu0 %v454_v12 }
  0xac   : > { %704 = vmatprep.mubr.f32.mxu0 %v457_v13 }
  0xaf   : > { %705 = vmatmul.mubr.f32.gmra.mrb[28].mxu0 %v456_v14 }
  0xb0   : > { %710 = vmatprep.mubr.f32.mxu0 %v459_v15 }
  0xb3   : > { %711 = vmatmul.mubr.f32.gmra.mrb[30].mxu0 %v458_v16 }
 0x130   : > { %v5196_v17 = vpop.f32.mrb[0].mxu1 }
 0x131   : > { %v5197_v18 = vpop.f32.mrb[1].mxu1 }
 0x132   : > { %v5890_v19 = vadd.f32 %v5197_v18, %v5196_v17 }
 0x134   : > { %v5199_v20 = vpop.f32.mrb[2].mxu1  ;;  %869 = vst.msk [vmem:[#allocation2 + $0x10] sm:$0xff] (!%p5090_p9), %vm868_vm0, %v5890_v19 }
 0x135   : > { %v5200_v21 = vpop.f32.mrb[3].mxu1 }
 0x136   : > { %v5892_v22 = vadd.f32 %v5200_v21, %v5199_v20 }
 0x138   : > { %v5202_v23 = vpop.f32.mrb[4].mxu1  ;;  %872 = vst.msk [vmem:[#allocation2 + $0x28] sm:$0xff] (!%p5090_p9), %vm868_vm0, %v5892_v22 }
 0x139   : > { %v5203_v24 = vpop.f32.mrb[5].mxu1 }
 0x13a   : > { %v5894_v25 = vadd.f32 %v5203_v24, %v5202_v23 }
 0x13c   : > { %v5205_v26 = vpop.f32.mrb[6].mxu1  ;;  %875 = vst.msk [vmem:[#allocation2 + $0x40] sm:$0xff] (!%p5090_p9), %vm868_vm0, %v5894_v25 }
 0x13d   : > { %v5206_v27 = vpop.f32.mrb[7].mxu1 }
 0x13e   : > { %v5896_v28 = vadd.f32 %v5206_v27, %v5205_v26 }
 0x140   : > { %v5208_v29 = vpop.f32.mrb[8].mxu1  ;;  %878 = vst.msk [vmem:[#allocation2 + $0x58] sm:$0xff] (!%p5090_p9), %vm868_vm0, %v5896_v28 }
 0x141   : > { %v5209_v30 = vpop.f32.mrb[9].mxu1 }
 0x142   : > { %v5898_v31 = vadd.f32 %v5209_v30, %v5208_v29 }
 0x144   : > { %v5211_v32 = vpop.f32.mrb[10].mxu1  ;;  %881 = vst.msk [vmem:[#allocation2 + $0x70] sm:$0xff] (!%p5090_p9), %vm868_vm0, %v5898_v31 }
 0x145   : > { %v5212_v34 = vpop.f32.mrb[11].mxu1 }
 0x146   : > { %v5904_v36 = vadd.f32 %v5212_v34, %v5211_v32 }
 0x148   : > { %v5214_v37 = vpop.f32.mrb[12].mxu1  ;;  %884 = vst.msk [vmem:[#allocation2 + $0x88] sm:$0xff] (!%p5090_p9), %vm868_vm0, %v5904_v36 }
 0x149   : > { %v5215_v39 = vpop.f32.mrb[13].mxu1 }
 0x14a   : > { %v5900_v33 = vpop.f32.mrb[0].mxu0  ;;  %v5910_v41 = vadd.f32 %v5215_v39, %v5214_v37 }
 0x14b   : > { %v5902_v35 = vpop.f32.mrb[1].mxu0  ;;  %866 = vst [vmem:[#allocation2] sm:$0xff] (!%p5090_p9), %v5900_v33 }
 0x14c   : > { %v5217_v42 = vpop.f32.mrb[14].mxu1  ;;  %867 = vst [vmem:[#allocation2 + $0x8] sm:$0xff] (!%p5090_p9), %v5902_v35  ;;  %887 = vst.msk [vmem:[#allocation2 + $0xa0] sm:$0xff] (!%p5090_p9), %vm868_vm0, %v5910_v41 }
 0x14d   : > { %v5218_v44 = vpop.f32.mrb[15].mxu1 }
 0x14e   : > { %v5906_v38 = vpop.f32.mrb[2].mxu0  ;;  %v5916_v46 = vadd.f32 %v5218_v44, %v5217_v42 }
 0x14f   : > { %v5908_v40 = vpop.f32.mrb[3].mxu0  ;;  %870 = vst [vmem:[#allocation2 + $0x18] sm:$0xff] (!%p5090_p9), %v5906_v38 }
 0x150   : > { %v5220_v47 = vpop.f32.mrb[16].mxu1  ;;  %871 = vst [vmem:[#allocation2 + $0x20] sm:$0xff] (!%p5090_p9), %v5908_v40  ;;  %890 = vst.msk [vmem:[#allocation2 + $0xb8] sm:$0xff] (!%p5090_p9), %vm868_vm0, %v5916_v46 }
 0x151   : > { %v5221_v49 = vpop.f32.mrb[17].mxu1 }
 0x152   : > { %v5912_v43 = vpop.f32.mrb[4].mxu0  ;;  %v5922_v51 = vadd.f32 %v5221_v49, %v5220_v47 }
 0x153   : > { %v5914_v45 = vpop.f32.mrb[5].mxu0  ;;  %873 = vst [vmem:[#allocation2 + $0x30] sm:$0xff] (!%p5090_p9), %v5912_v43 }
 0x154   : > { %v5223_v52 = vpop.f32.mrb[18].mxu1  ;;  %874 = vst [vmem:[#allocation2 + $0x38] sm:$0xff] (!%p5090_p9), %v5914_v45  ;;  %893 = vst.msk [vmem:[#allocation2 + $0xd0] sm:$0xff] (!%p5090_p9), %vm868_vm0, %v5922_v51 }
 0x155   : > { %v5224_v54 = vpop.f32.mrb[19].mxu1 }
 0x156   : > { %v5918_v48 = vpop.f32.mrb[6].mxu0  ;;  %v5928_v56 = vadd.f32 %v5224_v54, %v5223_v52 }
 0x157   : > { %v5920_v50 = vpop.f32.mrb[7].mxu0  ;;  %876 = vst [vmem:[#allocation2 + $0x48] sm:$0xff] (!%p5090_p9), %v5918_v48 }
 0x158   : > { %v5226_v57 = vpop.f32.mrb[20].mxu1  ;;  %877 = vst [vmem:[#allocation2 + $0x50] sm:$0xff] (!%p5090_p9), %v5920_v50  ;;  %896 = vst.msk [vmem:[#allocation2 + $0xe8] sm:$0xff] (!%p5090_p9), %vm868_vm0, %v5928_v56 }
 0x159   : > { %v5227_v59 = vpop.f32.mrb[21].mxu1 }
 0x15a   : > { %v5924_v53 = vpop.f32.mrb[8].mxu0  ;;  %v5934_v61 = vadd.f32 %v5227_v59, %v5226_v57 }
 0x15b   : > { %v5926_v55 = vpop.f32.mrb[9].mxu0  ;;  %879 = vst [vmem:[#allocation2 + $0x60] sm:$0xff] (!%p5090_p9), %v5924_v53 }
 0x15c   : > { %v5229_v62 = vpop.f32.mrb[22].mxu1  ;;  %880 = vst [vmem:[#allocation2 + $0x68] sm:$0xff] (!%p5090_p9), %v5926_v55  ;;  %899 = vst.msk [vmem:[#allocation2 + $0x100] sm:$0xff] (!%p5090_p9), %vm868_vm0, %v5934_v61 }
 0x15d   : > { %v5230_v0 = vpop.f32.mrb[23].mxu1 }
 0x15e   : > { %v5930_v58 = vpop.f32.mrb[10].mxu0  ;;  %v5940_v2 = vadd.f32 %v5230_v0, %v5229_v62 }
 0x15f   : > { %v5932_v60 = vpop.f32.mrb[11].mxu0  ;;  %882 = vst [vmem:[#allocation2 + $0x78] sm:$0xff] (!%p5090_p9), %v5930_v58 }
 0x160   : > { %v5232_v3 = vpop.f32.mrb[24].mxu1  ;;  %883 = vst [vmem:[#allocation2 + $0x80] sm:$0xff] (!%p5090_p9), %v5932_v60  ;;  %902 = vst.msk [vmem:[#allocation2 + $0x118] sm:$0xff] (!%p5090_p9), %vm868_vm0, %v5940_v2 }
 0x161   : > { %v5233_v5 = vpop.f32.mrb[25].mxu1 }
 0x162   : > { %v5936_v63 = vpop.f32.mrb[12].mxu0  ;;  %v5946_v7 = vadd.f32 %v5233_v5, %v5232_v3 }
 0x163   : > { %v5938_v1 = vpop.f32.mrb[13].mxu0  ;;  %885 = vst [vmem:[#allocation2 + $0x90] sm:$0xff] (!%p5090_p9), %v5936_v63 }
 0x164   : > { %v5235_v8 = vpop.f32.mrb[26].mxu1  ;;  %886 = vst [vmem:[#allocation2 + $0x98] sm:$0xff] (!%p5090_p9), %v5938_v1  ;;  %905 = vst.msk [vmem:[#allocation2 + $0x130] sm:$0xff] (!%p5090_p9), %vm868_vm0, %v5946_v7 }
 0x165   : > { %v5236_v10 = vpop.f32.mrb[27].mxu1 }
 0x166   : > { %v5942_v4 = vpop.f32.mrb[14].mxu0  ;;  %v5952_v12 = vadd.f32 %v5236_v10, %v5235_v8 }
 0x167   : > { %v5944_v6 = vpop.f32.mrb[15].mxu0  ;;  %888 = vst [vmem:[#allocation2 + $0xa8] sm:$0xff] (!%p5090_p9), %v5942_v4 }
 0x168   : > { %v5238_v13 = vpop.f32.mrb[28].mxu1  ;;  %889 = vst [vmem:[#allocation2 + $0xb0] sm:$0xff] (!%p5090_p9), %v5944_v6  ;;  %908 = vst.msk [vmem:[#allocation2 + $0x148] sm:$0xff] (!%p5090_p9), %vm868_vm0, %v5952_v12 }
 0x169   : > { %v5239_v15 = vpop.f32.mrb[29].mxu1 }
 0x16a   : > { %v5948_v9 = vpop.f32.mrb[16].mxu0  ;;  %v5958_v17 = vadd.f32 %v5239_v15, %v5238_v13 }
 0x16b   : > { %v5950_v11 = vpop.f32.mrb[17].mxu0  ;;  %891 = vst [vmem:[#allocation2 + $0xc0] sm:$0xff] (!%p5090_p9), %v5948_v9 }
 0x16c   : > { %v5241_v18 = vpop.f32.mrb[30].mxu1  ;;  %892 = vst [vmem:[#allocation2 + $0xc8] sm:$0xff] (!%p5090_p9), %v5950_v11  ;;  %911 = vst.msk [vmem:[#allocation2 + $0x160] sm:$0xff] (!%p5090_p9), %vm868_vm0, %v5958_v17 }
 0x16d   : > { %v5242_v21 = vpop.f32.mrb[31].mxu1 }
 0x16e   : > { %v5954_v14 = vpop.f32.mrb[18].mxu0  ;;  %v5964_v24 = vadd.f32 %v5242_v21, %v5241_v18 }
 0x16f   : > { %v5956_v16 = vpop.f32.mrb[19].mxu0  ;;  %894 = vst [vmem:[#allocation2 + $0xd8] sm:$0xff] (!%p5090_p9), %v5954_v14 }
 0x170   : > { %895 = vst [vmem:[#allocation2 + $0xe0] sm:$0xff] (!%p5090_p9), %v5956_v16  ;;  %914 = vst.msk [vmem:[#allocation2 + $0x178] sm:$0xff] (!%p5090_p9), %vm868_vm0, %v5964_v24 }
 0x172   : > { %v5960_v20 = vpop.f32.mrb[20].mxu0 }
 0x173   : > { %v5962_v23 = vpop.f32.mrb[21].mxu0  ;;  %897 = vst [vmem:[#allocation2 + $0xf0] sm:$0xff] (!%p5090_p9), %v5960_v20 }
 0x174   : > { %898 = vst [vmem:[#allocation2 + $0xf8] sm:$0xff] (!%p5090_p9), %v5962_v23 }
 0x176   : > { %v5966_v26 = vpop.f32.mrb[22].mxu0 }
 0x177   : > { %v5968_v27 = vpop.f32.mrb[23].mxu0  ;;  %900 = vst [vmem:[#allocation2 + $0x108] sm:$0xff] (!%p5090_p9), %v5966_v26 }
 0x178   : > { %901 = vst [vmem:[#allocation2 + $0x110] sm:$0xff] (!%p5090_p9), %v5968_v27 }
 0x17a   : > { %v5970_v29 = vpop.f32.mrb[24].mxu0 }
 0x17b   : > { %v5972_v30 = vpop.f32.mrb[25].mxu0  ;;  %903 = vst [vmem:[#allocation2 + $0x120] sm:$0xff] (!%p5090_p9), %v5970_v29 }
 0x17c   : > { %904 = vst [vmem:[#allocation2 + $0x128] sm:$0xff] (!%p5090_p9), %v5972_v30 }
 0x17e   : > { %v5974_v32 = vpop.f32.mrb[26].mxu0 }
 0x17f   : > { %v5976_v34 = vpop.f32.mrb[27].mxu0  ;;  %906 = vst [vmem:[#allocation2 + $0x138] sm:$0xff] (!%p5090_p9), %v5974_v32 }
 0x180   : > { %907 = vst [vmem:[#allocation2 + $0x140] sm:$0xff] (!%p5090_p9), %v5976_v34 }
 0x181   : > { %865 = sbr.rel (%p5090_p9) target bundleno = 393 (0x189), region = 83 }
 0x182   : > { %v5978_v37 = vpop.f32.mrb[28].mxu0 }
 0x183   : > { %v5980_v39 = vpop.f32.mrb[29].mxu0  ;;  %909 = vst [vmem:[#allocation2 + $0x150] sm:$0xff] (!%p5090_p9), %v5978_v37 }
 0x184   : > { %910 = vst [vmem:[#allocation2 + $0x158] sm:$0xff] (!%p5090_p9), %v5980_v39 }
 0x186   : > { %v5982_v42 = vpop.f32.mrb[30].mxu0 }
 0x187   : > { %v5984_v44 = vpop.f32.mrb[31].mxu0  ;;  %912 = vst [vmem:[#allocation2 + $0x168] sm:$0xff] (!%p5090_p9), %v5982_v42 }
 0x188   : > { %913 = vst [vmem:[#allocation2 + $0x170] sm:$0xff] %v5984_v44 }
 0x189 PF: > { %p5091_p10 = scmp.eq.s32.totalorder %s5663_s8, 0 }
 0x18a   : > { %v919_v47 = vld [vmem:[#allocation2] sm:$0xff] (!%p5091_p10)  ;;  %v920_v49 = vld [vmem:[#allocation2 + $0x8] sm:$0xff] (!%p5091_p10)  ;;  %v921_v52 = vld [vmem:[#allocation2 + $0x10] sm:$0xff] (!%p5091_p10)  ;;  %vm1017_vm1 = vcmask (!%p5091_p10), 261120  }
 0x18b   : > { %918 = sbr.rel (%p5091_p10) target bundleno = 421 (0x1a5), region = 87  ;;  %v967_v54 = vadd.f32 (!%p5091_p10), %v919_v47, %v5900_v33  ;;  %v968_v57 = vadd.f32 (!%p5091_p10), %v920_v49, %v5902_v35  ;;  %v969_v59 = vadd.f32 (!%p5091_p10), %v5890_v19, %v921_v52  ;;  %v922_v62 = vld [vmem:[#allocation2 + $0x18] sm:$0xff] (!%p5091_p10)  ;;  %v923_v0 = vld [vmem:[#allocation2 + $0x20] sm:$0xff] (!%p5091_p10)  ;;  %v924_v3 = vld [vmem:[#allocation2 + $0x28] sm:$0xff] (!%p5091_p10) }
 0x18c   : > { %v970_v5 = vadd.f32 (!%p5091_p10), %v922_v62, %v5906_v38  ;;  %v971_v8 = vadd.f32 (!%p5091_p10), %v923_v0, %v5908_v40  ;;  %v972_v10 = vadd.f32 (!%p5091_p10), %v5892_v22, %v924_v3  ;;  %v925_v13 = vld [vmem:[#allocation2 + $0x30] sm:$0xff] (!%p5091_p10)  ;;  %v926_v15 = vld [vmem:[#allocation2 + $0x38] sm:$0xff] (!%p5091_p10)  ;;  %v927_v18 = vld [vmem:[#allocation2 + $0x40] sm:$0xff] (!%p5091_p10) }
 0x18d   : > { %1015 = vst [vmem:[#allocation2] sm:$0xff] (!%p5091_p10), %v967_v54  ;;  %1016 = vst [vmem:[#allocation2 + $0x8] sm:$0xff] (!%p5091_p10), %v968_v57  ;;  %v973_v33 = vadd.f32 (!%p5091_p10), %v925_v13, %v5912_v43  ;;  %v974_v19 = vadd.f32 (!%p5091_p10), %v926_v15, %v5914_v45  ;;  %v975_v35 = vadd.f32 (!%p5091_p10), %v5894_v25, %v927_v18  ;;  %v928_v21 = vld [vmem:[#allocation2 + $0x48] sm:$0xff] (!%p5091_p10)  ;;  %v929_v47 = vld [vmem:[#allocation2 + $0x50] sm:$0xff] (!%p5091_p10) }
 0x18e   : > { %1018 = vst.msk [vmem:[#allocation2 + $0x10] sm:$0xff] (!%p5091_p10), %vm1017_vm1, %v969_v59  ;;  %v930_v38 = vld [vmem:[#allocation2 + $0x58] sm:$0xff] (!%p5091_p10)  ;;  %1019 = vst [vmem:[#allocation2 + $0x18] sm:$0xff] (!%p5091_p10), %v970_v5  ;;  %v976_v22 = vadd.f32 (!%p5091_p10), %v928_v21, %v5918_v48  ;;  %v977_v40 = vadd.f32 (!%p5091_p10), %v929_v47, %v5920_v50  ;;  %v931_v52 = vld [vmem:[#allocation2 + $0x60] sm:$0xff] (!%p5091_p10) }
 0x18f   : > { %1020 = vst [vmem:[#allocation2 + $0x20] sm:$0xff] (!%p5091_p10), %v971_v8  ;;  %1021 = vst.msk [vmem:[#allocation2 + $0x28] sm:$0xff] (!%p5091_p10), %vm1017_vm1, %v972_v10  ;;  %v978_v49 = vadd.f32 (!%p5091_p10), %v5896_v28, %v930_v38  ;;  %v932_v54 = vld [vmem:[#allocation2 + $0x68] sm:$0xff] (!%p5091_p10)  ;;  %v933_v43 = vld [vmem:[#allocation2 + $0x70] sm:$0xff] (!%p5091_p10)  ;;  %v979_v25 = vadd.f32 (!%p5091_p10), %v931_v52, %v5924_v53 }
 0x190   : > { %1022 = vst [vmem:[#allocation2 + $0x30] sm:$0xff] (!%p5091_p10), %v973_v33  ;;  %1023 = vst [vmem:[#allocation2 + $0x38] sm:$0xff] (!%p5091_p10), %v974_v19  ;;  %v980_v45 = vadd.f32 (!%p5091_p10), %v932_v54, %v5926_v55  ;;  %v981_v57 = vadd.f32 (!%p5091_p10), %v5898_v31, %v933_v43  ;;  %v934_v59 = vld [vmem:[#allocation2 + $0x78] sm:$0xff] (!%p5091_p10)  ;;  %v935_v62 = vld [vmem:[#allocation2 + $0x80] sm:$0xff] (!%p5091_p10) }
 0x191   : > { %1024 = vst.msk [vmem:[#allocation2 + $0x40] sm:$0xff] (!%p5091_p10), %vm1017_vm1, %v975_v35  ;;  %v936_v48 = vld [vmem:[#allocation2 + $0x88] sm:$0xff] (!%p5091_p10)  ;;  %1025 = vst [vmem:[#allocation2 + $0x48] sm:$0xff] (!%p5091_p10), %v976_v22  ;;  %v982_v28 = vadd.f32 (!%p5091_p10), %v934_v59, %v5930_v58  ;;  %v983_v50 = vadd.f32 (!%p5091_p10), %v935_v62, %v5932_v60  ;;  %v937_v3 = vld [vmem:[#allocation2 + $0x90] sm:$0xff] (!%p5091_p10) }
 0x192   : > { %1026 = vst [vmem:[#allocation2 + $0x50] sm:$0xff] %v977_v40  ;;  %1027 = vst.msk [vmem:[#allocation2 + $0x58] sm:$0xff] %vm1017_vm1, %v978_v49  ;;  %v984_v0 = vadd.f32 %v5904_v36, %v936_v48  ;;  %v938_v5 = vld [vmem:[#allocation2 + $0x98] sm:$0xff]  ;;  %v939_v53 = vld [vmem:[#allocation2 + $0xa0] sm:$0xff]  ;;  %v985_v31 = vadd.f32 %v937_v3, %v5936_v63 }
 0x193   : > { %1028 = vst [vmem:[#allocation2 + $0x60] sm:$0xff] %v979_v25  ;;  %1029 = vst [vmem:[#allocation2 + $0x68] sm:$0xff] %v980_v45  ;;  %v986_v55 = vadd.f32 %v938_v5, %v5938_v1  ;;  %v987_v8 = vadd.f32 %v5910_v41, %v939_v53  ;;  %v940_v10 = vld [vmem:[#allocation2 + $0xa8] sm:$0xff]  ;;  %v941_v13 = vld [vmem:[#allocation2 + $0xb0] sm:$0xff] }
 0x194   : > { %1030 = vst.msk [vmem:[#allocation2 + $0x70] sm:$0xff] %vm1017_vm1, %v981_v57  ;;  %v942_v58 = vld [vmem:[#allocation2 + $0xb8] sm:$0xff]  ;;  %1031 = vst [vmem:[#allocation2 + $0x78] sm:$0xff] %v982_v28  ;;  %v988_v36 = vadd.f32 %v940_v10, %v5942_v4  ;;  %v989_v60 = vadd.f32 %v941_v13, %v5944_v6  ;;  %v943_v18 = vld [vmem:[#allocation2 + $0xc0] sm:$0xff] }
 0x195   : > { %1032 = vst [vmem:[#allocation2 + $0x80] sm:$0xff] %v983_v50  ;;  %1033 = vst.msk [vmem:[#allocation2 + $0x88] sm:$0xff] %vm1017_vm1, %v984_v0  ;;  %v990_v15 = vadd.f32 %v5916_v46, %v942_v58  ;;  %v944_v33 = vld [vmem:[#allocation2 + $0xc8] sm:$0xff]  ;;  %v945_v63 = vld [vmem:[#allocation2 + $0xd0] sm:$0xff]  ;;  %v991_v41 = vadd.f32 %v943_v18, %v5948_v9 }
 0x196   : > { %1034 = vst [vmem:[#allocation2 + $0x90] sm:$0xff] %v985_v31  ;;  %1035 = vst [vmem:[#allocation2 + $0x98] sm:$0xff] %v986_v55  ;;  %v992_v1 = vadd.f32 %v944_v33, %v5950_v11  ;;  %v993_v19 = vadd.f32 %v5922_v51, %v945_v63  ;;  %v946_v35 = vld [vmem:[#allocation2 + $0xd8] sm:$0xff]  ;;  %v947_v21 = vld [vmem:[#allocation2 + $0xe0] sm:$0xff] }
 0x197   : > { %1036 = vst.msk [vmem:[#allocation2 + $0xa0] sm:$0xff] %vm1017_vm1, %v987_v8  ;;  %v948_v4 = vld [vmem:[#allocation2 + $0xe8] sm:$0xff]  ;;  %1037 = vst [vmem:[#allocation2 + $0xa8] sm:$0xff] %v988_v36  ;;  %v994_v46 = vadd.f32 %v946_v35, %v5954_v14  ;;  %v995_v6 = vadd.f32 %v947_v21, %v5956_v16  ;;  %v949_v38 = vld [vmem:[#allocation2 + $0xf0] sm:$0xff] }
 0x198   : > { %1038 = vst [vmem:[#allocation2 + $0xb0] sm:$0xff] %v989_v60  ;;  %1039 = vst.msk [vmem:[#allocation2 + $0xb8] sm:$0xff] %vm1017_vm1, %v990_v15  ;;  %v996_v47 = vadd.f32 %v5928_v56, %v948_v4  ;;  %v950_v22 = vld [vmem:[#allocation2 + $0xf8] sm:$0xff]  ;;  %v951_v9 = vld [vmem:[#allocation2 + $0x100] sm:$0xff]  ;;  %v997_v51 = vadd.f32 %v949_v38, %v5960_v20 }
 0x199   : > { %1040 = vst [vmem:[#allocation2 + $0xc0] sm:$0xff] %v991_v41  ;;  %1041 = vst [vmem:[#allocation2 + $0xc8] sm:$0xff] %v992_v1  ;;  %v998_v11 = vadd.f32 %v950_v22, %v5962_v23  ;;  %v999_v40 = vadd.f32 %v5934_v61, %v951_v9  ;;  %v952_v49 = vld [vmem:[#allocation2 + $0x108] sm:$0xff]  ;;  %v953_v52 = vld [vmem:[#allocation2 + $0x110] sm:$0xff] }
 0x19a   : > { %1042 = vst.msk [vmem:[#allocation2 + $0xd0] sm:$0xff] %vm1017_vm1, %v993_v19  ;;  %v954_v14 = vld [vmem:[#allocation2 + $0x118] sm:$0xff]  ;;  %1043 = vst [vmem:[#allocation2 + $0xd8] sm:$0xff] %v994_v46  ;;  %v1000_v56 = vadd.f32 %v952_v49, %v5966_v26  ;;  %v1001_v16 = vadd.f32 %v953_v52, %v5968_v27  ;;  %v955_v43 = vld [vmem:[#allocation2 + $0x120] sm:$0xff] }
 0x19b   : > { %1044 = vst [vmem:[#allocation2 + $0xe0] sm:$0xff] %v995_v6  ;;  %1045 = vst.msk [vmem:[#allocation2 + $0xe8] sm:$0xff] %vm1017_vm1, %v996_v47  ;;  %v1002_v54 = vadd.f32 %v5940_v2, %v954_v14  ;;  %v956_v25 = vld [vmem:[#allocation2 + $0x128] sm:$0xff]  ;;  %v957_v20 = vld [vmem:[#allocation2 + $0x130] sm:$0xff]  ;;  %v1003_v61 = vadd.f32 %v955_v43, %v5970_v29 }
 0x19c   : > { %1046 = vst [vmem:[#allocation2 + $0xf0] sm:$0xff] %v997_v51  ;;  %1047 = vst [vmem:[#allocation2 + $0xf8] sm:$0xff] %v998_v11  ;;  %v1004_v23 = vadd.f32 %v956_v25, %v5972_v30  ;;  %v1005_v45 = vadd.f32 %v5946_v7, %v957_v20  ;;  %v958_v57 = vld [vmem:[#allocation2 + $0x138] sm:$0xff]  ;;  %v959_v59 = vld [vmem:[#allocation2 + $0x140] sm:$0xff] }
 0x19d   : > { %1048 = vst.msk [vmem:[#allocation2 + $0x100] sm:$0xff] %vm1017_vm1, %v999_v40  ;;  %v960_v26 = vld [vmem:[#allocation2 + $0x148] sm:$0xff]  ;;  %1049 = vst [vmem:[#allocation2 + $0x108] sm:$0xff] %v1000_v56  ;;  %v1006_v2 = vadd.f32 %v958_v57, %v5974_v32  ;;  %v1007_v27 = vadd.f32 %v959_v59, %v5976_v34  ;;  %v961_v48 = vld [vmem:[#allocation2 + $0x150] sm:$0xff] }
 0x19e   : > { %1050 = vst [vmem:[#allocation2 + $0x110] sm:$0xff] %v1001_v16  ;;  %1051 = vst.msk [vmem:[#allocation2 + $0x118] sm:$0xff] %vm1017_vm1, %v1002_v54  ;;  %v1008_v62 = vadd.f32 %v5952_v12, %v960_v26  ;;  %v962_v28 = vld [vmem:[#allocation2 + $0x158] sm:$0xff]  ;;  %v963_v29 = vld [vmem:[#allocation2 + $0x160] sm:$0xff]  ;;  %v1009_v7 = vadd.f32 %v961_v48, %v5978_v37 }
 0x19f   : > { %1052 = vst [vmem:[#allocation2 + $0x120] sm:$0xff] %v1003_v61  ;;  %1053 = vst [vmem:[#allocation2 + $0x128] sm:$0xff] %v1004_v23  ;;  %v1010_v30 = vadd.f32 %v962_v28, %v5980_v39  ;;  %v1011_v50 = vadd.f32 %v5958_v17, %v963_v29  ;;  %v964_v0 = vld [vmem:[#allocation2 + $0x168] sm:$0xff]  ;;  %v965_v3 = vld [vmem:[#allocation2 + $0x170] sm:$0xff] }
 0x1a0   : > { %1054 = vst.msk [vmem:[#allocation2 + $0x130] sm:$0xff] %vm1017_vm1, %v1005_v45  ;;  %v966_v32 = vld [vmem:[#allocation2 + $0x178] sm:$0xff]  ;;  %1055 = vst [vmem:[#allocation2 + $0x138] sm:$0xff] %v1006_v2  ;;  %v1012_v12 = vadd.f32 %v964_v0, %v5982_v42  ;;  %v1013_v34 = vadd.f32 %v965_v3, %v5984_v44 }
 0x1a1   : > { %1056 = vst [vmem:[#allocation2 + $0x140] sm:$0xff] %v1007_v27  ;;  %1057 = vst.msk [vmem:[#allocation2 + $0x148] sm:$0xff] %vm1017_vm1, %v1008_v62  ;;  %v1014_v5 = vadd.f32 %v5964_v24, %v966_v32 }
 0x1a2   : > { %1058 = vst [vmem:[#allocation2 + $0x150] sm:$0xff] %v1009_v7  ;;  %1059 = vst [vmem:[#allocation2 + $0x158] sm:$0xff] %v1010_v30 }
 0x1a3   : > { %1060 = vst.msk [vmem:[#allocation2 + $0x160] sm:$0xff] %vm1017_vm1, %v1011_v50  ;;  %1061 = vst [vmem:[#allocation2 + $0x168] sm:$0xff] %v1012_v12 }
 0x1a4   : > { %1062 = vst [vmem:[#allocation2 + $0x170] sm:$0xff] %v1013_v34  ;;  %1063 = vst.msk [vmem:[#allocation2 + $0x178] sm:$0xff] %vm1017_vm1, %v1014_v5 }
 0x1a5 PF: > { %p5092_p11 = scmp.ne.s32.totalorder %s5663_s8, 2 }
 0x1a6   : > { %v6124_v24 = vld [vmem:[%s8555_s2] ss:$0 sm:$0xff] (!%p5092_p11)  ;;  %vm1137_vm2 = vcmask (!%p5092_p11), 261120   ;;  %s5574_s16 = smov (!%p5092_p11), 96   ;;  %v6141_v8 = vld [vmem:[#allocation2 + $0x68] sm:$0xff] (!%p5092_p11)  ;;  %v6155_v15 = vld [vmem:[#allocation2 + $0x98] sm:$0xff] (!%p5092_p11) }
 0x1a7   : > { %1067 = sbr.rel (%p5092_p11) target bundleno = 2236 (0x8bc), region = 91  ;;  %v6130_v42 = vld [vmem:[#allocation2] sm:$0xff] (!%p5092_p11)  ;;  %v1125_v58 = vadd.f32 (!%p5092_p11), %v6124_v24, %v6141_v8  ;;  %v6157_v18 = vld [vmem:[#allocation2 + $0x8] sm:$0xff] (!%p5092_p11)  ;;  %s5575_s8 = smov (!%p5092_p11), 64   ;;  %v1127_v63 = vadd.f32 (!%p5092_p11), %v6124_v24, %v6155_v15  ;;  %v6169_v19 = vld [vmem:[#allocation2 + $0xf8] sm:$0xff] (!%p5092_p11)  ;;  %vm1183_vm3 = vcmask (!%p5092_p11), 260096  }
 0x1a8   : > { %1226 = vrot.lane.b32.xlu0 (!%p5092_p11), %v6130_v42, %s5574_s16  ;;  %v1310_v55 = vrot.slane (!%p5092_p11), %v6130_v42, 1  ;;  %v6144_v10 = vld [vmem:[#allocation2 + $0x18] sm:$0xff] (!%p5092_p11)  ;;  %v6150_v36 = vld [vmem:[#allocation2 + $0x80] sm:$0xff] (!%p5092_p11)  ;;  %v1121_v41 = vadd.f32 (!%p5092_p11), %v6124_v24, %v6157_v18  ;;  %v1131_v21 = vadd.f32 (!%p5092_p11), %v6124_v24, %v6169_v19  ;;  %v6178_v4 = vld [vmem:[#allocation2 + $0x110] sm:$0xff] (!%p5092_p11)  ;;  %s5576_s18 = smov (!%p5092_p11), 32   ;;  %s5578_s21 = smov (!%p5092_p11), 80  }
 0x1a9   : > { %v6132_v44 = vld [vmem:[#allocation2 + $0x20] sm:$0xff] (!%p5092_p11)  ;;  %v1126_v60 = vadd.f32 (!%p5092_p11), %v6124_v24, %v6150_v36  ;;  %1142 = vst.msk [vmem:[#allocation3 + $0x20] sm:$0xff] (!%p5092_p11), %vm1137_vm2, %v1125_v58  ;;  %v1311_v33 = vrot.slane (!%p5092_p11), %v6144_v10, 1  ;;  %1144 = vst.msk [vmem:[#allocation3 + $0x30] sm:$0xff] (!%p5092_p11), %vm1137_vm2, %v1127_v63  ;;  %v1132_v6 = vadd.f32 (!%p5092_p11), %v6124_v24, %v6178_v4  ;;  %v6186_v47 = vld [vmem:[#allocation2 + $0x128] sm:$0xff] (!%p5092_p11)  ;;  %s5579_s22 = smov (!%p5092_p11), 112  }
 0x1aa   : > { %v6117_v17 = vld [vmem:[#allocation2 + $0x30] sm:$0xff] (!%p5092_p11)  ;;  %v1122_v53 = vadd.f32 (!%p5092_p11), %v6124_v24, %v6132_v44  ;;  %v6138_v31 = vld [vmem:[#allocation2 + $0x38] sm:$0xff] (!%p5092_p11)  ;;  %v6167_v1 = vld [vmem:[#allocation2 + $0xe0] sm:$0xff] (!%p5092_p11)  ;;  %1138 = vst.msk [vmem:[#allocation3] sm:$0xff] (!%p5092_p11), %vm1137_vm2, %v1121_v41  ;;  %v1133_v38 = vadd.f32 (!%p5092_p11), %v6124_v24, %v6186_v47  ;;  %s5580_s23 = smov (!%p5092_p11), 48   ;;  %vm2192_vm4 = vcmask (!%p5092_p11), 130048  }
 0x1ab   : > { %1230 = vrot.lane.b32.xlu1 (!%p5092_p11), %v6117_v17, %s5574_s16  ;;  %v1123_v13 = vadd.f32 (!%p5092_p11), %v6124_v24, %v6138_v31  ;;  %1143 = vst.msk [vmem:[#allocation3 + $0x28] sm:$0xff] (!%p5092_p11), %vm1137_vm2, %v1126_v60  ;;  %v1130_v35 = vadd.f32 (!%p5092_p11), %v6124_v24, %v6167_v1  ;;  %v6180_v46 = vld [vmem:[#allocation2 + $0x48] sm:$0xff] (!%p5092_p11)  ;;  %1148 = vst.msk [vmem:[#allocation3 + $0x50] sm:$0xff] (!%p5092_p11), %vm1137_vm2, %v1131_v21  ;;  %v6192_v22 = vld [vmem:[#allocation2 + $0x140] sm:$0xff] (!%p5092_p11)  ;;  %v1312_v26 = vrot.slane (!%p5092_p11), %v6117_v17, 1  ;;  %v1524_v21 = vrot.slane (!%p5092_p11), %v6157_v18, 1 }
 0x1ac   : > { %v6119_v37 = vld [vmem:[#allocation2 + $0x50] sm:$0xff] (!%p5092_p11)  ;;  %1139 = vst.msk [vmem:[#allocation3 + $0x8] sm:$0xff] (!%p5092_p11), %vm1137_vm2, %v1122_v53  ;;  %1228 = vrot.lane.b32.xlu0 (!%p5092_p11), %v6144_v10, %s5574_s16  ;;  %v6194_v9 = vld [vmem:[#allocation2 + $0x158] sm:$0xff] (!%p5092_p11)  ;;  %1149 = vst.msk [vmem:[#allocation3 + $0x58] sm:$0xff] (!%p5092_p11), %vm1137_vm2, %v1132_v6  ;;  %v1134_v51 = vadd.f32 (!%p5092_p11), %v6124_v24, %v6192_v22  ;;  %v1313_v32 = vrot.slane (!%p5092_p11), %v6180_v46, 1  ;;  %v1525_v6 = vrot.slane (!%p5092_p11), %v6132_v44, 1 }
 0x1ad   : > { %v1124_v39 = vadd.f32 (!%p5092_p11), %v6124_v24, %v6119_v37  ;;  %1140 = vst.msk [vmem:[#allocation3 + $0x10] sm:$0xff] (!%p5092_p11), %vm1137_vm2, %v1123_v13  ;;  %1147 = vst.msk [vmem:[#allocation3 + $0x48] sm:$0xff] (!%p5092_p11), %vm1137_vm2, %v1130_v35  ;;  %v1135_v11 = vadd.f32 (!%p5092_p11), %v6124_v24, %v6194_v9  ;;  %v6202_v40 = vld [vmem:[#allocation2 + $0xc8] sm:$0xff] (!%p5092_p11)  ;;  %v6204_v49 = vld [vmem:[#allocation2 + $0xb0] sm:$0xff] (!%p5092_p11)  ;;  %v1526_v18 = vrot.slane (!%p5092_p11), %v6138_v31, 1  ;;  %vm2238_vm5 = vcmask (!%p5092_p11), 129024  }
 0x1ae   : > { %1150 = vst.msk [vmem:[#allocation3 + $0x60] sm:$0xff] %vm1137_vm2, %v1133_v38  ;;  %v1129_v14 = vadd.f32 %v6124_v24, %v6202_v40  ;;  %v1128_v56 = vadd.f32 %v6124_v24, %v6204_v49  ;;  %v6214_v43 = vld [vmem:[#allocation2 + $0x60] sm:$0xff]  ;;  %1151 = vst.msk [vmem:[#allocation3 + $0x68] sm:$0xff] %vm1137_vm2, %v1134_v51  ;;  %v6230_v2 = vld [vmem:[#allocation2 + $0x78] sm:$0xff]  ;;  %s5581_s24 = smov 16   ;;  %s5583_s10 = smov 104  }
 0x1af   : > { %1141 = vst.msk [vmem:[#allocation3 + $0x18] sm:$0xff] %vm1137_vm2, %v1124_v39  ;;  %1324 = vrot.lane.b32.xlu1 %v1310_v55, %s5575_s8  ;;  %1152 = vst.msk [vmem:[#allocation3 + $0x70] sm:$0xff] %vm1137_vm2, %v1135_v11  ;;  %v6233_v62 = vld [vmem:[#allocation2 + $0xc0] sm:$0xff]  ;;  %v6238_v29 = vld [vmem:[#allocation2 + $0xd8] sm:$0xff]  ;;  %v1314_v35 = vrot.slane %v6214_v43, 1  ;;  %v1315_v38 = vrot.slane %v6230_v2, 1 }
 0x1b0   : > { %1232 = vrot.lane.b32.xlu0 %v6180_v46, %s5574_s16  ;;  %v1158_v61 = vld [vmem:[#allocation3 + $0x21] sm:$0x7f]  ;;  %1146 = vst.msk [vmem:[#allocation3 + $0x40] sm:$0xff] %vm1137_vm2, %v1129_v14  ;;  %1145 = vst.msk [vmem:[#allocation3 + $0x38] sm:$0xff] %vm1137_vm2, %v1128_v56  ;;  %v1160_v27 = vld [vmem:[#allocation3 + $0x31] sm:$0x7f] }
 0x1b1   : > { %v1172_v45 = vadd.f32 %v1158_v61, %v6180_v46  ;;  %v1174_v48 = vadd.f32 %v1160_v27, %v6230_v2  ;;  %v6243_v0 = vld [vmem:[#allocation2 + $0xf0] sm:$0xff]  ;;  %v6250_v34 = vld [vmem:[#allocation2 + $0x108] sm:$0xff]  ;;  %v6252_v39 = vld [vmem:[#allocation2 + $0x120] sm:$0xff]  ;;  %v1527_v11 = vrot.slane %v6119_v37, 1  ;;  %v1317_v14 = vrot.slane %v6233_v62, 1  ;;  %s5584_s13 = smov 72  }
 0x1b2   : > { %v1159_v57 = vld [vmem:[#allocation3 + $0x29] sm:$0x7f]  ;;  %v1163_v7 = vld [vmem:[#allocation3 + $0x51] sm:$0x7f]  ;;  %v6258_v55 = vld [vmem:[#allocation2 + $0x138] sm:$0xff]  ;;  %v1529_v56 = vrot.slane %v6150_v36, 1 }
 0x1b3   : > { %1326 = vrot.lane.b32.xlu1 %v1311_v33, %s5575_s8  ;;  %v1155_v54 = vld [vmem:[#allocation3 + $0x9] sm:$0x7f]  ;;  %v1173_v59 = vadd.f32 %v1159_v57, %v6214_v43  ;;  %1187 = vst.msk [vmem:[#allocation3 + $0x21] sm:$0x7f] %vm1183_vm3, %v1172_v45  ;;  %v1177_v50 = vadd.f32 %v1163_v7, %v6238_v29  ;;  %v1164_v3 = vld [vmem:[#allocation3 + $0x59] sm:$0x7f] }
 0x1b4   : > { %v1169_v25 = vadd.f32 %v1155_v54, %v6130_v42  ;;  %v1156_v20 = vld [vmem:[#allocation3 + $0x11] sm:$0x7f]  ;;  %1234 = vrot.lane.b32.xlu0 %v6214_v43, %s5574_s16  ;;  %v1162_v28 = vld [vmem:[#allocation3 + $0x49] sm:$0x7f]  ;;  %1189 = vst.msk [vmem:[#allocation3 + $0x31] sm:$0x7f] %vm1183_vm3, %v1174_v48  ;;  %v1178_v12 = vadd.f32 %v1164_v3, %v6243_v0 }
 0x1b5   : > { %v1170_v23 = vadd.f32 %v1156_v20, %v6144_v10  ;;  %1188 = vst.msk [vmem:[#allocation3 + $0x29] sm:$0x7f] %vm1183_vm3, %v1173_v59  ;;  %v1176_v30 = vadd.f32 %v1162_v28, %v6233_v62  ;;  %v1165_v5 = vld [vmem:[#allocation3 + $0x61] sm:$0x7f]  ;;  %1192 = vst.msk [vmem:[#allocation3 + $0x51] sm:$0x7f] %vm1183_vm3, %v1177_v50 }
 0x1b6   : > { %v1157_v52 = vld [vmem:[#allocation3 + $0x19] sm:$0x7f]  ;;  %1184 = vst.msk [vmem:[#allocation3 + $0x9] sm:$0x7f] %vm1183_vm3, %v1169_v25  ;;  %v1166_v53 = vld [vmem:[#allocation3 + $0x69] sm:$0x7f] }
 0x1b7   : > { %v1171_v16 = vadd.f32 %v1157_v52, %v6117_v17  ;;  %1412 = vrot.lane.b32.xlu1 %v6130_v42, %s5576_s18  ;;  %1185 = vst.msk [vmem:[#allocation3 + $0x11] sm:$0x7f] %vm1183_vm3, %v1170_v23  ;;  %1191 = vst.msk [vmem:[#allocation3 + $0x49] sm:$0x7f] %vm1183_vm3, %v1176_v30  ;;  %v1179_v42 = vadd.f32 %v1165_v5, %v6250_v34  ;;  %v1167_v13 = vld [vmem:[#allocation3 + $0x71] sm:$0x7f]  ;;  %v1180_v60 = vadd.f32 %v1166_v53, %v6252_v39 }
 0x1b8   : > { %1328 = vrot.lane.b32.xlu0 %v1312_v26, %s5575_s8  ;;  %1193 = vst.msk [vmem:[#allocation3 + $0x59] sm:$0x7f] %vm1183_vm3, %v1178_v12  ;;  %v6261_v58 = vld [vmem:[#allocation2 + $0x90] sm:$0xff]  ;;  %v1181_v33 = vadd.f32 %v1167_v13, %v6258_v55  ;;  %v1161_v63 = vld [vmem:[#allocation3 + $0x39] sm:$0x7f]  ;;  %v1528_v52 = vrot.slane %v6141_v8, 1 }
 0x1b9   : > { %1186 = vst.msk [vmem:[#allocation3 + $0x19] sm:$0x7f] %vm1183_vm3, %v1171_v16  ;;  %1194 = vst.msk [vmem:[#allocation3 + $0x61] sm:$0x7f] %vm1183_vm3, %v1179_v42  ;;  %v1175_v41 = vadd.f32 %v1161_v63, %v6261_v58  ;;  %v1318_v16 = vrot.slane %v6238_v29, 1  ;;  %v1889_v54 = vld [vmem:[%s8556_s3 + $0x8] sm:$0xff] }
 0x1ba   : > { %1195 = vst.msk [vmem:[#allocation3 + $0x69] sm:$0x7f] %vm1183_vm3, %v1180_v60  ;;  %1196 = vst.msk [vmem:[#allocation3 + $0x71] sm:$0x7f] %vm1183_vm3, %v1181_v33  ;;  %v1888_v20 = vld [vmem:[%s8556_s3] sm:$0xff]  ;;  %v1890_v61 = vld [vmem:[%s8556_s3 + $0x10] sm:$0xff] }
 0x1bb   : > { %1236 = vrot.lane.b32.xlu1 %v6230_v2, %s5574_s16  ;;  %1190 = vst.msk [vmem:[#allocation3 + $0x39] sm:$0x7f] %vm1183_vm3, %v1175_v41  ;;  %v5431_v23 = vpack.c.bf16 %v1890_v61, %v1888_v20  ;;  %v1893_v45 = vld [vmem:[%s8556_s3 + $0x28] sm:$0xff]  ;;  %v1895_v57 = vld [vmem:[%s8556_s3 + $0x38] sm:$0xff]  ;;  %v1892_v26 = vld [vmem:[%s8556_s3 + $0x20] sm:$0xff]  ;;  %v1319_v48 = vrot.slane %v6243_v0, 1 }
 0x1bc   : > { %1414 = vrot.lane.b32.xlu0 %v6144_v10, %s5576_s18  ;;  %v6285_v10 = vld [vmem:[#allocation2 + $0x170] sm:$0xff]  ;;  %v5433_v59 = vpack.c.bf16 %v1895_v57, %v1893_v45  ;;  %v5577_v28 = vmov 0.0   ;;  %v1321_v7 = vrot.slane %v6252_v39, 1  ;;  %v1316_v30 = vrot.slane %v6261_v58, 1  ;;  %v1201_v13 = vld [vmem:[#allocation3 + $0x20] sm:$0xff]  ;;  %v1202_v41 = vld [vmem:[#allocation3 + $0x28] sm:$0xff] }
 0x1bd   : > { %2008 = vmatprep.mubr.f32.mxu0 %v5577_v28  ;;  %v1198_v50 = vld [vmem:[#allocation3 + $0x8] sm:$0xff]  ;;  %v1394_v33 = vld [vmem:[#allocation3 + $0x1] sm:$0x7f]  ;;  %v1537_v45 = vrot.slane %v6192_v22, 1  ;;  %s5585_s11 = smov 88   ;;  %vm3197_vm6 = vcmask 64512  }
 0x1be   : > { %vm3243_vm7 = vcmask 63488   ;;  %s5587_s19 = smov 122   ;;  %s5588_s20 = smov 127   ;;  %vm4201_vm8 = vcmask 7168   ;;  %vm4247_vm9 = vcmask 6144  }
 0x1bf   : > { %1330 = vrot.lane.b32.xlu1 %v1313_v32, %s5575_s8  ;;  %s5593_s25 = smov 121  }
 0x1c0   : > { %1416 = vrot.lane.b32.xlu0 %v6117_v17, %s5576_s18  ;;  %v1136_v17 = vadd.f32 %v6124_v24, %v6285_v10 }
 0x1c2   : > { %1153 = vst.msk [vmem:[#allocation3 + $0x78] sm:$0xff] %vm1137_vm2, %v1136_v17 }
 0x1c3   : > { %1332 = vrot.lane.b32.xlu1 %v1314_v35, %s5575_s8 }
 0x1c4   : > { %1540 = vrot.lane.b32.xlu0 %v1524_v21, %s5574_s16 }
 0x1c7   : > { %1418 = vrot.lane.b32.xlu1 %v6180_v46, %s5576_s18  ;;  %v6298_v46 = vld [vmem:[#allocation2 + $0x150] sm:$0xff] }
 0x1c8   : > { %1334 = vrot.lane.b32.xlu0 %v1315_v38, %s5575_s8  ;;  %v1203_v38 = vld [vmem:[#allocation3 + $0x30] sm:$0xff] }
 0x1c9   : > { %v1168_v51 = vld [vmem:[#allocation3 + $0x79] sm:$0x7f] }
 0x1ca   : > { %v1182_v24 = vadd.f32 %v1168_v51, %v6298_v46  ;;  %v1088_v51 = vld [vmem:[#allocation2 + $0xa8] sm:$0xff] }
 0x1cb   : > { %1542 = vrot.lane.b32.xlu1 %v1525_v6, %s5574_s16 }
 0x1cc   : > { %1240 = vrot.lane.b32.xlu0 %v6233_v62, %s5574_s16  ;;  %1197 = vst.msk [vmem:[#allocation3 + $0x79] sm:$0x7f] %vm1183_vm3, %v1182_v24 }
 0x1cf   : > { %1420 = vrot.lane.b32.xlu1 %v6214_v43, %s5576_s18  ;;  %v1891_v43 = vld [vmem:[%s8556_s3 + $0x18] sm:$0xff] }
 0x1d0   : > { %1544 = vrot.lane.b32.xlu0 %v1526_v18, %s5574_s16  ;;  %v5429_v25 = vpack.c.bf16 %v1891_v43, %v1889_v54 }
 0x1d2   : > { %5430 = vmatprep.subr.bf16.mxu0 %v5429_v25 }
 0x1d3   : > { %1242 = vrot.lane.b32.xlu1 %v6238_v29, %s5574_s16  ;;  %5432 = vmatpush1.bf16.msra.mxu0 %v5431_v23 }
 0x1d4   : > { %1422 = vrot.lane.b32.xlu0 %v6230_v2, %s5576_s18  ;;  %v1894_v2 = vld [vmem:[%s8556_s3 + $0x30] sm:$0xff]  ;;  %5434 = vmatprep.subr.bf16.mxu0 %v5433_v59 }
 0x1d5   : > { %v5435_v27 = vpack.c.bf16 %v1894_v2, %v1892_v26 }
 0x1d7   : > { %1634 = vrot.lane.b32.xlu1 %v6132_v44, %s5575_s8  ;;  %5436 = vmatpush1.bf16.msra.mxu0 %v5435_v27 }
 0x1d8   : > { %1546 = vrot.lane.b32.xlu0 %v1527_v11, %s5574_s16 }
 0x1db   : > { %1244 = vrot.lane.b32.xlu1 %v6243_v0, %s5574_s16 }
 0x1dc   : > { %1424 = vrot.lane.b32.xlu0 %v6261_v58, %s5576_s18 }
 0x1df   : > { %1636 = vrot.lane.b32.xlu1 %v6138_v31, %s5575_s8 }
 0x1e0   : > { %1338 = vrot.lane.b32.xlu0 %v1317_v14, %s5575_s8 }
 0x1e3   : > { %1548 = vrot.lane.b32.xlu1 %v1528_v52, %s5574_s16 }
 0x1e4   : > { %1246 = vrot.lane.b32.xlu0 %v6250_v34, %s5574_s16 }
 0x1e7   : > { %1638 = vrot.lane.b32.xlu1 %v6119_v37, %s5575_s8 }
 0x1e8   : > { %1340 = vrot.lane.b32.xlu0 %v1318_v16, %s5575_s8  ;;  %v1536_v16 = vrot.slane %v6186_v47, 1 }
 0x1eb   : > { %1550 = vrot.lane.b32.xlu1 %v1529_v56, %s5574_s16 }
 0x1ec   : > { %1718 = vrot.lane.b32.xlu0 %v6132_v44, %s5576_s18  ;;  %v1530_v44 = vrot.slane %v6155_v15, 1 }
 0x1ef   : > { %1248 = vrot.lane.b32.xlu1 %v6252_v39, %s5574_s16 }
 0x1f0   : > { %1428 = vrot.lane.b32.xlu0 %v6233_v62, %s5576_s18  ;;  %v1320_v62 = vrot.slane %v6250_v34, 1 }
 0x1f3   : > { %1640 = vrot.lane.b32.xlu1 %v6141_v8, %s5575_s8 }
 0x1f4   : > { %1342 = vrot.lane.b32.xlu0 %v1319_v48, %s5575_s8  ;;  %v1538_v48 = vrot.slane %v6194_v9, 1 }
 0x1f7   : > { %1552 = vrot.lane.b32.xlu1 %v1530_v44, %s5574_s16 }
 0x1f8   : > { %1720 = vrot.lane.b32.xlu0 %v6138_v31, %s5576_s18  ;;  %v1532_v31 = vrot.slane %v6202_v40, 1  ;;  %v1534_v40 = vrot.slane %v6169_v19, 1 }
 0x1fb   : > { %1250 = vrot.lane.b32.xlu1 %v6258_v55, %s5574_s16 }
 0x1fc   : > { %1430 = vrot.lane.b32.xlu0 %v6238_v29, %s5576_s18  ;;  %v1533_v29 = vrot.slane %v6167_v1, 1 }
 0x1ff   : > { %1642 = vrot.lane.b32.xlu1 %v6150_v36, %s5575_s8 }
 0x200   : > { %1238 = vrot.lane.b32.xlu0 %v6261_v58, %s5574_s16 }
 0x203   : > { %1344 = vrot.lane.b32.xlu1 %v1320_v62, %s5575_s8 }
 0x204   : > { %1722 = vrot.lane.b32.xlu0 %v6119_v37, %s5576_s18  ;;  %v1322_v37 = vrot.slane %v6258_v55, 1 }
 0x207   : > { %1432 = vrot.lane.b32.xlu1 %v6243_v0, %s5576_s18 }
 0x208   : > { %1644 = vrot.lane.b32.xlu0 %v6155_v15, %s5575_s8 }
 0x20b   : > { %1346 = vrot.lane.b32.xlu1 %v1321_v7, %s5575_s8 }
 0x20c   : > { %1556 = vrot.lane.b32.xlu0 %v1532_v31, %s5574_s16 }
 0x20f   : > { %1724 = vrot.lane.b32.xlu1 %v6141_v8, %s5576_s18  ;;  %v1200_v8 = vld [vmem:[#allocation3 + $0x18] sm:$0xff] }
 0x210   : > { %1434 = vrot.lane.b32.xlu0 %v6250_v34, %s5576_s18  ;;  %v1199_v34 = vld [vmem:[#allocation3 + $0x10] sm:$0xff] }
 0x213   : > { %1646 = vrot.lane.b32.xlu1 %v6204_v49, %s5575_s8 }
 0x214   : > { %1348 = vrot.lane.b32.xlu0 %v1322_v37, %s5575_s8 }
 0x217   : > { %1558 = vrot.lane.b32.xlu1 %v1533_v29, %s5574_s16 }
 0x218   : > { %1726 = vrot.lane.b32.xlu0 %v6150_v36, %s5576_s18  ;;  %v1535_v36 = vrot.slane %v6178_v4, 1 }
 0x21a   : > { %v1227_v32 = vpop.permute.xlu0 %1226 }
 0x21b   : > { %1336 = vrot.lane.b32.xlu1 %v1316_v30, %s5575_s8  ;;  %v1268_v12 = vadd.f32 %v1227_v32, %v1198_v50 }
 0x21c   : > { %1436 = vrot.lane.b32.xlu0 %v6252_v39, %s5576_s18 }
 0x21d   : > { %v1231_v0 = vpop.permute.xlu1 %1230  ;;  %1282 = vst.msk [vmem:[#allocation3 + $0x8] sm:$0xff] %vm1137_vm2, %v1268_v12 }
 0x21e   : > { %v1270_v3 = vadd.f32 %v1231_v0, %v1200_v8  ;;  %v1229_v42 = vpop.permute.xlu0 %1228  ;;  %v1531_v8 = vrot.slane %v6204_v49, 1 }
 0x21f   : > { %1560 = vrot.lane.b32.xlu1 %v1534_v40, %s5574_s16  ;;  %v1269_v53 = vadd.f32 %v1229_v42, %v1199_v34 }
 0x220   : > { %1284 = vst.msk [vmem:[#allocation3 + $0x18] sm:$0xff] %vm1137_vm2, %v1270_v3  ;;  %1728 = vrot.lane.b32.xlu0 %v6155_v15, %s5576_s18 }
 0x221   : > { %v1325_v5 = vpop.permute.xlu1 %1324  ;;  %1283 = vst.msk [vmem:[#allocation3 + $0x10] sm:$0xff] %vm1137_vm2, %v1269_v53 }
 0x222   : > { %v1233_v60 = vpop.permute.xlu0 %1232 }
 0x223   : > { %1438 = vrot.lane.b32.xlu1 %v6258_v55, %s5576_s18  ;;  %v1271_v39 = vadd.f32 %v1233_v60, %v1201_v13 }
 0x224   : > { %v1296_v63 = vld [vmem:[#allocation3 + $0x8] sm:$0x7f]  ;;  %1648 = vrot.lane.b32.xlu0 %v6167_v1, %s5575_s8 }
 0x225   : > { %v1327_v58 = vpop.permute.xlu1 %1326  ;;  %v1366_v55 = vadd.f32 %v1325_v5, %v1296_v63  ;;  %1285 = vst.msk [vmem:[#allocation3 + $0x20] sm:$0xff] %vm1137_vm2, %v1271_v39 }
 0x226   : > { %v1235_v21 = vpop.permute.xlu0 %1234 }
 0x227   : > { %1562 = vrot.lane.b32.xlu1 %v1535_v36, %s5574_s16  ;;  %1380 = vst.msk [vmem:[#allocation3 + $0x8] sm:$0x7f] %vm1183_vm3, %v1366_v55  ;;  %v1272_v6 = vadd.f32 %v1235_v21, %v1202_v41  ;;  %v1298_v18 = vld [vmem:[#allocation3 + $0x18] sm:$0x7f]  ;;  %v1206_v36 = vld [vmem:[#allocation3 + $0x50] sm:$0xff] }
 0x228   : > { %v1297_v17 = vld [vmem:[#allocation3 + $0x10] sm:$0x7f]  ;;  %1730 = vrot.lane.b32.xlu0 %v6204_v49, %s5576_s18  ;;  %v1205_v49 = vld [vmem:[#allocation3 + $0x48] sm:$0xff]  ;;  %v1207_v21 = vld [vmem:[#allocation3 + $0x58] sm:$0xff] }
 0x229   : > { %v1413_v35 = vpop.permute.xlu1 %1412  ;;  %v1367_v24 = vadd.f32 %v1327_v58, %v1297_v17  ;;  %1286 = vst.msk [vmem:[#allocation3 + $0x28] sm:$0xff] %vm1137_vm2, %v1272_v6 }
 0x22a   : > { %v1460_v15 = vadd.f32 %v1413_v35, %v1394_v33  ;;  %v1329_v52 = vpop.permute.xlu0 %1328 }
 0x22b   : > { %1440 = vrot.lane.b32.xlu1 %v6298_v46, %s5576_s18  ;;  %1381 = vst.msk [vmem:[#allocation3 + $0x10] sm:$0x7f] %vm1183_vm3, %v1367_v24  ;;  %v1368_v56 = vadd.f32 %v1329_v52, %v1298_v18  ;;  %v1323_v18 = vrot.slane %v6298_v46, 1 }
 0x22c   : > { %1476 = vst.msk [vmem:[#allocation3 + $0x1] sm:$0x7f] %vm1183_vm3, %v1460_v15  ;;  %1650 = vrot.lane.b32.xlu0 %v6169_v19, %s5575_s8  ;;  %v1299_v54 = vld [vmem:[#allocation3 + $0x20] sm:$0x7f] }
 0x22d   : > { %v1237_v11 = vpop.permute.xlu1 %1236  ;;  %1382 = vst.msk [vmem:[#allocation3 + $0x18] sm:$0x7f] %vm1183_vm3, %v1368_v56  ;;  %v1539_v56 = vrot.slane %v6285_v10, 1 }
 0x22e   : > { %v1273_v14 = vadd.f32 %v1237_v11, %v1203_v38  ;;  %v1415_v25 = vpop.permute.xlu0 %1414  ;;  %v1395_v20 = vld [vmem:[#allocation3 + $0x9] sm:$0x7f] }
 0x22f   : > { %1426 = vrot.lane.b32.xlu1 %v1088_v51, %s5576_s18  ;;  %v1461_v23 = vadd.f32 %v1415_v25, %v1395_v20 }
 0x230   : > { %1287 = vst.msk [vmem:[#allocation3 + $0x30] sm:$0xff] %vm1137_vm2, %v1273_v14  ;;  %1564 = vrot.lane.b32.xlu0 %v1536_v16, %s5574_s16  ;;  %v1300_v57 = vld [vmem:[#allocation3 + $0x28] sm:$0x7f] }
 0x231   : > { %v1331_v43 = vpop.permute.xlu1 %1330  ;;  %1477 = vst.msk [vmem:[#allocation3 + $0x9] sm:$0x7f] %vm1183_vm3, %v1461_v23  ;;  %v1208_v23 = vld [vmem:[#allocation3 + $0x60] sm:$0xff] }
 0x232   : > { %v1369_v61 = vadd.f32 %v1331_v43, %v1299_v54  ;;  %v1417_v26 = vpop.permute.xlu0 %1416  ;;  %v1396_v2 = vld [vmem:[#allocation3 + $0x11] sm:$0x7f]  ;;  %v1111_v54 = vld [vmem:[#allocation2 + $0x168] sm:$0xff] }
 0x233   : > { %1652 = vrot.lane.b32.xlu1 %v6178_v4, %s5575_s8  ;;  %v1462_v44 = vadd.f32 %v1417_v26, %v1396_v2  ;;  %v1492_v62 = vld [vmem:[#allocation3] sm:$0x7f] }
 0x234   : > { %1383 = vst.msk [vmem:[#allocation3 + $0x20] sm:$0x7f] %vm1183_vm3, %v1369_v61  ;;  %1566 = vrot.lane.b32.xlu0 %v1537_v45, %s5574_s16  ;;  %v1397_v7 = vld [vmem:[#allocation3 + $0x19] sm:$0x7f]  ;;  %v5110_v45 = vld [vmem:[%s8557_s4] ss:$0 sm:$0xff] }
 0x235   : > { %v1333_v59 = vpop.permute.xlu1 %1332  ;;  %1478 = vst.msk [vmem:[#allocation3 + $0x11] sm:$0x7f] %vm1183_vm3, %v1462_v44 }
 0x236   : > { %v1370_v27 = vadd.f32 %v1333_v59, %v1300_v57  ;;  %v1541_v29 = vpop.permute.xlu0 %1540 }
 0x237   : > { %1732 = vrot.lane.b32.xlu1 %v6167_v1, %s5576_s18  ;;  %v1588_v30 = vadd.f32 %v1541_v29, %v1492_v62  ;;  %v1301_v1 = vld [vmem:[#allocation3 + $0x30] sm:$0x7f] }
 0x238   : > { %1384 = vst.msk [vmem:[#allocation3 + $0x28] sm:$0x7f] %vm1183_vm3, %v1370_v27  ;;  %1654 = vrot.lane.b32.xlu0 %v6186_v47, %s5575_s8  ;;  %v1493_v50 = vld [vmem:[#allocation3 + $0x8] sm:$0x7f] }
 0x239   : > { %v1419_v31 = vpop.permute.xlu1 %1418  ;;  %1604 = vst.msk [vmem:[#allocation3] sm:$0x7f] %vm1183_vm3, %v1588_v30 }
 0x23a   : > { %v1463_v37 = vadd.f32 %v1419_v31, %v1397_v7  ;;  %v1335_v0 = vpop.permute.xlu0 %1334  ;;  %v1209_v31 = vld [vmem:[#allocation3 + $0x68] sm:$0xff] }
 0x23b   : > { %1568 = vrot.lane.b32.xlu1 %v1538_v48, %s5574_s16  ;;  %v1371_v32 = vadd.f32 %v1335_v0, %v1301_v1  ;;  %v1398_v12 = vld [vmem:[#allocation3 + $0x21] sm:$0x7f] }
 0x23c   : > { %1479 = vst.msk [vmem:[#allocation3 + $0x19] sm:$0x7f] %vm1183_vm3, %v1463_v37  ;;  %1734 = vrot.lane.b32.xlu0 %v6169_v19, %s5576_s18  ;;  %v1494_v58 = vld [vmem:[#allocation3 + $0x10] sm:$0x7f] }
 0x23d   : > { %v1543_v40 = vpop.permute.xlu1 %1542  ;;  %1385 = vst.msk [vmem:[#allocation3 + $0x30] sm:$0x7f] %vm1183_vm3, %v1371_v32 }
 0x23e   : > { %v1589_v3 = vadd.f32 %v1543_v40, %v1493_v50  ;;  %v1241_v5 = vpop.permute.xlu0 %1240  ;;  %v1402_v40 = vld [vmem:[#allocation3 + $0x41] sm:$0x7f] }
 0x23f   : > { %1554 = vrot.lane.b32.xlu1 %v1531_v8, %s5574_s16  ;;  %v1275_v53 = vadd.f32 %v1241_v5, %v1205_v49  ;;  %v1399_v41 = vld [vmem:[#allocation3 + $0x29] sm:$0x7f] }
 0x240   : > { %1605 = vst.msk [vmem:[#allocation3 + $0x8] sm:$0x7f] %vm1183_vm3, %v1589_v3  ;;  %1656 = vrot.lane.b32.xlu0 %v6192_v22, %s5575_s8  ;;  %v1072_v3 = vld [vmem:[#allocation2 + $0x28] sm:$0xff] }
 0x241   : > { %v1421_v34 = vpop.permute.xlu1 %1420  ;;  %1289 = vst.msk [vmem:[#allocation3 + $0x48] sm:$0xff] %vm1137_vm2, %v1275_v53 }
 0x242   : > { %v1464_v42 = vadd.f32 %v1421_v34, %v1398_v12  ;;  %v1545_v13 = vpop.permute.xlu0 %1544  ;;  %v1816_v34 = vrot.slane %v1072_v3, 1 }
 0x243   : > { %1736 = vrot.lane.b32.xlu1 %v6178_v4, %s5576_s18  ;;  %v1590_v39 = vadd.f32 %v1545_v13, %v1494_v58  ;;  %v1620_v4 = vld [vmem:[#allocation3 + $0x1] sm:$0x7f]  ;;  %v1495_v6 = vld [vmem:[#allocation3 + $0x18] sm:$0x7f]  ;;  %v1210_v58 = vld [vmem:[#allocation3 + $0x70] sm:$0xff] }
 0x244   : > { %1480 = vst.msk [vmem:[#allocation3 + $0x21] sm:$0x7f] %vm1183_vm3, %v1464_v42  ;;  %1658 = vrot.lane.b32.xlu0 %v6194_v9, %s5575_s8  ;;  %v1400_v11 = vld [vmem:[#allocation3 + $0x31] sm:$0x7f] }
 0x245   : > { %v1243_v19 = vpop.permute.xlu1 %1242  ;;  %1606 = vst.msk [vmem:[#allocation3 + $0x10] sm:$0x7f] %vm1183_vm3, %v1590_v39 }
 0x246   : > { %v1276_v60 = vadd.f32 %v1243_v19, %v1206_v36  ;;  %v1423_v63 = vpop.permute.xlu0 %1422 }
 0x247   : > { %1738 = vrot.lane.b32.xlu1 %v6186_v47, %s5576_s18  ;;  %v1465_v35 = vadd.f32 %v1423_v63, %v1399_v41  ;;  %v1621_v51 = vld [vmem:[#allocation3 + $0x9] sm:$0x7f] }
 0x248   : > { %1290 = vst.msk [vmem:[#allocation3 + $0x50] sm:$0xff] %vm1137_vm2, %v1276_v60  ;;  %1660 = vrot.lane.b32.xlu0 %v6285_v10, %s5575_s8  ;;  %v1303_v43 = vld [vmem:[#allocation3 + $0x48] sm:$0x7f] }
 0x249   : > { %v1635_v33 = vpop.permute.xlu1 %1634  ;;  %1481 = vst.msk [vmem:[#allocation3 + $0x29] sm:$0x7f] %vm1183_vm3, %v1465_v35 }
 0x24a   : > { %v1676_v55 = vadd.f32 %v1635_v33, %v1620_v4  ;;  %v1547_v15 = vpop.permute.xlu0 %1546 }
 0x24b   : > { %1740 = vrot.lane.b32.xlu1 %v6192_v22, %s5576_s18  ;;  %v1591_v17 = vadd.f32 %v1547_v15, %v1495_v6 }
 0x24c   : > { %1690 = vst.msk [vmem:[#allocation3 + $0x1] sm:$0x7f] %vm1183_vm3, %v1676_v55  ;;  %1742 = vrot.lane.b32.xlu0 %v6194_v9, %s5576_s18  ;;  %v1496_v9 = vld [vmem:[#allocation3 + $0x20] sm:$0x7f] }
 0x24d   : > { %v1245_v47 = vpop.permute.xlu1 %1244  ;;  %1607 = vst.msk [vmem:[#allocation3 + $0x18] sm:$0x7f] %vm1183_vm3, %v1591_v17 }
 0x24e   : > { %v1277_v38 = vadd.f32 %v1245_v47, %v1207_v21  ;;  %v1425_v24 = vpop.permute.xlu0 %1424 }
 0x24f   : > { %1744 = vrot.lane.b32.xlu1 %v6285_v10, %s5576_s18  ;;  %v1466_v14 = vadd.f32 %v1425_v24, %v1400_v11  ;;  %v1622_v10 = vld [vmem:[#allocation3 + $0x11] sm:$0x7f] }
 0x250   : > { %1291 = vst.msk [vmem:[#allocation3 + $0x58] sm:$0xff] %vm1137_vm2, %v1277_v38  ;;  %1252 = vrot.lane.b32.xlu0 %v6298_v46, %s5574_s16  ;;  %v1497_v2 = vld [vmem:[#allocation3 + $0x28] sm:$0x7f]  ;;  %v1304_v48 = vld [vmem:[#allocation3 + $0x50] sm:$0x7f]  ;;  %v1075_v38 = vld [vmem:[#allocation2 + $0x40] sm:$0xff] }
 0x251   : > { %v1637_v22 = vpop.permute.xlu1 %1636  ;;  %1482 = vst.msk [vmem:[#allocation3 + $0x31] sm:$0x7f] %vm1183_vm3, %v1466_v14  ;;  %v1817_v24 = vrot.slane %v1075_v38, 1  ;;  %v1084_v38 = vld [vmem:[#allocation2 + $0x88] sm:$0xff] }
 0x252   : > { %v1677_v52 = vadd.f32 %v1637_v22, %v1621_v51  ;;  %v1339_v25 = vpop.permute.xlu0 %1338 }
 0x253   : > { %1350 = vrot.lane.b32.xlu1 %v1323_v18, %s5575_s8  ;;  %v1373_v61 = vadd.f32 %v1339_v25, %v1303_v43  ;;  %v1704_v30 = vld [vmem:[#allocation3] sm:$0xff]  ;;  %v1204_v18 = vld [vmem:[#allocation3 + $0x38] sm:$0xff] }
 0x254   : > { %1691 = vst.msk [vmem:[#allocation3 + $0x9] sm:$0x7f] %vm1183_vm3, %v1677_v52  ;;  %1442 = vrot.lane.b32.xlu0 %v1111_v54, %s5576_s18  ;;  %v1623_v50 = vld [vmem:[#allocation3 + $0x19] sm:$0x7f] }
 0x255   : > { %v1549_v16 = vpop.permute.xlu1 %1548  ;;  %1387 = vst.msk [vmem:[#allocation3 + $0x48] sm:$0x7f] %vm1183_vm3, %v1373_v61 }
 0x256   : > { %v1592_v20 = vadd.f32 %v1549_v16, %v1496_v9  ;;  %v1247_v57 = vpop.permute.xlu0 %1246 }
 0x257   : > { %1570 = vrot.lane.b32.xlu1 %v1539_v56, %s5574_s16  ;;  %v1278_v26 = vadd.f32 %v1247_v57, %v1208_v23  ;;  %v1305_v36 = vld [vmem:[#allocation3 + $0x58] sm:$0x7f] }
 0x258   : > { %1608 = vst.msk [vmem:[#allocation3 + $0x20] sm:$0x7f] %vm1183_vm3, %v1592_v20  ;;  %2109 = vrot.lane.b32.xlu0 %v5110_v45, %s5575_s8  ;;  %v1498_v5 = vld [vmem:[#allocation3 + $0x30] sm:$0x7f] }
 0x259   : > { %v1639_v46 = vpop.permute.xlu1 %1638  ;;  %1292 = vst.msk [vmem:[#allocation3 + $0x60] sm:$0xff] %vm1137_vm2, %v1278_v26  ;;  %v1078_v26 = vld [vmem:[#allocation2 + $0x58] sm:$0xff] }
 0x25a   : > { %v1678_v59 = vadd.f32 %v1639_v46, %v1622_v10  ;;  %v1341_v44 = vpop.permute.xlu0 %1340 }
 0x25b   : > { %v1374_v7 = vadd.f32 %v1341_v44, %v1304_v48  ;;  %v1705_v63 = vld [vmem:[#allocation3 + $0x8] sm:$0xff]  ;;  %v1818_v48 = vrot.slane %v1078_v26, 1 }
 0x25c   : > { %1692 = vst.msk [vmem:[#allocation3 + $0x11] sm:$0x7f] %vm1183_vm3, %v1678_v59  ;;  %v1403_v47 = vld [vmem:[#allocation3 + $0x49] sm:$0x7f] }
 0x25d   : > { %v1551_v27 = vpop.permute.xlu1 %1550  ;;  %1388 = vst.msk [vmem:[#allocation3 + $0x50] sm:$0x7f] %vm1183_vm3, %v1374_v7 }
 0x25e   : > { %v1593_v62 = vadd.f32 %v1551_v27, %v1497_v2  ;;  %v1719_v37 = vpop.permute.xlu0 %1718 }
 0x25f   : > { %v1760_v1 = vadd.f32 %v1719_v37, %v1704_v30  ;;  %v1624_v35 = vld [vmem:[#allocation3 + $0x21] sm:$0x7f] }
 0x260   : > { %1609 = vst.msk [vmem:[#allocation3 + $0x28] sm:$0x7f] %vm1183_vm3, %v1593_v62  ;;  %v1306_v22 = vld [vmem:[#allocation3 + $0x60] sm:$0x7f] }
 0x261   : > { %v1249_v29 = vpop.permute.xlu1 %1248  ;;  %1774 = vst.msk [vmem:[#allocation3] sm:$0xff] %vm1137_vm2, %v1760_v1 }
 0x262   : > { %v1279_v8 = vadd.f32 %v1249_v29, %v1209_v31  ;;  %v1429_v32 = vpop.permute.xlu0 %1428 }
 0x263   : > { %v1468_v12 = vadd.f32 %v1429_v32, %v1402_v40  ;;  %v1706_v20 = vld [vmem:[#allocation3 + $0x10] sm:$0xff] }
 0x264   : > { %1293 = vst.msk [vmem:[#allocation3 + $0x68] sm:$0xff] %vm1137_vm2, %v1279_v8  ;;  %v1404_v16 = vld [vmem:[#allocation3 + $0x51] sm:$0x7f] }
 0x265   : > { %v1641_v0 = vpop.permute.xlu1 %1640  ;;  %1484 = vst.msk [vmem:[#allocation3 + $0x41] sm:$0x7f] %vm1183_vm3, %v1468_v12 }
 0x266   : > { %v1679_v49 = vadd.f32 %v1641_v0, %v1623_v50  ;;  %v1343_v53 = vpop.permute.xlu0 %1342  ;;  %v1081_v50 = vld [vmem:[#allocation2 + $0x70] sm:$0xff] }
 0x267   : > { %v1375_v13 = vadd.f32 %v1343_v53, %v1305_v36  ;;  %v1625_v57 = vld [vmem:[#allocation3 + $0x29] sm:$0x7f]  ;;  %v1819_v12 = vrot.slane %v1081_v50, 1 }
 0x268   : > { %1693 = vst.msk [vmem:[#allocation3 + $0x19] sm:$0x7f] %vm1183_vm3, %v1679_v49  ;;  %v1788_v60 = vld [vmem:[#allocation3] sm:$0x7f] }
 0x269   : > { %v1553_v42 = vpop.permute.xlu1 %1552  ;;  %v1844_v39 = vadd.f32 %v1816_v34, %v1788_v60  ;;  %1389 = vst.msk [vmem:[#allocation3 + $0x58] sm:$0x7f] %vm1183_vm3, %v1375_v13 }
 0x26a   : > { %v1594_v19 = vadd.f32 %v1553_v42, %v1498_v5  ;;  %v1721_v33 = vpop.permute.xlu0 %1720 }
 0x26b   : > { %1858 = vst.msk [vmem:[#allocation3] sm:$0x7f] %vm1183_vm3, %v1844_v39  ;;  %v1761_v55 = vadd.f32 %v1721_v33, %v1705_v63  ;;  %v1307_v10 = vld [vmem:[#allocation3 + $0x68] sm:$0x7f] }
 0x26c   : > { %1610 = vst.msk [vmem:[#allocation3 + $0x30] sm:$0x7f] %vm1183_vm3, %v1594_v19  ;;  %v1500_v62 = vld [vmem:[#allocation3 + $0x40] sm:$0x7f] }
 0x26d   : > { %v1251_v4 = vpop.permute.xlu1 %1250  ;;  %1775 = vst.msk [vmem:[#allocation3 + $0x8] sm:$0xff] %vm1137_vm2, %v1761_v55 }
 0x26e   : > { %v1280_v41 = vadd.f32 %v1251_v4, %v1210_v58  ;;  %v1431_v15 = vpop.permute.xlu0 %1430 }
 0x26f   : > { %v1469_v17 = vadd.f32 %v1431_v15, %v1403_v47  ;;  %v1707_v27 = vld [vmem:[#allocation3 + $0x18] sm:$0xff] }
 0x270   : > { %1294 = vst.msk [vmem:[#allocation3 + $0x70] sm:$0xff] %vm1137_vm2, %v1280_v41  ;;  %v1405_v3 = vld [vmem:[#allocation3 + $0x59] sm:$0x7f] }
 0x271   : > { %v1643_v21 = vpop.permute.xlu1 %1642  ;;  %1485 = vst.msk [vmem:[#allocation3 + $0x49] sm:$0x7f] %vm1183_vm3, %v1469_v17 }
 0x272   : > { %v1680_v6 = vadd.f32 %v1643_v21, %v1624_v35  ;;  %v1239_v11 = vpop.permute.xlu0 %1238  ;;  %v1872_v14 = vld [vmem:[#allocation3] sm:$0xff] }
 0x273   : > { %v1274_v56 = vadd.f32 %v1239_v11, %v1204_v18  ;;  %5094 = vmatmul.mubr.msk.f32.vlgmr.msra.gmra.mrb[0].mxu0 %vm1137_vm2, %v1872_v14  ;;  %v1626_v8 = vld [vmem:[#allocation3 + $0x31] sm:$0x7f] }
 0x274   : > { %1694 = vst.msk [vmem:[#allocation3 + $0x21] sm:$0x7f] %vm1183_vm3, %v1680_v6  ;;  %2013 = vmatprep.mubr.f32.mxu0 %v5577_v28  ;;  %v1789_v9 = vld [vmem:[#allocation3 + $0x8] sm:$0x7f] }
 0x275   : > { %v1345_v51 = vpop.permute.xlu1 %1344  ;;  %1288 = vst.msk [vmem:[#allocation3 + $0x38] sm:$0xff] %vm1137_vm2, %v1274_v56  ;;  %v1845_v43 = vadd.f32 %v1817_v24, %v1789_v9  ;;  %v1820_v24 = vrot.slane %v1084_v38, 1 }
 0x276   : > { %v1376_v52 = vadd.f32 %v1345_v51, %v1306_v22  ;;  %v1723_v25 = vpop.permute.xlu0 %1722 }
 0x277   : > { %v1762_v23 = vadd.f32 %v1723_v25, %v1706_v20  ;;  %1859 = vst.msk [vmem:[#allocation3 + $0x8] sm:$0x7f] %vm1183_vm3, %v1845_v43  ;;  %v1308_v53 = vld [vmem:[#allocation3 + $0x70] sm:$0x7f] }
 0x278   : > { %1390 = vst.msk [vmem:[#allocation3 + $0x60] sm:$0x7f] %vm1183_vm3, %v1376_v52  ;;  %v1501_v34 = vld [vmem:[#allocation3 + $0x48] sm:$0x7f] }
 0x279   : > { %v1433_v54 = vpop.permute.xlu1 %1432  ;;  %1776 = vst.msk [vmem:[#allocation3 + $0x10] sm:$0xff] %vm1137_vm2, %v1762_v23  ;;  %v1087_v23 = vld [vmem:[#allocation2 + $0xa0] sm:$0xff] }
 0x27a   : > { %v1470_v61 = vadd.f32 %v1433_v54, %v1404_v16  ;;  %v1645_v45 = vpop.permute.xlu0 %1644 }
 0x27b   : > { %v1681_v2 = vadd.f32 %v1645_v45, %v1625_v57  ;;  %v1708_v33 = vld [vmem:[#allocation3 + $0x20] sm:$0xff]  ;;  %v1821_v57 = vrot.slane %v1087_v23, 1 }
 0x27c   : > { %1486 = vst.msk [vmem:[#allocation3 + $0x51] sm:$0x7f] %vm1183_vm3, %v1470_v61  ;;  %v1302_v60 = vld [vmem:[#allocation3 + $0x38] sm:$0x7f] }
 0x27d   : > { %v1347_v46 = vpop.permute.xlu1 %1346  ;;  %1695 = vst.msk [vmem:[#allocation3 + $0x29] sm:$0x7f] %vm1183_vm3, %v1681_v2 }
 0x27e   : > { %v1377_v59 = vadd.f32 %v1347_v46, %v1307_v10  ;;  %v1557_v7 = vpop.permute.xlu0 %1556  ;;  %v1873_v29 = vld [vmem:[#allocation3 + $0x8] sm:$0xff] }
 0x27f   : > { %v1596_v37 = vadd.f32 %v1557_v7, %v1500_v62  ;;  %5095 = vmatmul.mubr.msk.f32.gmra.mrb[2].mxu0 %vm1137_vm2, %v1873_v29  ;;  %v1406_v15 = vld [vmem:[#allocation3 + $0x61] sm:$0x7f] }
 0x280   : > { %1391 = vst.msk [vmem:[#allocation3 + $0x68] sm:$0x7f] %vm1183_vm3, %v1377_v59  ;;  %2019 = vmatprep.mubr.f32.mxu0 %v5577_v28  ;;  %v1790_v30 = vld [vmem:[#allocation3 + $0x10] sm:$0x7f] }
 0x281   : > { %v1725_v44 = vpop.permute.xlu1 %1724  ;;  %1612 = vst.msk [vmem:[#allocation3 + $0x40] sm:$0x7f] %vm1183_vm3, %v1596_v37  ;;  %v1846_v40 = vadd.f32 %v1818_v48, %v1790_v30 }
 0x282   : > { %v1763_v31 = vadd.f32 %v1725_v44, %v1707_v27  ;;  %v1435_v0 = vpop.permute.xlu0 %1434 }
 0x283   : > { %v1471_v49 = vadd.f32 %v1435_v0, %v1405_v3  ;;  %1860 = vst.msk [vmem:[#allocation3 + $0x10] sm:$0x7f] %vm1183_vm3, %v1846_v40  ;;  %v1502_v35 = vld [vmem:[#allocation3 + $0x50] sm:$0x7f] }
 0x284   : > { %1777 = vst.msk [vmem:[#allocation3 + $0x18] sm:$0xff] %vm1137_vm2, %v1763_v31  ;;  %v1709_v52 = vld [vmem:[#allocation3 + $0x28] sm:$0xff] }
 0x285   : > { %v1647_v1 = vpop.permute.xlu1 %1646  ;;  %1487 = vst.msk [vmem:[#allocation3 + $0x59] sm:$0x7f] %vm1183_vm3, %v1471_v49 }
 0x286   : > { %v1682_v32 = vadd.f32 %v1647_v1, %v1626_v8  ;;  %v1349_v42 = vpop.permute.xlu0 %1348  ;;  %v1090_v8 = vld [vmem:[#allocation2 + $0xb8] sm:$0xff] }
 0x287   : > { %v1378_v19 = vadd.f32 %v1349_v42, %v1308_v53  ;;  %v1407_v18 = vld [vmem:[#allocation3 + $0x69] sm:$0x7f]  ;;  %v1822_v0 = vrot.slane %v1090_v8, 1 }
 0x288   : > { %1696 = vst.msk [vmem:[#allocation3 + $0x31] sm:$0x7f] %vm1183_vm3, %v1682_v32  ;;  %v1627_v25 = vld [vmem:[#allocation3 + $0x41] sm:$0x7f] }
 0x289   : > { %v1559_v5 = vpop.permute.xlu1 %1558  ;;  %1392 = vst.msk [vmem:[#allocation3 + $0x70] sm:$0x7f] %vm1183_vm3, %v1378_v19 }
 0x28a   : > { %v1597_v36 = vadd.f32 %v1559_v5, %v1501_v34  ;;  %v1727_v4 = vpop.permute.xlu0 %1726  ;;  %v1874_v41 = vld [vmem:[#allocation3 + $0x10] sm:$0xff] }
 0x28b   : > { %v1791_v13 = vld [vmem:[#allocation3 + $0x18] sm:$0x7f]  ;;  %v1764_v55 = vadd.f32 %v1727_v4, %v1708_v33  ;;  %5096 = vmatmul.mubr.msk.f32.gmra.mrb[4].mxu0 %vm1137_vm2, %v1874_v41 }
 0x28c   : > { %1613 = vst.msk [vmem:[#allocation3 + $0x48] sm:$0x7f] %vm1183_vm3, %v1597_v36  ;;  %v1847_v58 = vadd.f32 %v1819_v12, %v1791_v13  ;;  %2025 = vmatprep.mubr.f32.mxu0 %v5577_v28  ;;  %v1503_v16 = vld [vmem:[#allocation3 + $0x58] sm:$0x7f] }
 0x28d   : > { %v1337_v39 = vpop.permute.xlu1 %1336  ;;  %1778 = vst.msk [vmem:[#allocation3 + $0x20] sm:$0xff] %vm1137_vm2, %v1764_v55 }
 0x28e   : > { %v1372_v63 = vadd.f32 %v1337_v39, %v1302_v60  ;;  %1861 = vst.msk [vmem:[#allocation3 + $0x18] sm:$0x7f] %vm1183_vm3, %v1847_v58  ;;  %v1437_v47 = vpop.permute.xlu0 %1436  ;;  %v1095_v39 = vld [vmem:[#allocation2 + $0xe8] sm:$0xff] }
 0x28f   : > { %v1472_v17 = vadd.f32 %v1437_v47, %v1406_v15  ;;  %v1710_v26 = vld [vmem:[#allocation3 + $0x30] sm:$0xff] }
 0x290   : > { %1386 = vst.msk [vmem:[#allocation3 + $0x38] sm:$0x7f] %vm1183_vm3, %v1372_v63  ;;  %v1408_v46 = vld [vmem:[#allocation3 + $0x71] sm:$0x7f] }
 0x291   : > { %v1561_v21 = vpop.permute.xlu1 %1560  ;;  %1488 = vst.msk [vmem:[#allocation3 + $0x61] sm:$0x7f] %vm1183_vm3, %v1472_v17 }
 0x292   : > { %v1598_v6 = vadd.f32 %v1561_v21, %v1502_v35  ;;  %v1729_v11 = vpop.permute.xlu0 %1728  ;;  %v1823_v21 = vrot.slane %v1095_v39, 1 }
 0x293   : > { %v1765_v56 = vadd.f32 %v1729_v11, %v1709_v52  ;;  %v1628_v29 = vld [vmem:[#allocation3 + $0x49] sm:$0x7f] }
 0x294   : > { %1614 = vst.msk [vmem:[#allocation3 + $0x50] sm:$0x7f] %vm1183_vm3, %v1598_v6  ;;  %v1792_v9 = vld [vmem:[#allocation3 + $0x20] sm:$0x7f] }
 0x295   : > { %v1439_v22 = vpop.permute.xlu1 %1438  ;;  %v1875_v51 = vld [vmem:[#allocation3 + $0x18] sm:$0xff]  ;;  %1779 = vst.msk [vmem:[#allocation3 + $0x28] sm:$0xff] %vm1137_vm2, %v1765_v56  ;;  %v1848_v43 = vadd.f32 %v1820_v24, %v1792_v9 }
 0x296   : > { %v1473_v14 = vadd.f32 %v1439_v22, %v1407_v18  ;;  %5097 = vmatmul.mubr.msk.f32.gmra.mrb[6].mxu0 %vm1137_vm2, %v1875_v51  ;;  %v1649_v20 = vpop.permute.xlu0 %1648 }
 0x297   : > { %2031 = vmatprep.mubr.f32.mxu0 %v5577_v28  ;;  %v1683_v10 = vadd.f32 %v1649_v20, %v1627_v25  ;;  %1862 = vst.msk [vmem:[#allocation3 + $0x20] sm:$0x7f] %vm1183_vm3, %v1848_v43  ;;  %v1401_v48 = vld [vmem:[#allocation3 + $0x39] sm:$0x7f] }
 0x298   : > { %1489 = vst.msk [vmem:[#allocation3 + $0x69] sm:$0x7f] %vm1183_vm3, %v1473_v14  ;;  %v1504_v32 = vld [vmem:[#allocation3 + $0x60] sm:$0x7f] }
 0x299   : > { %v1563_v54 = vpop.permute.xlu1 %1562  ;;  %1697 = vst.msk [vmem:[#allocation3 + $0x41] sm:$0x7f] %vm1183_vm3, %v1683_v10 }
 0x29a   : > { %v1599_v61 = vadd.f32 %v1563_v54, %v1503_v16  ;;  %v1731_v59 = vpop.permute.xlu0 %1730  ;;  %v1098_v16 = vld [vmem:[#allocation2 + $0x100] sm:$0xff] }
 0x29b   : > { %v1766_v27 = vadd.f32 %v1731_v59, %v1710_v26  ;;  %v1629_v40 = vld [vmem:[#allocation3 + $0x51] sm:$0x7f]  ;;  %v1824_v20 = vrot.slane %v1098_v16, 1 }
 0x29c   : > { %1615 = vst.msk [vmem:[#allocation3 + $0x58] sm:$0x7f] %vm1183_vm3, %v1599_v61  ;;  %v1793_v44 = vld [vmem:[#allocation3 + $0x28] sm:$0x7f]  ;;  %v1101_v61 = vld [vmem:[#allocation2 + $0x118] sm:$0xff] }
 0x29d   : > { %v1441_v45 = vpop.permute.xlu1 %1440  ;;  %1780 = vst.msk [vmem:[#allocation3 + $0x30] sm:$0xff] %vm1137_vm2, %v1766_v27  ;;  %v1849_v7 = vadd.f32 %v1821_v57, %v1793_v44  ;;  %v1825_v26 = vrot.slane %v1101_v61, 1  ;;  %v1104_v27 = vld [vmem:[#allocation2 + $0x130] sm:$0xff] }
 0x29e   : > { %v1474_v2 = vadd.f32 %v1441_v45, %v1408_v46  ;;  %v1651_v31 = vpop.permute.xlu0 %1650  ;;  %v1876_v30 = vld [vmem:[#allocation3 + $0x20] sm:$0xff]  ;;  %v1826_v8 = vrot.slane %v1104_v27, 1 }
 0x29f   : > { %v1684_v1 = vadd.f32 %v1651_v31, %v1628_v29  ;;  %5098 = vmatmul.mubr.msk.f32.gmra.mrb[8].mxu0 %vm1137_vm2, %v1876_v30  ;;  %1863 = vst.msk [vmem:[#allocation3 + $0x28] sm:$0x7f] %vm1183_vm3, %v1849_v7  ;;  %v1505_v19 = vld [vmem:[#allocation3 + $0x68] sm:$0x7f] }
 0x2a0   : > { %1490 = vst.msk [vmem:[#allocation3 + $0x71] sm:$0x7f] %vm1183_vm3, %v1474_v2  ;;  %2037 = vmatprep.mubr.f32.mxu0 %v5577_v28  ;;  %v1711_v5 = vld [vmem:[#allocation3 + $0x40] sm:$0xff] }
 0x2a1   : > { %v1427_v62 = vpop.permute.xlu1 %1426  ;;  %1698 = vst.msk [vmem:[#allocation3 + $0x49] sm:$0x7f] %vm1183_vm3, %v1684_v1 }
 0x2a2   : > { %v1467_v37 = vadd.f32 %v1427_v62, %v1401_v48  ;;  %v1565_v3 = vpop.permute.xlu0 %1564 }
 0x2a3   : > { %v1600_v12 = vadd.f32 %v1565_v3, %v1504_v32  ;;  %v1630_v41 = vld [vmem:[#allocation3 + $0x59] sm:$0x7f] }
 0x2a4   : > { %1483 = vst.msk [vmem:[#allocation3 + $0x39] sm:$0x7f] %vm1183_vm3, %v1467_v37  ;;  %v1794_v34 = vld [vmem:[#allocation3 + $0x30] sm:$0x7f]  ;;  %v1211_v3 = vld [vmem:[#allocation3 + $0x78] sm:$0xff] }
 0x2a5   : > { %v1653_v50 = vpop.permute.xlu1 %1652  ;;  %1616 = vst.msk [vmem:[#allocation3 + $0x60] sm:$0x7f] %vm1183_vm3, %v1600_v12  ;;  %v1850_v53 = vadd.f32 %v1822_v0, %v1794_v34 }
 0x2a6   : > { %v1685_v49 = vadd.f32 %v1653_v50, %v1629_v40  ;;  %v1567_v36 = vpop.permute.xlu0 %1566  ;;  %v1877_v58 = vld [vmem:[#allocation3 + $0x28] sm:$0xff] }
 0x2a7   : > { %v1601_v60 = vadd.f32 %v1567_v36, %v1505_v19  ;;  %5099 = vmatmul.mubr.msk.f32.gmra.mrb[10].mxu0 %vm1137_vm2, %v1877_v58  ;;  %1864 = vst.msk [vmem:[#allocation3 + $0x30] sm:$0x7f] %vm1183_vm3, %v1850_v53  ;;  %v1506_v4 = vld [vmem:[#allocation3 + $0x70] sm:$0x7f] }
 0x2a8   : > { %1699 = vst.msk [vmem:[#allocation3 + $0x51] sm:$0x7f] %vm1183_vm3, %v1685_v49  ;;  %2043 = vmatprep.mubr.f32.mxu0 %v5577_v28  ;;  %v1712_v38 = vld [vmem:[#allocation3 + $0x48] sm:$0xff] }
 0x2a9   : > { %v1733_v42 = vpop.permute.xlu1 %1732  ;;  %1617 = vst.msk [vmem:[#allocation3 + $0x68] sm:$0x7f] %vm1183_vm3, %v1601_v60  ;;  %v1107_v49 = vld [vmem:[#allocation2 + $0x148] sm:$0xff] }
 0x2aa   : > { %v1767_v13 = vadd.f32 %v1733_v42, %v1711_v5  ;;  %v1655_v63 = vpop.permute.xlu0 %1654  ;;  %v1827_v36 = vrot.slane %v1107_v49, 1 }
 0x2ab   : > { %v1686_v35 = vadd.f32 %v1655_v63, %v1630_v41  ;;  %v1499_v47 = vld [vmem:[#allocation3 + $0x38] sm:$0x7f] }
 0x2ac   : > { %1781 = vst.msk [vmem:[#allocation3 + $0x40] sm:$0xff] %vm1137_vm2, %v1767_v13  ;;  %v1631_v56 = vld [vmem:[#allocation3 + $0x61] sm:$0x7f]  ;;  %v1113_v63 = vld [vmem:[#allocation2 + $0x178] sm:$0xff] }
 0x2ad   : > { %v1569_v33 = vpop.permute.xlu1 %1568  ;;  %1700 = vst.msk [vmem:[#allocation3 + $0x59] sm:$0x7f] %vm1183_vm3, %v1686_v35  ;;  %v1110_v13 = vld [vmem:[#allocation2 + $0x160] sm:$0xff] }
 0x2ae   : > { %v1602_v55 = vadd.f32 %v1569_v33, %v1506_v4  ;;  %v1735_v6 = vpop.permute.xlu0 %1734  ;;  %v1878_v18 = vld [vmem:[#allocation3 + $0x30] sm:$0xff]  ;;  %v1828_v33 = vrot.slane %v1110_v13, 1 }
 0x2af   : > { %v1768_v51 = vadd.f32 %v1735_v6, %v1712_v38  ;;  %5100 = vmatmul.mubr.msk.f32.gmra.mrb[12].mxu0 %vm1137_vm2, %v1878_v18  ;;  %v1713_v11 = vld [vmem:[#allocation3 + $0x50] sm:$0xff] }
 0x2b0   : > { %1618 = vst.msk [vmem:[#allocation3 + $0x70] sm:$0x7f] %vm1183_vm3, %v1602_v55  ;;  %2049 = vmatprep.mubr.f32.mxu0 %v5577_v28  ;;  %v1632_v10 = vld [vmem:[#allocation3 + $0x69] sm:$0x7f] }
 0x2b1   : > { %v1555_v15 = vpop.permute.xlu1 %1554  ;;  %1782 = vst.msk [vmem:[#allocation3 + $0x48] sm:$0xff] %vm1137_vm2, %v1768_v51 }
 0x2b2   : > { %v1595_v17 = vadd.f32 %v1555_v15, %v1499_v47  ;;  %v1657_v14 = vpop.permute.xlu0 %1656  ;;  %v1829_v47 = vrot.slane %v1113_v63, 1 }
 0x2b3   : > { %v1795_v22 = vld [vmem:[#allocation3 + $0x40] sm:$0x7f]  ;;  %v1687_v54 = vadd.f32 %v1657_v14, %v1631_v56 }
 0x2b4   : > { %v1851_v24 = vadd.f32 %v1823_v21, %v1795_v22  ;;  %1611 = vst.msk [vmem:[#allocation3 + $0x38] sm:$0x7f] %vm1183_vm3, %v1595_v17  ;;  %v1714_v43 = vld [vmem:[#allocation3 + $0x58] sm:$0xff] }
 0x2b5   : > { %v1737_v52 = vpop.permute.xlu1 %1736  ;;  %1701 = vst.msk [vmem:[#allocation3 + $0x61] sm:$0x7f] %vm1183_vm3, %v1687_v54 }
 0x2b6   : > { %1865 = vst.msk [vmem:[#allocation3 + $0x40] sm:$0x7f] %vm1183_vm3, %v1851_v24  ;;  %v1769_v9 = vadd.f32 %v1737_v52, %v1713_v11  ;;  %v1659_v23 = vpop.permute.xlu0 %1658 }
 0x2b7   : > { %v1688_v45 = vadd.f32 %v1659_v23, %v1632_v10  ;;  %v1633_v48 = vld [vmem:[#allocation3 + $0x71] sm:$0x7f] }
 0x2b8   : > { %1783 = vst.msk [vmem:[#allocation3 + $0x50] sm:$0xff] %vm1137_vm2, %v1769_v9  ;;  %v1796_v59 = vld [vmem:[#allocation3 + $0x48] sm:$0x7f] }
 0x2b9   : > { %v1739_v25 = vpop.permute.xlu1 %1738  ;;  %1702 = vst.msk [vmem:[#allocation3 + $0x69] sm:$0x7f] %vm1183_vm3, %v1688_v45  ;;  %v1852_v2 = vadd.f32 %v1824_v20, %v1796_v59 }
 0x2ba   : > { %v1770_v46 = vadd.f32 %v1739_v25, %v1714_v43  ;;  %v1661_v44 = vpop.permute.xlu0 %1660 }
 0x2bb   : > { %v1879_v57 = vld [vmem:[#allocation3 + $0x38] sm:$0xff]  ;;  %v1689_v7 = vadd.f32 %v1661_v44, %v1633_v48  ;;  %1866 = vst.msk [vmem:[#allocation3 + $0x48] sm:$0x7f] %vm1183_vm3, %v1852_v2 }
 0x2bc   : > { %1784 = vst.msk [vmem:[#allocation3 + $0x58] sm:$0xff] %vm1137_vm2, %v1770_v46  ;;  %5101 = vmatmul.mubr.msk.f32.gmra.mrb[14].mxu0 %vm1137_vm2, %v1879_v57  ;;  %v1715_v37 = vld [vmem:[#allocation3 + $0x60] sm:$0xff] }
 0x2bd   : > { %2055 = vmatprep.mubr.f32.mxu0 %v5577_v28  ;;  %v1741_v62 = vpop.permute.xlu1 %1740  ;;  %v1880_v31 = vld [vmem:[#allocation3 + $0x40] sm:$0xff]  ;;  %1703 = vst.msk [vmem:[#allocation3 + $0x71] sm:$0x7f] %vm1183_vm3, %v1689_v7 }
 0x2be   : > { %v1771_v1 = vadd.f32 %v1741_v62, %v1715_v37  ;;  %v1743_v40 = vpop.permute.xlu0 %1742 }
 0x2bf   : > { %v1797_v29 = vld [vmem:[#allocation3 + $0x50] sm:$0x7f] }
 0x2c0   : > { %5102 = vmatmul.mubr.msk.f32.gmra.mrb[16].mxu0 %vm1137_vm2, %v1880_v31  ;;  %v1853_v30 = vadd.f32 %v1825_v26, %v1797_v29  ;;  %1785 = vst.msk [vmem:[#allocation3 + $0x60] sm:$0xff] %vm1137_vm2, %v1771_v1  ;;  %v1716_v0 = vld [vmem:[#allocation3 + $0x68] sm:$0xff] }
 0x2c1   : > { %2060 = vmatprep.mubr.f32.mxu0 %v5577_v28  ;;  %v1772_v12 = vadd.f32 %v1743_v40, %v1716_v0  ;;  %v1745_v42 = vpop.permute.xlu1 %1744 }
 0x2c2   : > { %1867 = vst.msk [vmem:[#allocation3 + $0x50] sm:$0x7f] %vm1183_vm3, %v1853_v30  ;;  %v1253_v34 = vpop.permute.xlu0 %1252  ;;  %v1881_v5 = vld [vmem:[#allocation3 + $0x48] sm:$0xff] }
 0x2c3   : > { %v1798_v50 = vld [vmem:[#allocation3 + $0x58] sm:$0x7f]  ;;  %1786 = vst.msk [vmem:[#allocation3 + $0x68] sm:$0xff] %vm1137_vm2, %v1772_v12  ;;  %v1281_v53 = vadd.f32 %v1253_v34, %v1211_v3 }
 0x2c4   : > { %v1854_v32 = vadd.f32 %v1826_v8, %v1798_v50  ;;  %5103 = vmatmul.mubr.msk.f32.gmra.mrb[18].mxu0 %vm1137_vm2, %v1881_v5  ;;  %v1717_v19 = vld [vmem:[#allocation3 + $0x70] sm:$0xff] }
 0x2c5   : > { %2066 = vmatprep.mubr.f32.mxu0 %v5577_v28  ;;  %1295 = vst.msk [vmem:[#allocation3 + $0x78] sm:$0xff] %vm1137_vm2, %v1281_v53  ;;  %v1773_v58 = vadd.f32 %v1745_v42, %v1717_v19  ;;  %v1351_v55 = vpop.permute.xlu1 %1350 }
 0x2c6   : > { %1868 = vst.msk [vmem:[#allocation3 + $0x58] sm:$0x7f] %vm1183_vm3, %v1854_v32  ;;  %v1443_v51 = vpop.permute.xlu0 %1442 }
 0x2c7   : > { %v1799_v39 = vld [vmem:[#allocation3 + $0x60] sm:$0x7f]  ;;  %1787 = vst.msk [vmem:[#allocation3 + $0x70] sm:$0xff] %vm1137_vm2, %v1773_v58 }
 0x2c8   : > { %v1855_v4 = vadd.f32 %v1827_v36, %v1799_v39 }
 0x2c9   : > { %v1882_v60 = vld [vmem:[#allocation3 + $0x50] sm:$0xff]  ;;  %v1571_v14 = vpop.permute.xlu1 %1570 }
 0x2ca   : > { %5104 = vmatmul.mubr.msk.f32.gmra.mrb[20].mxu0 %vm1137_vm2, %v1882_v60  ;;  %1869 = vst.msk [vmem:[#allocation3 + $0x60] sm:$0x7f] %vm1183_vm3, %v1855_v4  ;;  %v1800_v35 = vld [vmem:[#allocation3 + $0x68] sm:$0x7f]  ;;  %v6594_v54 = vpop.permute.xlu0 %2109 }
 0x2cb   : > { %2072 = vmatprep.mubr.f32.mxu0 %v5577_v28  ;;  %v1856_v21 = vadd.f32 %v1828_v33, %v1800_v35 }
 0x2cc   : > { %v1309_v15 = vld [vmem:[#allocation3 + $0x78] sm:$0x7f] }
 0x2cd   : > { %v1883_v41 = vld [vmem:[#allocation3 + $0x58] sm:$0xff]  ;;  %v1379_v6 = vadd.f32 %v1351_v55, %v1309_v15  ;;  %1870 = vst.msk [vmem:[#allocation3 + $0x68] sm:$0x7f] %vm1183_vm3, %v1856_v21 }
 0x2ce   : > { %5105 = vmatmul.mubr.msk.f32.gmra.mrb[22].mxu0 %vm1137_vm2, %v1883_v41  ;;  %v1801_v38 = vld [vmem:[#allocation3 + $0x70] sm:$0x7f] }
 0x2cf   : > { %2078 = vmatprep.mubr.f32.mxu0 %v5577_v28  ;;  %1393 = vst.msk [vmem:[#allocation3 + $0x78] sm:$0x7f] %vm1183_vm3, %v1379_v6  ;;  %v1857_v17 = vadd.f32 %v1829_v47, %v1801_v38 }
 0x2d1   : > { %v1884_v18 = vld [vmem:[#allocation3 + $0x60] sm:$0xff]  ;;  %1871 = vst.msk [vmem:[#allocation3 + $0x70] sm:$0x7f] %vm1183_vm3, %v1857_v17 }
 0x2d2   : > { %5106 = vmatmul.mubr.msk.f32.gmra.mrb[24].mxu0 %vm1137_vm2, %v1884_v18 }
 0x2d3   : > { %2084 = vmatprep.mubr.f32.mxu0 %v5577_v28 }
 0x2d4   : > { %v1885_v22 = vld [vmem:[#allocation3 + $0x68] sm:$0xff] }
 0x2d6   : > { %5107 = vmatmul.mubr.msk.f32.gmra.mrb[26].mxu0 %vm1137_vm2, %v1885_v22  ;;  %v1409_v24 = vld [vmem:[#allocation3 + $0x79] sm:$0x7f] }
 0x2d7   : > { %2090 = vmatprep.mubr.f32.mxu0 %v5577_v28  ;;  %v1475_v11 = vadd.f32 %v1443_v51, %v1409_v24 }
 0x2d8   : > { %v1886_v52 = vld [vmem:[#allocation3 + $0x70] sm:$0xff] }
 0x2d9   : > { %1491 = vst.msk [vmem:[#allocation3 + $0x79] sm:$0x7f] %vm1183_vm3, %v1475_v11 }
 0x2da   : > { %5108 = vmatmul.mubr.msk.f32.gmra.mrb[28].mxu0 %vm1137_vm2, %v1886_v52 }
 0x2db   : > { %2096 = vmatprep.mubr.f32.mxu0 %v5577_v28 }
 0x2e0   : > { %v1507_v56 = vld [vmem:[#allocation3 + $0x78] sm:$0x7f] }
 0x2e1   : > { %v1603_v9 = vadd.f32 %v1571_v14, %v1507_v56 }
 0x2e3   : > { %1619 = vst.msk [vmem:[#allocation3 + $0x78] sm:$0x7f] %vm1183_vm3, %v1603_v9 }
 0x2ea   : > { %v1887_v16 = vld [vmem:[#allocation3 + $0x78] sm:$0xff] }
 0x2eb   : > { %5109 = vmatmul.mubr.msk.f32.gmra.mrb[30].mxu0 %vm1137_vm2, %v1887_v16 }
 0x346   : > { %v6596_v43 = vpop.f32.mrb[0].mxu0 }
 0x347   : > { %2467 = vrot.lane.b32.xlu1 %v6596_v43, %s5578_s21  ;;  %2281 = vrot.lane.b32.xlu0 %v6596_v43, %s5579_s22  ;;  %v2012_v28 = vpop.f32.mrb[1].mxu0  ;;  %v2365_v25 = vrot.slane %v6596_v43, 1  ;;  %v2112_v20 = vadd.f32 %v6594_v54, %v6596_v43 }
 0x34b   : > { %2379 = vrot.lane.b32.xlu0 %v2365_v25, %s5574_s16  ;;  %2144 = vrot.lane.b32.xlu1 %v2112_v20, %s5575_s8 }
 0x34f   : > { %2565 = vrot.lane.b32.xlu0 %v2365_v25, %s5580_s23 }
 0x352   : > { %v6608_v61 = vpop.f32.mrb[2].mxu0 }
 0x353   : > { %2659 = vrot.lane.b32.xlu0 %v6608_v61, %s5576_s18  ;;  %2283 = vrot.lane.b32.xlu1 %v6608_v61, %s5579_s22  ;;  %v6614_v23 = vpop.f32.mrb[3].mxu0  ;;  %v2366_v10 = vrot.slane %v6608_v61, 1  ;;  %v2113_v46 = vadd.f32 %v6594_v54, %v6608_v61 }
 0x357   : > { %2469 = vrot.lane.b32.xlu1 %v6608_v61, %s5578_s21  ;;  %2567 = vrot.lane.b32.xlu0 %v2366_v10, %s5580_s23 }
 0x35b   : > { %2146 = vrot.lane.b32.xlu1 %v2113_v46, %s5575_s8 }
 0x35e   : > { %v6623_v45 = vpop.f32.mrb[4].mxu0 }
 0x35f   : > { %2381 = vrot.lane.b32.xlu1 %v2366_v10, %s5574_s16  ;;  %2285 = vrot.lane.b32.xlu0 %v6623_v45, %s5579_s22  ;;  %v6628_v57 = vpop.f32.mrb[5].mxu0  ;;  %v2367_v26 = vrot.slane %v6623_v45, 1  ;;  %v2114_v2 = vadd.f32 %v6594_v54, %v6623_v45 }
 0x363   : > { %2661 = vrot.lane.b32.xlu1 %v6623_v45, %s5576_s18  ;;  %2471 = vrot.lane.b32.xlu0 %v6623_v45, %s5578_s21 }
 0x367   : > { %2569 = vrot.lane.b32.xlu1 %v2367_v26, %s5580_s23  ;;  %2148 = vrot.lane.b32.xlu0 %v2114_v2, %s5575_s8 }
 0x369   : > { %v6634_v59 = vpop.f32.mrb[6].mxu0 }
 0x36a   : > { %v6639_v27 = vpop.f32.mrb[7].mxu0  ;;  %v2368_v44 = vrot.slane %v6634_v59, 1  ;;  %v2115_v7 = vadd.f32 %v6594_v54, %v6634_v59 }
 0x36b   : > { %2383 = vrot.lane.b32.xlu0 %v2367_v26, %s5574_s16  ;;  %2287 = vrot.lane.b32.xlu1 %v6634_v59, %s5579_s22 }
 0x36f   : > { %2473 = vrot.lane.b32.xlu1 %v6634_v59, %s5578_s21  ;;  %2385 = vrot.lane.b32.xlu0 %v2368_v44, %s5574_s16 }
 0x372   : > { %v6650_v48 = vpop.f32.mrb[8].mxu0 }
 0x373   : > { %2663 = vrot.lane.b32.xlu1 %v6634_v59, %s5576_s18  ;;  %2289 = vrot.lane.b32.xlu0 %v6650_v48, %s5579_s22  ;;  %v6656_v62 = vpop.f32.mrb[9].mxu0  ;;  %v2116_v31 = vadd.f32 %v6594_v54, %v6650_v48  ;;  %v2369_v40 = vrot.slane %v6650_v48, 1 }
 0x377   : > { %2150 = vrot.lane.b32.xlu1 %v2115_v7, %s5575_s8  ;;  %2152 = vrot.lane.b32.xlu0 %v2116_v31, %s5575_s8 }
 0x37a   : > { %v6664_v29 = vpop.f32.mrb[10].mxu0 }
 0x37b   : > { %2571 = vrot.lane.b32.xlu1 %v2368_v44, %s5580_s23  ;;  %2291 = vrot.lane.b32.xlu0 %v6664_v29, %s5579_s22  ;;  %v6669_v37 = vpop.f32.mrb[11].mxu0  ;;  %v2370_v30 = vrot.slane %v6664_v29, 1  ;;  %v2117_v12 = vadd.f32 %v6594_v54, %v6664_v29 }
 0x37f   : > { %2475 = vrot.lane.b32.xlu1 %v6650_v48, %s5578_s21  ;;  %2477 = vrot.lane.b32.xlu0 %v6664_v29, %s5578_s21 }
 0x382   : > { %v6676_v8 = vpop.f32.mrb[12].mxu0 }
 0x383   : > { %2665 = vrot.lane.b32.xlu1 %v6650_v48, %s5576_s18  ;;  %2389 = vrot.lane.b32.xlu0 %v2370_v30, %s5574_s16  ;;  %v6681_v1 = vpop.f32.mrb[13].mxu0  ;;  %v2118_v3 = vadd.f32 %v6594_v54, %v6676_v8  ;;  %v2371_v34 = vrot.slane %v6676_v8, 1 }
 0x387   : > { %2387 = vrot.lane.b32.xlu1 %v2369_v40, %s5574_s16  ;;  %2575 = vrot.lane.b32.xlu0 %v2370_v30, %s5580_s23 }
 0x38b   : > { %2573 = vrot.lane.b32.xlu1 %v2369_v40, %s5580_s23  ;;  %2669 = vrot.lane.b32.xlu0 %v6676_v8, %s5576_s18 }
 0x38f   : > { %v6689_v50 = vpop.f32.mrb[14].mxu0  ;;  %2667 = vrot.lane.b32.xlu1 %v6664_v29, %s5576_s18  ;;  %2156 = vrot.lane.b32.xlu0 %v2118_v3, %s5575_s8 }
 0x390   : > { %v6691_v0 = vpop.f32.mrb[15].mxu0  ;;  %v2119_v13 = vadd.f32 %v6594_v54, %v6689_v50 }
 0x393   : > { %v6698_v32 = vpop.f32.mrb[16].mxu0  ;;  %2154 = vrot.lane.b32.xlu1 %v2117_v12, %s5575_s8  ;;  %2577 = vrot.lane.b32.xlu0 %v2371_v34, %s5580_s23 }
 0x394   : > { %v2059_v49 = vpop.f32.mrb[17].mxu0  ;;  %v2372_v53 = vrot.slane %v6698_v32, 1  ;;  %v2120_v33 = vadd.f32 %v6594_v54, %v6698_v32 }
 0x397   : > { %v6707_v5 = vpop.f32.mrb[18].mxu0  ;;  %2479 = vrot.lane.b32.xlu1 %v6676_v8, %s5578_s21  ;;  %2483 = vrot.lane.b32.xlu0 %v6698_v32, %s5578_s21 }
 0x398   : > { %v6713_v42 = vpop.f32.mrb[19].mxu0  ;;  %v2121_v21 = vadd.f32 %v6594_v54, %v6707_v5  ;;  %v2373_v15 = vrot.slane %v6707_v5, 1 }
 0x39b   : > { %2293 = vrot.lane.b32.xlu1 %v6676_v8, %s5579_s22  ;;  %2393 = vrot.lane.b32.xlu0 %v2372_v53, %s5574_s16 }
 0x39d   : > { %v6716_v36 = vpop.f32.mrb[20].mxu0 }
 0x39e   : > { %v6721_v19 = vpop.f32.mrb[21].mxu0  ;;  %v2122_v51 = vadd.f32 %v6594_v54, %v6716_v36  ;;  %v2374_v56 = vrot.slane %v6716_v36, 1 }
 0x39f   : > { %2158 = vrot.lane.b32.xlu1 %v2119_v13, %s5575_s8  ;;  %2581 = vrot.lane.b32.xlu0 %v2372_v53, %s5580_s23 }
 0x3a1   : > { %v6725_v58 = vpop.f32.mrb[22].mxu0 }
 0x3a2   : > { %v6729_v60 = vpop.f32.mrb[23].mxu0  ;;  %v2123_v47 = vadd.f32 %v6594_v54, %v6725_v58  ;;  %v2375_v6 = vrot.slane %v6725_v58, 1 }
 0x3a3   : > { %2295 = vrot.lane.b32.xlu1 %v6698_v32, %s5579_s22  ;;  %2297 = vrot.lane.b32.xlu0 %v6707_v5, %s5579_s22 }
 0x3a5   : > { %v6735_v39 = vpop.f32.mrb[24].mxu0 }
 0x3a6   : > { %v6737_v4 = vpop.f32.mrb[25].mxu0  ;;  %v2376_v24 = vrot.slane %v6735_v39, 1  ;;  %v2124_v10 = vadd.f32 %v6594_v54, %v6735_v39 }
 0x3a7   : > { %2160 = vrot.lane.b32.xlu1 %v2120_v33, %s5575_s8  ;;  %2299 = vrot.lane.b32.xlu0 %v6716_v36, %s5579_s22 }
 0x3a9   : > { %v6744_v63 = vpop.f32.mrb[26].mxu0 }
 0x3aa   : > { %v6746_v41 = vpop.f32.mrb[27].mxu0  ;;  %v2125_v46 = vadd.f32 %v6594_v54, %v6744_v63  ;;  %v2377_v44 = vrot.slane %v6744_v63, 1 }
 0x3ab   : > { %2485 = vrot.lane.b32.xlu1 %v6707_v5, %s5578_s21  ;;  %2489 = vrot.lane.b32.xlu0 %v6725_v58, %s5578_s21 }
 0x3ad   : > { %v6752_v55 = vpop.f32.mrb[28].mxu0 }
 0x3ae   : > { %v6754_v35 = vpop.f32.mrb[29].mxu0  ;;  %v2126_v7 = vadd.f32 %v6594_v54, %v6752_v55 }
 0x3af   : > { %2162 = vrot.lane.b32.xlu1 %v2121_v21, %s5575_s8  ;;  %2166 = vrot.lane.b32.xlu0 %v2123_v47, %s5575_s8 }
 0x3b3   : > { %2395 = vrot.lane.b32.xlu1 %v2373_v15, %s5574_s16  ;;  %2399 = vrot.lane.b32.xlu0 %v2375_v6, %s5574_s16 }
 0x3b7   : > { %2583 = vrot.lane.b32.xlu1 %v2373_v15, %s5580_s23  ;;  %2303 = vrot.lane.b32.xlu0 %v6735_v39, %s5579_s22 }
 0x3b9   : > { %v6769_v38 = vpop.permute.xlu0 %2281  ;;  %v2468_v17 = vpop.permute.xlu1 %2467 }
 0x3bb   : > { %2487 = vrot.lane.b32.xlu1 %v6716_v36, %s5578_s21  ;;  %2491 = vrot.lane.b32.xlu0 %v6735_v39, %s5578_s21 }
 0x3bd   : > { %v6775_v18 = vpop.permute.xlu0 %2379  ;;  %v2145_v22 = vpop.permute.xlu1 %2144 }
 0x3be   : > { %2193 = vst.msk [vmem:[#allocation4] sm:$0xff] %vm2192_vm4, %v2145_v22  ;;  %v6781_v11 = vpop.f32.mrb[30].mxu0 }
 0x3bf   : > { %2164 = vrot.lane.b32.xlu1 %v2122_v51, %s5575_s8  ;;  %2401 = vrot.lane.b32.xlu0 %v2376_v24, %s5574_s16  ;;  %v6785_v52 = vpop.f32.mrb[31].mxu0 }
 0x3c1   : > { %v2566_v14 = vpop.permute.xlu0 %2565 }
 0x3c3   : > { %2397 = vrot.lane.b32.xlu1 %v2374_v56, %s5574_s16  ;;  %2305 = vrot.lane.b32.xlu0 %v6744_v63, %s5579_s22 }
 0x3c5   : > { %v2449_v9 = vld [vmem:[#allocation4 + $0x1] sm:$0x7f]  ;;  %v6791_v16 = vpop.permute.xlu1 %2283  ;;  %v2660_v25 = vpop.permute.xlu0 %2659 }
 0x3c6   : > { %v2515_v28 = vadd.f32 %v2468_v17, %v2449_v9 }
 0x3c7   : > { %2301 = vrot.lane.b32.xlu1 %v6725_v58, %s5579_s22  ;;  %2493 = vrot.lane.b32.xlu0 %v6744_v63, %s5578_s21 }
 0x3c8   : > { %2531 = vst.msk [vmem:[#allocation4 + $0x1] sm:$0x7f] %vm2238_vm5, %v2515_v28 }
 0x3c9   : > { %v6798_v20 = vpop.permute.xlu1 %2469  ;;  %v6806_v26 = vpop.permute.xlu0 %2567 }
 0x3cb   : > { %2168 = vrot.lane.b32.xlu1 %v2124_v10, %s5575_s8  ;;  %2170 = vrot.lane.b32.xlu0 %v2125_v46, %s5575_s8 }
 0x3cd   : > { %v2147_v2 = vpop.permute.xlu1 %2146 }
 0x3ce   : > { %2194 = vst.msk [vmem:[#allocation4 + $0x8] sm:$0xff] %vm2192_vm4, %v2147_v2  ;;  %v2378_v2 = vrot.slane %v6752_v55, 1 }
 0x3cf   : > { %v2547_v31 = vld [vmem:[#allocation4] sm:$0x7f]  ;;  %2403 = vrot.lane.b32.xlu0 %v2377_v44, %s5574_s16  ;;  %2172 = vrot.lane.b32.xlu1 %v2126_v7, %s5575_s8 }
 0x3d0   : > { %v2613_v30 = vadd.f32 %v2566_v14, %v2547_v31 }
 0x3d1   : > { %v6814_v40 = vpop.permute.xlu1 %2381  ;;  %v6816_v3 = vpop.permute.xlu0 %2285 }
 0x3d2   : > { %2629 = vst.msk [vmem:[#allocation4] sm:$0x7f] %vm2238_vm5, %v2613_v30 }
 0x3d3   : > { %2495 = vrot.lane.b32.xlu0 %v6752_v55, %s5578_s21  ;;  %2585 = vrot.lane.b32.xlu1 %v2374_v56, %s5580_s23 }
 0x3d5   : > { %v2210_v49 = vld [vmem:[#allocation4 + $0x9] sm:$0x7f]  ;;  %v6822_v12 = vpop.permute.xlu1 %2661  ;;  %v6824_v53 = vpop.permute.xlu0 %2471 }
 0x3d6   : > { %v2224_v13 = vadd.f32 %v2210_v49, %v6596_v43  ;;  %v2913_v43 = vld [vmem:[%s8558_s5] sm:$0xff] }
 0x3d7   : > { %2743 = vrot.lane.b32.xlu0 %v6608_v61, %s5581_s24  ;;  %2587 = vrot.lane.b32.xlu1 %v2375_v6, %s5580_s23  ;;  %v2914_v6 = vld [vmem:[%s8558_s5 + $0x8] sm:$0xff] }
 0x3d8   : > { %2239 = vst.msk [vmem:[#allocation4 + $0x9] sm:$0x7f] %vm2238_vm5, %v2224_v13  ;;  %v5437_v17 = vpack.c.bf16 %v2914_v6, %v2913_v43 }
 0x3d9   : > { %v2645_v33 = vld [vmem:[#allocation4 + $0x1] sm:$0x7f]  ;;  %v6831_v21 = vpop.permute.xlu1 %2569  ;;  %v2149_v47 = vpop.permute.xlu0 %2148 }
 0x3da   : > { %v2701_v15 = vadd.f32 %v2660_v25, %v2645_v33  ;;  %2195 = vst.msk [vmem:[#allocation4 + $0x10] sm:$0xff] %vm2192_vm4, %v2149_v47  ;;  %5438 = vmatprep.subr.bf16.mxu1 %v5437_v17 }
 0x3db   : > { %2745 = vrot.lane.b32.xlu0 %v6623_v45, %s5581_s24  ;;  %2671 = vrot.lane.b32.xlu1 %v6689_v50, %s5576_s18 }
 0x3dc   : > { %2715 = vst.msk [vmem:[#allocation4 + $0x1] sm:$0x7f] %vm2238_vm5, %v2701_v15  ;;  %5440 = vmatpush3.bf16.msra.mxu1 %v5437_v17 }
 0x3dd   : > { %v6845_v22 = vpop.permute.xlu0 %2383  ;;  %v6847_v51 = vpop.permute.xlu1 %2287 }
 0x3df   : > { %v2253_v14 = vld [vmem:[#allocation4 + $0x8] sm:$0xff]  ;;  %2391 = vrot.lane.b32.xlu0 %v2371_v34, %s5574_s16  ;;  %2589 = vrot.lane.b32.xlu1 %v2376_v24, %s5580_s23 }
 0x3e0   : > { %v2323_v56 = vadd.f32 %v6769_v38, %v2253_v14 }
 0x3e1   : > { %v2211_v9 = vld [vmem:[#allocation4 + $0x11] sm:$0x7f]  ;;  %v6854_v28 = vpop.permute.xlu1 %2473  ;;  %v6856_v25 = vpop.permute.xlu0 %2385 }
 0x3e2   : > { %2337 = vst.msk [vmem:[#allocation4 + $0x8] sm:$0xff] %vm2192_vm4, %v2323_v56  ;;  %v2225_v10 = vadd.f32 %v2211_v9, %v6608_v61 }
 0x3e3   : > { %2747 = vrot.lane.b32.xlu0 %v6634_v59, %s5581_s24  ;;  %2591 = vrot.lane.b32.xlu1 %v2377_v44, %s5580_s23 }
 0x3e4   : > { %2240 = vst.msk [vmem:[#allocation4 + $0x11] sm:$0x7f] %vm2238_vm5, %v2225_v10 }
 0x3e5   : > { %v6864_v34 = vpop.permute.xlu1 %2663  ;;  %v6866_v38 = vpop.permute.xlu0 %2289 }
 0x3e7   : > { %2749 = vrot.lane.b32.xlu0 %v6650_v48, %s5581_s24  ;;  %2673 = vrot.lane.b32.xlu1 %v6707_v5, %s5576_s18 }
 0x3e9   : > { %v2351_v24 = vld [vmem:[#allocation4 + $0x8] sm:$0x7f]  ;;  %v2151_v46 = vpop.permute.xlu1 %2150  ;;  %v2153_v61 = vpop.permute.xlu0 %2152 }
 0x3ea   : > { %v2421_v7 = vadd.f32 %v6775_v18, %v2351_v24  ;;  %2196 = vst.msk [vmem:[#allocation4 + $0x18] sm:$0xff] %vm2192_vm4, %v2151_v46  ;;  %2197 = vst.msk [vmem:[#allocation4 + $0x20] sm:$0xff] %vm2192_vm4, %v2153_v61  ;;  %v2127_v18 = vadd.f32 %v6594_v54, %v6781_v11 }
 0x3eb   : > { %v2254_v44 = vld [vmem:[#allocation4 + $0x10] sm:$0xff]  ;;  %2675 = vrot.lane.b32.xlu0 %v6716_v36, %s5576_s18  ;;  %2593 = vrot.lane.b32.xlu1 %v2378_v2, %s5580_s23 }
 0x3ec   : > { %2435 = vst.msk [vmem:[#allocation4 + $0x8] sm:$0x7f] %vm2238_vm5, %v2421_v7  ;;  %v2324_v31 = vadd.f32 %v6791_v16, %v2254_v44 }
 0x3ed   : > { %v6883_v30 = vpop.permute.xlu1 %2571  ;;  %v6885_v49 = vpop.permute.xlu0 %2291 }
 0x3ee   : > { %2338 = vst.msk [vmem:[#allocation4 + $0x10] sm:$0xff] %vm2192_vm4, %v2324_v31 }
 0x3ef   : > { %2751 = vrot.lane.b32.xlu0 %v6664_v29, %s5581_s24  ;;  %2174 = vrot.lane.b32.xlu1 %v2127_v18, %s5575_s8 }
 0x3f1   : > { %v2212_v13 = vld [vmem:[#allocation4 + $0x19] sm:$0x7f]  ;;  %v2213_v33 = vld [vmem:[#allocation4 + $0x21] sm:$0x7f]  ;;  %v6893_v47 = vpop.permute.xlu1 %2475  ;;  %v6895_v15 = vpop.permute.xlu0 %2477 }
 0x3f2   : > { %v2226_v16 = vadd.f32 %v2212_v13, %v6623_v45  ;;  %v2227_v43 = vadd.f32 %v2213_v33, %v6634_v59 }
 0x3f3   : > { %v2450_v6 = vld [vmem:[#allocation4 + $0x9] sm:$0x7f]  ;;  %2753 = vrot.lane.b32.xlu0 %v6676_v8, %s5581_s24  ;;  %2307 = vrot.lane.b32.xlu1 %v6752_v55, %s5579_s22 }
 0x3f4   : > { %v2516_v54 = vadd.f32 %v6798_v20, %v2450_v6  ;;  %2241 = vst.msk [vmem:[#allocation4 + $0x19] sm:$0x7f] %vm2238_vm5, %v2226_v16  ;;  %2242 = vst.msk [vmem:[#allocation4 + $0x21] sm:$0x7f] %vm2238_vm5, %v2227_v43 }
 0x3f5   : > { %v2352_v17 = vld [vmem:[#allocation4 + $0x10] sm:$0x7f]  ;;  %v6906_v14 = vpop.permute.xlu1 %2665  ;;  %v6908_v56 = vpop.permute.xlu0 %2389 }
 0x3f6   : > { %2532 = vst.msk [vmem:[#allocation4 + $0x9] sm:$0x7f] %vm2238_vm5, %v2516_v54  ;;  %v2422_v45 = vadd.f32 %v6814_v40, %v2352_v17 }
 0x3f7   : > { %2679 = vrot.lane.b32.xlu0 %v6735_v39, %s5576_s18  ;;  %2677 = vrot.lane.b32.xlu1 %v6725_v58, %s5576_s18 }
 0x3f8   : > { %2436 = vst.msk [vmem:[#allocation4 + $0x10] sm:$0x7f] %vm2238_vm5, %v2422_v45 }
 0x3f9   : > { %v6917_v59 = vpop.permute.xlu1 %2387  ;;  %v6919_v20 = vpop.permute.xlu0 %2575 }
 0x3fb   : > { %v2255_v9 = vld [vmem:[#allocation4 + $0x18] sm:$0xff]  ;;  %v2256_v10 = vld [vmem:[#allocation4 + $0x20] sm:$0xff]  ;;  %2481 = vrot.lane.b32.xlu0 %v6689_v50, %s5578_s21  ;;  %2755 = vrot.lane.b32.xlu1 %v6689_v50, %s5581_s24 }
 0x3fc   : > { %v2325_v40 = vadd.f32 %v6816_v3, %v2255_v9  ;;  %v2326_v24 = vadd.f32 %v6847_v51, %v2256_v10 }
 0x3fd   : > { %v2548_v46 = vld [vmem:[#allocation4 + $0x8] sm:$0x7f]  ;;  %v6927_v61 = vpop.permute.xlu1 %2573  ;;  %v6929_v7 = vpop.permute.xlu0 %2669 }
 0x3fe   : > { %v2614_v44 = vadd.f32 %v6806_v26, %v2548_v46  ;;  %2339 = vst.msk [vmem:[#allocation4 + $0x18] sm:$0xff] %vm2192_vm4, %v2325_v40  ;;  %2340 = vst.msk [vmem:[#allocation4 + $0x20] sm:$0xff] %vm2192_vm4, %v2326_v24  ;;  %v2563_v24 = vrot.slane %v6689_v50, 1 }
 0x3ff   : > { %v2451_v31 = vld [vmem:[#allocation4 + $0x11] sm:$0x7f]  ;;  %2683 = vrot.lane.b32.xlu0 %v6752_v55, %s5576_s18  ;;  %2681 = vrot.lane.b32.xlu1 %v6744_v63, %s5576_s18 }
 0x400   : > { %2630 = vst.msk [vmem:[#allocation4 + $0x8] sm:$0x7f] %vm2238_vm5, %v2614_v44  ;;  %v2517_v3 = vadd.f32 %v6824_v53, %v2451_v31 }
 0x401   : > { %v6940_v51 = vpop.permute.xlu1 %2667  ;;  %v2157_v18 = vpop.permute.xlu0 %2156 }
 0x402   : > { %2533 = vst.msk [vmem:[#allocation4 + $0x11] sm:$0x7f] %vm2238_vm5, %v2517_v3 }
 0x403   : > { %2199 = vst.msk [vmem:[#allocation4 + $0x30] sm:$0xff] %vm2192_vm4, %v2157_v18  ;;  %2759 = vrot.lane.b32.xlu0 %v6716_v36, %s5581_s24  ;;  %2757 = vrot.lane.b32.xlu1 %v6707_v5, %s5581_s24 }
 0x405   : > { %v2353_v26 = vld [vmem:[#allocation4 + $0x18] sm:$0x7f]  ;;  %v2354_v13 = vld [vmem:[#allocation4 + $0x20] sm:$0x7f]  ;;  %v2155_v33 = vpop.permute.xlu1 %2154  ;;  %v6948_v16 = vpop.permute.xlu0 %2577 }
 0x406   : > { %v2423_v53 = vadd.f32 %v6845_v22, %v2353_v26  ;;  %v2424_v43 = vadd.f32 %v6856_v25, %v2354_v13  ;;  %2198 = vst.msk [vmem:[#allocation4 + $0x28] sm:$0xff] %vm2192_vm4, %v2155_v33  ;;  %v2564_v33 = vrot.slane %v6781_v11, 1 }
 0x407   : > { %v2646_v6 = vld [vmem:[#allocation4 + $0x9] sm:$0x7f]  ;;  %2405 = vrot.lane.b32.xlu0 %v2378_v2, %s5574_s16  ;;  %2685 = vrot.lane.b32.xlu1 %v6781_v11, %s5576_s18 }
 0x408   : > { %v2702_v54 = vadd.f32 %v6822_v12, %v2646_v6  ;;  %2437 = vst.msk [vmem:[#allocation4 + $0x18] sm:$0x7f] %vm2238_vm5, %v2423_v53  ;;  %2438 = vst.msk [vmem:[#allocation4 + $0x20] sm:$0x7f] %vm2238_vm5, %v2424_v43 }
 0x409   : > { %v2549_v17 = vld [vmem:[#allocation4 + $0x10] sm:$0x7f]  ;;  %v6961_v45 = vpop.permute.xlu1 %2479  ;;  %v6963_v25 = vpop.permute.xlu0 %2483 }
 0x40a   : > { %v2215_v22 = vld [vmem:[#allocation4 + $0x31] sm:$0x7f]  ;;  %2716 = vst.msk [vmem:[#allocation4 + $0x9] sm:$0x7f] %vm2238_vm5, %v2702_v54  ;;  %v2615_v9 = vadd.f32 %v6831_v21, %v2549_v17 }
 0x40b   : > { %v2229_v2 = vadd.f32 %v2215_v22, %v6664_v29  ;;  %2763 = vrot.lane.b32.xlu0 %v6735_v39, %s5581_s24  ;;  %2761 = vrot.lane.b32.xlu1 %v6725_v58, %s5581_s24 }
 0x40c   : > { %2631 = vst.msk [vmem:[#allocation4 + $0x10] sm:$0x7f] %vm2238_vm5, %v2615_v9 }
 0x40d   : > { %2244 = vst.msk [vmem:[#allocation4 + $0x31] sm:$0x7f] %vm2238_vm5, %v2229_v2  ;;  %v2214_v12 = vld [vmem:[#allocation4 + $0x29] sm:$0x7f]  ;;  %v6974_v10 = vpop.permute.xlu1 %2293  ;;  %v6976_v40 = vpop.permute.xlu0 %2393 }
 0x40e   : > { %v2228_v21 = vadd.f32 %v2214_v12, %v6650_v48 }
 0x40f   : > { %v2452_v29 = vld [vmem:[#allocation4 + $0x19] sm:$0x7f]  ;;  %v2453_v46 = vld [vmem:[#allocation4 + $0x21] sm:$0x7f]  ;;  %2765 = vrot.lane.b32.xlu0 %v6744_v63, %s5581_s24  ;;  %2579 = vrot.lane.b32.xlu1 %v2563_v24, %s5580_s23 }
 0x410   : > { %v2518_v44 = vadd.f32 %v6854_v28, %v2452_v29  ;;  %v2519_v31 = vadd.f32 %v6893_v47, %v2453_v46  ;;  %2243 = vst.msk [vmem:[#allocation4 + $0x29] sm:$0x7f] %vm2238_vm5, %v2228_v21 }
 0x411   : > { %v2159_v3 = vpop.permute.xlu1 %2158  ;;  %v6986_v18 = vpop.permute.xlu0 %2581 }
 0x412   : > { %2534 = vst.msk [vmem:[#allocation4 + $0x19] sm:$0x7f] %vm2238_vm5, %v2518_v44  ;;  %2535 = vst.msk [vmem:[#allocation4 + $0x21] sm:$0x7f] %vm2238_vm5, %v2519_v31 }
 0x413   : > { %2200 = vst.msk [vmem:[#allocation4 + $0x38] sm:$0xff] %vm2192_vm4, %v2159_v3  ;;  %v2647_v48 = vld [vmem:[#allocation4 + $0x11] sm:$0x7f]  ;;  %2769 = vrot.lane.b32.xlu0 %v6781_v11, %s5581_s24  ;;  %2767 = vrot.lane.b32.xlu1 %v6752_v55, %s5581_s24  ;;  %s5592_s24 = smov 123  }
 0x414   : > { %v2258_v50 = vld [vmem:[#allocation4 + $0x30] sm:$0xff]  ;;  %v2703_v28 = vadd.f32 %v6864_v34, %v2647_v48 }
 0x415   : > { %v2328_v47 = vadd.f32 %v6885_v49, %v2258_v50  ;;  %v6997_v26 = vpop.permute.xlu1 %2295  ;;  %v6999_v13 = vpop.permute.xlu0 %2297 }
 0x416   : > { %2717 = vst.msk [vmem:[#allocation4 + $0x11] sm:$0x7f] %vm2238_vm5, %v2703_v28 }
 0x417   : > { %2342 = vst.msk [vmem:[#allocation4 + $0x30] sm:$0xff] %vm2192_vm4, %v2328_v47  ;;  %v2257_v53 = vld [vmem:[#allocation4 + $0x28] sm:$0xff]  ;;  %2595 = vrot.lane.b32.xlu0 %v2564_v33, %s5580_s23  ;;  %2497 = vrot.lane.b32.xlu1 %v6781_v11, %s5578_s21  ;;  %s5591_s23 = smov 126  }
 0x418   : > { %v2327_v34 = vadd.f32 %v6866_v38, %v2257_v53 }
 0x419   : > { %v2550_v43 = vld [vmem:[#allocation4 + $0x18] sm:$0x7f]  ;;  %v2551_v49 = vld [vmem:[#allocation4 + $0x20] sm:$0x7f]  ;;  %v2161_v54 = vpop.permute.xlu1 %2160  ;;  %v7008_v17 = vpop.permute.xlu0 %2299 }
 0x41a   : > { %v2216_v6 = vld [vmem:[#allocation4 + $0x39] sm:$0x7f]  ;;  %v2616_v22 = vadd.f32 %v6883_v30, %v2550_v43  ;;  %v2617_v9 = vadd.f32 %v6927_v61, %v2551_v49  ;;  %2341 = vst.msk [vmem:[#allocation4 + $0x28] sm:$0xff] %vm2192_vm4, %v2327_v34  ;;  %2201 = vst.msk [vmem:[#allocation4 + $0x40] sm:$0xff] %vm2192_vm4, %v2161_v54  ;;  %v5127_v61 = vld [vmem:[%s8559_s6] ss:$0 sm:$0xff] }
 0x41b   : > { %v2230_v2 = vadd.f32 %v2216_v6, %v6676_v8  ;;  %3114 = vrot.lane.b32.xlu1 %v5127_v61, %s5576_s18  ;;  %s5582_s18 = smov 120  }
 0x41c   : > { %2632 = vst.msk [vmem:[#allocation4 + $0x18] sm:$0x7f] %vm2238_vm5, %v2616_v22  ;;  %2633 = vst.msk [vmem:[#allocation4 + $0x20] sm:$0x7f] %vm2238_vm5, %v2617_v9 }
 0x41d   : > { %2245 = vst.msk [vmem:[#allocation4 + $0x39] sm:$0x7f] %vm2238_vm5, %v2230_v2  ;;  %v7018_v38 = vpop.permute.xlu1 %2485  ;;  %v7020_v12 = vpop.permute.xlu0 %2489 }
 0x41e   : > { %v2356_v11 = vld [vmem:[#allocation4 + $0x30] sm:$0x7f] }
 0x41f   : > { %v2426_v30 = vadd.f32 %v6908_v56, %v2356_v11 }
 0x421   : > { %2440 = vst.msk [vmem:[#allocation4 + $0x30] sm:$0x7f] %vm2238_vm5, %v2426_v30  ;;  %v2355_v8 = vld [vmem:[#allocation4 + $0x28] sm:$0x7f]  ;;  %v2457_v24 = vld [vmem:[#allocation4 + $0x41] sm:$0x7f]  ;;  %v2163_v21 = vpop.permute.xlu1 %2162  ;;  %v2167_v29 = vpop.permute.xlu0 %2166 }
 0x422   : > { %v2425_v46 = vadd.f32 %v6917_v59, %v2355_v8  ;;  %v2523_v44 = vadd.f32 %v6963_v25, %v2457_v24  ;;  %2202 = vst.msk [vmem:[#allocation4 + $0x48] sm:$0xff] %vm2192_vm4, %v2163_v21  ;;  %2204 = vst.msk [vmem:[#allocation4 + $0x58] sm:$0xff] %vm2192_vm4, %v2167_v29 }
 0x423   : > { %v2648_v56 = vld [vmem:[#allocation4 + $0x19] sm:$0x7f]  ;;  %v2649_v31 = vld [vmem:[#allocation4 + $0x21] sm:$0x7f] }
 0x424   : > { %v2259_v3 = vld [vmem:[#allocation4 + $0x38] sm:$0xff]  ;;  %v2704_v48 = vadd.f32 %v6906_v14, %v2648_v56  ;;  %v2705_v50 = vadd.f32 %v6940_v51, %v2649_v31  ;;  %2439 = vst.msk [vmem:[#allocation4 + $0x28] sm:$0x7f] %vm2238_vm5, %v2425_v46  ;;  %2539 = vst.msk [vmem:[#allocation4 + $0x41] sm:$0x7f] %vm2238_vm5, %v2523_v44 }
 0x425   : > { %v2329_v28 = vadd.f32 %v6974_v10, %v2259_v3  ;;  %v7037_v59 = vpop.permute.xlu1 %2395  ;;  %v7039_v25 = vpop.permute.xlu0 %2399 }
 0x426   : > { %2718 = vst.msk [vmem:[#allocation4 + $0x19] sm:$0x7f] %vm2238_vm5, %v2704_v48  ;;  %2719 = vst.msk [vmem:[#allocation4 + $0x21] sm:$0x7f] %vm2238_vm5, %v2705_v50 }
 0x427   : > { %2343 = vst.msk [vmem:[#allocation4 + $0x38] sm:$0xff] %vm2192_vm4, %v2329_v28 }
 0x428   : > { %v2455_v47 = vld [vmem:[#allocation4 + $0x31] sm:$0x7f] }
 0x429   : > { %v2521_v14 = vadd.f32 %v6961_v45, %v2455_v47  ;;  %v2217_v51 = vld [vmem:[#allocation4 + $0x49] sm:$0x7f]  ;;  %v2219_v33 = vld [vmem:[#allocation4 + $0x59] sm:$0x7f]  ;;  %v7045_v53 = vpop.permute.xlu1 %2583  ;;  %v7047_v10 = vpop.permute.xlu0 %2303 }
 0x42a   : > { %v2231_v34 = vadd.f32 %v2217_v51, %v6698_v32  ;;  %v2233_v43 = vadd.f32 %v2219_v33, %v6716_v36 }
 0x42b   : > { %2537 = vst.msk [vmem:[#allocation4 + $0x31] sm:$0x7f] %vm2238_vm5, %v2521_v14  ;;  %v2454_v49 = vld [vmem:[#allocation4 + $0x29] sm:$0x7f]  ;;  %v2555_v6 = vld [vmem:[#allocation4 + $0x40] sm:$0x7f] }
 0x42c   : > { %v2520_v54 = vadd.f32 %v6895_v15, %v2454_v49  ;;  %v2621_v22 = vadd.f32 %v6986_v18, %v2555_v6  ;;  %2246 = vst.msk [vmem:[#allocation4 + $0x49] sm:$0x7f] %vm2238_vm5, %v2231_v34  ;;  %2248 = vst.msk [vmem:[#allocation4 + $0x59] sm:$0x7f] %vm2238_vm5, %v2233_v43 }
 0x42d   : > { %v7056_v45 = vpop.permute.xlu1 %2487  ;;  %v7058_v9 = vpop.permute.xlu0 %2491 }
 0x42e   : > { %2536 = vst.msk [vmem:[#allocation4 + $0x29] sm:$0x7f] %vm2238_vm5, %v2520_v54  ;;  %2637 = vst.msk [vmem:[#allocation4 + $0x40] sm:$0x7f] %vm2238_vm5, %v2621_v22 }
 0x431   : > { %v2165_v36 = vpop.permute.xlu1 %2164  ;;  %v7062_v2 = vpop.permute.xlu0 %2401 }
 0x432   : > { %v2553_v32 = vld [vmem:[#allocation4 + $0x30] sm:$0x7f]  ;;  %2203 = vst.msk [vmem:[#allocation4 + $0x50] sm:$0xff] %vm2192_vm4, %v2165_v36  ;;  %v2729_v36 = vld [vmem:[#allocation4] sm:$0xff] }
 0x433   : > { %v2619_v15 = vadd.f32 %v6948_v16, %v2553_v32  ;;  %v2260_v18 = vld [vmem:[#allocation4 + $0x48] sm:$0xff]  ;;  %v2262_v11 = vld [vmem:[#allocation4 + $0x58] sm:$0xff] }
 0x434   : > { %v2330_v30 = vadd.f32 %v6997_v26, %v2260_v18  ;;  %v2332_v61 = vadd.f32 %v7008_v17, %v2262_v11 }
 0x435   : > { %2635 = vst.msk [vmem:[#allocation4 + $0x30] sm:$0x7f] %vm2238_vm5, %v2619_v15  ;;  %v2552_v8 = vld [vmem:[#allocation4 + $0x28] sm:$0x7f]  ;;  %v2398_v24 = vpop.permute.xlu1 %2397  ;;  %v7069_v21 = vpop.permute.xlu0 %2305 }
 0x436   : > { %v2618_v29 = vadd.f32 %v6919_v20, %v2552_v8  ;;  %2344 = vst.msk [vmem:[#allocation4 + $0x48] sm:$0xff] %vm2192_vm4, %v2330_v30  ;;  %2346 = vst.msk [vmem:[#allocation4 + $0x58] sm:$0xff] %vm2192_vm4, %v2332_v61 }
 0x438   : > { %2634 = vst.msk [vmem:[#allocation4 + $0x28] sm:$0x7f] %vm2238_vm5, %v2618_v29 }
 0x439   : > { %v2218_v16 = vld [vmem:[#allocation4 + $0x51] sm:$0x7f]  ;;  %v2302_v46 = vpop.permute.xlu1 %2301  ;;  %v7075_v44 = vpop.permute.xlu0 %2493 }
 0x43a   : > { %v2232_v26 = vadd.f32 %v2218_v16, %v6707_v5 }
 0x43c   : > { %2247 = vst.msk [vmem:[#allocation4 + $0x51] sm:$0x7f] %vm2238_vm5, %v2232_v26  ;;  %v2651_v30 = vld [vmem:[#allocation4 + $0x31] sm:$0x7f] }
 0x43d   : > { %v2358_v17 = vld [vmem:[#allocation4 + $0x48] sm:$0x7f]  ;;  %v2360_v56 = vld [vmem:[#allocation4 + $0x58] sm:$0x7f]  ;;  %v2169_v31 = vpop.permute.xlu1 %2168  ;;  %v2171_v3 = vpop.permute.xlu0 %2170 }
 0x43e   : > { %v2428_v20 = vadd.f32 %v6976_v40, %v2358_v17  ;;  %v2430_v48 = vadd.f32 %v2398_v24, %v2360_v56  ;;  %2205 = vst.msk [vmem:[#allocation4 + $0x60] sm:$0xff] %vm2192_vm4, %v2169_v31  ;;  %2206 = vst.msk [vmem:[#allocation4 + $0x68] sm:$0xff] %vm2192_vm4, %v2171_v3  ;;  %v2357_v3 = vld [vmem:[#allocation4 + $0x38] sm:$0x7f] }
 0x43f   : > { %v2650_v50 = vld [vmem:[#allocation4 + $0x29] sm:$0x7f] }
 0x440   : > { %2442 = vst.msk [vmem:[#allocation4 + $0x48] sm:$0x7f] %vm2238_vm5, %v2428_v20  ;;  %2444 = vst.msk [vmem:[#allocation4 + $0x58] sm:$0x7f] %vm2238_vm5, %v2430_v48  ;;  %v2706_v5 = vadd.f32 %v6929_v7, %v2650_v50 }
 0x441   : > { %v7085_v28 = vpop.permute.xlu0 %2403  ;;  %v2173_v47 = vpop.permute.xlu1 %2172 }
 0x442   : > { %2207 = vst.msk [vmem:[#allocation4 + $0x70] sm:$0xff] %vm2192_vm4, %v2173_v47 }
 0x443   : > { %2720 = vst.msk [vmem:[#allocation4 + $0x29] sm:$0x7f] %vm2238_vm5, %v2706_v5  ;;  %v2261_v40 = vld [vmem:[#allocation4 + $0x50] sm:$0xff] }
 0x444   : > { %v2331_v14 = vadd.f32 %v6999_v13, %v2261_v40 }
 0x445   : > { %v2220_v51 = vld [vmem:[#allocation4 + $0x61] sm:$0x7f]  ;;  %v2221_v33 = vld [vmem:[#allocation4 + $0x69] sm:$0x7f]  ;;  %v7090_v34 = vpop.permute.xlu0 %2495  ;;  %v7092_v43 = vpop.permute.xlu1 %2585 }
 0x446   : > { %2345 = vst.msk [vmem:[#allocation4 + $0x50] sm:$0xff] %vm2192_vm4, %v2331_v14  ;;  %v2234_v7 = vadd.f32 %v2220_v51, %v6725_v58  ;;  %v2235_v49 = vadd.f32 %v2221_v33, %v6735_v39  ;;  %v2842_v33 = vrot.slane %v6628_v57, 1 }
 0x447   : > { %v2458_v6 = vld [vmem:[#allocation4 + $0x49] sm:$0x7f]  ;;  %v2460_v54 = vld [vmem:[#allocation4 + $0x59] sm:$0x7f] }
 0x448   : > { %v2524_v22 = vadd.f32 %v7018_v38, %v2458_v6  ;;  %v2526_v32 = vadd.f32 %v7020_v12, %v2460_v54  ;;  %2249 = vst.msk [vmem:[#allocation4 + $0x61] sm:$0x7f] %vm2238_vm5, %v2234_v7  ;;  %2250 = vst.msk [vmem:[#allocation4 + $0x69] sm:$0x7f] %vm2238_vm5, %v2235_v49  ;;  %v2730_v12 = vld [vmem:[#allocation4 + $0x8] sm:$0xff]  ;;  %v2732_v54 = vld [vmem:[#allocation4 + $0x18] sm:$0xff] }
 0x449   : > { %v2222_v13 = vld [vmem:[#allocation4 + $0x71] sm:$0x7f]  ;;  %v2744_v15 = vpop.permute.xlu0 %2743  ;;  %v2588_v18 = vpop.permute.xlu1 %2587 }
 0x44a   : > { %2540 = vst.msk [vmem:[#allocation4 + $0x49] sm:$0x7f] %vm2238_vm5, %v2524_v22  ;;  %2542 = vst.msk [vmem:[#allocation4 + $0x59] sm:$0x7f] %vm2238_vm5, %v2526_v32  ;;  %v2236_v58 = vadd.f32 %v2222_v13, %v6744_v63  ;;  %v2785_v39 = vadd.f32 %v2744_v15, %v2729_v36  ;;  %v2652_v15 = vld [vmem:[#allocation4 + $0x41] sm:$0x7f] }
 0x44c   : > { %2251 = vst.msk [vmem:[#allocation4 + $0x71] sm:$0x7f] %vm2238_vm5, %v2236_v58 }
 0x44d   : > { %2799 = vst.msk [vmem:[#allocation4] sm:$0xff] %vm2192_vm4, %v2785_v39  ;;  %v2359_v38 = vld [vmem:[#allocation4 + $0x50] sm:$0x7f]  ;;  %v2746_v11 = vpop.permute.xlu0 %2745  ;;  %v2672_v61 = vpop.permute.xlu1 %2671 }
 0x44e   : > { %v2429_v8 = vadd.f32 %v7037_v59, %v2359_v38  ;;  %v2786_v24 = vadd.f32 %v2746_v11, %v2730_v12  ;;  %v2707_v29 = vadd.f32 %v2672_v61, %v2651_v30  ;;  %v2841_v59 = vrot.slane %v6614_v23, 1  ;;  %v2731_v23 = vld [vmem:[#allocation4 + $0x10] sm:$0xff] }
 0x44f   : > { %v2263_v16 = vld [vmem:[#allocation4 + $0x60] sm:$0xff]  ;;  %v2264_v26 = vld [vmem:[#allocation4 + $0x68] sm:$0xff] }
 0x450   : > { %2443 = vst.msk [vmem:[#allocation4 + $0x50] sm:$0x7f] %vm2238_vm5, %v2429_v8  ;;  %v2333_v17 = vadd.f32 %v2302_v46, %v2263_v16  ;;  %v2334_v63 = vadd.f32 %v7047_v10, %v2264_v26  ;;  %2721 = vst.msk [vmem:[#allocation4 + $0x31] sm:$0x7f] %vm2238_vm5, %v2707_v29  ;;  %v2733_v26 = vld [vmem:[#allocation4 + $0x20] sm:$0xff] }
 0x451   : > { %2800 = vst.msk [vmem:[#allocation4 + $0x8] sm:$0xff] %vm2192_vm4, %v2786_v24  ;;  %v2556_v56 = vld [vmem:[#allocation4 + $0x48] sm:$0x7f]  ;;  %v2558_v31 = vld [vmem:[#allocation4 + $0x58] sm:$0x7f]  ;;  %v2392_v20 = vpop.permute.xlu0 %2391  ;;  %v7111_v48 = vpop.permute.xlu1 %2589 }
 0x452   : > { %v2622_v50 = vadd.f32 %v7045_v53, %v2556_v56  ;;  %2347 = vst.msk [vmem:[#allocation4 + $0x60] sm:$0xff] %vm2192_vm4, %v2333_v17  ;;  %2348 = vst.msk [vmem:[#allocation4 + $0x68] sm:$0xff] %vm2192_vm4, %v2334_v63  ;;  %v2624_v46 = vadd.f32 %v2588_v18, %v2558_v31  ;;  %v2427_v10 = vadd.f32 %v2392_v20, %v2357_v3  ;;  %v2844_v31 = vrot.slane %v6656_v62, 1 }
 0x453   : > { %v2265_v5 = vld [vmem:[#allocation4 + $0x70] sm:$0xff] }
 0x454   : > { %v2813_v47 = vld [vmem:[#allocation4] sm:$0x7f]  ;;  %2638 = vst.msk [vmem:[#allocation4 + $0x48] sm:$0x7f] %vm2238_vm5, %v2622_v50  ;;  %v2335_v40 = vadd.f32 %v7069_v21, %v2265_v5  ;;  %2640 = vst.msk [vmem:[#allocation4 + $0x58] sm:$0x7f] %vm2238_vm5, %v2624_v46 }
 0x455   : > { %v2869_v14 = vadd.f32 %v2841_v59, %v2813_v47  ;;  %2441 = vst.msk [vmem:[#allocation4 + $0x38] sm:$0x7f] %vm2238_vm5, %v2427_v10  ;;  %v2748_v51 = vpop.permute.xlu0 %2747  ;;  %v7121_v53 = vpop.permute.xlu1 %2591 }
 0x456   : > { %2349 = vst.msk [vmem:[#allocation4 + $0x70] sm:$0xff] %vm2192_vm4, %v2335_v40  ;;  %v2787_v7 = vadd.f32 %v2748_v51, %v2731_v23 }
 0x457   : > { %2883 = vst.msk [vmem:[#allocation4] sm:$0x7f] %vm2238_vm5, %v2869_v14  ;;  %v2459_v49 = vld [vmem:[#allocation4 + $0x51] sm:$0x7f] }
 0x458   : > { %v2814_v6 = vld [vmem:[#allocation4 + $0x8] sm:$0x7f]  ;;  %v2525_v21 = vadd.f32 %v7056_v45, %v2459_v49  ;;  %2801 = vst.msk [vmem:[#allocation4 + $0x10] sm:$0xff] %vm2192_vm4, %v2787_v7  ;;  %v2845_v7 = vrot.slane %v6669_v37, 1 }
 0x459   : > { %v2870_v22 = vadd.f32 %v2842_v33, %v2814_v6  ;;  %v2361_v32 = vld [vmem:[#allocation4 + $0x60] sm:$0x7f]  ;;  %v2362_v13 = vld [vmem:[#allocation4 + $0x68] sm:$0x7f]  ;;  %v2750_v36 = vpop.permute.xlu0 %2749  ;;  %v2674_v18 = vpop.permute.xlu1 %2673 }
 0x45a   : > { %2541 = vst.msk [vmem:[#allocation4 + $0x51] sm:$0x7f] %vm2238_vm5, %v2525_v21  ;;  %v2431_v57 = vadd.f32 %v7039_v25, %v2361_v32  ;;  %v2432_v58 = vadd.f32 %v7062_v2, %v2362_v13  ;;  %v2788_v39 = vadd.f32 %v2750_v36, %v2732_v54  ;;  %v2708_v38 = vadd.f32 %v2674_v18, %v2652_v15  ;;  %v2735_v32 = vld [vmem:[#allocation4 + $0x30] sm:$0xff] }
 0x45b   : > { %2884 = vst.msk [vmem:[#allocation4 + $0x8] sm:$0x7f] %vm2238_vm5, %v2870_v22  ;;  %v2653_v12 = vld [vmem:[#allocation4 + $0x49] sm:$0x7f]  ;;  %v2843_v2 = vrot.slane %v6639_v27, 1  ;;  %v2846_v36 = vrot.slane %v6681_v1, 1 }
 0x45c   : > { %2445 = vst.msk [vmem:[#allocation4 + $0x60] sm:$0x7f] %vm2238_vm5, %v2431_v57  ;;  %2446 = vst.msk [vmem:[#allocation4 + $0x68] sm:$0x7f] %vm2238_vm5, %v2432_v58  ;;  %v2655_v23 = vld [vmem:[#allocation4 + $0x59] sm:$0x7f] }
 0x45d   : > { %2802 = vst.msk [vmem:[#allocation4 + $0x18] sm:$0xff] %vm2192_vm4, %v2788_v39  ;;  %v2363_v45 = vld [vmem:[#allocation4 + $0x70] sm:$0x7f]  ;;  %v2676_v11 = vpop.permute.xlu0 %2675  ;;  %v7136_v30 = vpop.permute.xlu1 %2593  ;;  %v2456_v22 = vld [vmem:[#allocation4 + $0x39] sm:$0x7f] }
 0x45e   : > { %2722 = vst.msk [vmem:[#allocation4 + $0x41] sm:$0x7f] %vm2238_vm5, %v2708_v38  ;;  %v2897_v25 = vld [vmem:[#allocation4] sm:$0xff]  ;;  %v2433_v61 = vadd.f32 %v7085_v28, %v2363_v45  ;;  %v2709_v8 = vadd.f32 %v2676_v11, %v2653_v12 }
 0x45f   : > { %5283 = vmatprep.mubr.msk.f32.mxu1 %vm2192_vm4, %v2897_v25  ;;  %v2815_v24 = vld [vmem:[#allocation4 + $0x10] sm:$0x7f] }
 0x460   : > { %2447 = vst.msk [vmem:[#allocation4 + $0x70] sm:$0x7f] %vm2238_vm5, %v2433_v61  ;;  %2723 = vst.msk [vmem:[#allocation4 + $0x49] sm:$0x7f] %vm2238_vm5, %v2709_v8  ;;  %v2871_v29 = vadd.f32 %v2843_v2, %v2815_v24 }
 0x461   : > { %v2557_v16 = vld [vmem:[#allocation4 + $0x50] sm:$0x7f]  ;;  %v2752_v17 = vpop.permute.xlu0 %2751  ;;  %v2175_v63 = vpop.permute.xlu1 %2174 }
 0x462   : > { %v2898_v56 = vld [vmem:[#allocation4 + $0x8] sm:$0xff]  ;;  %v2623_v27 = vadd.f32 %v7092_v43, %v2557_v16  ;;  %v2789_v3 = vadd.f32 %v2752_v17, %v2733_v26  ;;  %2208 = vst.msk [vmem:[#allocation4 + $0x78] sm:$0xff] %vm2192_vm4, %v2175_v63 }
 0x463   : > { %5284 = vmatmul.mubr.msk.f32.vlgmr.msra.gmra.mrb[0].mxu1 %vm2192_vm4, %v2898_v56  ;;  %2885 = vst.msk [vmem:[#allocation4 + $0x10] sm:$0x7f] %vm2238_vm5, %v2871_v29  ;;  %v2461_v28 = vld [vmem:[#allocation4 + $0x61] sm:$0x7f]  ;;  %v2462_v20 = vld [vmem:[#allocation4 + $0x69] sm:$0x7f] }
 0x464   : > { %v2816_v59 = vld [vmem:[#allocation4 + $0x18] sm:$0x7f]  ;;  %v2527_v50 = vadd.f32 %v7058_v9, %v2461_v28  ;;  %v2528_v46 = vadd.f32 %v7075_v44, %v2462_v20  ;;  %2639 = vst.msk [vmem:[#allocation4 + $0x50] sm:$0x7f] %vm2238_vm5, %v2623_v27  ;;  %v2734_v43 = vld [vmem:[#allocation4 + $0x28] sm:$0xff]  ;;  %v2847_v56 = vrot.slane %v6691_v0, 1 }
 0x465   : > { %2803 = vst.msk [vmem:[#allocation4 + $0x20] sm:$0xff] %vm2192_vm4, %v2789_v3  ;;  %v2872_v62 = vadd.f32 %v2844_v31, %v2816_v59  ;;  %v2754_v10 = vpop.permute.xlu0 %2753  ;;  %v2308_v5 = vpop.permute.xlu1 %2307  ;;  %v2736_v29 = vld [vmem:[#allocation4 + $0x40] sm:$0xff] }
 0x466   : > { %2543 = vst.msk [vmem:[#allocation4 + $0x61] sm:$0x7f] %vm2238_vm5, %v2527_v50  ;;  %2544 = vst.msk [vmem:[#allocation4 + $0x69] sm:$0x7f] %vm2238_vm5, %v2528_v46  ;;  %v2790_v47 = vadd.f32 %v2754_v10, %v2734_v43  ;;  %v2848_v43 = vrot.slane %v6713_v42, 1 }
 0x467   : > { %2886 = vst.msk [vmem:[#allocation4 + $0x18] sm:$0x7f] %vm2238_vm5, %v2872_v62  ;;  %v2463_v40 = vld [vmem:[#allocation4 + $0x71] sm:$0x7f]  ;;  %v2737_v8 = vld [vmem:[#allocation4 + $0x48] sm:$0xff] }
 0x468   : > { %v2529_v9 = vadd.f32 %v7090_v34, %v2463_v40  ;;  %2804 = vst.msk [vmem:[#allocation4 + $0x28] sm:$0xff] %vm2192_vm4, %v2790_v47 }
 0x469   : > { %v2223_v44 = vld [vmem:[#allocation4 + $0x79] sm:$0x7f]  ;;  %v2680_v14 = vpop.permute.xlu0 %2679  ;;  %v2678_v51 = vpop.permute.xlu1 %2677 }
 0x46a   : > { %v2899_v33 = vld [vmem:[#allocation4 + $0x10] sm:$0xff]  ;;  %2545 = vst.msk [vmem:[#allocation4 + $0x71] sm:$0x7f] %vm2238_vm5, %v2529_v9  ;;  %v2237_v49 = vadd.f32 %v2223_v44, %v6752_v55  ;;  %v2711_v6 = vadd.f32 %v2680_v14, %v2655_v23  ;;  %v2849_v44 = vrot.slane %v6721_v19, 1 }
 0x46b   : > { %5286 = vmatprep.mubr.msk.f32.mxu1 %vm2192_vm4, %v2899_v33  ;;  %v2654_v21 = vld [vmem:[#allocation4 + $0x51] sm:$0x7f] }
 0x46c   : > { %v2817_v54 = vld [vmem:[#allocation4 + $0x20] sm:$0x7f]  ;;  %2252 = vst.msk [vmem:[#allocation4 + $0x79] sm:$0x7f] %vm2238_vm5, %v2237_v49  ;;  %2725 = vst.msk [vmem:[#allocation4 + $0x59] sm:$0x7f] %vm2238_vm5, %v2711_v6  ;;  %v2710_v34 = vadd.f32 %v2678_v51, %v2654_v21 }
 0x46d   : > { %v2873_v13 = vadd.f32 %v2845_v7, %v2817_v54  ;;  %v2559_v37 = vld [vmem:[#allocation4 + $0x60] sm:$0x7f]  ;;  %v2560_v15 = vld [vmem:[#allocation4 + $0x68] sm:$0x7f]  ;;  %v2482_v18 = vpop.permute.xlu0 %2481  ;;  %v2756_v57 = vpop.permute.xlu1 %2755 }
 0x46e   : > { %v2900_v55 = vld [vmem:[#allocation4 + $0x18] sm:$0xff]  ;;  %v2625_v58 = vadd.f32 %v7111_v48, %v2559_v37  ;;  %v2626_v39 = vadd.f32 %v7121_v53, %v2560_v15  ;;  %2724 = vst.msk [vmem:[#allocation4 + $0x51] sm:$0x7f] %vm2238_vm5, %v2710_v34  ;;  %v2522_v38 = vadd.f32 %v2482_v18, %v2456_v22  ;;  %v2791_v45 = vadd.f32 %v2756_v57, %v2735_v32 }
 0x46f   : > { %5287 = vmatmul.mubr.msk.f32.gmra.mrb[2].mxu1 %vm2192_vm4, %v2900_v55  ;;  %2887 = vst.msk [vmem:[#allocation4 + $0x20] sm:$0x7f] %vm2238_vm5, %v2873_v13  ;;  %v2818_v12 = vld [vmem:[#allocation4 + $0x28] sm:$0x7f]  ;;  %v2850_v18 = vrot.slane %v6729_v60, 1  ;;  %v2851_v57 = vrot.slane %v6737_v4, 1 }
 0x470   : > { %2641 = vst.msk [vmem:[#allocation4 + $0x60] sm:$0x7f] %vm2238_vm5, %v2625_v58  ;;  %2642 = vst.msk [vmem:[#allocation4 + $0x68] sm:$0x7f] %vm2238_vm5, %v2626_v39  ;;  %v2874_v1 = vadd.f32 %v2846_v36, %v2818_v12 }
 0x471   : > { %2538 = vst.msk [vmem:[#allocation4 + $0x39] sm:$0x7f] %vm2238_vm5, %v2522_v38  ;;  %v2561_v48 = vld [vmem:[#allocation4 + $0x70] sm:$0x7f]  ;;  %v2684_v53 = vpop.permute.xlu0 %2683  ;;  %v2682_v11 = vpop.permute.xlu1 %2681 }
 0x472   : > { %2805 = vst.msk [vmem:[#allocation4 + $0x30] sm:$0xff] %vm2192_vm4, %v2791_v45  ;;  %v2627_v25 = vadd.f32 %v7136_v30, %v2561_v48 }
 0x473   : > { %2888 = vst.msk [vmem:[#allocation4 + $0x28] sm:$0x7f] %vm2238_vm5, %v2874_v1  ;;  %v2266_v2 = vld [vmem:[#allocation4 + $0x78] sm:$0xff] }
 0x474   : > { %2643 = vst.msk [vmem:[#allocation4 + $0x70] sm:$0x7f] %vm2238_vm5, %v2627_v25  ;;  %v2336_v61 = vadd.f32 %v2308_v5, %v2266_v2  ;;  %v2739_v47 = vld [vmem:[#allocation4 + $0x58] sm:$0xff] }
 0x475   : > { %v2760_v24 = vpop.permute.xlu0 %2759  ;;  %v2758_v16 = vpop.permute.xlu1 %2757  ;;  %v2738_v40 = vld [vmem:[#allocation4 + $0x50] sm:$0xff] }
 0x476   : > { %v2901_v26 = vld [vmem:[#allocation4 + $0x20] sm:$0xff]  ;;  %2350 = vst.msk [vmem:[#allocation4 + $0x78] sm:$0xff] %vm2192_vm4, %v2336_v61  ;;  %v2793_v17 = vadd.f32 %v2760_v24, %v2737_v8  ;;  %v2792_v63 = vadd.f32 %v2758_v16, %v2736_v29  ;;  %v2853_v61 = vrot.slane %v6754_v35, 1  ;;  %v2854_v8 = vrot.slane %v6785_v52, 1 }
 0x477   : > { %5289 = vmatprep.mubr.msk.f32.mxu1 %vm2192_vm4, %v2901_v26  ;;  %v2657_v30 = vld [vmem:[#allocation4 + $0x69] sm:$0x7f]  ;;  %v2656_v31 = vld [vmem:[#allocation4 + $0x61] sm:$0x7f] }
 0x478   : > { %v2713_v27 = vadd.f32 %v2684_v53, %v2657_v30  ;;  %v2712_v3 = vadd.f32 %v2682_v11, %v2656_v31  ;;  %2807 = vst.msk [vmem:[#allocation4 + $0x48] sm:$0xff] %vm2192_vm4, %v2793_v17  ;;  %2806 = vst.msk [vmem:[#allocation4 + $0x40] sm:$0xff] %vm2192_vm4, %v2792_v63  ;;  %v2554_v54 = vld [vmem:[#allocation4 + $0x38] sm:$0x7f]  ;;  %v2852_v53 = vrot.slane %v6746_v41, 1 }
 0x479   : > { %v2819_v28 = vld [vmem:[#allocation4 + $0x30] sm:$0x7f]  ;;  %v2406_v20 = vpop.permute.xlu0 %2405  ;;  %v2686_v59 = vpop.permute.xlu1 %2685 }
 0x47a   : > { %v2902_v50 = vld [vmem:[#allocation4 + $0x28] sm:$0xff]  ;;  %v2875_v46 = vadd.f32 %v2847_v56, %v2819_v28  ;;  %2727 = vst.msk [vmem:[#allocation4 + $0x69] sm:$0x7f] %vm2238_vm5, %v2713_v27  ;;  %2726 = vst.msk [vmem:[#allocation4 + $0x61] sm:$0x7f] %vm2238_vm5, %v2712_v3 }
 0x47b   : > { %5290 = vmatmul.mubr.msk.f32.gmra.mrb[4].mxu1 %vm2192_vm4, %v2902_v50  ;;  %v2658_v0 = vld [vmem:[#allocation4 + $0x71] sm:$0x7f] }
 0x47c   : > { %2889 = vst.msk [vmem:[#allocation4 + $0x30] sm:$0x7f] %vm2238_vm5, %v2875_v46  ;;  %v2714_v62 = vadd.f32 %v2686_v59, %v2658_v0 }
 0x47d   : > { %v2364_v10 = vld [vmem:[#allocation4 + $0x78] sm:$0x7f]  ;;  %v2764_v5 = vpop.permute.xlu0 %2763  ;;  %v2762_v9 = vpop.permute.xlu1 %2761 }
 0x47e   : > { %v2434_v14 = vadd.f32 %v2406_v20, %v2364_v10  ;;  %2728 = vst.msk [vmem:[#allocation4 + $0x71] sm:$0x7f] %vm2238_vm5, %v2714_v62  ;;  %v2795_v23 = vadd.f32 %v2764_v5, %v2739_v47  ;;  %v2794_v51 = vadd.f32 %v2762_v9, %v2738_v40 }
 0x47f   : > { %v2820_v33 = vld [vmem:[#allocation4 + $0x40] sm:$0x7f]  ;;  %v2821_v7 = vld [vmem:[#allocation4 + $0x48] sm:$0x7f] }
 0x480   : > { %v2876_v49 = vadd.f32 %v2848_v43, %v2820_v33  ;;  %2448 = vst.msk [vmem:[#allocation4 + $0x78] sm:$0x7f] %vm2238_vm5, %v2434_v14  ;;  %v2877_v42 = vadd.f32 %v2849_v44, %v2821_v7 }
 0x481   : > { %2809 = vst.msk [vmem:[#allocation4 + $0x58] sm:$0xff] %vm2192_vm4, %v2795_v23  ;;  %2808 = vst.msk [vmem:[#allocation4 + $0x50] sm:$0xff] %vm2192_vm4, %v2794_v51  ;;  %v2766_v6 = vpop.permute.xlu0 %2765  ;;  %v2740_v21 = vld [vmem:[#allocation4 + $0x60] sm:$0xff]  ;;  %v2580_v34 = vpop.permute.xlu1 %2579  ;;  %v2741_v37 = vld [vmem:[#allocation4 + $0x68] sm:$0xff] }
 0x482   : > { %2890 = vst.msk [vmem:[#allocation4 + $0x40] sm:$0x7f] %vm2238_vm5, %v2876_v49  ;;  %v2796_v19 = vadd.f32 %v2766_v6, %v2740_v21  ;;  %v2620_v22 = vadd.f32 %v2580_v34, %v2554_v54  ;;  %2891 = vst.msk [vmem:[#allocation4 + $0x48] sm:$0x7f] %vm2238_vm5, %v2877_v42 }
 0x483   : > { %v2903_v32 = vld [vmem:[#allocation4 + $0x30] sm:$0xff] }
 0x484   : > { %5292 = vmatprep.mubr.msk.f32.mxu1 %vm2192_vm4, %v2903_v32  ;;  %2810 = vst.msk [vmem:[#allocation4 + $0x60] sm:$0xff] %vm2192_vm4, %v2796_v19 }
 0x485   : > { %2636 = vst.msk [vmem:[#allocation4 + $0x38] sm:$0x7f] %vm2238_vm5, %v2620_v22  ;;  %v2770_v13 = vpop.permute.xlu0 %2769  ;;  %v2742_v36 = vld [vmem:[#allocation4 + $0x70] sm:$0xff]  ;;  %v2768_v15 = vpop.permute.xlu1 %2767 }
 0x486   : > { %v2798_v55 = vadd.f32 %v2770_v13, %v2742_v36  ;;  %v2797_v58 = vadd.f32 %v2768_v15, %v2741_v37 }
 0x487   : > { %v2464_v1 = vld [vmem:[#allocation4 + $0x79] sm:$0x7f] }
 0x488   : > { %v2822_v39 = vld [vmem:[#allocation4 + $0x50] sm:$0x7f]  ;;  %v2823_v38 = vld [vmem:[#allocation4 + $0x58] sm:$0x7f]  ;;  %2812 = vst.msk [vmem:[#allocation4 + $0x70] sm:$0xff] %vm2192_vm4, %v2798_v55  ;;  %2811 = vst.msk [vmem:[#allocation4 + $0x68] sm:$0xff] %vm2192_vm4, %v2797_v58 }
 0x489   : > { %v2878_v45 = vadd.f32 %v2850_v18, %v2822_v39  ;;  %v2879_v12 = vadd.f32 %v2851_v57, %v2823_v38  ;;  %v2498_v48 = vpop.permute.xlu1 %2497  ;;  %v2905_v25 = vld [vmem:[#allocation4 + $0x40] sm:$0xff]  ;;  %v2906_v41 = vld [vmem:[#allocation4 + $0x48] sm:$0xff]  ;;  %v2596_v63 = vpop.permute.xlu0 %2595 }
 0x48a   : > { %v2530_v11 = vadd.f32 %v2498_v48, %v2464_v1 }
 0x48b   : > { %2892 = vst.msk [vmem:[#allocation4 + $0x50] sm:$0x7f] %vm2238_vm5, %v2878_v45  ;;  %2893 = vst.msk [vmem:[#allocation4 + $0x58] sm:$0x7f] %vm2238_vm5, %v2879_v12  ;;  %v2824_v4 = vld [vmem:[#allocation4 + $0x60] sm:$0x7f] }
 0x48c   : > { %v2904_v60 = vld [vmem:[#allocation4 + $0x38] sm:$0xff]  ;;  %2546 = vst.msk [vmem:[#allocation4 + $0x79] sm:$0x7f] %vm2238_vm5, %v2530_v11  ;;  %v2880_v2 = vadd.f32 %v2852_v53, %v2824_v4 }
 0x48d   : > { %5293 = vmatmul.mubr.msk.f32.gmra.mrb[6].mxu1 %vm2192_vm4, %v2904_v60  ;;  %v7231_v59 = vpop.permute.xlu1 %3114 }
 0x48e   : > { %5295 = vmatprep.mubr.msk.f32.mxu1 %vm2192_vm4, %v2905_v25  ;;  %2894 = vst.msk [vmem:[#allocation4 + $0x60] sm:$0x7f] %vm2238_vm5, %v2880_v2 }
 0x48f   : > { %v2825_v24 = vld [vmem:[#allocation4 + $0x68] sm:$0x7f]  ;;  %v2826_v29 = vld [vmem:[#allocation4 + $0x70] sm:$0x7f] }
 0x490   : > { %v2881_v16 = vadd.f32 %v2853_v61, %v2825_v24  ;;  %v2882_v26 = vadd.f32 %v2854_v8, %v2826_v29 }
 0x491   : > { %5296 = vmatmul.mubr.msk.f32.gmra.mrb[8].mxu1 %vm2192_vm4, %v2906_v41 }
 0x492   : > { %v2907_v17 = vld [vmem:[#allocation4 + $0x50] sm:$0xff]  ;;  %2895 = vst.msk [vmem:[#allocation4 + $0x68] sm:$0x7f] %vm2238_vm5, %v2881_v16  ;;  %2896 = vst.msk [vmem:[#allocation4 + $0x70] sm:$0x7f] %vm2238_vm5, %v2882_v26  ;;  %v2908_v56 = vld [vmem:[#allocation4 + $0x58] sm:$0xff] }
 0x493   : > { %5298 = vmatprep.mubr.msk.f32.mxu1 %vm2192_vm4, %v2907_v17  ;;  %v2562_v35 = vld [vmem:[#allocation4 + $0x78] sm:$0x7f] }
 0x494   : > { %v2628_v52 = vadd.f32 %v2596_v63, %v2562_v35 }
 0x495   : > { %5299 = vmatmul.mubr.msk.f32.gmra.mrb[10].mxu1 %vm2192_vm4, %v2908_v56  ;;  %v2909_v30 = vld [vmem:[#allocation4 + $0x60] sm:$0xff] }
 0x496   : > { %2644 = vst.msk [vmem:[#allocation4 + $0x78] sm:$0x7f] %vm2238_vm5, %v2628_v52  ;;  %5301 = vmatprep.mubr.msk.f32.mxu1 %vm2192_vm4, %v2909_v30 }
 0x499   : > { %v2910_v31 = vld [vmem:[#allocation4 + $0x68] sm:$0xff]  ;;  %v2911_v27 = vld [vmem:[#allocation4 + $0x70] sm:$0xff] }
 0x49a   : > { %5302 = vmatmul.mubr.msk.f32.gmra.mrb[12].mxu1 %vm2192_vm4, %v2910_v31 }
 0x49b   : > { %5304 = vmatprep.mubr.msk.f32.mxu1 %vm2192_vm4, %v2911_v27 }
 0x49d   : > { %v2912_v3 = vld [vmem:[#allocation4 + $0x78] sm:$0xff] }
 0x49e   : > { %5305 = vmatmul.mubr.msk.f32.gmra.mrb[14].mxu1 %vm2192_vm4, %v2912_v3 }
 0x536   : > { %v7219_v28 = vpop.f32.mrb[0].mxu1 }
 0x537   : > { %v7221_v20 = vpop.f32.mrb[1].mxu1  ;;  %3288 = vrot.lane.b32.xlu0 %v7219_v28, %s5582_s18  ;;  %3664 = vrot.lane.b32.xlu1 %v7219_v28, %s5578_s21  ;;  %v7238_v50 = vrot.slane %v7219_v28, 1  ;;  %v3118_v46 = vadd.f32 %v7219_v28, %v7231_v59 }
 0x538   : > { %v3370_v43 = vrot.slane %v7221_v20, 1  ;;  %v3117_v10 = vadd.f32 %v7231_v59, %v7221_v20 }
 0x53b   : > { %3474 = vrot.lane.b32.xlu0 %v7219_v28, %s5583_s10  ;;  %3748 = vrot.lane.b32.xlu1 %v7219_v28, %s5584_s13 }
 0x53f   : > { %3472 = vrot.lane.b32.xlu0 %v7221_v20, %s5583_s10  ;;  %3286 = vrot.lane.b32.xlu1 %v7221_v20, %s5582_s18 }
 0x542   : > { %v7242_v0 = vpop.f32.mrb[2].mxu1 }
 0x543   : > { %v7244_v62 = vpop.f32.mrb[3].mxu1  ;;  %3572 = vrot.lane.b32.xlu1 %v7238_v50, %s5585_s11  ;;  %3151 = vrot.lane.b32.xlu0 %v3118_v46, %s5574_s16  ;;  %v7278_v40 = vrot.slane %v7242_v0, 1  ;;  %v3120_v9 = vadd.f32 %v7242_v0, %v7231_v59 }
 0x544   : > { %v3119_v23 = vadd.f32 %v7231_v59, %v7244_v62  ;;  %v7299_v7 = vrot.slane %v7244_v62, 1 }
 0x547   : > { %3384 = vrot.lane.b32.xlu1 %v3370_v43, %s5579_s22  ;;  %3386 = vrot.lane.b32.xlu0 %v7238_v50, %s5579_s22 }
 0x54b   : > { %3570 = vrot.lane.b32.xlu1 %v3370_v43, %s5585_s11  ;;  %3149 = vrot.lane.b32.xlu0 %v3117_v10, %s5574_s16 }
 0x54e   : > { %v7257_v5 = vpop.f32.mrb[4].mxu1 }
 0x54f   : > { %v7259_v47 = vpop.f32.mrb[5].mxu1  ;;  %3752 = vrot.lane.b32.xlu1 %v7242_v0, %s5584_s13  ;;  %3292 = vrot.lane.b32.xlu0 %v7242_v0, %s5582_s18  ;;  %v7330_v19 = vrot.slane %v7257_v5, 1  ;;  %v3122_v22 = vadd.f32 %v7257_v5, %v7231_v59 }
 0x550   : > { %v7338_v32 = vrot.slane %v7259_v47, 1  ;;  %v3121_v13 = vadd.f32 %v7231_v59, %v7259_v47 }
 0x553   : > { %3290 = vrot.lane.b32.xlu1 %v7244_v62, %s5582_s18  ;;  %3478 = vrot.lane.b32.xlu0 %v7242_v0, %s5583_s10 }
 0x557   : > { %3476 = vrot.lane.b32.xlu1 %v7244_v62, %s5583_s10  ;;  %3668 = vrot.lane.b32.xlu0 %v7242_v0, %s5578_s21 }
 0x55b   : > { %3750 = vrot.lane.b32.xlu1 %v7244_v62, %s5584_s13  ;;  %3666 = vrot.lane.b32.xlu0 %v7244_v62, %s5578_s21 }
 0x55f   : > { %3390 = vrot.lane.b32.xlu1 %v7278_v40, %s5579_s22  ;;  %3155 = vrot.lane.b32.xlu0 %v3120_v9, %s5574_s16 }
 0x560   : > { %v7285_v44 = vpop.f32.mrb[6].mxu1 }
 0x561   : > { %v7287_v14 = vpop.f32.mrb[7].mxu1  ;;  %v3124_v15 = vadd.f32 %v7285_v44, %v7231_v59 }
 0x562   : > { %v3123_v36 = vadd.f32 %v7231_v59, %v7287_v14  ;;  %v7359_v37 = vrot.slane %v7287_v14, 1 }
 0x563   : > { %3153 = vrot.lane.b32.xlu1 %v3119_v23, %s5574_s16  ;;  %3576 = vrot.lane.b32.xlu0 %v7278_v40, %s5585_s11 }
 0x564   : > { %v7294_v51 = vpop.f32.mrb[8].mxu1 }
 0x565   : > { %v7296_v33 = vpop.f32.mrb[9].mxu1  ;;  %v3126_v57 = vadd.f32 %v7294_v51, %v7231_v59  ;;  %v7384_v55 = vrot.slane %v7294_v51, 1 }
 0x566   : > { %v3377_v18 = vrot.slane %v7296_v33, 1  ;;  %v3125_v58 = vadd.f32 %v7231_v59, %v7296_v33 }
 0x567   : > { %3388 = vrot.lane.b32.xlu1 %v7299_v7, %s5579_s22  ;;  %3574 = vrot.lane.b32.xlu0 %v7299_v7, %s5585_s11 }
 0x568   : > { %v7305_v49 = vpop.f32.mrb[10].mxu1 }
 0x569   : > { %v7307_v42 = vpop.f32.mrb[11].mxu1  ;;  %v3128_v45 = vadd.f32 %v7305_v49, %v7231_v59  ;;  %v7412_v48 = vrot.slane %v7305_v49, 1 }
 0x56a   : > { %v3127_v25 = vadd.f32 %v7231_v59, %v7307_v42  ;;  %v7433_v8 = vrot.slane %v7307_v42, 1 }
 0x56b   : > { %3296 = vrot.lane.b32.xlu1 %v7257_v5, %s5582_s18  ;;  %3672 = vrot.lane.b32.xlu0 %v7257_v5, %s5578_s21 }
 0x56d   : > { %v7313_v6 = vpop.f32.mrb[12].mxu1 }
 0x56e   : > { %v7315_v21 = vpop.f32.mrb[13].mxu1  ;;  %v3130_v63 = vadd.f32 %v7313_v6, %v7231_v59  ;;  %v7461_v31 = vrot.slane %v7313_v6, 1 }
 0x56f   : > { %3482 = vrot.lane.b32.xlu1 %v7257_v5, %s5583_s10  ;;  %3480 = vrot.lane.b32.xlu0 %v7259_v47, %s5583_s10  ;;  %v3129_v35 = vadd.f32 %v7231_v59, %v7315_v21  ;;  %v7464_v27 = vrot.slane %v7315_v21, 1 }
 0x571   : > { %v7321_v54 = vpop.f32.mrb[14].mxu1 }
 0x572   : > { %v7327_v34 = vpop.f32.mrb[15].mxu1  ;;  %v3132_v9 = vadd.f32 %v7321_v54, %v7231_v59 }
 0x573   : > { %3294 = vrot.lane.b32.xlu1 %v7259_v47, %s5582_s18  ;;  %3670 = vrot.lane.b32.xlu0 %v7259_v47, %s5578_s21 }
 0x577   : > { %3394 = vrot.lane.b32.xlu1 %v7330_v19, %s5579_s22  ;;  %3159 = vrot.lane.b32.xlu0 %v3122_v22, %s5574_s16 }
 0x57b   : > { %3580 = vrot.lane.b32.xlu1 %v7330_v19, %s5585_s11  ;;  %3392 = vrot.lane.b32.xlu0 %v7338_v32, %s5579_s22 }
 0x57f   : > { %3157 = vrot.lane.b32.xlu1 %v3121_v13, %s5574_s16  ;;  %3578 = vrot.lane.b32.xlu0 %v7338_v32, %s5585_s11  ;;  %v3131_v13 = vadd.f32 %v7231_v59, %v7327_v34 }
 0x583   : > { %3674 = vrot.lane.b32.xlu1 %v7287_v14, %s5578_s21  ;;  %3676 = vrot.lane.b32.xlu0 %v7285_v44, %s5578_s21 }
 0x587   : > { %3161 = vrot.lane.b32.xlu1 %v3123_v36, %s5574_s16  ;;  %3484 = vrot.lane.b32.xlu0 %v7287_v14, %s5583_s10 }
 0x58b   : > { %3582 = vrot.lane.b32.xlu1 %v7359_v37, %s5585_s11  ;;  %3298 = vrot.lane.b32.xlu0 %v7287_v14, %s5582_s18 }
 0x58f   : > { %3396 = vrot.lane.b32.xlu1 %v7359_v37, %s5579_s22  ;;  %3163 = vrot.lane.b32.xlu0 %v3124_v15, %s5574_s16 }
 0x593   : > { %3302 = vrot.lane.b32.xlu1 %v7294_v51, %s5582_s18  ;;  %3490 = vrot.lane.b32.xlu0 %v7294_v51, %s5583_s10 }
 0x597   : > { %3488 = vrot.lane.b32.xlu1 %v7296_v33, %s5583_s10  ;;  %3300 = vrot.lane.b32.xlu0 %v7296_v33, %s5582_s18 }
 0x59b   : > { %3398 = vrot.lane.b32.xlu1 %v3377_v18, %s5579_s22  ;;  %3167 = vrot.lane.b32.xlu0 %v3126_v57, %s5574_s16 }
 0x59f   : > { %3586 = vrot.lane.b32.xlu1 %v3377_v18, %s5585_s11  ;;  %3400 = vrot.lane.b32.xlu0 %v7384_v55, %s5579_s22 }
 0x5a3   : > { %3494 = vrot.lane.b32.xlu1 %v7305_v49, %s5583_s10  ;;  %3588 = vrot.lane.b32.xlu0 %v7384_v55, %s5585_s11 }
 0x5a7   : > { %3304 = vrot.lane.b32.xlu1 %v7307_v42, %s5582_s18  ;;  %3165 = vrot.lane.b32.xlu0 %v3125_v58, %s5574_s16 }
 0x5a9   : > { %v7398_v39 = vpop.permute.xlu0 %3288  ;;  %v7400_v38 = vpop.permute.xlu1 %3664 }
 0x5ab   : > { %3171 = vrot.lane.b32.xlu1 %v3128_v45, %s5574_s16  ;;  %3306 = vrot.lane.b32.xlu0 %v7305_v49, %s5582_s18 }
 0x5ad   : > { %v7407_v12 = vpop.permute.xlu0 %3474  ;;  %v7409_v1 = vpop.permute.xlu1 %3748 }
 0x5af   : > { %3404 = vrot.lane.b32.xlu1 %v7412_v48, %s5579_s22  ;;  %3492 = vrot.lane.b32.xlu0 %v7307_v42, %s5583_s10 }
 0x5b1   : > { %v3473_v53 = vpop.permute.xlu0 %3472  ;;  %v3287_v11 = vpop.permute.xlu1 %3286 }
 0x5b3   : > { %3310 = vrot.lane.b32.xlu1 %v7313_v6, %s5582_s18  ;;  %3592 = vrot.lane.b32.xlu0 %v7412_v48, %s5585_s11 }
 0x5b5   : > { %v3152_v60 = vpop.permute.xlu0 %3151  ;;  %v7422_v4 = vpop.permute.xlu1 %3572 }
 0x5b6   : > { %3199 = vst.msk [vmem:[#allocation5 + $0x8] sm:$0xff] %vm3197_vm6, %v3152_v60 }
 0x5b7   : > { %3498 = vrot.lane.b32.xlu1 %v7313_v6, %s5583_s10  ;;  %3169 = vrot.lane.b32.xlu0 %v3127_v25, %s5574_s16 }
 0x5b9   : > { %v7430_v2 = vpop.permute.xlu0 %3386  ;;  %v3385_v61 = vpop.permute.xlu1 %3384 }
 0x5bb   : > { %3308 = vrot.lane.b32.xlu1 %v7315_v21, %s5582_s18  ;;  %3402 = vrot.lane.b32.xlu0 %v7433_v8, %s5579_s22 }
 0x5bd   : > { %v3215_v41 = vld [vmem:[#allocation5 + $0x9] sm:$0x7f]  ;;  %v3150_v24 = vpop.permute.xlu0 %3149  ;;  %v3571_v29 = vpop.permute.xlu1 %3570 }
 0x5be   : > { %v3229_v16 = vadd.f32 %v3215_v41, %v7221_v20  ;;  %3198 = vst.msk [vmem:[#allocation5] sm:$0xff] %vm3197_vm6, %v3150_v24 }
 0x5bf   : > { %3496 = vrot.lane.b32.xlu1 %v7315_v21, %s5583_s10  ;;  %3590 = vrot.lane.b32.xlu0 %v7433_v8, %s5585_s11 }
 0x5c0   : > { %3244 = vst.msk [vmem:[#allocation5 + $0x9] sm:$0x7f] %vm3243_vm7, %v3229_v16 }
 0x5c1   : > { %v7446_v26 = vpop.permute.xlu0 %3292  ;;  %v7448_v17 = vpop.permute.xlu1 %3752 }
 0x5c3   : > { %3175 = vrot.lane.b32.xlu1 %v3130_v63, %s5574_s16  ;;  %3173 = vrot.lane.b32.xlu0 %v3129_v35, %s5574_s16 }
 0x5c5   : > { %v3454_v56 = vld [vmem:[#allocation5 + $0x1] sm:$0x7f]  ;;  %v7456_v52 = vpop.permute.xlu0 %3478  ;;  %v7458_v30 = vpop.permute.xlu1 %3290 }
 0x5c6   : > { %v3520_v3 = vadd.f32 %v3473_v53, %v3454_v56 }
 0x5c7   : > { %v3258_v20 = vld [vmem:[#allocation5 + $0x8] sm:$0xff]  ;;  %3408 = vrot.lane.b32.xlu1 %v7461_v31, %s5579_s22  ;;  %3594 = vrot.lane.b32.xlu0 %v7464_v27, %s5585_s11 }
 0x5c8   : > { %v3328_v46 = vadd.f32 %v3287_v11, %v3258_v20  ;;  %3536 = vst.msk [vmem:[#allocation5 + $0x1] sm:$0x7f] %vm3243_vm7, %v3520_v3  ;;  %v3918_v3 = vld [vmem:[%s8560_s7] sm:$0xff] }
 0x5c9   : > { %v7471_v43 = vpop.permute.xlu0 %3668  ;;  %v7473_v10 = vpop.permute.xlu1 %3476  ;;  %5307 = vmatprep.subr.mxu1 %v3918_v3 }
 0x5ca   : > { %3342 = vst.msk [vmem:[#allocation5 + $0x8] sm:$0xff] %vm3197_vm6, %v3328_v46  ;;  %5308 = vmatpush3.msra.mxu1 %v3918_v3 }
 0x5cb   : > { %3406 = vrot.lane.b32.xlu1 %v7464_v27, %s5579_s22  ;;  %3179 = vrot.lane.b32.xlu0 %v3132_v9, %s5574_s16 }
 0x5cd   : > { %v7481_v23 = vpop.permute.xlu0 %3666  ;;  %v7483_v22 = vpop.permute.xlu1 %3750 }
 0x5cf   : > { %v3552_v36 = vld [vmem:[#allocation5] sm:$0x7f]  ;;  %3500 = vrot.lane.b32.xlu1 %v7327_v34, %s5583_s10  ;;  %3177 = vrot.lane.b32.xlu0 %v3131_v13, %s5574_s16 }
 0x5d0   : > { %v3618_v15 = vadd.f32 %v3571_v29, %v3552_v36 }
 0x5d1   : > { %v3356_v18 = vld [vmem:[#allocation5 + $0x8] sm:$0x7f]  ;;  %v3156_v57 = vpop.permute.xlu0 %3155  ;;  %v7490_v58 = vpop.permute.xlu1 %3390 }
 0x5d2   : > { %v3426_v45 = vadd.f32 %v3385_v61, %v3356_v18  ;;  %3634 = vst.msk [vmem:[#allocation5] sm:$0x7f] %vm3243_vm7, %v3618_v15 }
 0x5d3   : > { %3201 = vst.msk [vmem:[#allocation5 + $0x18] sm:$0xff] %vm3197_vm6, %v3156_v57  ;;  %3754 = vrot.lane.b32.xlu1 %v7259_v47, %s5584_s13  ;;  %3596 = vrot.lane.b32.xlu0 %v7461_v31, %s5585_s11 }
 0x5d4   : > { %3440 = vst.msk [vmem:[#allocation5 + $0x8] sm:$0x7f] %vm3243_vm7, %v3426_v45 }
 0x5d5   : > { %v7499_v59 = vpop.permute.xlu0 %3576  ;;  %v3154_v53 = vpop.permute.xlu1 %3153 }
 0x5d6   : > { %3200 = vst.msk [vmem:[#allocation5 + $0x10] sm:$0xff] %vm3197_vm6, %v3154_v53 }
 0x5d7   : > { %3680 = vrot.lane.b32.xlu1 %v7307_v42, %s5578_s21  ;;  %3678 = vrot.lane.b32.xlu0 %v7294_v51, %s5578_s21 }
 0x5d9   : > { %v3650_v11 = vld [vmem:[#allocation5 + $0x1] sm:$0x7f]  ;;  %v7506_v25 = vpop.permute.xlu0 %3574  ;;  %v3389_v61 = vpop.permute.xlu1 %3388 }
 0x5da   : > { %v3217_v60 = vld [vmem:[#allocation5 + $0x19] sm:$0x7f]  ;;  %v3706_v41 = vadd.f32 %v7400_v38, %v3650_v11 }
 0x5db   : > { %v3231_v24 = vadd.f32 %v3217_v60, %v7244_v62  ;;  %v3455_v29 = vld [vmem:[#allocation5 + $0x9] sm:$0x7f]  ;;  %3756 = vrot.lane.b32.xlu1 %v7257_v5, %s5584_s13  ;;  %3312 = vrot.lane.b32.xlu0 %v7327_v34, %s5582_s18 }
 0x5dc   : > { %v3521_v16 = vadd.f32 %v7407_v12, %v3455_v29  ;;  %3720 = vst.msk [vmem:[#allocation5 + $0x1] sm:$0x7f] %vm3243_vm7, %v3706_v41 }
 0x5dd   : > { %3246 = vst.msk [vmem:[#allocation5 + $0x19] sm:$0x7f] %vm3243_vm7, %v3231_v24  ;;  %v3216_v63 = vld [vmem:[#allocation5 + $0x11] sm:$0x7f]  ;;  %v7517_v35 = vpop.permute.xlu0 %3672  ;;  %v7519_v56 = vpop.permute.xlu1 %3296 }
 0x5de   : > { %3537 = vst.msk [vmem:[#allocation5 + $0x9] sm:$0x7f] %vm3243_vm7, %v3521_v16  ;;  %v3230_v62 = vadd.f32 %v7219_v28, %v3216_v63 }
 0x5df   : > { %3758 = vrot.lane.b32.xlu1 %v7287_v14, %s5584_s13  ;;  %3682 = vrot.lane.b32.xlu0 %v7305_v49, %s5578_s21 }
 0x5e0   : > { %3245 = vst.msk [vmem:[#allocation5 + $0x11] sm:$0x7f] %vm3243_vm7, %v3230_v62 }
 0x5e1   : > { %v7528_v38 = vpop.permute.xlu0 %3480  ;;  %v7530_v12 = vpop.permute.xlu1 %3482 }
 0x5e3   : > { %3832 = vrot.lane.b32.xlu1 %v7238_v50, %s5575_s8  ;;  %3684 = vrot.lane.b32.xlu0 %v7315_v21, %s5578_s21  ;;  %v3734_v28 = vld [vmem:[#allocation5] sm:$0xff] }
 0x5e4   : > { %v3260_v20 = vld [vmem:[#allocation5 + $0x18] sm:$0xff]  ;;  %v3790_v9 = vadd.f32 %v7409_v1, %v3734_v28 }
 0x5e5   : > { %v3330_v46 = vadd.f32 %v7458_v30, %v3260_v20  ;;  %v3553_v13 = vld [vmem:[#allocation5 + $0x8] sm:$0x7f]  ;;  %v7541_v36 = vpop.permute.xlu0 %3670  ;;  %v3295_v15 = vpop.permute.xlu1 %3294 }
 0x5e6   : > { %v3619_v18 = vadd.f32 %v7422_v4, %v3553_v13  ;;  %3804 = vst.msk [vmem:[#allocation5] sm:$0xff] %vm3197_vm6, %v3790_v9 }
 0x5e7   : > { %3344 = vst.msk [vmem:[#allocation5 + $0x18] sm:$0xff] %vm3197_vm6, %v3330_v46  ;;  %v3259_v50 = vld [vmem:[#allocation5 + $0x10] sm:$0xff]  ;;  %3834 = vrot.lane.b32.xlu1 %v7299_v7, %s5575_s8  ;;  %3760 = vrot.lane.b32.xlu0 %v7285_v44, %s5584_s13 }
 0x5e8   : > { %3635 = vst.msk [vmem:[#allocation5 + $0x8] sm:$0x7f] %vm3243_vm7, %v3619_v18  ;;  %v3329_v1 = vadd.f32 %v7398_v39, %v3259_v50  ;;  %v7609_v18 = vrot.slane %v7327_v34, 1 }
 0x5e9   : > { %v3160_v30 = vpop.permute.xlu0 %3159  ;;  %v7552_v57 = vpop.permute.xlu1 %3394 }
 0x5ea   : > { %3343 = vst.msk [vmem:[#allocation5 + $0x10] sm:$0xff] %vm3197_vm6, %v3329_v1  ;;  %3203 = vst.msk [vmem:[#allocation5 + $0x28] sm:$0xff] %vm3197_vm6, %v3160_v30  ;;  %v3568_v1 = vrot.slane %v7285_v44, 1 }
 0x5eb   : > { %3486 = vrot.lane.b32.xlu1 %v7285_v44, %s5583_s10  ;;  %3686 = vrot.lane.b32.xlu0 %v7313_v6, %s5578_s21 }
 0x5ed   : > { %v7560_v4 = vpop.permute.xlu0 %3392  ;;  %v7562_v45 = vpop.permute.xlu1 %3580 }
 0x5ee   : > { %v3358_v7 = vld [vmem:[#allocation5 + $0x18] sm:$0x7f] }
 0x5ef   : > { %v3428_v53 = vadd.f32 %v3389_v61, %v3358_v7  ;;  %v3651_v39 = vld [vmem:[#allocation5 + $0x9] sm:$0x7f]  ;;  %3836 = vrot.lane.b32.xlu1 %v7278_v40, %s5575_s8  ;;  %3688 = vrot.lane.b32.xlu0 %v7327_v34, %s5578_s21 }
 0x5f0   : > { %v3707_v11 = vadd.f32 %v7481_v23, %v3651_v39 }
 0x5f1   : > { %3442 = vst.msk [vmem:[#allocation5 + $0x18] sm:$0x7f] %vm3243_vm7, %v3428_v53  ;;  %v3357_v60 = vld [vmem:[#allocation5 + $0x10] sm:$0x7f]  ;;  %v3219_v41 = vld [vmem:[#allocation5 + $0x29] sm:$0x7f]  ;;  %v7570_v24 = vpop.permute.xlu0 %3578  ;;  %v3158_v29 = vpop.permute.xlu1 %3157 }
 0x5f2   : > { %3721 = vst.msk [vmem:[#allocation5 + $0x9] sm:$0x7f] %vm3243_vm7, %v3707_v11  ;;  %v3427_v61 = vadd.f32 %v7430_v2, %v3357_v60  ;;  %v3233_v16 = vadd.f32 %v3219_v41, %v7259_v47 }
 0x5f3   : > { %3202 = vst.msk [vmem:[#allocation5 + $0x20] sm:$0xff] %vm3197_vm6, %v3158_v29  ;;  %3838 = vrot.lane.b32.xlu1 %v7338_v32, %s5575_s8  ;;  %3762 = vrot.lane.b32.xlu0 %v7294_v51, %s5584_s13 }
 0x5f4   : > { %3441 = vst.msk [vmem:[#allocation5 + $0x10] sm:$0x7f] %vm3243_vm7, %v3427_v61  ;;  %3248 = vst.msk [vmem:[#allocation5 + $0x29] sm:$0x7f] %vm3243_vm7, %v3233_v16 }
 0x5f5   : > { %v7582_v40 = vpop.permute.xlu0 %3676  ;;  %v7584_v23 = vpop.permute.xlu1 %3674 }
 0x5f7   : > { %3764 = vrot.lane.b32.xlu1 %v7307_v42, %s5584_s13  ;;  %3690 = vrot.lane.b32.xlu0 %v7321_v54, %s5578_s21  ;;  %s5589_s21 = smov 125  }
 0x5f8   : > { %v3457_v63 = vld [vmem:[#allocation5 + $0x19] sm:$0x7f] }
 0x5f9   : > { %v3523_v47 = vadd.f32 %v7456_v52, %v3457_v63  ;;  %v3735_v32 = vld [vmem:[#allocation5 + $0x8] sm:$0xff]  ;;  %v7591_v62 = vpop.permute.xlu0 %3484  ;;  %v3162_v3 = vpop.permute.xlu1 %3161 }
 0x5fa   : > { %v3218_v2 = vld [vmem:[#allocation5 + $0x21] sm:$0x7f]  ;;  %v3791_v20 = vadd.f32 %v7483_v22, %v3735_v32  ;;  %3204 = vst.msk [vmem:[#allocation5 + $0x30] sm:$0xff] %vm3197_vm6, %v3162_v3 }
 0x5fb   : > { %3539 = vst.msk [vmem:[#allocation5 + $0x19] sm:$0x7f] %vm3243_vm7, %v3523_v47  ;;  %v3232_v28 = vadd.f32 %v7242_v0, %v3218_v2  ;;  %v3456_v46 = vld [vmem:[#allocation5 + $0x11] sm:$0x7f]  ;;  %v3262_v9 = vld [vmem:[#allocation5 + $0x28] sm:$0xff]  ;;  %3840 = vrot.lane.b32.xlu1 %v7330_v19, %s5575_s8  ;;  %3766 = vrot.lane.b32.xlu0 %v7305_v49, %s5584_s13 }
 0x5fc   : > { %3805 = vst.msk [vmem:[#allocation5 + $0x8] sm:$0xff] %vm3197_vm6, %v3791_v20  ;;  %v3522_v52 = vadd.f32 %v7473_v10, %v3456_v46  ;;  %v3332_v13 = vadd.f32 %v3295_v15, %v3262_v9 }
 0x5fd   : > { %3247 = vst.msk [vmem:[#allocation5 + $0x21] sm:$0x7f] %vm3243_vm7, %v3232_v28  ;;  %v7604_v22 = vpop.permute.xlu0 %3298  ;;  %v7606_v0 = vpop.permute.xlu1 %3582 }
 0x5fe   : > { %3538 = vst.msk [vmem:[#allocation5 + $0x11] sm:$0x7f] %vm3243_vm7, %v3522_v52 }
 0x5ff   : > { %3346 = vst.msk [vmem:[#allocation5 + $0x28] sm:$0xff] %vm3197_vm6, %v3332_v13  ;;  %3842 = vrot.lane.b32.xlu1 %v7359_v37, %s5575_s8  ;;  %3598 = vrot.lane.b32.xlu0 %v7609_v18, %s5585_s11 }
 0x601   : > { %v3220_v10 = vld [vmem:[#allocation5 + $0x31] sm:$0x7f]  ;;  %v3164_v15 = vpop.permute.xlu0 %3163  ;;  %v7617_v50 = vpop.permute.xlu1 %3396 }
 0x602   : > { %v3555_v19 = vld [vmem:[#allocation5 + $0x18] sm:$0x7f]  ;;  %v3234_v7 = vadd.f32 %v7257_v5, %v3220_v10  ;;  %3205 = vst.msk [vmem:[#allocation5 + $0x38] sm:$0xff] %vm3197_vm6, %v3164_v15 }
 0x603   : > { %v3621_v30 = vadd.f32 %v7499_v59, %v3555_v19  ;;  %3768 = vrot.lane.b32.xlu1 %v7315_v21, %s5584_s13  ;;  %3844 = vrot.lane.b32.xlu0 %v3568_v1, %s5575_s8 }
 0x604   : > { %v3261_v53 = vld [vmem:[#allocation5 + $0x20] sm:$0xff]  ;;  %3249 = vst.msk [vmem:[#allocation5 + $0x31] sm:$0x7f] %vm3243_vm7, %v3234_v7 }
 0x605   : > { %3637 = vst.msk [vmem:[#allocation5 + $0x18] sm:$0x7f] %vm3243_vm7, %v3621_v30  ;;  %v3331_v37 = vadd.f32 %v7446_v26, %v3261_v53  ;;  %v3554_v39 = vld [vmem:[#allocation5 + $0x10] sm:$0x7f]  ;;  %v7629_v11 = vpop.permute.xlu0 %3490  ;;  %v7631_v59 = vpop.permute.xlu1 %3302 }
 0x606   : > { %v3360_v44 = vld [vmem:[#allocation5 + $0x28] sm:$0x7f]  ;;  %v3620_v5 = vadd.f32 %v7506_v25, %v3554_v39 }
 0x607   : > { %v3430_v60 = vadd.f32 %v7560_v4, %v3360_v44  ;;  %3345 = vst.msk [vmem:[#allocation5 + $0x20] sm:$0xff] %vm3197_vm6, %v3331_v37  ;;  %3584 = vrot.lane.b32.xlu1 %v3568_v1, %s5585_s11  ;;  %3770 = vrot.lane.b32.xlu0 %v7313_v6, %s5584_s13  ;;  %v5144_v37 = vld [vmem:[#allocation7] ss:$0 sm:$0xff] }
 0x608   : > { %3636 = vst.msk [vmem:[#allocation5 + $0x10] sm:$0x7f] %vm3243_vm7, %v3620_v5 }
 0x609   : > { %3444 = vst.msk [vmem:[#allocation5 + $0x28] sm:$0x7f] %vm3243_vm7, %v3430_v60  ;;  %v3221_v26 = vld [vmem:[#allocation5 + $0x39] sm:$0x7f]  ;;  %v7641_v41 = vpop.permute.xlu0 %3300  ;;  %v7643_v29 = vpop.permute.xlu1 %3488 }
 0x60a   : > { %v3235_v25 = vadd.f32 %v3221_v26, %v7287_v14 }
 0x60b   : > { %v3263_v4 = vld [vmem:[#allocation5 + $0x30] sm:$0xff]  ;;  %3772 = vrot.lane.b32.xlu1 %v7327_v34, %s5584_s13  ;;  %3410 = vrot.lane.b32.xlu0 %v7609_v18, %s5579_s22  ;;  %s5590_s22 = smov 124  }
 0x60c   : > { %v3653_v61 = vld [vmem:[#allocation5 + $0x19] sm:$0x7f]  ;;  %v3333_v63 = vadd.f32 %v7519_v56, %v3263_v4  ;;  %3250 = vst.msk [vmem:[#allocation5 + $0x39] sm:$0x7f] %vm3243_vm7, %v3235_v25 }
 0x60d   : > { %v3709_v16 = vadd.f32 %v7541_v36, %v3653_v61  ;;  %v3168_v32 = vpop.permute.xlu0 %3167  ;;  %v7653_v2 = vpop.permute.xlu1 %3398 }
 0x60e   : > { %v3359_v47 = vld [vmem:[#allocation5 + $0x20] sm:$0x7f]  ;;  %3347 = vst.msk [vmem:[#allocation5 + $0x30] sm:$0xff] %vm3197_vm6, %v3333_v63  ;;  %3207 = vst.msk [vmem:[#allocation5 + $0x48] sm:$0xff] %vm3197_vm6, %v3168_v32 }
 0x60f   : > { %3723 = vst.msk [vmem:[#allocation5 + $0x19] sm:$0x7f] %vm3243_vm7, %v3709_v16  ;;  %v3429_v14 = vadd.f32 %v7490_v58, %v3359_v47  ;;  %v3652_v3 = vld [vmem:[#allocation5 + $0x11] sm:$0x7f]  ;;  %3848 = vrot.lane.b32.xlu1 %v7433_v8, %s5575_s8  ;;  %3846 = vrot.lane.b32.xlu0 %v7384_v55, %s5575_s8 }
 0x610   : > { %v3459_v20 = vld [vmem:[#allocation5 + $0x29] sm:$0x7f]  ;;  %v3708_v56 = vadd.f32 %v7471_v43, %v3652_v3 }
 0x611   : > { %v3525_v36 = vadd.f32 %v7530_v12, %v3459_v20  ;;  %3443 = vst.msk [vmem:[#allocation5 + $0x20] sm:$0x7f] %vm3243_vm7, %v3429_v14  ;;  %v7666_v28 = vpop.permute.xlu0 %3400  ;;  %v7668_v58 = vpop.permute.xlu1 %3586 }
 0x612   : > { %3722 = vst.msk [vmem:[#allocation5 + $0x11] sm:$0x7f] %vm3243_vm7, %v3708_v56 }
 0x613   : > { %3541 = vst.msk [vmem:[#allocation5 + $0x29] sm:$0x7f] %vm3243_vm7, %v3525_v36  ;;  %v3264_v46 = vld [vmem:[#allocation5 + $0x38] sm:$0xff]  ;;  %3502 = vrot.lane.b32.xlu1 %v7321_v54, %s5583_s10  ;;  %3774 = vrot.lane.b32.xlu0 %v7321_v54, %s5584_s13 }
 0x614   : > { %v3334_v55 = vadd.f32 %v7604_v22, %v3264_v46 }
 0x615   : > { %v3361_v8 = vld [vmem:[#allocation5 + $0x30] sm:$0x7f]  ;;  %v3222_v43 = vld [vmem:[#allocation5 + $0x49] sm:$0x7f]  ;;  %v7677_v12 = vpop.permute.xlu0 %3588  ;;  %v7679_v9 = vpop.permute.xlu1 %3494 }
 0x616   : > { %v3431_v52 = vadd.f32 %v7552_v57, %v3361_v8  ;;  %3348 = vst.msk [vmem:[#allocation5 + $0x38] sm:$0xff] %vm3197_vm6, %v3334_v55  ;;  %v3236_v13 = vadd.f32 %v3222_v43, %v7296_v33 }
 0x617   : > { %3852 = vrot.lane.b32.xlu1 %v7464_v27, %s5575_s8  ;;  %3850 = vrot.lane.b32.xlu0 %v7412_v48, %s5575_s8 }
 0x618   : > { %v3458_v19 = vld [vmem:[#allocation5 + $0x21] sm:$0x7f]  ;;  %3445 = vst.msk [vmem:[#allocation5 + $0x30] sm:$0x7f] %vm3243_vm7, %v3431_v52  ;;  %3251 = vst.msk [vmem:[#allocation5 + $0x49] sm:$0x7f] %vm3243_vm7, %v3236_v13 }
 0x619   : > { %v3524_v22 = vadd.f32 %v7528_v38, %v3458_v19  ;;  %v3166_v15 = vpop.permute.xlu0 %3165  ;;  %v3305_v57 = vpop.permute.xlu1 %3304  ;;  %v3736_v1 = vld [vmem:[#allocation5 + $0x10] sm:$0xff] }
 0x61a   : > { %v3557_v10 = vld [vmem:[#allocation5 + $0x28] sm:$0x7f]  ;;  %3206 = vst.msk [vmem:[#allocation5 + $0x40] sm:$0xff] %vm3197_vm6, %v3166_v15  ;;  %v3792_v33 = vadd.f32 %v7448_v17, %v3736_v1 }
 0x61b   : > { %v3623_v30 = vadd.f32 %v7562_v45, %v3557_v10  ;;  %3540 = vst.msk [vmem:[#allocation5 + $0x21] sm:$0x7f] %vm3243_vm7, %v3524_v22  ;;  %3856 = vrot.lane.b32.xlu1 %v7609_v18, %s5575_s8  ;;  %3854 = vrot.lane.b32.xlu0 %v7461_v31, %s5575_s8  ;;  %v3569_v45 = vrot.slane %v7321_v54, 1 }
 0x61c   : > { %3806 = vst.msk [vmem:[#allocation5 + $0x10] sm:$0xff] %vm3197_vm6, %v3792_v33 }
 0x61d   : > { %3639 = vst.msk [vmem:[#allocation5 + $0x28] sm:$0x7f] %vm3243_vm7, %v3623_v30  ;;  %v3362_v48 = vld [vmem:[#allocation5 + $0x38] sm:$0x7f]  ;;  %v7701_v27 = vpop.permute.xlu0 %3306  ;;  %v3172_v38 = vpop.permute.xlu1 %3171 }
 0x61e   : > { %v3432_v7 = vadd.f32 %v7617_v50, %v3362_v48  ;;  %3209 = vst.msk [vmem:[#allocation5 + $0x58] sm:$0xff] %vm3197_vm6, %v3172_v38 }
 0x61f   : > { %v3460_v17 = vld [vmem:[#allocation5 + $0x31] sm:$0x7f]  ;;  %v3265_v53 = vld [vmem:[#allocation5 + $0x48] sm:$0xff]  ;;  %3600 = vrot.lane.b32.xlu1 %v3569_v45, %s5585_s11  ;;  %3858 = vrot.lane.b32.xlu0 %v3569_v45, %s5575_s8  ;;  %s5586_s8 = smov 4  }
 0x620   : > { %v3526_v31 = vadd.f32 %v7591_v62, %v3460_v17  ;;  %3446 = vst.msk [vmem:[#allocation5 + $0x38] sm:$0x7f] %vm3243_vm7, %v3432_v7  ;;  %v3335_v18 = vadd.f32 %v7641_v41, %v3265_v53 }
 0x621   : > { %v3462_v44 = vld [vmem:[#allocation5 + $0x41] sm:$0x7f]  ;;  %v7711_v54 = vpop.permute.xlu0 %3492  ;;  %v7713_v50 = vpop.permute.xlu1 %3404 }
 0x622   : > { %v3556_v39 = vld [vmem:[#allocation5 + $0x20] sm:$0x7f]  ;;  %3542 = vst.msk [vmem:[#allocation5 + $0x31] sm:$0x7f] %vm3243_vm7, %v3526_v31  ;;  %v3528_v60 = vadd.f32 %v7643_v29, %v3462_v44 }
 0x623   : > { %v3622_v5 = vadd.f32 %v7570_v24, %v3556_v39  ;;  %3349 = vst.msk [vmem:[#allocation5 + $0x48] sm:$0xff] %vm3197_vm6, %v3335_v18  ;;  %4118 = vrot.lane.b32.xlu0 %v5144_v37, %s5586_s8  ;;  %v3737_v18 = vld [vmem:[#allocation5 + $0x18] sm:$0xff] }
 0x624   : > { %v3655_v62 = vld [vmem:[#allocation5 + $0x29] sm:$0x7f]  ;;  %3544 = vst.msk [vmem:[#allocation5 + $0x41] sm:$0x7f] %vm3243_vm7, %v3528_v60 }
 0x625   : > { %3638 = vst.msk [vmem:[#allocation5 + $0x20] sm:$0x7f] %vm3243_vm7, %v3622_v5  ;;  %v3711_v26 = vadd.f32 %v7584_v23, %v3655_v62  ;;  %v3224_v41 = vld [vmem:[#allocation5 + $0x59] sm:$0x7f]  ;;  %v7722_v25 = vpop.permute.xlu0 %3592  ;;  %v7724_v61 = vpop.permute.xlu1 %3310 }
 0x626   : > { %v3238_v24 = vadd.f32 %v3224_v41, %v7307_v42 }
 0x627   : > { %3725 = vst.msk [vmem:[#allocation5 + $0x29] sm:$0x7f] %vm3243_vm7, %v3711_v26 }
 0x628   : > { %3253 = vst.msk [vmem:[#allocation5 + $0x59] sm:$0x7f] %vm3243_vm7, %v3238_v24 }
 0x629   : > { %v3558_v29 = vld [vmem:[#allocation5 + $0x30] sm:$0x7f]  ;;  %v3170_v16 = vpop.permute.xlu0 %3169  ;;  %v7729_v63 = vpop.permute.xlu1 %3498 }
 0x62a   : > { %v3363_v4 = vld [vmem:[#allocation5 + $0x48] sm:$0x7f]  ;;  %v3624_v23 = vadd.f32 %v7606_v0, %v3558_v29  ;;  %3208 = vst.msk [vmem:[#allocation5 + $0x50] sm:$0xff] %vm3197_vm6, %v3170_v16 }
 0x62b   : > { %v3433_v47 = vadd.f32 %v7653_v2, %v3363_v4  ;;  %v3560_v32 = vld [vmem:[#allocation5 + $0x40] sm:$0x7f] }
 0x62c   : > { %v3654_v14 = vld [vmem:[#allocation5 + $0x21] sm:$0x7f]  ;;  %3640 = vst.msk [vmem:[#allocation5 + $0x30] sm:$0x7f] %vm3243_vm7, %v3624_v23  ;;  %v3626_v42 = vadd.f32 %v7668_v58, %v3560_v32 }
 0x62d   : > { %3447 = vst.msk [vmem:[#allocation5 + $0x48] sm:$0x7f] %vm3243_vm7, %v3433_v47  ;;  %v3710_v3 = vadd.f32 %v7517_v35, %v3654_v14  ;;  %v3403_v20 = vpop.permute.xlu0 %3402  ;;  %v3309_v56 = vpop.permute.xlu1 %3308 }
 0x62e   : > { %3642 = vst.msk [vmem:[#allocation5 + $0x40] sm:$0x7f] %vm3243_vm7, %v3626_v42 }
 0x62f   : > { %3724 = vst.msk [vmem:[#allocation5 + $0x21] sm:$0x7f] %vm3243_vm7, %v3710_v3  ;;  %v3267_v0 = vld [vmem:[#allocation5 + $0x58] sm:$0xff] }
 0x630   : > { %v3337_v2 = vadd.f32 %v3305_v57, %v3267_v0 }
 0x631   : > { %v3223_v36 = vld [vmem:[#allocation5 + $0x51] sm:$0x7f]  ;;  %v7740_v46 = vpop.permute.xlu0 %3590  ;;  %v7742_v55 = vpop.permute.xlu1 %3496 }
 0x632   : > { %3351 = vst.msk [vmem:[#allocation5 + $0x58] sm:$0xff] %vm3197_vm6, %v3337_v2  ;;  %v3237_v8 = vadd.f32 %v7294_v51, %v3223_v36 }
 0x633   : > { %v3656_v58 = vld [vmem:[#allocation5 + $0x31] sm:$0x7f] }
 0x634   : > { %v3463_v43 = vld [vmem:[#allocation5 + $0x49] sm:$0x7f]  ;;  %v3712_v35 = vadd.f32 %v7582_v40, %v3656_v58  ;;  %3252 = vst.msk [vmem:[#allocation5 + $0x51] sm:$0x7f] %vm3243_vm7, %v3237_v8 }
 0x635   : > { %v3529_v52 = vadd.f32 %v7629_v11, %v3463_v43  ;;  %v3174_v13 = vpop.permute.xlu0 %3173  ;;  %v3176_v19 = vpop.permute.xlu1 %3175  ;;  %v3739_v8 = vld [vmem:[#allocation5 + $0x28] sm:$0xff] }
 0x636   : > { %3726 = vst.msk [vmem:[#allocation5 + $0x31] sm:$0x7f] %vm3243_vm7, %v3712_v35  ;;  %v3738_v47 = vld [vmem:[#allocation5 + $0x20] sm:$0xff] }
 0x637   : > { %3545 = vst.msk [vmem:[#allocation5 + $0x49] sm:$0x7f] %vm3243_vm7, %v3529_v52 }
 0x638   : > { %3210 = vst.msk [vmem:[#allocation5 + $0x60] sm:$0xff] %vm3197_vm6, %v3174_v13  ;;  %3211 = vst.msk [vmem:[#allocation5 + $0x68] sm:$0xff] %vm3197_vm6, %v3176_v19  ;;  %v3818_v19 = vld [vmem:[#allocation5] sm:$0x7f] }
 0x639   : > { %v3365_v22 = vld [vmem:[#allocation5 + $0x58] sm:$0x7f]  ;;  %v7753_v51 = vpop.permute.xlu0 %3594  ;;  %v7755_v10 = vpop.permute.xlu1 %3408 }
 0x63a   : > { %v3435_v40 = vadd.f32 %v3403_v20, %v3365_v22 }
 0x63b   : > { %v3266_v15 = vld [vmem:[#allocation5 + $0x50] sm:$0xff] }
 0x63c   : > { %v3336_v11 = vadd.f32 %v7631_v59, %v3266_v15  ;;  %3449 = vst.msk [vmem:[#allocation5 + $0x58] sm:$0x7f] %vm3243_vm7, %v3435_v40 }
 0x63d   : > { %v7759_v33 = vpop.permute.xlu1 %3406  ;;  %v3180_v48 = vpop.permute.xlu0 %3179 }
 0x63e   : > { %v3561_v57 = vld [vmem:[#allocation5 + $0x48] sm:$0x7f]  ;;  %3350 = vst.msk [vmem:[#allocation5 + $0x50] sm:$0xff] %vm3197_vm6, %v3336_v11  ;;  %3213 = vst.msk [vmem:[#allocation5 + $0x78] sm:$0xff] %vm3197_vm6, %v3180_v48 }
 0x63f   : > { %v3225_v1 = vld [vmem:[#allocation5 + $0x61] sm:$0x7f]  ;;  %v3226_v30 = vld [vmem:[#allocation5 + $0x69] sm:$0x7f]  ;;  %v3627_v38 = vadd.f32 %v7677_v12, %v3561_v57 }
 0x640   : > { %v3239_v45 = vadd.f32 %v7305_v49, %v3225_v1  ;;  %v3240_v7 = vadd.f32 %v3226_v30, %v7315_v21  ;;  %v3819_v1 = vld [vmem:[#allocation5 + $0x8] sm:$0x7f] }
 0x641   : > { %3643 = vst.msk [vmem:[#allocation5 + $0x48] sm:$0x7f] %vm3243_vm7, %v3627_v38  ;;  %v7769_v59 = vpop.permute.xlu1 %3500  ;;  %v3178_v17 = vpop.permute.xlu0 %3177 }
 0x642   : > { %3254 = vst.msk [vmem:[#allocation5 + $0x61] sm:$0x7f] %vm3243_vm7, %v3239_v45  ;;  %3255 = vst.msk [vmem:[#allocation5 + $0x69] sm:$0x7f] %vm3243_vm7, %v3240_v7 }
 0x643   : > { %3212 = vst.msk [vmem:[#allocation5 + $0x70] sm:$0xff] %vm3197_vm6, %v3178_v17  ;;  %v3465_v12 = vld [vmem:[#allocation5 + $0x59] sm:$0x7f] }
 0x644   : > { %v3531_v53 = vadd.f32 %v7679_v9, %v3465_v12 }
 0x645   : > { %v3364_v31 = vld [vmem:[#allocation5 + $0x50] sm:$0x7f]  ;;  %v3228_v49 = vld [vmem:[#allocation5 + $0x79] sm:$0x7f]  ;;  %v3755_v21 = vpop.permute.xlu1 %3754  ;;  %v7773_v37 = vpop.permute.xlu0 %3596 }
 0x646   : > { %v3434_v39 = vadd.f32 %v7666_v28, %v3364_v31  ;;  %3547 = vst.msk [vmem:[#allocation5 + $0x59] sm:$0x7f] %vm3243_vm7, %v3531_v53  ;;  %v3242_v44 = vadd.f32 %v3228_v49, %v7327_v34  ;;  %v3793_v5 = vadd.f32 %v3755_v21, %v3737_v18  ;;  %v3657_v28 = vld [vmem:[#allocation5 + $0x41] sm:$0x7f]  ;;  %v3461_v49 = vld [vmem:[#allocation5 + $0x39] sm:$0x7f] }
 0x648   : > { %3448 = vst.msk [vmem:[#allocation5 + $0x50] sm:$0x7f] %vm3243_vm7, %v3434_v39  ;;  %3257 = vst.msk [vmem:[#allocation5 + $0x79] sm:$0x7f] %vm3243_vm7, %v3242_v44  ;;  %v3658_v24 = vld [vmem:[#allocation5 + $0x49] sm:$0x7f] }
 0x649   : > { %v3268_v60 = vld [vmem:[#allocation5 + $0x60] sm:$0xff]  ;;  %v3269_v62 = vld [vmem:[#allocation5 + $0x68] sm:$0xff]  ;;  %3807 = vst.msk [vmem:[#allocation5 + $0x18] sm:$0xff] %vm3197_vm6, %v3793_v5  ;;  %v3681_v29 = vpop.permute.xlu1 %3680  ;;  %v3679_v4 = vpop.permute.xlu0 %3678 }
 0x64a   : > { %v3338_v26 = vadd.f32 %v7701_v27, %v3268_v60  ;;  %v3339_v9 = vadd.f32 %v3309_v56, %v3269_v62  ;;  %v3227_v41 = vld [vmem:[#allocation5 + $0x71] sm:$0x7f]  ;;  %v3714_v16 = vadd.f32 %v3681_v29, %v3658_v24  ;;  %v3713_v23 = vadd.f32 %v3679_v4, %v3657_v28 }
 0x64b   : > { %v3241_v34 = vadd.f32 %v7313_v6, %v3227_v41 }
 0x64c   : > { %3352 = vst.msk [vmem:[#allocation5 + $0x60] sm:$0xff] %vm3197_vm6, %v3338_v26  ;;  %3353 = vst.msk [vmem:[#allocation5 + $0x68] sm:$0xff] %vm3197_vm6, %v3339_v9 }
 0x64d   : > { %3256 = vst.msk [vmem:[#allocation5 + $0x71] sm:$0x7f] %vm3243_vm7, %v3241_v34  ;;  %3728 = vst.msk [vmem:[#allocation5 + $0x49] sm:$0x7f] %vm3243_vm7, %v3714_v16  ;;  %v3563_v27 = vld [vmem:[#allocation5 + $0x58] sm:$0x7f]  ;;  %v3757_v32 = vpop.permute.xlu1 %3756  ;;  %v3313_v14 = vpop.permute.xlu0 %3312 }
 0x64e   : > { %3727 = vst.msk [vmem:[#allocation5 + $0x41] sm:$0x7f] %vm3243_vm7, %v3713_v23  ;;  %v3629_v42 = vadd.f32 %v7722_v25, %v3563_v27  ;;  %v3794_v3 = vadd.f32 %v3757_v32, %v3738_v47 }
 0x64f   : > { %v3464_v20 = vld [vmem:[#allocation5 + $0x51] sm:$0x7f]  ;;  %v3271_v56 = vld [vmem:[#allocation5 + $0x78] sm:$0xff] }
 0x650   : > { %v3530_v0 = vadd.f32 %v7711_v54, %v3464_v20  ;;  %3645 = vst.msk [vmem:[#allocation5 + $0x58] sm:$0x7f] %vm3243_vm7, %v3629_v42  ;;  %v3341_v6 = vadd.f32 %v3313_v14, %v3271_v56 }
 0x651   : > { %3808 = vst.msk [vmem:[#allocation5 + $0x20] sm:$0xff] %vm3197_vm6, %v3794_v3  ;;  %v3759_v58 = vpop.permute.xlu1 %3758  ;;  %v3683_v43 = vpop.permute.xlu0 %3682 }
 0x652   : > { %3546 = vst.msk [vmem:[#allocation5 + $0x51] sm:$0x7f] %vm3243_vm7, %v3530_v0  ;;  %v3795_v52 = vadd.f32 %v3759_v58, %v3739_v8 }
 0x653   : > { %v3366_v2 = vld [vmem:[#allocation5 + $0x60] sm:$0x7f]  ;;  %v3367_v36 = vld [vmem:[#allocation5 + $0x68] sm:$0x7f]  ;;  %3355 = vst.msk [vmem:[#allocation5 + $0x78] sm:$0xff] %vm3197_vm6, %v3341_v6 }
 0x654   : > { %v3436_v35 = vadd.f32 %v7713_v50, %v3366_v2  ;;  %v3437_v25 = vadd.f32 %v7759_v33, %v3367_v36  ;;  %v3270_v54 = vld [vmem:[#allocation5 + $0x70] sm:$0xff]  ;;  %3809 = vst.msk [vmem:[#allocation5 + $0x28] sm:$0xff] %vm3197_vm6, %v3795_v52  ;;  %v3742_v14 = vld [vmem:[#allocation5 + $0x48] sm:$0xff] }
 0x655   : > { %v3340_v13 = vadd.f32 %v7724_v61, %v3270_v54  ;;  %v3833_v22 = vpop.permute.xlu1 %3832  ;;  %v3685_v40 = vpop.permute.xlu0 %3684  ;;  %v3740_v33 = vld [vmem:[#allocation5 + $0x30] sm:$0xff]  ;;  %v3741_v28 = vld [vmem:[#allocation5 + $0x40] sm:$0xff] }
 0x656   : > { %3450 = vst.msk [vmem:[#allocation5 + $0x60] sm:$0x7f] %vm3243_vm7, %v3436_v35  ;;  %3451 = vst.msk [vmem:[#allocation5 + $0x68] sm:$0x7f] %vm3243_vm7, %v3437_v25  ;;  %v3874_v50 = vadd.f32 %v3833_v22, %v3818_v19 }
 0x657   : > { %3354 = vst.msk [vmem:[#allocation5 + $0x70] sm:$0xff] %vm3197_vm6, %v3340_v13  ;;  %v3660_v15 = vld [vmem:[#allocation5 + $0x59] sm:$0x7f] }
 0x658   : > { %3888 = vst.msk [vmem:[#allocation5] sm:$0x7f] %vm3243_vm7, %v3874_v50  ;;  %v3716_v11 = vadd.f32 %v3685_v40, %v3660_v15  ;;  %v3822_v20 = vld [vmem:[#allocation5 + $0x20] sm:$0x7f] }
 0x659   : > { %v3562_v57 = vld [vmem:[#allocation5 + $0x50] sm:$0x7f]  ;;  %v3835_v30 = vpop.permute.xlu1 %3834  ;;  %v3761_v48 = vpop.permute.xlu0 %3760 }
 0x65a   : > { %v3628_v38 = vadd.f32 %v7740_v46, %v3562_v57  ;;  %3730 = vst.msk [vmem:[#allocation5 + $0x59] sm:$0x7f] %vm3243_vm7, %v3716_v11  ;;  %v3875_v61 = vadd.f32 %v3835_v30, %v3819_v1  ;;  %v3796_v45 = vadd.f32 %v3761_v48, %v3740_v33 }
 0x65b   : > { %v3823_v25 = vld [vmem:[#allocation5 + $0x28] sm:$0x7f] }
 0x65c   : > { %3644 = vst.msk [vmem:[#allocation5 + $0x50] sm:$0x7f] %vm3243_vm7, %v3628_v38  ;;  %3889 = vst.msk [vmem:[#allocation5 + $0x8] sm:$0x7f] %vm3243_vm7, %v3875_v61 }
 0x65d   : > { %v3466_v7 = vld [vmem:[#allocation5 + $0x61] sm:$0x7f]  ;;  %v3467_v17 = vld [vmem:[#allocation5 + $0x69] sm:$0x7f]  ;;  %3810 = vst.msk [vmem:[#allocation5 + $0x30] sm:$0xff] %vm3197_vm6, %v3796_v45  ;;  %v3487_v18 = vpop.permute.xlu1 %3486  ;;  %v3687_v46 = vpop.permute.xlu0 %3686 }
 0x65e   : > { %v3532_v12 = vadd.f32 %v7742_v55, %v3466_v7  ;;  %v3533_v53 = vadd.f32 %v7729_v63, %v3467_v17  ;;  %v3368_v31 = vld [vmem:[#allocation5 + $0x70] sm:$0x7f]  ;;  %v3527_v39 = vadd.f32 %v3487_v18, %v3461_v49  ;;  %v3369_v18 = vld [vmem:[#allocation5 + $0x78] sm:$0x7f] }
 0x65f   : > { %v3438_v21 = vadd.f32 %v7755_v10, %v3368_v31  ;;  %v3902_v44 = vld [vmem:[#allocation5] sm:$0xff]  ;;  %v3820_v63 = vld [vmem:[#allocation5 + $0x10] sm:$0x7f]  ;;  %v3821_v10 = vld [vmem:[#allocation5 + $0x18] sm:$0x7f] }
 0x660   : > { %3548 = vst.msk [vmem:[#allocation5 + $0x61] sm:$0x7f] %vm3243_vm7, %v3532_v12  ;;  %3549 = vst.msk [vmem:[#allocation5 + $0x69] sm:$0x7f] %vm3243_vm7, %v3533_v53  ;;  %5309 = vmatprep.mubr.msk.f32.mxu1 %vm3197_vm6, %v3902_v44 }
 0x661   : > { %3452 = vst.msk [vmem:[#allocation5 + $0x70] sm:$0x7f] %vm3243_vm7, %v3438_v21  ;;  %3543 = vst.msk [vmem:[#allocation5 + $0x39] sm:$0x7f] %vm3243_vm7, %v3527_v39  ;;  %v3837_v55 = vpop.permute.xlu1 %3836  ;;  %v3689_v5 = vpop.permute.xlu0 %3688  ;;  %v3744_v50 = vld [vmem:[#allocation5 + $0x58] sm:$0xff] }
 0x662   : > { %v3876_v60 = vadd.f32 %v3837_v55, %v3820_v63 }
 0x663   : > { %v3659_v62 = vld [vmem:[#allocation5 + $0x51] sm:$0x7f]  ;;  %v3903_v26 = vld [vmem:[#allocation5 + $0x8] sm:$0xff] }
 0x664   : > { %v3715_v9 = vadd.f32 %v3683_v43, %v3659_v62  ;;  %3890 = vst.msk [vmem:[#allocation5 + $0x10] sm:$0x7f] %vm3243_vm7, %v3876_v60  ;;  %5310 = vmatmul.mubr.msk.f32.vlgmr.msra.gmra.mrb[16].mxu1 %vm3197_vm6, %v3903_v26  ;;  %v3824_v15 = vld [vmem:[#allocation5 + $0x30] sm:$0x7f] }
 0x665   : > { %v3839_v29 = vpop.permute.xlu1 %3838  ;;  %v3763_v4 = vpop.permute.xlu0 %3762 }
 0x666   : > { %3729 = vst.msk [vmem:[#allocation5 + $0x51] sm:$0x7f] %vm3243_vm7, %v3715_v9  ;;  %v3877_v23 = vadd.f32 %v3839_v29, %v3821_v10  ;;  %v3797_v27 = vadd.f32 %v3763_v4, %v3741_v28 }
 0x667   : > { %v3564_v41 = vld [vmem:[#allocation5 + $0x60] sm:$0x7f]  ;;  %v3565_v24 = vld [vmem:[#allocation5 + $0x68] sm:$0x7f] }
 0x668   : > { %v3630_v34 = vadd.f32 %v7753_v51, %v3564_v41  ;;  %v3631_v16 = vadd.f32 %v7773_v37, %v3565_v24  ;;  %v3468_v47 = vld [vmem:[#allocation5 + $0x71] sm:$0x7f]  ;;  %3891 = vst.msk [vmem:[#allocation5 + $0x18] sm:$0x7f] %vm3243_vm7, %v3877_v23  ;;  %v3559_v33 = vld [vmem:[#allocation5 + $0x38] sm:$0x7f] }
 0x669   : > { %v3534_v32 = vadd.f32 %v7769_v59, %v3468_v47  ;;  %3811 = vst.msk [vmem:[#allocation5 + $0x40] sm:$0xff] %vm3197_vm6, %v3797_v27  ;;  %v3765_v42 = vpop.permute.xlu1 %3764  ;;  %v3691_v51 = vpop.permute.xlu0 %3690 }
 0x66a   : > { %3646 = vst.msk [vmem:[#allocation5 + $0x60] sm:$0x7f] %vm3243_vm7, %v3630_v34  ;;  %3647 = vst.msk [vmem:[#allocation5 + $0x68] sm:$0x7f] %vm3243_vm7, %v3631_v16  ;;  %v3798_v37 = vadd.f32 %v3765_v42, %v3742_v14 }
 0x66b   : > { %3550 = vst.msk [vmem:[#allocation5 + $0x71] sm:$0x7f] %vm3243_vm7, %v3534_v32  ;;  %v3904_v3 = vld [vmem:[#allocation5 + $0x10] sm:$0xff] }
 0x66c   : > { %3812 = vst.msk [vmem:[#allocation5 + $0x48] sm:$0xff] %vm3197_vm6, %v3798_v37  ;;  %5312 = vmatprep.mubr.msk.f32.mxu1 %vm3197_vm6, %v3904_v3 }
 0x66d   : > { %v3841_v56 = vpop.permute.xlu1 %3840  ;;  %v3743_v59 = vld [vmem:[#allocation5 + $0x50] sm:$0xff]  ;;  %v3767_v0 = vpop.permute.xlu0 %3766 }
 0x66e   : > { %v3878_v6 = vadd.f32 %v3841_v56, %v3822_v20  ;;  %v3799_v2 = vadd.f32 %v3767_v0, %v3743_v59 }
 0x66f   : > { %v3905_v58 = vld [vmem:[#allocation5 + $0x18] sm:$0xff] }
 0x670   : > { %3892 = vst.msk [vmem:[#allocation5 + $0x20] sm:$0x7f] %vm3243_vm7, %v3878_v6  ;;  %5313 = vmatmul.mubr.msk.f32.gmra.mrb[18].mxu1 %vm3197_vm6, %v3905_v58 }
 0x671   : > { %v3661_v36 = vld [vmem:[#allocation5 + $0x61] sm:$0x7f]  ;;  %v3662_v8 = vld [vmem:[#allocation5 + $0x69] sm:$0x7f]  ;;  %3813 = vst.msk [vmem:[#allocation5 + $0x50] sm:$0xff] %vm3197_vm6, %v3799_v2  ;;  %v3843_v52 = vpop.permute.xlu1 %3842  ;;  %v3599_v13 = vpop.permute.xlu0 %3598 }
 0x672   : > { %v3717_v43 = vadd.f32 %v3687_v46, %v3661_v36  ;;  %v3718_v35 = vadd.f32 %v3689_v5, %v3662_v8  ;;  %v3566_v54 = vld [vmem:[#allocation5 + $0x70] sm:$0x7f]  ;;  %v3879_v19 = vadd.f32 %v3843_v52, %v3823_v25  ;;  %v3825_v5 = vld [vmem:[#allocation5 + $0x40] sm:$0x7f] }
 0x673   : > { %v3632_v22 = vadd.f32 %v3599_v13, %v3566_v54  ;;  %v3826_v63 = vld [vmem:[#allocation5 + $0x48] sm:$0x7f] }
 0x674   : > { %3731 = vst.msk [vmem:[#allocation5 + $0x61] sm:$0x7f] %vm3243_vm7, %v3717_v43  ;;  %3732 = vst.msk [vmem:[#allocation5 + $0x69] sm:$0x7f] %vm3243_vm7, %v3718_v35 }
 0x675   : > { %3893 = vst.msk [vmem:[#allocation5 + $0x28] sm:$0x7f] %vm3243_vm7, %v3879_v19  ;;  %3648 = vst.msk [vmem:[#allocation5 + $0x70] sm:$0x7f] %vm3243_vm7, %v3632_v22  ;;  %v3769_v40 = vpop.permute.xlu1 %3768  ;;  %v3845_v11 = vpop.permute.xlu0 %3844 }
 0x676   : > { %v3800_v57 = vadd.f32 %v3769_v40, %v3744_v50  ;;  %v3880_v1 = vadd.f32 %v3845_v11, %v3824_v15 }
 0x677   : > { %v3906_v30 = vld [vmem:[#allocation5 + $0x20] sm:$0xff] }
 0x678   : > { %3814 = vst.msk [vmem:[#allocation5 + $0x58] sm:$0xff] %vm3197_vm6, %v3800_v57  ;;  %5315 = vmatprep.mubr.msk.f32.mxu1 %vm3197_vm6, %v3906_v30  ;;  %v3827_v23 = vld [vmem:[#allocation5 + $0x50] sm:$0x7f] }
 0x679   : > { %3894 = vst.msk [vmem:[#allocation5 + $0x30] sm:$0x7f] %vm3243_vm7, %v3880_v1  ;;  %v3585_v48 = vpop.permute.xlu1 %3584  ;;  %v3771_v61 = vpop.permute.xlu0 %3770 }
 0x67a   : > { %v3625_v45 = vadd.f32 %v3585_v48, %v3559_v33 }
 0x67b   : > { %v3745_v38 = vld [vmem:[#allocation5 + $0x60] sm:$0xff]  ;;  %v3746_v49 = vld [vmem:[#allocation5 + $0x68] sm:$0xff] }
 0x67c   : > { %v3801_v7 = vadd.f32 %v3771_v61, %v3745_v38  ;;  %v3663_v17 = vld [vmem:[#allocation5 + $0x71] sm:$0x7f]  ;;  %v3907_v12 = vld [vmem:[#allocation5 + $0x28] sm:$0xff]  ;;  %3641 = vst.msk [vmem:[#allocation5 + $0x38] sm:$0x7f] %vm3243_vm7, %v3625_v45 }
 0x67d   : > { %v3719_v53 = vadd.f32 %v3691_v51, %v3663_v17  ;;  %5316 = vmatmul.mubr.msk.f32.gmra.mrb[20].mxu1 %vm3197_vm6, %v3907_v12  ;;  %v3773_v31 = vpop.permute.xlu1 %3772  ;;  %v3411_v46 = vpop.permute.xlu0 %3410 }
 0x67e   : > { %3815 = vst.msk [vmem:[#allocation5 + $0x60] sm:$0xff] %vm3197_vm6, %v3801_v7  ;;  %v3802_v21 = vadd.f32 %v3773_v31, %v3746_v49  ;;  %v3439_v39 = vadd.f32 %v3411_v46, %v3369_v18 }
 0x67f   : > { %3733 = vst.msk [vmem:[#allocation5 + $0x71] sm:$0x7f] %vm3243_vm7, %v3719_v53  ;;  %v3828_v16 = vld [vmem:[#allocation5 + $0x58] sm:$0x7f] }
 0x680   : > { %v3908_v44 = vld [vmem:[#allocation5 + $0x30] sm:$0xff]  ;;  %3816 = vst.msk [vmem:[#allocation5 + $0x68] sm:$0xff] %vm3197_vm6, %v3802_v21 }
 0x681   : > { %3453 = vst.msk [vmem:[#allocation5 + $0x78] sm:$0x7f] %vm3243_vm7, %v3439_v39  ;;  %5318 = vmatprep.mubr.msk.f32.mxu1 %vm3197_vm6, %v3908_v44  ;;  %v3849_v55 = vpop.permute.xlu1 %3848  ;;  %v3847_v60 = vpop.permute.xlu0 %3846 }
 0x682   : > { %v3882_v62 = vadd.f32 %v3849_v55, %v3826_v63  ;;  %v3881_v26 = vadd.f32 %v3847_v60, %v3825_v5 }
 0x683   : > { %v3909_v9 = vld [vmem:[#allocation5 + $0x38] sm:$0xff] }
 0x684   : > { %3896 = vst.msk [vmem:[#allocation5 + $0x48] sm:$0x7f] %vm3243_vm7, %v3882_v62  ;;  %3895 = vst.msk [vmem:[#allocation5 + $0x40] sm:$0x7f] %vm3243_vm7, %v3881_v26  ;;  %5319 = vmatmul.mubr.msk.f32.gmra.mrb[22].mxu1 %vm3197_vm6, %v3909_v9 }
 0x685   : > { %v3503_v10 = vpop.permute.xlu1 %3502  ;;  %v3775_v24 = vpop.permute.xlu0 %3774  ;;  %v3829_v3 = vld [vmem:[#allocation5 + $0x60] sm:$0x7f] }
 0x686   : > { %v3747_v41 = vld [vmem:[#allocation5 + $0x70] sm:$0xff] }
 0x687   : > { %v3803_v29 = vadd.f32 %v3775_v24, %v3747_v41  ;;  %v3830_v37 = vld [vmem:[#allocation5 + $0x68] sm:$0x7f] }
 0x688   : > { %v3469_v28 = vld [vmem:[#allocation5 + $0x79] sm:$0x7f] }
 0x689   : > { %v3535_v4 = vadd.f32 %v3503_v10, %v3469_v28  ;;  %3817 = vst.msk [vmem:[#allocation5 + $0x70] sm:$0xff] %vm3197_vm6, %v3803_v29  ;;  %v3853_v34 = vpop.permute.xlu1 %3852  ;;  %v3851_v27 = vpop.permute.xlu0 %3850 }
 0x68a   : > { %v3884_v47 = vadd.f32 %v3853_v34, %v3828_v16  ;;  %v3883_v32 = vadd.f32 %v3851_v27, %v3827_v23 }
 0x68b   : > { %3551 = vst.msk [vmem:[#allocation5 + $0x79] sm:$0x7f] %vm3243_vm7, %v3535_v4  ;;  %v3910_v14 = vld [vmem:[#allocation5 + $0x40] sm:$0xff]  ;;  %v3911_v42 = vld [vmem:[#allocation5 + $0x48] sm:$0xff] }
 0x68c   : > { %3898 = vst.msk [vmem:[#allocation5 + $0x58] sm:$0x7f] %vm3243_vm7, %v3884_v47  ;;  %3897 = vst.msk [vmem:[#allocation5 + $0x50] sm:$0x7f] %vm3243_vm7, %v3883_v32  ;;  %5321 = vmatprep.mubr.msk.f32.mxu1 %vm3197_vm6, %v3910_v14 }
 0x68d   : > { %v3857_v51 = vpop.permute.xlu1 %3856  ;;  %5322 = vmatmul.mubr.msk.f32.gmra.mrb[24].mxu1 %vm3197_vm6, %v3911_v42  ;;  %v3855_v20 = vpop.permute.xlu0 %3854 }
 0x68e   : > { %v3886_v56 = vadd.f32 %v3857_v51, %v3830_v37  ;;  %v3885_v59 = vadd.f32 %v3855_v20, %v3829_v3 }
 0x690   : > { %3900 = vst.msk [vmem:[#allocation5 + $0x68] sm:$0x7f] %vm3243_vm7, %v3886_v56  ;;  %3899 = vst.msk [vmem:[#allocation5 + $0x60] sm:$0x7f] %vm3243_vm7, %v3885_v59  ;;  %v3831_v2 = vld [vmem:[#allocation5 + $0x70] sm:$0x7f] }
 0x691   : > { %v3601_v0 = vpop.permute.xlu1 %3600  ;;  %v3859_v36 = vpop.permute.xlu0 %3858 }
 0x692   : > { %v3567_v6 = vld [vmem:[#allocation5 + $0x78] sm:$0x7f]  ;;  %v3887_v58 = vadd.f32 %v3859_v36, %v3831_v2 }
 0x693   : > { %v3633_v8 = vadd.f32 %v3601_v0, %v3567_v6  ;;  %v3912_v43 = vld [vmem:[#allocation5 + $0x50] sm:$0xff]  ;;  %v3913_v35 = vld [vmem:[#allocation5 + $0x58] sm:$0xff] }
 0x694   : > { %3901 = vst.msk [vmem:[#allocation5 + $0x70] sm:$0x7f] %vm3243_vm7, %v3887_v58  ;;  %5324 = vmatprep.mubr.msk.f32.mxu1 %vm3197_vm6, %v3912_v43 }
 0x695   : > { %3649 = vst.msk [vmem:[#allocation5 + $0x78] sm:$0x7f] %vm3243_vm7, %v3633_v8  ;;  %5325 = vmatmul.mubr.msk.f32.gmra.mrb[26].mxu1 %vm3197_vm6, %v3913_v35  ;;  %v7872_v40 = vpop.permute.xlu0 %4118 }
 0x697   : > { %v3914_v25 = vld [vmem:[#allocation5 + $0x60] sm:$0xff]  ;;  %v3915_v52 = vld [vmem:[#allocation5 + $0x68] sm:$0xff] }
 0x698   : > { %5327 = vmatprep.mubr.msk.f32.mxu1 %vm3197_vm6, %v3914_v25 }
 0x699   : > { %5328 = vmatmul.mubr.msk.f32.gmra.mrb[28].mxu1 %vm3197_vm6, %v3915_v52 }
 0x69b   : > { %v3916_v54 = vld [vmem:[#allocation5 + $0x70] sm:$0xff] }
 0x69c   : > { %v3917_v13 = vld [vmem:[#allocation5 + $0x78] sm:$0xff]  ;;  %5330 = vmatprep.mubr.msk.f32.mxu1 %vm3197_vm6, %v3916_v54 }
 0x69d   : > { %5331 = vmatmul.mubr.msk.f32.gmra.mrb[30].mxu1 %vm3197_vm6, %v3917_v13 }
 0x737   : > { %v7864_v19 = vpop.f32.mrb[16].mxu1 }
 0x738   : > { %v7866_v22 = vpop.f32.mrb[17].mxu1  ;;  %4668 = vrot.lane.b32.xlu1 %v7864_v19, %s5587_s19  ;;  %4292 = vrot.lane.b32.xlu0 %v7864_v19, %s5588_s20  ;;  %v4122_v50 = vadd.f32 %v7864_v19, %v7872_v40  ;;  %v7884_v15 = vrot.slane %v7864_v19, 1 }
 0x739   : > { %v4121_v11 = vadd.f32 %v7872_v40, %v7866_v22  ;;  %v4374_v30 = vrot.slane %v7866_v22, 1 }
 0x73c   : > { %4290 = vrot.lane.b32.xlu1 %v7866_v22, %s5588_s20  ;;  %4478 = vrot.lane.b32.xlu0 %v7864_v19, %s5589_s21 }
 0x740   : > { %4476 = vrot.lane.b32.xlu1 %v7866_v22, %s5589_s21  ;;  %4155 = vrot.lane.b32.xlu0 %v4122_v50, %s5590_s22 }
 0x743   : > { %v7888_v57 = vpop.f32.mrb[18].mxu1 }
 0x744   : > { %v7890_v1 = vpop.f32.mrb[19].mxu1  ;;  %4390 = vrot.lane.b32.xlu0 %v7884_v15, %s5591_s23  ;;  %4153 = vrot.lane.b32.xlu1 %v4121_v11, %s5590_s22  ;;  %v4124_v38 = vadd.f32 %v7888_v57, %v7872_v40  ;;  %v7924_v7 = vrot.slane %v7888_v57, 1 }
 0x745   : > { %v4123_v17 = vadd.f32 %v7872_v40, %v7890_v1  ;;  %v7932_v12 = vrot.slane %v7890_v1, 1 }
 0x748   : > { %4576 = vrot.lane.b32.xlu0 %v7884_v15, %s5592_s24  ;;  %4388 = vrot.lane.b32.xlu1 %v4374_v30, %s5591_s23 }
 0x74c   : > { %4296 = vrot.lane.b32.xlu0 %v7888_v57, %s5588_s20  ;;  %4574 = vrot.lane.b32.xlu1 %v4374_v30, %s5592_s24 }
 0x750   : > { %v7902_v33 = vpop.f32.mrb[20].mxu1  ;;  %4482 = vrot.lane.b32.xlu0 %v7888_v57, %s5589_s21  ;;  %4672 = vrot.lane.b32.xlu1 %v7888_v57, %s5587_s19 }
 0x751   : > { %v7904_v48 = vpop.f32.mrb[21].mxu1  ;;  %v4126_v39 = vadd.f32 %v7902_v33, %v7872_v40  ;;  %v7972_v55 = vrot.slane %v7902_v33, 1 }
 0x752   : > { %v4125_v5 = vadd.f32 %v7872_v40, %v7904_v48  ;;  %v7980_v60 = vrot.slane %v7904_v48, 1 }
 0x754   : > { %4670 = vrot.lane.b32.xlu0 %v7890_v1, %s5587_s19  ;;  %4294 = vrot.lane.b32.xlu1 %v7890_v1, %s5588_s20 }
 0x757   : > { %v7916_v61 = vpop.f32.mrb[22].mxu1 }
 0x758   : > { %v7918_v45 = vpop.f32.mrb[23].mxu1  ;;  %4159 = vrot.lane.b32.xlu0 %v4124_v38, %s5590_s22  ;;  %4480 = vrot.lane.b32.xlu1 %v7890_v1, %s5589_s21  ;;  %v4128_v62 = vadd.f32 %v7916_v61, %v7872_v40 }
 0x759   : > { %v4127_v26 = vadd.f32 %v7872_v40, %v7918_v45  ;;  %v8007_v10 = vrot.slane %v7918_v45, 1 }
 0x75c   : > { %4394 = vrot.lane.b32.xlu0 %v7924_v7, %s5591_s23  ;;  %4157 = vrot.lane.b32.xlu1 %v4123_v17, %s5590_s22 }
 0x760   : > { %v7934_v53 = vpop.f32.mrb[24].mxu1  ;;  %4580 = vrot.lane.b32.xlu0 %v7924_v7, %s5592_s24  ;;  %4392 = vrot.lane.b32.xlu1 %v7932_v12, %s5591_s23 }
 0x761   : > { %v7940_v31 = vpop.f32.mrb[25].mxu1  ;;  %v4130_v9 = vadd.f32 %v7934_v53, %v7872_v40  ;;  %v8024_v24 = vrot.slane %v7934_v53, 1 }
 0x762   : > { %v4381_v41 = vrot.slane %v7940_v31, 1  ;;  %v4129_v4 = vadd.f32 %v7872_v40, %v7940_v31 }
 0x764   : > { %4300 = vrot.lane.b32.xlu0 %v7902_v33, %s5588_s20  ;;  %4578 = vrot.lane.b32.xlu1 %v7932_v12, %s5592_s24 }
 0x768   : > { %v7946_v49 = vpop.f32.mrb[26].mxu1  ;;  %4486 = vrot.lane.b32.xlu0 %v7902_v33, %s5589_s21  ;;  %4676 = vrot.lane.b32.xlu1 %v7902_v33, %s5587_s19 }
 0x769   : > { %v7952_v18 = vpop.f32.mrb[27].mxu1  ;;  %v4132_v29 = vadd.f32 %v7946_v49, %v7872_v40  ;;  %v8058_v47 = vrot.slane %v7946_v49, 1 }
 0x76a   : > { %v8036_v28 = vrot.slane %v7952_v18, 1  ;;  %v4131_v20 = vadd.f32 %v7872_v40, %v7952_v18 }
 0x76c   : > { %v7954_v46 = vpop.f32.mrb[28].mxu1  ;;  %4674 = vrot.lane.b32.xlu0 %v7904_v48, %s5587_s19  ;;  %4298 = vrot.lane.b32.xlu1 %v7904_v48, %s5588_s20 }
 0x76d   : > { %v7960_v21 = vpop.f32.mrb[29].mxu1  ;;  %v4134_v42 = vadd.f32 %v7954_v46, %v7872_v40  ;;  %v8101_v25 = vrot.slane %v7954_v46, 1 }
 0x76e   : > { %v8073_v3 = vrot.slane %v7960_v21, 1 }
 0x770   : > { %v7964_v44 = vpop.f32.mrb[30].mxu1  ;;  %4163 = vrot.lane.b32.xlu0 %v4126_v39, %s5590_s22  ;;  %4484 = vrot.lane.b32.xlu1 %v7904_v48, %s5589_s21  ;;  %v4133_v39 = vadd.f32 %v7872_v40, %v7960_v21 }
 0x771   : > { %v7969_v63 = vpop.f32.mrb[31].mxu1  ;;  %v4136_v50 = vadd.f32 %v7964_v44, %v7872_v40 }
 0x774   : > { %4398 = vrot.lane.b32.xlu0 %v7972_v55, %s5591_s23  ;;  %4161 = vrot.lane.b32.xlu1 %v4125_v5, %s5590_s22 }
 0x778   : > { %4584 = vrot.lane.b32.xlu0 %v7972_v55, %s5592_s24  ;;  %4396 = vrot.lane.b32.xlu1 %v7980_v60, %s5591_s23 }
 0x77c   : > { %4678 = vrot.lane.b32.xlu0 %v7918_v45, %s5587_s19  ;;  %4582 = vrot.lane.b32.xlu1 %v7980_v60, %s5592_s24 }
 0x780   : > { %4167 = vrot.lane.b32.xlu0 %v4128_v62, %s5590_s22  ;;  %4302 = vrot.lane.b32.xlu1 %v7918_v45, %s5588_s20 }
 0x784   : > { %4304 = vrot.lane.b32.xlu0 %v7940_v31, %s5588_s20  ;;  %4488 = vrot.lane.b32.xlu1 %v7918_v45, %s5589_s21 }
 0x788   : > { %4492 = vrot.lane.b32.xlu0 %v7940_v31, %s5589_s21  ;;  %4165 = vrot.lane.b32.xlu1 %v4127_v26, %s5590_s22 }
 0x78c   : > { %4171 = vrot.lane.b32.xlu0 %v4130_v9, %s5590_s22  ;;  %4400 = vrot.lane.b32.xlu1 %v8007_v10, %s5591_s23  ;;  %v4135_v9 = vadd.f32 %v7872_v40, %v7969_v63 }
 0x790   : > { %4402 = vrot.lane.b32.xlu0 %v4381_v41, %s5591_s23  ;;  %4586 = vrot.lane.b32.xlu1 %v8007_v10, %s5592_s24 }
 0x794   : > { %4590 = vrot.lane.b32.xlu0 %v4381_v41, %s5592_s24  ;;  %4306 = vrot.lane.b32.xlu1 %v7934_v53, %s5588_s20 }
 0x798   : > { %4308 = vrot.lane.b32.xlu0 %v7952_v18, %s5588_s20  ;;  %4494 = vrot.lane.b32.xlu1 %v7934_v53, %s5589_s21 }
 0x79c   : > { %4496 = vrot.lane.b32.xlu0 %v7952_v18, %s5589_s21  ;;  %4404 = vrot.lane.b32.xlu1 %v8024_v24, %s5591_s23 }
 0x7a0   : > { %4175 = vrot.lane.b32.xlu0 %v4132_v29, %s5590_s22  ;;  %4592 = vrot.lane.b32.xlu1 %v8024_v24, %s5592_s24 }
 0x7a4   : > { %4406 = vrot.lane.b32.xlu0 %v8036_v28, %s5591_s23  ;;  %4169 = vrot.lane.b32.xlu1 %v4129_v4, %s5590_s22 }
 0x7a8   : > { %4594 = vrot.lane.b32.xlu0 %v8036_v28, %s5592_s24  ;;  %4310 = vrot.lane.b32.xlu1 %v7946_v49, %s5588_s20 }
 0x7aa   : > { %v8047_v34 = vpop.permute.xlu1 %4668  ;;  %v8049_v16 = vpop.permute.xlu0 %4292 }
 0x7ac   : > { %4312 = vrot.lane.b32.xlu0 %v7960_v21, %s5588_s20  ;;  %4498 = vrot.lane.b32.xlu1 %v7946_v49, %s5589_s21 }
 0x7ae   : > { %v4291_v23 = vpop.permute.xlu1 %4290  ;;  %v8055_v27 = vpop.permute.xlu0 %4478 }
 0x7b0   : > { %4500 = vrot.lane.b32.xlu0 %v7960_v21, %s5589_s21  ;;  %4408 = vrot.lane.b32.xlu1 %v8058_v47, %s5591_s23 }
 0x7b2   : > { %v4477_v32 = vpop.permute.xlu1 %4476  ;;  %v4156_v14 = vpop.permute.xlu0 %4155 }
 0x7b3   : > { %4203 = vst.msk [vmem:[#allocation6 + $0x8] sm:$0xff] %vm4201_vm8, %v4156_v14 }
 0x7b4   : > { %4179 = vrot.lane.b32.xlu0 %v4134_v42, %s5590_s22  ;;  %4596 = vrot.lane.b32.xlu1 %v8058_v47, %s5592_s24 }
 0x7b6   : > { %v4154_v51 = vpop.permute.xlu1 %4153  ;;  %v8070_v37 = vpop.permute.xlu0 %4390 }
 0x7b7   : > { %4202 = vst.msk [vmem:[#allocation6] sm:$0xff] %vm4201_vm8, %v4154_v51 }
 0x7b8   : > { %4410 = vrot.lane.b32.xlu0 %v8073_v3, %s5591_s23  ;;  %4173 = vrot.lane.b32.xlu1 %v4131_v20, %s5590_s22 }
 0x7ba   : > { %v4219_v56 = vld [vmem:[#allocation6 + $0x9] sm:$0x7f]  ;;  %v4389_v59 = vpop.permute.xlu1 %4388  ;;  %v8081_v0 = vpop.permute.xlu0 %4576 }
 0x7bb   : > { %v4233_v6 = vadd.f32 %v4219_v56, %v7866_v22 }
 0x7bc   : > { %4598 = vrot.lane.b32.xlu0 %v8073_v3, %s5592_s24  ;;  %4314 = vrot.lane.b32.xlu1 %v7954_v46, %s5588_s20 }
 0x7bd   : > { %4248 = vst.msk [vmem:[#allocation6 + $0x9] sm:$0x7f] %vm4247_vm9, %v4233_v6 }
 0x7be   : > { %v4458_v2 = vld [vmem:[#allocation6 + $0x1] sm:$0x7f]  ;;  %v4575_v36 = vpop.permute.xlu1 %4574  ;;  %v8089_v8 = vpop.permute.xlu0 %4296 }
 0x7bf   : > { %v4524_v58 = vadd.f32 %v4477_v32, %v4458_v2 }
 0x7c0   : > { %4316 = vrot.lane.b32.xlu0 %v7969_v63, %s5588_s20  ;;  %4502 = vrot.lane.b32.xlu1 %v7954_v46, %s5589_s21 }
 0x7c1   : > { %4540 = vst.msk [vmem:[#allocation6 + $0x1] sm:$0x7f] %vm4247_vm9, %v4524_v58 }
 0x7c2   : > { %v8096_v43 = vpop.permute.xlu1 %4672  ;;  %v8098_v35 = vpop.permute.xlu0 %4482 }
 0x7c4   : > { %v4262_v52 = vld [vmem:[#allocation6 + $0x8] sm:$0xff]  ;;  %4504 = vrot.lane.b32.xlu0 %v7969_v63, %s5589_s21  ;;  %4412 = vrot.lane.b32.xlu1 %v8101_v25, %s5591_s23 }
 0x7c5   : > { %v4332_v54 = vadd.f32 %v4291_v23, %v4262_v52 }
 0x7c6   : > { %v4295_v13 = vpop.permute.xlu1 %4294  ;;  %v8107_v22 = vpop.permute.xlu0 %4670 }
 0x7c7   : > { %4346 = vst.msk [vmem:[#allocation6 + $0x8] sm:$0xff] %vm4201_vm8, %v4332_v54 }
 0x7c8   : > { %v4556_v11 = vld [vmem:[#allocation6] sm:$0x7f]  ;;  %4183 = vrot.lane.b32.xlu0 %v4136_v50, %s5590_s22  ;;  %4600 = vrot.lane.b32.xlu1 %v8101_v25, %s5592_s24 }
 0x7c9   : > { %v4622_v30 = vadd.f32 %v4575_v36, %v4556_v11 }
 0x7ca   : > { %v8115_v38 = vpop.permute.xlu1 %4480  ;;  %v4160_v17 = vpop.permute.xlu0 %4159 }
 0x7cb   : > { %4638 = vst.msk [vmem:[#allocation6] sm:$0x7f] %vm4247_vm9, %v4622_v30 }
 0x7cc   : > { %4205 = vst.msk [vmem:[#allocation6 + $0x18] sm:$0xff] %vm4201_vm8, %v4160_v17  ;;  %4682 = vrot.lane.b32.xlu0 %v7934_v53, %s5587_s19  ;;  %4177 = vrot.lane.b32.xlu1 %v4133_v39, %s5590_s22 }
 0x7ce   : > { %v4360_v5 = vld [vmem:[#allocation6 + $0x8] sm:$0x7f]  ;;  %v4158_v62 = vpop.permute.xlu1 %4157  ;;  %v8124_v26 = vpop.permute.xlu0 %4394 }
 0x7cf   : > { %v4430_v41 = vadd.f32 %v4389_v59, %v4360_v5  ;;  %4204 = vst.msk [vmem:[#allocation6 + $0x10] sm:$0xff] %vm4201_vm8, %v4158_v62 }
 0x7d0   : > { %4686 = vrot.lane.b32.xlu0 %v7946_v49, %s5587_s19  ;;  %4181 = vrot.lane.b32.xlu1 %v4135_v9, %s5590_s22 }
 0x7d1   : > { %4444 = vst.msk [vmem:[#allocation6 + $0x8] sm:$0x7f] %vm4247_vm9, %v4430_v41 }
 0x7d2   : > { %v4654_v29 = vld [vmem:[#allocation6 + $0x1] sm:$0x7f]  ;;  %v4393_v23 = vpop.permute.xlu1 %4392  ;;  %v8133_v32 = vpop.permute.xlu0 %4580 }
 0x7d3   : > { %v4221_v4 = vld [vmem:[#allocation6 + $0x19] sm:$0x7f]  ;;  %v4710_v14 = vadd.f32 %v8047_v34, %v4654_v29 }
 0x7d4   : > { %v4235_v42 = vadd.f32 %v4221_v4, %v7890_v1  ;;  %4690 = vrot.lane.b32.xlu0 %v7954_v46, %s5587_s19  ;;  %4680 = vrot.lane.b32.xlu1 %v7916_v61, %s5587_s19 }
 0x7d5   : > { %4724 = vst.msk [vmem:[#allocation6 + $0x1] sm:$0x7f] %vm4247_vm9, %v4710_v14 }
 0x7d6   : > { %4250 = vst.msk [vmem:[#allocation6 + $0x19] sm:$0x7f] %vm4247_vm9, %v4235_v42  ;;  %v4220_v40 = vld [vmem:[#allocation6 + $0x11] sm:$0x7f]  ;;  %v8143_v51 = vpop.permute.xlu1 %4578  ;;  %v8145_v20 = vpop.permute.xlu0 %4300 }
 0x7d7   : > { %v4234_v56 = vadd.f32 %v7864_v19, %v4220_v40 }
 0x7d8   : > { %v4459_v34 = vld [vmem:[#allocation6 + $0x9] sm:$0x7f]  ;;  %4694 = vrot.lane.b32.xlu0 %v7964_v44, %s5587_s19  ;;  %4684 = vrot.lane.b32.xlu1 %v7952_v18, %s5587_s19 }
 0x7d9   : > { %v4525_v59 = vadd.f32 %v8055_v27, %v4459_v34  ;;  %4249 = vst.msk [vmem:[#allocation6 + $0x11] sm:$0x7f] %vm4247_vm9, %v4234_v56 }
 0x7da   : > { %v8154_v6 = vpop.permute.xlu1 %4676  ;;  %v8156_v2 = vpop.permute.xlu0 %4486 }
 0x7db   : > { %4541 = vst.msk [vmem:[#allocation6 + $0x9] sm:$0x7f] %vm4247_vm9, %v4525_v59 }
 0x7dc   : > { %4506 = vrot.lane.b32.xlu0 %v7964_v44, %s5589_s21  ;;  %4688 = vrot.lane.b32.xlu1 %v7960_v21, %s5587_s19 }
 0x7dd   : > { %v4264_v36 = vld [vmem:[#allocation6 + $0x18] sm:$0xff] }
 0x7de   : > { %v4334_v58 = vadd.f32 %v4295_v13, %v4264_v36  ;;  %v4299_v52 = vpop.permute.xlu1 %4298  ;;  %v8163_v54 = vpop.permute.xlu0 %4674 }
 0x7e0   : > { %4348 = vst.msk [vmem:[#allocation6 + $0x18] sm:$0xff] %vm4201_vm8, %v4334_v58  ;;  %v4263_v27 = vld [vmem:[#allocation6 + $0x10] sm:$0xff]  ;;  %4754 = vrot.lane.b32.xlu0 %v7890_v1, %s5593_s25  ;;  %4692 = vrot.lane.b32.xlu1 %v7969_v63, %s5587_s19 }
 0x7e1   : > { %v4333_v50 = vadd.f32 %v8049_v16, %v4263_v27 }
 0x7e2   : > { %v4557_v11 = vld [vmem:[#allocation6 + $0x8] sm:$0x7f]  ;;  %v8171_v30 = vpop.permute.xlu1 %4484  ;;  %v4164_v17 = vpop.permute.xlu0 %4163 }
 0x7e3   : > { %v4623_v13 = vadd.f32 %v8081_v0, %v4557_v11  ;;  %4347 = vst.msk [vmem:[#allocation6 + $0x10] sm:$0xff] %vm4201_vm8, %v4333_v50  ;;  %4207 = vst.msk [vmem:[#allocation6 + $0x28] sm:$0xff] %vm4201_vm8, %v4164_v17 }
 0x7e4   : > { %4758 = vrot.lane.b32.xlu0 %v7904_v48, %s5593_s25  ;;  %4490 = vrot.lane.b32.xlu1 %v7916_v61, %s5589_s21 }
 0x7e5   : > { %4639 = vst.msk [vmem:[#allocation6 + $0x8] sm:$0x7f] %vm4247_vm9, %v4623_v13 }
 0x7e6   : > { %v4162_v16 = vpop.permute.xlu1 %4161  ;;  %v8181_v39 = vpop.permute.xlu0 %4398 }
 0x7e7   : > { %v4362_v1 = vld [vmem:[#allocation6 + $0x18] sm:$0x7f]  ;;  %4206 = vst.msk [vmem:[#allocation6 + $0x20] sm:$0xff] %vm4201_vm8, %v4162_v16 }
 0x7e8   : > { %v4432_v5 = vadd.f32 %v4393_v23, %v4362_v1  ;;  %4762 = vrot.lane.b32.xlu0 %v7918_v45, %s5593_s25  ;;  %4752 = vrot.lane.b32.xlu1 %v7864_v19, %s5593_s25  ;;  %v8233_v1 = vrot.slane %v7969_v63, 1 }
 0x7ea   : > { %4446 = vst.msk [vmem:[#allocation6 + $0x18] sm:$0x7f] %vm4247_vm9, %v4432_v5  ;;  %v4361_v0 = vld [vmem:[#allocation6 + $0x10] sm:$0x7f]  ;;  %v4223_v62 = vld [vmem:[#allocation6 + $0x29] sm:$0x7f]  ;;  %v4397_v9 = vpop.permute.xlu1 %4396  ;;  %v8189_v41 = vpop.permute.xlu0 %4584 }
 0x7eb   : > { %v4431_v29 = vadd.f32 %v8070_v37, %v4361_v0  ;;  %v4237_v4 = vadd.f32 %v4223_v62, %v7904_v48 }
 0x7ec   : > { %v4655_v23 = vld [vmem:[#allocation6 + $0x9] sm:$0x7f]  ;;  %4766 = vrot.lane.b32.xlu0 %v7934_v53, %s5593_s25  ;;  %4756 = vrot.lane.b32.xlu1 %v7888_v57, %s5593_s25 }
 0x7ed   : > { %v4711_v19 = vadd.f32 %v8107_v22, %v4655_v23  ;;  %4445 = vst.msk [vmem:[#allocation6 + $0x10] sm:$0x7f] %vm4247_vm9, %v4431_v29  ;;  %4252 = vst.msk [vmem:[#allocation6 + $0x29] sm:$0x7f] %vm4247_vm9, %v4237_v4 }
 0x7ee   : > { %v4222_v14 = vld [vmem:[#allocation6 + $0x21] sm:$0x7f]  ;;  %v8200_v42 = vpop.permute.xlu1 %4582  ;;  %v8202_v40 = vpop.permute.xlu0 %4678 }
 0x7ef   : > { %4725 = vst.msk [vmem:[#allocation6 + $0x9] sm:$0x7f] %vm4247_vm9, %v4711_v19  ;;  %v4236_v48 = vadd.f32 %v7888_v57, %v4222_v14 }
 0x7f0   : > { %4770 = vrot.lane.b32.xlu0 %v7946_v49, %s5593_s25  ;;  %4760 = vrot.lane.b32.xlu1 %v7902_v33, %s5593_s25 }
 0x7f1   : > { %v4461_v37 = vld [vmem:[#allocation6 + $0x19] sm:$0x7f]  ;;  %4251 = vst.msk [vmem:[#allocation6 + $0x21] sm:$0x7f] %vm4247_vm9, %v4236_v48 }
 0x7f2   : > { %v4527_v22 = vadd.f32 %v8098_v35, %v4461_v37  ;;  %v4303_v56 = vpop.permute.xlu1 %4302  ;;  %v4168_v34 = vpop.permute.xlu0 %4167 }
 0x7f3   : > { %4209 = vst.msk [vmem:[#allocation6 + $0x38] sm:$0xff] %vm4201_vm8, %v4168_v34 }
 0x7f4   : > { %4543 = vst.msk [vmem:[#allocation6 + $0x19] sm:$0x7f] %vm4247_vm9, %v4527_v22  ;;  %v4460_v59 = vld [vmem:[#allocation6 + $0x11] sm:$0x7f]  ;;  %v4266_v36 = vld [vmem:[#allocation6 + $0x28] sm:$0xff]  ;;  %4774 = vrot.lane.b32.xlu0 %v7954_v46, %s5593_s25  ;;  %4764 = vrot.lane.b32.xlu1 %v7916_v61, %s5593_s25 }
 0x7f5   : > { %v4526_v57 = vadd.f32 %v8115_v38, %v4460_v59  ;;  %v4336_v58 = vadd.f32 %v4299_v52, %v4266_v36 }
 0x7f6   : > { %v8219_v35 = vpop.permute.xlu1 %4488  ;;  %v8221_v27 = vpop.permute.xlu0 %4304 }
 0x7f7   : > { %4542 = vst.msk [vmem:[#allocation6 + $0x11] sm:$0x7f] %vm4247_vm9, %v4526_v57 }
 0x7f8   : > { %4350 = vst.msk [vmem:[#allocation6 + $0x28] sm:$0xff] %vm4201_vm8, %v4336_v58  ;;  %v4265_v50 = vld [vmem:[#allocation6 + $0x20] sm:$0xff]  ;;  %4778 = vrot.lane.b32.xlu0 %v7964_v44, %s5593_s25  ;;  %4768 = vrot.lane.b32.xlu1 %v7952_v18, %s5593_s25 }
 0x7f9   : > { %v4335_v11 = vadd.f32 %v8089_v8, %v4265_v50 }
 0x7fa   : > { %v4225_v38 = vld [vmem:[#allocation6 + $0x39] sm:$0x7f]  ;;  %v4166_v52 = vpop.permute.xlu1 %4165  ;;  %v8230_v13 = vpop.permute.xlu0 %4492 }
 0x7fb   : > { %v4559_v17 = vld [vmem:[#allocation6 + $0x18] sm:$0x7f]  ;;  %4349 = vst.msk [vmem:[#allocation6 + $0x20] sm:$0xff] %vm4201_vm8, %v4335_v11  ;;  %v4239_v5 = vadd.f32 %v4225_v38, %v7918_v45  ;;  %4208 = vst.msk [vmem:[#allocation6 + $0x30] sm:$0xff] %vm4201_vm8, %v4166_v52 }
 0x7fc   : > { %v4625_v16 = vadd.f32 %v8133_v32, %v4559_v17  ;;  %4772 = vrot.lane.b32.xlu1 %v7960_v21, %s5593_s25  ;;  %4414 = vrot.lane.b32.xlu0 %v8233_v1, %s5591_s23 }
 0x7fd   : > { %4254 = vst.msk [vmem:[#allocation6 + $0x39] sm:$0x7f] %vm4247_vm9, %v4239_v5 }
 0x7fe   : > { %4641 = vst.msk [vmem:[#allocation6 + $0x18] sm:$0x7f] %vm4247_vm9, %v4625_v16  ;;  %v4558_v8 = vld [vmem:[#allocation6 + $0x10] sm:$0x7f]  ;;  %v4401_v62 = vpop.permute.xlu1 %4400  ;;  %v4172_v32 = vpop.permute.xlu0 %4171 }
 0x7ff   : > { %v4364_v0 = vld [vmem:[#allocation6 + $0x28] sm:$0x7f]  ;;  %v4624_v29 = vadd.f32 %v8143_v51, %v4558_v8  ;;  %4211 = vst.msk [vmem:[#allocation6 + $0x48] sm:$0xff] %vm4201_vm8, %v4172_v32  ;;  %v4572_v51 = vrot.slane %v7916_v61, 1 }
 0x800   : > { %v4434_v4 = vadd.f32 %v4397_v9, %v4364_v0  ;;  %4776 = vrot.lane.b32.xlu1 %v7969_v63, %s5593_s25  ;;  %4602 = vrot.lane.b32.xlu0 %v8233_v1, %s5592_s24  ;;  %v4573_v9 = vrot.slane %v7964_v44, 1 }
 0x801   : > { %4640 = vst.msk [vmem:[#allocation6 + $0x10] sm:$0x7f] %vm4247_vm9, %v4624_v29 }
 0x802   : > { %4448 = vst.msk [vmem:[#allocation6 + $0x28] sm:$0x7f] %vm4247_vm9, %v4434_v4  ;;  %v4363_v45 = vld [vmem:[#allocation6 + $0x20] sm:$0x7f]  ;;  %v4224_v23 = vld [vmem:[#allocation6 + $0x31] sm:$0x7f]  ;;  %v8253_v19 = vpop.permute.xlu1 %4586  ;;  %v8255_v14 = vpop.permute.xlu0 %4402 }
 0x803   : > { %v4433_v48 = vadd.f32 %v8124_v26, %v4363_v45  ;;  %v4238_v37 = vadd.f32 %v7902_v33, %v4224_v23 }
 0x804   : > { %v4268_v34 = vld [vmem:[#allocation6 + $0x38] sm:$0xff]  ;;  %4588 = vrot.lane.b32.xlu1 %v4572_v51, %s5592_s24  ;;  %4604 = vrot.lane.b32.xlu0 %v4573_v9, %s5592_s24 }
 0x805   : > { %v4657_v22 = vld [vmem:[#allocation6 + $0x19] sm:$0x7f]  ;;  %4447 = vst.msk [vmem:[#allocation6 + $0x20] sm:$0x7f] %vm4247_vm9, %v4433_v48  ;;  %v4338_v36 = vadd.f32 %v4303_v56, %v4268_v34  ;;  %4253 = vst.msk [vmem:[#allocation6 + $0x31] sm:$0x7f] %vm4247_vm9, %v4238_v37 }
 0x806   : > { %v4713_v59 = vadd.f32 %v8163_v54, %v4657_v22  ;;  %v4226_v61 = vld [vmem:[#allocation6 + $0x49] sm:$0x7f]  ;;  %v8268_v57 = vpop.permute.xlu1 %4306  ;;  %v8270_v26 = vpop.permute.xlu0 %4590 }
 0x807   : > { %4352 = vst.msk [vmem:[#allocation6 + $0x38] sm:$0xff] %vm4201_vm8, %v4338_v36  ;;  %v4240_v33 = vadd.f32 %v4226_v61, %v7940_v31 }
 0x808   : > { %4727 = vst.msk [vmem:[#allocation6 + $0x19] sm:$0x7f] %vm4247_vm9, %v4713_v59  ;;  %v4656_v58 = vld [vmem:[#allocation6 + $0x11] sm:$0x7f]  ;;  %4836 = vrot.lane.b32.xlu1 %v7884_v15, %s5582_s18  ;;  %4838 = vrot.lane.b32.xlu0 %v7932_v12, %s5582_s18 }
 0x809   : > { %v4463_v50 = vld [vmem:[#allocation6 + $0x29] sm:$0x7f]  ;;  %v4712_v54 = vadd.f32 %v8096_v43, %v4656_v58  ;;  %4255 = vst.msk [vmem:[#allocation6 + $0x49] sm:$0x7f] %vm4247_vm9, %v4240_v33 }
 0x80a   : > { %v4529_v56 = vadd.f32 %v8156_v2, %v4463_v50  ;;  %v8282_v11 = vpop.permute.xlu1 %4494  ;;  %v8284_v17 = vpop.permute.xlu0 %4308 }
 0x80b   : > { %4726 = vst.msk [vmem:[#allocation6 + $0x11] sm:$0x7f] %vm4247_vm9, %v4712_v54 }
 0x80c   : > { %4545 = vst.msk [vmem:[#allocation6 + $0x29] sm:$0x7f] %vm4247_vm9, %v4529_v56  ;;  %v4462_v31 = vld [vmem:[#allocation6 + $0x21] sm:$0x7f]  ;;  %v4267_v38 = vld [vmem:[#allocation6 + $0x30] sm:$0xff]  ;;  %4840 = vrot.lane.b32.xlu1 %v7924_v7, %s5582_s18  ;;  %4842 = vrot.lane.b32.xlu0 %v7980_v60, %s5582_s18 }
 0x80d   : > { %v4528_v15 = vadd.f32 %v8171_v30, %v4462_v31  ;;  %v4337_v12 = vadd.f32 %v8145_v20, %v4267_v38 }
 0x80e   : > { %v4366_v43 = vld [vmem:[#allocation6 + $0x38] sm:$0x7f]  ;;  %v8294_v2 = vpop.permute.xlu1 %4404  ;;  %v8296_v52 = vpop.permute.xlu0 %4496 }
 0x80f   : > { %4544 = vst.msk [vmem:[#allocation6 + $0x21] sm:$0x7f] %vm4247_vm9, %v4528_v15  ;;  %v4436_v16 = vadd.f32 %v4401_v62, %v4366_v43 }
 0x810   : > { %4351 = vst.msk [vmem:[#allocation6 + $0x30] sm:$0xff] %vm4201_vm8, %v4337_v12  ;;  %v4269_v5 = vld [vmem:[#allocation6 + $0x48] sm:$0xff]  ;;  %4844 = vrot.lane.b32.xlu1 %v7972_v55, %s5582_s18  ;;  %4846 = vrot.lane.b32.xlu0 %v8007_v10, %s5582_s18 }
 0x811   : > { %4450 = vst.msk [vmem:[#allocation6 + $0x38] sm:$0x7f] %vm4247_vm9, %v4436_v16  ;;  %v4339_v7 = vadd.f32 %v8221_v27, %v4269_v5 }
 0x812   : > { %v8306_v20 = vpop.permute.xlu1 %4592  ;;  %v4176_v30 = vpop.permute.xlu0 %4175 }
 0x813   : > { %v4561_v60 = vld [vmem:[#allocation6 + $0x28] sm:$0x7f]  ;;  %4353 = vst.msk [vmem:[#allocation6 + $0x48] sm:$0xff] %vm4201_vm8, %v4339_v7  ;;  %4213 = vst.msk [vmem:[#allocation6 + $0x58] sm:$0xff] %vm4201_vm8, %v4176_v30 }
 0x814   : > { %v4627_v8 = vadd.f32 %v8189_v41, %v4561_v60  ;;  %4848 = vrot.lane.b32.xlu1 %v4572_v51, %s5582_s18  ;;  %4850 = vrot.lane.b32.xlu0 %v8024_v24, %s5582_s18 }
 0x816   : > { %4643 = vst.msk [vmem:[#allocation6 + $0x28] sm:$0x7f] %vm4247_vm9, %v4627_v8  ;;  %v4560_v55 = vld [vmem:[#allocation6 + $0x20] sm:$0x7f]  ;;  %v4170_v27 = vpop.permute.xlu1 %4169  ;;  %v4407_v0 = vpop.permute.xlu0 %4406 }
 0x817   : > { %v4365_v10 = vld [vmem:[#allocation6 + $0x30] sm:$0x7f]  ;;  %v4626_v62 = vadd.f32 %v8200_v42, %v4560_v55  ;;  %4210 = vst.msk [vmem:[#allocation6 + $0x40] sm:$0xff] %vm4201_vm8, %v4170_v27 }
 0x818   : > { %v4435_v32 = vadd.f32 %v8181_v39, %v4365_v10  ;;  %4852 = vrot.lane.b32.xlu1 %v8036_v28, %s5582_s18  ;;  %4854 = vrot.lane.b32.xlu0 %v8058_v47, %s5582_s18 }
 0x819   : > { %4642 = vst.msk [vmem:[#allocation6 + $0x20] sm:$0x7f] %vm4247_vm9, %v4626_v62 }
 0x81a   : > { %4449 = vst.msk [vmem:[#allocation6 + $0x30] sm:$0x7f] %vm4247_vm9, %v4435_v32  ;;  %v4367_v24 = vld [vmem:[#allocation6 + $0x48] sm:$0x7f]  ;;  %v4228_v41 = vld [vmem:[#allocation6 + $0x59] sm:$0x7f]  ;;  %v8324_v29 = vpop.permute.xlu1 %4310  ;;  %v8326_v4 = vpop.permute.xlu0 %4594 }
 0x81b   : > { %v4437_v39 = vadd.f32 %v8255_v14, %v4367_v24  ;;  %v4242_v42 = vadd.f32 %v4228_v41, %v7952_v18 }
 0x81c   : > { %4856 = vrot.lane.b32.xlu1 %v8073_v3, %s5582_s18  ;;  %4858 = vrot.lane.b32.xlu0 %v8101_v25, %s5582_s18 }
 0x81d   : > { %v4659_v45 = vld [vmem:[#allocation6 + $0x29] sm:$0x7f]  ;;  %4451 = vst.msk [vmem:[#allocation6 + $0x48] sm:$0x7f] %vm4247_vm9, %v4437_v39  ;;  %4257 = vst.msk [vmem:[#allocation6 + $0x59] sm:$0x7f] %vm4247_vm9, %v4242_v42 }
 0x81e   : > { %v4715_v28 = vadd.f32 %v8202_v40, %v4659_v45  ;;  %v4466_v47 = vld [vmem:[#allocation6 + $0x41] sm:$0x7f]  ;;  %v4499_v23 = vpop.permute.xlu1 %4498  ;;  %v4313_v51 = vpop.permute.xlu0 %4312 }
 0x81f   : > { %v4532_v18 = vadd.f32 %v8230_v13, %v4466_v47 }
 0x820   : > { %4729 = vst.msk [vmem:[#allocation6 + $0x29] sm:$0x7f] %vm4247_vm9, %v4715_v28  ;;  %v4658_v14 = vld [vmem:[#allocation6 + $0x21] sm:$0x7f]  ;;  %4860 = vrot.lane.b32.xlu1 %v8233_v1, %s5582_s18  ;;  %4862 = vrot.lane.b32.xlu0 %v4573_v9, %s5582_s18 }
 0x821   : > { %v4464_v48 = vld [vmem:[#allocation6 + $0x31] sm:$0x7f]  ;;  %v4714_v3 = vadd.f32 %v8154_v6, %v4658_v14  ;;  %4548 = vst.msk [vmem:[#allocation6 + $0x41] sm:$0x7f] %vm4247_vm9, %v4532_v18 }
 0x822   : > { %v4530_v25 = vadd.f32 %v8219_v35, %v4464_v48  ;;  %v8347_v40 = vpop.permute.xlu1 %4408  ;;  %v8349_v37 = vpop.permute.xlu0 %4500 }
 0x823   : > { %4728 = vst.msk [vmem:[#allocation6 + $0x21] sm:$0x7f] %vm4247_vm9, %v4714_v3 }
 0x824   : > { %4546 = vst.msk [vmem:[#allocation6 + $0x31] sm:$0x7f] %vm4247_vm9, %v4530_v25  ;;  %v4467_v13 = vld [vmem:[#allocation6 + $0x49] sm:$0x7f]  ;;  %v4271_v1 = vld [vmem:[#allocation6 + $0x58] sm:$0xff] }
 0x825   : > { %v4533_v22 = vadd.f32 %v8282_v11, %v4467_v13  ;;  %v4341_v44 = vadd.f32 %v8284_v17, %v4271_v1 }
 0x826   : > { %v4597_v9 = vpop.permute.xlu1 %4596  ;;  %v4180_v6 = vpop.permute.xlu0 %4179 }
 0x827   : > { %4549 = vst.msk [vmem:[#allocation6 + $0x49] sm:$0x7f] %vm4247_vm9, %v4533_v22 }
 0x828   : > { %4355 = vst.msk [vmem:[#allocation6 + $0x58] sm:$0xff] %vm4201_vm8, %v4341_v44  ;;  %4215 = vst.msk [vmem:[#allocation6 + $0x68] sm:$0xff] %vm4201_vm8, %v4180_v6  ;;  %v4564_v35 = vld [vmem:[#allocation6 + $0x40] sm:$0x7f] }
 0x829   : > { %v4630_v34 = vadd.f32 %v8270_v26, %v4564_v35 }
 0x82a   : > { %v4174_v36 = vpop.permute.xlu1 %4173  ;;  %v4411_v61 = vpop.permute.xlu0 %4410 }
 0x82b   : > { %v4562_v59 = vld [vmem:[#allocation6 + $0x30] sm:$0x7f]  ;;  %4646 = vst.msk [vmem:[#allocation6 + $0x40] sm:$0x7f] %vm4247_vm9, %v4630_v34 }
 0x82c   : > { %v4628_v33 = vadd.f32 %v8253_v19, %v4562_v59  ;;  %4212 = vst.msk [vmem:[#allocation6 + $0x50] sm:$0xff] %vm4201_vm8, %v4174_v36 }
 0x82e   : > { %4644 = vst.msk [vmem:[#allocation6 + $0x30] sm:$0x7f] %vm4247_vm9, %v4628_v33  ;;  %v4565_v58 = vld [vmem:[#allocation6 + $0x48] sm:$0x7f]  ;;  %v8363_v56 = vpop.permute.xlu1 %4314  ;;  %v8365_v11 = vpop.permute.xlu0 %4598 }
 0x82f   : > { %v4369_v50 = vld [vmem:[#allocation6 + $0x58] sm:$0x7f]  ;;  %v4230_v54 = vld [vmem:[#allocation6 + $0x69] sm:$0x7f]  ;;  %v4631_v26 = vadd.f32 %v8306_v20, %v4565_v58 }
 0x830   : > { %v4439_v17 = vadd.f32 %v4407_v0, %v4369_v50  ;;  %v4244_v31 = vadd.f32 %v4230_v54, %v7960_v21  ;;  %v4739_v54 = vld [vmem:[#allocation6 + $0x8] sm:$0xff] }
 0x831   : > { %4647 = vst.msk [vmem:[#allocation6 + $0x48] sm:$0x7f] %vm4247_vm9, %v4631_v26 }
 0x832   : > { %4453 = vst.msk [vmem:[#allocation6 + $0x58] sm:$0x7f] %vm4247_vm9, %v4439_v17  ;;  %4259 = vst.msk [vmem:[#allocation6 + $0x69] sm:$0x7f] %vm4247_vm9, %v4244_v31  ;;  %v4503_v38 = vpop.permute.xlu1 %4502  ;;  %v4317_v15 = vpop.permute.xlu0 %4316  ;;  %v4661_v10 = vld [vmem:[#allocation6 + $0x41] sm:$0x7f] }
 0x833   : > { %v4227_v19 = vld [vmem:[#allocation6 + $0x51] sm:$0x7f] }
 0x834   : > { %v4241_v12 = vadd.f32 %v7934_v53, %v4227_v19 }
 0x836   : > { %4256 = vst.msk [vmem:[#allocation6 + $0x51] sm:$0x7f] %vm4247_vm9, %v4241_v12  ;;  %v8374_v43 = vpop.permute.xlu1 %4412  ;;  %v8376_v16 = vpop.permute.xlu0 %4504  ;;  %v4741_v12 = vld [vmem:[#allocation6 + $0x18] sm:$0xff] }
 0x838   : > { %v4662_v13 = vld [vmem:[#allocation6 + $0x49] sm:$0x7f] }
 0x839   : > { %v4469_v5 = vld [vmem:[#allocation6 + $0x59] sm:$0x7f]  ;;  %v4273_v7 = vld [vmem:[#allocation6 + $0x68] sm:$0xff] }
 0x83a   : > { %v4535_v21 = vadd.f32 %v4499_v23, %v4469_v5  ;;  %v4343_v60 = vadd.f32 %v4313_v51, %v4273_v7  ;;  %v8378_v20 = vpop.permute.xlu1 %4600  ;;  %v4184_v30 = vpop.permute.xlu0 %4183  ;;  %v4660_v51 = vld [vmem:[#allocation6 + $0x31] sm:$0x7f] }
 0x83b   : > { %4217 = vst.msk [vmem:[#allocation6 + $0x78] sm:$0xff] %vm4201_vm8, %v4184_v30 }
 0x83c   : > { %4551 = vst.msk [vmem:[#allocation6 + $0x59] sm:$0x7f] %vm4247_vm9, %v4535_v21 }
 0x83d   : > { %4357 = vst.msk [vmem:[#allocation6 + $0x68] sm:$0xff] %vm4201_vm8, %v4343_v60  ;;  %v4270_v53 = vld [vmem:[#allocation6 + $0x50] sm:$0xff] }
 0x83e   : > { %v4340_v8 = vadd.f32 %v8268_v57, %v4270_v53  ;;  %v4178_v55 = vpop.permute.xlu1 %4177  ;;  %v4683_v27 = vpop.permute.xlu0 %4682 }
 0x83f   : > { %4214 = vst.msk [vmem:[#allocation6 + $0x60] sm:$0xff] %vm4201_vm8, %v4178_v55  ;;  %v4717_v0 = vadd.f32 %v4683_v27, %v4661_v10 }
 0x840   : > { %4354 = vst.msk [vmem:[#allocation6 + $0x50] sm:$0xff] %vm4201_vm8, %v4340_v8  ;;  %v4743_v8 = vld [vmem:[#allocation6 + $0x28] sm:$0xff] }
 0x841   : > { %4731 = vst.msk [vmem:[#allocation6 + $0x41] sm:$0x7f] %vm4247_vm9, %v4717_v0 }
 0x842   : > { %v4232_v24 = vld [vmem:[#allocation6 + $0x79] sm:$0x7f]  ;;  %v4182_v41 = vpop.permute.xlu1 %4181  ;;  %v8387_v39 = vpop.permute.xlu0 %4686 }
 0x843   : > { %v4567_v62 = vld [vmem:[#allocation6 + $0x58] sm:$0x7f]  ;;  %v4246_v57 = vadd.f32 %v4232_v24, %v7969_v63  ;;  %4216 = vst.msk [vmem:[#allocation6 + $0x70] sm:$0xff] %vm4201_vm8, %v4182_v41  ;;  %v4740_v24 = vld [vmem:[#allocation6 + $0x10] sm:$0xff] }
 0x844   : > { %v4371_v32 = vld [vmem:[#allocation6 + $0x68] sm:$0x7f]  ;;  %v4633_v42 = vadd.f32 %v4597_v9, %v4567_v62 }
 0x845   : > { %v4441_v45 = vadd.f32 %v4411_v61, %v4371_v32  ;;  %4261 = vst.msk [vmem:[#allocation6 + $0x79] sm:$0x7f] %vm4247_vm9, %v4246_v57 }
 0x846   : > { %4649 = vst.msk [vmem:[#allocation6 + $0x58] sm:$0x7f] %vm4247_vm9, %v4633_v42  ;;  %v4229_v47 = vld [vmem:[#allocation6 + $0x61] sm:$0x7f]  ;;  %v4681_v23 = vpop.permute.xlu1 %4680  ;;  %v8394_v18 = vpop.permute.xlu0 %4690 }
 0x847   : > { %4455 = vst.msk [vmem:[#allocation6 + $0x68] sm:$0x7f] %vm4247_vm9, %v4441_v45  ;;  %v4368_v28 = vld [vmem:[#allocation6 + $0x50] sm:$0x7f]  ;;  %v4243_v48 = vadd.f32 %v7946_v49, %v4229_v47  ;;  %v4716_v3 = vadd.f32 %v4681_v23, %v4660_v51  ;;  %v4742_v23 = vld [vmem:[#allocation6 + $0x20] sm:$0xff] }
 0x848   : > { %v4438_v14 = vadd.f32 %v8294_v2, %v4368_v28  ;;  %v4745_v41 = vld [vmem:[#allocation6 + $0x40] sm:$0xff] }
 0x849   : > { %4258 = vst.msk [vmem:[#allocation6 + $0x61] sm:$0x7f] %vm4247_vm9, %v4243_v48  ;;  %4730 = vst.msk [vmem:[#allocation6 + $0x31] sm:$0x7f] %vm4247_vm9, %v4716_v3 }
 0x84a   : > { %4452 = vst.msk [vmem:[#allocation6 + $0x50] sm:$0x7f] %vm4247_vm9, %v4438_v14  ;;  %v4231_v63 = vld [vmem:[#allocation6 + $0x71] sm:$0x7f]  ;;  %v4685_v25 = vpop.permute.xlu1 %4684  ;;  %v8401_v1 = vpop.permute.xlu0 %4694 }
 0x84b   : > { %v4245_v22 = vadd.f32 %v7954_v46, %v4231_v63  ;;  %v4718_v44 = vadd.f32 %v4685_v25, %v4662_v13 }
 0x84c   : > { %v4275_v6 = vld [vmem:[#allocation6 + $0x78] sm:$0xff] }
 0x84d   : > { %v4345_v35 = vadd.f32 %v4317_v15, %v4275_v6  ;;  %4260 = vst.msk [vmem:[#allocation6 + $0x71] sm:$0x7f] %vm4247_vm9, %v4245_v22  ;;  %4732 = vst.msk [vmem:[#allocation6 + $0x49] sm:$0x7f] %vm4247_vm9, %v4718_v44  ;;  %v4664_v34 = vld [vmem:[#allocation6 + $0x59] sm:$0x7f] }
 0x84e   : > { %v4471_v9 = vld [vmem:[#allocation6 + $0x69] sm:$0x7f]  ;;  %v4689_v49 = vpop.permute.xlu1 %4688  ;;  %v8406_v59 = vpop.permute.xlu0 %4506 }
 0x84f   : > { %v4537_v2 = vadd.f32 %v4503_v38, %v4471_v9  ;;  %4359 = vst.msk [vmem:[#allocation6 + $0x78] sm:$0xff] %vm4201_vm8, %v4345_v35  ;;  %v4720_v36 = vadd.f32 %v4689_v49, %v4664_v34 }
 0x850   : > { %v4272_v46 = vld [vmem:[#allocation6 + $0x60] sm:$0xff]  ;;  %v4744_v13 = vld [vmem:[#allocation6 + $0x30] sm:$0xff] }
 0x851   : > { %4553 = vst.msk [vmem:[#allocation6 + $0x69] sm:$0x7f] %vm4247_vm9, %v4537_v2  ;;  %v4468_v61 = vld [vmem:[#allocation6 + $0x51] sm:$0x7f]  ;;  %v4342_v58 = vadd.f32 %v8324_v29, %v4272_v46  ;;  %4734 = vst.msk [vmem:[#allocation6 + $0x59] sm:$0x7f] %vm4247_vm9, %v4720_v36 }
 0x852   : > { %v4534_v33 = vadd.f32 %v8296_v52, %v4468_v61  ;;  %v4693_v50 = vpop.permute.xlu1 %4692  ;;  %v4755_v26 = vpop.permute.xlu0 %4754  ;;  %v4465_v52 = vld [vmem:[#allocation6 + $0x39] sm:$0x7f] }
 0x853   : > { %4356 = vst.msk [vmem:[#allocation6 + $0x60] sm:$0xff] %vm4201_vm8, %v4342_v58  ;;  %v4795_v17 = vadd.f32 %v4755_v26, %v4739_v54 }
 0x854   : > { %4550 = vst.msk [vmem:[#allocation6 + $0x51] sm:$0x7f] %vm4247_vm9, %v4534_v33  ;;  %v4274_v31 = vld [vmem:[#allocation6 + $0x70] sm:$0xff] }
 0x855   : > { %v4344_v19 = vadd.f32 %v8363_v56, %v4274_v31  ;;  %4809 = vst.msk [vmem:[#allocation6 + $0x8] sm:$0xff] %vm4201_vm8, %v4795_v17  ;;  %v4738_v56 = vld [vmem:[#allocation6] sm:$0xff] }
 0x856   : > { %v4491_v15 = vpop.permute.xlu1 %4490  ;;  %v4759_v29 = vpop.permute.xlu0 %4758  ;;  %v4373_v49 = vld [vmem:[#allocation6 + $0x78] sm:$0x7f] }
 0x857   : > { %4358 = vst.msk [vmem:[#allocation6 + $0x70] sm:$0xff] %vm4201_vm8, %v4344_v19  ;;  %v4531_v7 = vadd.f32 %v4491_v15, %v4465_v52  ;;  %v4797_v21 = vadd.f32 %v4759_v29, %v4741_v12 }
 0x858   : > { %v4569_v38 = vld [vmem:[#allocation6 + $0x68] sm:$0x7f]  ;;  %v4748_v46 = vld [vmem:[#allocation6 + $0x58] sm:$0xff] }
 0x859   : > { %v4635_v5 = vadd.f32 %v8378_v20, %v4569_v38  ;;  %4547 = vst.msk [vmem:[#allocation6 + $0x39] sm:$0x7f] %vm4247_vm9, %v4531_v7 }
 0x85a   : > { %4811 = vst.msk [vmem:[#allocation6 + $0x18] sm:$0xff] %vm4201_vm8, %v4797_v21  ;;  %v4370_v30 = vld [vmem:[#allocation6 + $0x60] sm:$0x7f]  ;;  %v4753_v53 = vpop.permute.xlu1 %4752  ;;  %v4763_v55 = vpop.permute.xlu0 %4762 }
 0x85b   : > { %4651 = vst.msk [vmem:[#allocation6 + $0x68] sm:$0x7f] %vm4247_vm9, %v4635_v5  ;;  %v4566_v60 = vld [vmem:[#allocation6 + $0x50] sm:$0x7f]  ;;  %v4440_v20 = vadd.f32 %v8347_v40, %v4370_v30  ;;  %v4794_v27 = vadd.f32 %v4753_v53, %v4738_v56  ;;  %v4799_v0 = vadd.f32 %v4763_v55, %v4743_v8 }
 0x85c   : > { %v4632_v10 = vadd.f32 %v8326_v4, %v4566_v60  ;;  %v4823_v53 = vld [vmem:[#allocation6 + $0x8] sm:$0x7f] }
 0x85d   : > { %4454 = vst.msk [vmem:[#allocation6 + $0x60] sm:$0x7f] %vm4247_vm9, %v4440_v20 }
 0x85e   : > { %4648 = vst.msk [vmem:[#allocation6 + $0x50] sm:$0x7f] %vm4247_vm9, %v4632_v10  ;;  %v4372_v62 = vld [vmem:[#allocation6 + $0x70] sm:$0x7f]  ;;  %v4757_v32 = vpop.permute.xlu1 %4756  ;;  %v4767_v42 = vpop.permute.xlu0 %4766 }
 0x85f   : > { %4808 = vst.msk [vmem:[#allocation6] sm:$0xff] %vm4201_vm8, %v4794_v27  ;;  %4813 = vst.msk [vmem:[#allocation6 + $0x28] sm:$0xff] %vm4201_vm8, %v4799_v0  ;;  %v4442_v45 = vadd.f32 %v8374_v43, %v4372_v62  ;;  %v4796_v4 = vadd.f32 %v4757_v32, %v4740_v24  ;;  %v4801_v57 = vadd.f32 %v4767_v42, %v4745_v41 }
 0x860   : > { %v4563_v52 = vld [vmem:[#allocation6 + $0x38] sm:$0x7f] }
 0x861   : > { %4456 = vst.msk [vmem:[#allocation6 + $0x70] sm:$0x7f] %vm4247_vm9, %v4442_v45  ;;  %v4825_v0 = vld [vmem:[#allocation6 + $0x18] sm:$0x7f] }
 0x862   : > { %v4666_v40 = vld [vmem:[#allocation6 + $0x69] sm:$0x7f]  ;;  %4810 = vst.msk [vmem:[#allocation6 + $0x10] sm:$0xff] %vm4201_vm8, %v4796_v4  ;;  %4815 = vst.msk [vmem:[#allocation6 + $0x40] sm:$0xff] %vm4201_vm8, %v4801_v57  ;;  %v4761_v47 = vpop.permute.xlu1 %4760  ;;  %v4771_v51 = vpop.permute.xlu0 %4770 }
 0x863   : > { %v4722_v28 = vadd.f32 %v4693_v50, %v4666_v40  ;;  %v4798_v14 = vadd.f32 %v4761_v47, %v4742_v23 }
 0x864   : > { %v4470_v48 = vld [vmem:[#allocation6 + $0x61] sm:$0x7f] }
 0x865   : > { %4736 = vst.msk [vmem:[#allocation6 + $0x69] sm:$0x7f] %vm4247_vm9, %v4722_v28  ;;  %v4663_v3 = vld [vmem:[#allocation6 + $0x51] sm:$0x7f]  ;;  %v4536_v43 = vadd.f32 %v8349_v37, %v4470_v48  ;;  %v4746_v37 = vld [vmem:[#allocation6 + $0x48] sm:$0xff] }
 0x866   : > { %v4719_v63 = vadd.f32 %v8387_v39, %v4663_v3  ;;  %4812 = vst.msk [vmem:[#allocation6 + $0x20] sm:$0xff] %vm4201_vm8, %v4798_v14  ;;  %v4765_v25 = vpop.permute.xlu1 %4764  ;;  %v8436_v22 = vpop.permute.xlu0 %4774  ;;  %v4822_v60 = vld [vmem:[#allocation6] sm:$0x7f] }
 0x867   : > { %4552 = vst.msk [vmem:[#allocation6 + $0x61] sm:$0x7f] %vm4247_vm9, %v4536_v43  ;;  %v4800_v44 = vadd.f32 %v4765_v25, %v4744_v13 }
 0x868   : > { %4733 = vst.msk [vmem:[#allocation6 + $0x51] sm:$0x7f] %vm4247_vm9, %v4719_v63  ;;  %v4472_v9 = vld [vmem:[#allocation6 + $0x71] sm:$0x7f] }
 0x869   : > { %v4538_v6 = vadd.f32 %v8376_v16, %v4472_v9  ;;  %4814 = vst.msk [vmem:[#allocation6 + $0x30] sm:$0xff] %vm4201_vm8, %v4800_v44 }
 0x86a   : > { %v4769_v2 = vpop.permute.xlu1 %4768  ;;  %v8442_v35 = vpop.permute.xlu0 %4778 }
 0x86b   : > { %4554 = vst.msk [vmem:[#allocation6 + $0x71] sm:$0x7f] %vm4247_vm9, %v4538_v6  ;;  %v4802_v39 = vadd.f32 %v4769_v2, %v4746_v37 }
 0x86c   : > { %v4750_v17 = vld [vmem:[#allocation6 + $0x68] sm:$0xff] }
 0x86d   : > { %4816 = vst.msk [vmem:[#allocation6 + $0x48] sm:$0xff] %vm4201_vm8, %v4802_v39  ;;  %v4826_v57 = vld [vmem:[#allocation6 + $0x20] sm:$0x7f] }
 0x86e   : > { %v4568_v34 = vld [vmem:[#allocation6 + $0x60] sm:$0x7f]  ;;  %v4773_v61 = vpop.permute.xlu1 %4772  ;;  %v4415_v33 = vpop.permute.xlu0 %4414 }
 0x86f   : > { %v4747_v36 = vld [vmem:[#allocation6 + $0x50] sm:$0xff]  ;;  %v4634_v58 = vadd.f32 %v8365_v11, %v4568_v34  ;;  %v4804_v50 = vadd.f32 %v4773_v61, %v4748_v46  ;;  %v4443_v54 = vadd.f32 %v4415_v33, %v4373_v49 }
 0x870   : > { %v4803_v16 = vadd.f32 %v4771_v51, %v4747_v36  ;;  %v4827_v51 = vld [vmem:[#allocation6 + $0x28] sm:$0x7f]  ;;  %v4828_v13 = vld [vmem:[#allocation6 + $0x30] sm:$0x7f] }
 0x871   : > { %4650 = vst.msk [vmem:[#allocation6 + $0x60] sm:$0x7f] %vm4247_vm9, %v4634_v58  ;;  %4457 = vst.msk [vmem:[#allocation6 + $0x78] sm:$0x7f] %vm4247_vm9, %v4443_v54 }
 0x872   : > { %4817 = vst.msk [vmem:[#allocation6 + $0x50] sm:$0xff] %vm4201_vm8, %v4803_v16  ;;  %4818 = vst.msk [vmem:[#allocation6 + $0x58] sm:$0xff] %vm4201_vm8, %v4804_v50  ;;  %v4777_v26 = vpop.permute.xlu1 %4776  ;;  %v4570_v31 = vld [vmem:[#allocation6 + $0x70] sm:$0x7f]  ;;  %v4603_v19 = vpop.permute.xlu0 %4602 }
 0x873   : > { %v4806_v38 = vadd.f32 %v4777_v26, %v4750_v17  ;;  %v4636_v15 = vadd.f32 %v4603_v19, %v4570_v31 }
 0x874   : > { %v4830_v46 = vld [vmem:[#allocation6 + $0x48] sm:$0x7f] }
 0x875   : > { %4820 = vst.msk [vmem:[#allocation6 + $0x68] sm:$0xff] %vm4201_vm8, %v4806_v38 }
 0x876   : > { %4652 = vst.msk [vmem:[#allocation6 + $0x70] sm:$0x7f] %vm4247_vm9, %v4636_v15  ;;  %v4589_v11 = vpop.permute.xlu1 %4588  ;;  %v4605_v12 = vpop.permute.xlu0 %4604 }
 0x877   : > { %v4629_v29 = vadd.f32 %v4589_v11, %v4563_v52 }
 0x878   : > { %v4665_v5 = vld [vmem:[#allocation6 + $0x61] sm:$0x7f]  ;;  %v4473_v7 = vld [vmem:[#allocation6 + $0x79] sm:$0x7f] }
 0x879   : > { %v4721_v21 = vadd.f32 %v8394_v18, %v4665_v5  ;;  %v4539_v56 = vadd.f32 %v8406_v59, %v4473_v7  ;;  %4645 = vst.msk [vmem:[#allocation6 + $0x38] sm:$0x7f] %vm4247_vm9, %v4629_v29  ;;  %v4824_v59 = vld [vmem:[#allocation6 + $0x10] sm:$0x7f]  ;;  %v4832_v26 = vld [vmem:[#allocation6 + $0x58] sm:$0x7f] }
 0x87a   : > { %v4837_v30 = vpop.permute.xlu1 %4836  ;;  %v4839_v8 = vpop.permute.xlu0 %4838  ;;  %v4831_v33 = vld [vmem:[#allocation6 + $0x50] sm:$0x7f] }
 0x87b   : > { %4735 = vst.msk [vmem:[#allocation6 + $0x61] sm:$0x7f] %vm4247_vm9, %v4721_v21  ;;  %4555 = vst.msk [vmem:[#allocation6 + $0x79] sm:$0x7f] %vm4247_vm9, %v4539_v56  ;;  %v4878_v55 = vadd.f32 %v4837_v30, %v4822_v60  ;;  %v4879_v10 = vadd.f32 %v4839_v8, %v4823_v53 }
 0x87c   : > { %v4834_v53 = vld [vmem:[#allocation6 + $0x68] sm:$0x7f] }
 0x87d   : > { %v4667_v20 = vld [vmem:[#allocation6 + $0x71] sm:$0x7f]  ;;  %4892 = vst.msk [vmem:[#allocation6] sm:$0x7f] %vm4247_vm9, %v4878_v55  ;;  %4893 = vst.msk [vmem:[#allocation6 + $0x8] sm:$0x7f] %vm4247_vm9, %v4879_v10 }
 0x87e   : > { %v4723_v27 = vadd.f32 %v8401_v1, %v4667_v20  ;;  %v4841_v18 = vpop.permute.xlu1 %4840  ;;  %v4843_v62 = vpop.permute.xlu0 %4842 }
 0x87f   : > { %v4880_v32 = vadd.f32 %v4841_v18, %v4824_v59  ;;  %v4881_v24 = vadd.f32 %v4843_v62, %v4825_v0 }
 0x880   : > { %4737 = vst.msk [vmem:[#allocation6 + $0x71] sm:$0x7f] %vm4247_vm9, %v4723_v27  ;;  %v4913_v41 = vld [vmem:[#allocation6 + $0x38] sm:$0xff] }
 0x881   : > { %v5152_v42 = vmul.f32 -1.442695, %v4913_v41  ;;  %4894 = vst.msk [vmem:[#allocation6 + $0x10] sm:$0x7f] %vm4247_vm9, %v4880_v32  ;;  %4895 = vst.msk [vmem:[#allocation6 + $0x18] sm:$0x7f] %vm4247_vm9, %v4881_v24 }
 0x882   : > { %v4749_v45 = vld [vmem:[#allocation6 + $0x60] sm:$0xff]  ;;  %v4571_v1 = vld [vmem:[#allocation6 + $0x78] sm:$0x7f]  ;;  %v4845_v4 = vpop.permute.xlu1 %4844  ;;  %v4847_v40 = vpop.permute.xlu0 %4846 }
 0x883   : > { %v4805_v28 = vadd.f32 %v8436_v22, %v4749_v45  ;;  %5486 = vpow2.f32 %v5152_v42  ;;  %v4637_v47 = vadd.f32 %v4605_v12, %v4571_v1  ;;  %v4882_v23 = vadd.f32 %v4845_v4, %v4826_v57  ;;  %v4829_v22 = vld [vmem:[#allocation6 + $0x40] sm:$0x7f] }
 0x884   : > { %v4906_v14 = vld [vmem:[#allocation6] sm:$0xff]  ;;  %v4907_v48 = vld [vmem:[#allocation6 + $0x8] sm:$0xff]  ;;  %v4883_v3 = vadd.f32 %v4847_v40, %v4827_v51 }
 0x885   : > { %4819 = vst.msk [vmem:[#allocation6 + $0x60] sm:$0xff] %vm4201_vm8, %v4805_v28  ;;  %v5145_v43 = vmul.f32 -1.442695, %v4906_v14  ;;  %v5146_v63 = vmul.f32 -1.442695, %v4907_v48 }
 0x886   : > { %4653 = vst.msk [vmem:[#allocation6 + $0x78] sm:$0x7f] %vm4247_vm9, %v4637_v47  ;;  %4896 = vst.msk [vmem:[#allocation6 + $0x20] sm:$0x7f] %vm4247_vm9, %v4882_v23  ;;  %v4849_v25 = vpop.permute.xlu1 %4848  ;;  %v4851_v44 = vpop.permute.xlu0 %4850 }
 0x887   : > { %4897 = vst.msk [vmem:[#allocation6 + $0x28] sm:$0x7f] %vm4247_vm9, %v4883_v3  ;;  %v4751_v9 = vld [vmem:[#allocation6 + $0x70] sm:$0xff]  ;;  %5488 = vpow2.f32 %v5145_v43  ;;  %v4884_v6 = vadd.f32 %v4849_v25, %v4828_v13  ;;  %v4885_v2 = vadd.f32 %v4851_v44, %v4829_v22 }
 0x888   : > { %v4807_v37 = vadd.f32 %v8442_v35, %v4751_v9  ;;  %5490 = vpow2.f32 %v5146_v63  ;;  %v4908_v39 = vld [vmem:[#allocation6 + $0x10] sm:$0xff]  ;;  %v4909_v49 = vld [vmem:[#allocation6 + $0x18] sm:$0xff] }
 0x889   : > { %v5147_v34 = vmul.f32 -1.442695, %v4908_v39  ;;  %v5148_v36 = vmul.f32 -1.442695, %v4909_v49  ;;  %4898 = vst.msk [vmem:[#allocation6 + $0x30] sm:$0x7f] %vm4247_vm9, %v4884_v6 }
 0x88a   : > { %4899 = vst.msk [vmem:[#allocation6 + $0x40] sm:$0x7f] %vm4247_vm9, %v4885_v2  ;;  %v4853_v61 = vpop.permute.xlu1 %4852  ;;  %v4855_v58 = vpop.permute.xlu0 %4854 }
 0x88b   : > { %4821 = vst.msk [vmem:[#allocation6 + $0x70] sm:$0xff] %vm4201_vm8, %v4807_v37  ;;  %5492 = vpow2.f32 %v5147_v34  ;;  %v4886_v16 = vadd.f32 %v4853_v61, %v4830_v46  ;;  %v4887_v50 = vadd.f32 %v4855_v58, %v4831_v33 }
 0x88c   : > { %5494 = vpow2.f32 %v5148_v36  ;;  %v4833_v12 = vld [vmem:[#allocation6 + $0x60] sm:$0x7f] }
 0x88d   : > { %v4921_v54 = vld [vmem:[#allocation6 + $0x78] sm:$0xff]  ;;  %v4910_v35 = vld [vmem:[#allocation6 + $0x20] sm:$0xff]  ;;  %v5487_v17 = vpop.eup %5486  ;;  %4900 = vst.msk [vmem:[#allocation6 + $0x48] sm:$0x7f] %vm4247_vm9, %v4886_v16  ;;  %4901 = vst.msk [vmem:[#allocation6 + $0x50] sm:$0x7f] %vm4247_vm9, %v4887_v50 }
 0x88e   : > { %v5160_v31 = vmul.f32 -1.442695, %v4921_v54  ;;  %v5149_v19 = vmul.f32 -1.442695, %v4910_v35  ;;  %v4911_v38 = vld [vmem:[#allocation6 + $0x28] sm:$0xff]  ;;  %v4977_v15 = vadd.f32 1.0, %v5487_v17  ;;  %v4857_v52 = vpop.permute.xlu1 %4856  ;;  %v4859_v29 = vpop.permute.xlu0 %4858 }
 0x88f   : > { %v5150_v11 = vmul.f32 -1.442695, %v4911_v38  ;;  %v4888_v5 = vadd.f32 %v4857_v52, %v4832_v26  ;;  %v4889_v7 = vadd.f32 %v4859_v29, %v4833_v12 }
 0x890   : > { %5496 = vpow2.f32 %v5160_v31  ;;  %v4912_v21 = vld [vmem:[#allocation6 + $0x30] sm:$0xff] }
 0x891   : > { %5498 = vrcp.f32 %v4977_v15  ;;  %v4914_v56 = vld [vmem:[#allocation6 + $0x40] sm:$0xff]  ;;  %v5489_v60 = vpop.eup %5488  ;;  %v5151_v30 = vmul.f32 -1.442695, %v4912_v21  ;;  %4902 = vst.msk [vmem:[#allocation6 + $0x58] sm:$0x7f] %vm4247_vm9, %v4888_v5 }
 0x892   : > { %5500 = vpow2.f32 %v5149_v19  ;;  %4903 = vst.msk [vmem:[#allocation6 + $0x60] sm:$0x7f] %vm4247_vm9, %v4889_v7  ;;  %v5491_v8 = vpop.eup %5490  ;;  %v4970_v55 = vadd.f32 1.0, %v5489_v60  ;;  %v5153_v10 = vmul.f32 -1.442695, %v4914_v56  ;;  %v4861_v20 = vpop.permute.xlu1 %4860 }
 0x893   : > { %5502 = vpow2.f32 %v5150_v11  ;;  %v4835_v27 = vld [vmem:[#allocation6 + $0x70] sm:$0x7f]  ;;  %v4863_v18 = vpop.permute.xlu0 %4862  ;;  %v4971_v59 = vadd.f32 1.0, %v5491_v8  ;;  %v4890_v0 = vadd.f32 %v4861_v20, %v4834_v53 }
 0x894   : > { %5504 = vpow2.f32 %v5151_v30  ;;  %v4891_v62 = vadd.f32 %v4863_v18, %v4835_v27  ;;  %v4915_v32 = vld [vmem:[#allocation6 + $0x48] sm:$0xff]  ;;  %v4916_v24 = vld [vmem:[#allocation6 + $0x50] sm:$0xff] }
 0x895   : > { %5506 = vrcp.f32 %v4970_v55  ;;  %v5493_v41 = vpop.eup %5492  ;;  %v5154_v42 = vmul.f32 -1.442695, %v4915_v32  ;;  %4904 = vst.msk [vmem:[#allocation6 + $0x68] sm:$0x7f] %vm4247_vm9, %v4890_v0  ;;  %v5155_v4 = vmul.f32 -1.442695, %v4916_v24 }
 0x896   : > { %5508 = vrcp.f32 %v4971_v59  ;;  %4905 = vst.msk [vmem:[#allocation6 + $0x70] sm:$0x7f] %vm4247_vm9, %v4891_v62  ;;  %v5495_v45 = vpop.eup %5494  ;;  %v4972_v1 = vadd.f32 1.0, %v5493_v41 }
 0x897   : > { %5510 = vpow2.f32 %v5153_v10  ;;  %v4973_v57 = vadd.f32 1.0, %v5495_v45 }
 0x898   : > { %5512 = vpow2.f32 %v5154_v42  ;;  %v4917_v40 = vld [vmem:[#allocation6 + $0x58] sm:$0xff] }
 0x899   : > { %5514 = vrcp.f32 %v4972_v1  ;;  %v4918_v28 = vld [vmem:[#allocation6 + $0x60] sm:$0xff]  ;;  %v5156_v23 = vmul.f32 -1.442695, %v4917_v40 }
 0x89a   : > { %v5497_v47 = vpop.eup %5496  ;;  %5516 = vrcp.f32 %v4973_v57  ;;  %v5157_v51 = vmul.f32 -1.442695, %v4918_v28 }
 0x89b   : > { %v5499_v14 = vpop.eup %5498  ;;  %v4985_v48 = vadd.f32 1.0, %v5497_v47  ;;  %5518 = vpow2.f32 %v5155_v4 }
 0x89c   : > { %v5501_v3 = vpop.eup %5500  ;;  %5025 = vst.msk [vmem:[%s8562_s9 + $0x38] sm:$0xff] %vm4201_vm8, %v5499_v14  ;;  %5520 = vpow2.f32 %v5156_v23  ;;  %v4919_v25 = vld [vmem:[#allocation6 + $0x68] sm:$0xff] }
 0x89d   : > { %v5503_v43 = vpop.eup %5502  ;;  %5522 = vrcp.f32 %v4985_v48  ;;  %v4974_v63 = vadd.f32 1.0, %v5501_v3  ;;  %v4920_v13 = vld [vmem:[#allocation6 + $0x70] sm:$0xff]  ;;  %v5158_v9 = vmul.f32 -1.442695, %v4919_v25 }
 0x89e   : > { %v5505_v22 = vpop.eup %5504  ;;  %v4975_v44 = vadd.f32 1.0, %v5503_v43  ;;  %5524 = vpow2.f32 %v5157_v51  ;;  %v5159_v37 = vmul.f32 -1.442695, %v4920_v13 }
 0x89f   : > { %v5507_v6 = vpop.eup %5506  ;;  %5526 = vrcp.f32 %v4974_v63  ;;  %v4976_v2 = vadd.f32 1.0, %v5505_v22 }
 0x8a0   : > { %v5509_v39 = vpop.eup %5508  ;;  %5018 = vst.msk [vmem:[%s8562_s9] sm:$0xff] %vm4201_vm8, %v5507_v6  ;;  %5528 = vrcp.f32 %v4975_v44 }
 0x8a1   : > { %v5511_v49 = vpop.eup %5510  ;;  %5019 = vst.msk [vmem:[%s8562_s9 + $0x8] sm:$0xff] %vm4201_vm8, %v5509_v39  ;;  %5530 = vrcp.f32 %v4976_v2 }
 0x8a2   : > { %v5513_v34 = vpop.eup %5512  ;;  %v4978_v36 = vadd.f32 1.0, %v5511_v49  ;;  %5532 = vpow2.f32 %v5158_v9 }
 0x8a3   : > { %v5515_v61 = vpop.eup %5514  ;;  %v4979_v46 = vadd.f32 1.0, %v5513_v34  ;;  %5534 = vpow2.f32 %v5159_v37 }
 0x8a4   : > { %v5517_v33 = vpop.eup %5516  ;;  %5020 = vst.msk [vmem:[%s8562_s9 + $0x10] sm:$0xff] %vm4201_vm8, %v5515_v61  ;;  %5536 = vrcp.f32 %v4978_v36 }
 0x8a5   : > { %v5519_v58 = vpop.eup %5518  ;;  %5021 = vst.msk [vmem:[%s8562_s9 + $0x18] sm:$0xff] %vm4201_vm8, %v5517_v33  ;;  %5538 = vrcp.f32 %v4979_v46 }
 0x8a6   : > { %v5521_v16 = vpop.eup %5520  ;;  %v4980_v50 = vadd.f32 1.0, %v5519_v58 }
 0x8a7   : > { %v5523_v54 = vpop.eup %5522  ;;  %v4981_v35 = vadd.f32 1.0, %v5521_v16 }
 0x8a8   : > { %v5525_v26 = vpop.eup %5524  ;;  %5033 = vst.msk [vmem:[%s8562_s9 + $0x78] sm:$0xff] %vm4201_vm8, %v5523_v54  ;;  %5540 = vrcp.f32 %v4980_v50 }
 0x8a9   : > { %v5527_v17 = vpop.eup %5526  ;;  %5542 = vrcp.f32 %v4981_v35  ;;  %v4982_v31 = vadd.f32 1.0, %v5525_v26 }
 0x8aa   : > { %v5529_v19 = vpop.eup %5528  ;;  %5022 = vst.msk [vmem:[%s8562_s9 + $0x20] sm:$0xff] %vm4201_vm8, %v5527_v17 }
 0x8ab   : > { %v5531_v38 = vpop.eup %5530  ;;  %5023 = vst.msk [vmem:[%s8562_s9 + $0x28] sm:$0xff] %vm4201_vm8, %v5529_v19  ;;  %5544 = vrcp.f32 %v4982_v31 }
 0x8ac   : > { %v5533_v15 = vpop.eup %5532  ;;  %5024 = vst.msk [vmem:[%s8562_s9 + $0x30] sm:$0xff] %vm4201_vm8, %v5531_v38 }
 0x8ad   : > { %v5535_v11 = vpop.eup %5534  ;;  %v4983_v52 = vadd.f32 1.0, %v5533_v15 }
 0x8ae   : > { %v5537_v12 = vpop.eup %5536  ;;  %v4984_v29 = vadd.f32 1.0, %v5535_v11 }
 0x8af   : > { %v5539_v5 = vpop.eup %5538  ;;  %5026 = vst.msk [vmem:[%s8562_s9 + $0x40] sm:$0xff] %vm4201_vm8, %v5537_v12  ;;  %5546 = vrcp.f32 %v4983_v52 }
 0x8b0   : > { %5027 = vst.msk [vmem:[%s8562_s9 + $0x48] sm:$0xff] %vm4201_vm8, %v5539_v5  ;;  %5548 = vrcp.f32 %v4984_v29 }
 0x8b2   : > { %v5541_v7 = vpop.eup %5540 }
 0x8b3   : > { %v5543_v21 = vpop.eup %5542  ;;  %5028 = vst.msk [vmem:[%s8562_s9 + $0x50] sm:$0xff] %vm4201_vm8, %v5541_v7 }
 0x8b4   : > { %5029 = vst.msk [vmem:[%s8562_s9 + $0x58] sm:$0xff] %vm4201_vm8, %v5543_v21 }
 0x8b5   : > { %v5545_v56 = vpop.eup %5544 }
 0x8b6   : > { %5030 = vst.msk [vmem:[%s8562_s9 + $0x60] sm:$0xff] %vm4201_vm8, %v5545_v56 }
 0x8b9   : > { %v5547_v60 = vpop.eup %5546 }
 0x8ba   : > { %v5549_v30 = vpop.eup %5548  ;;  %5031 = vst.msk [vmem:[%s8562_s9 + $0x68] sm:$0xff] %vm4201_vm8, %v5547_v60 }
 0x8bb   : > { %5032 = vst.msk [vmem:[%s8562_s9 + $0x70] sm:$0xff] %vm4201_vm8, %v5549_v30 }
 0x8bc PF: > { %p18_p12 = scmp.ge.s32.totalorder %s5666_s14, 5   ;;  %s8563_s11 = smov %s5568_s12 }
 0x8bd   : > { %s8564_s12 = smov %s5675_s17  ;;  %s8565_s13 = smov %s5666_s14 }
 0x8be   :  { %20 = sbr.rel (!%p18_p12) target bundleno = 5 (0x5), region = 129 }

</bundles_post_ra>
